<compile_context>
chip_gen: v6e
topology: v6e:2x2x1
jax: 0.10.0
libtpu: 0.0.40
codegen_flags: <defaults>
</compile_context>

<pallas_src>
import functools

import jax
import jax.numpy as jnp
from jax import lax
from jax.experimental import pallas as pl
from jax.experimental.pallas import tpu as pltpu


def _round_up(x, m):
    return (x + m - 1) // m * m


def _fused_convblock_kernel(x_ref, w1_ref, b1_ref, w2_ref, b2_ref,
                            w3_ref, b3_ref, o_ref, pad1, pad2, pad3,
                            *, H, W, Ho, Wo, Wp, stride):
    """Fused ConvBlock forward for one image.

    x_ref  : (Cin, H*W)   NCHW block, spatial flattened on lanes
    w*_ref : (9, Ci, Co)  bf16 taps, tap index = ky*3 + kx
    b*_ref : (1, Co)      f32
    o_ref  : (C, Ho*Wo)   NCHW block, spatial flattened on lanes
    pad1/2/3 : f32 VMEM line buffers, flat (rows, Ci) with row pitch Wp.
        Padded-image value X(a, b) lives at flat row (a+2)*Wp + b; the zero
        left halo of row a is the (zero) last column of the previous pitch
        row, the right halo is column b == interior_width (zeroed by mask).
    """
    C = o_ref.shape[0]
    s = stride
    f32 = jnp.float32
    bf16 = jnp.bfloat16

    # ---- stage-1 padded input: zero, then scatter rows (CHW -> row-major HWC).
    # One XLU transpose for the whole image, then H aligned row stores.
    # (pad1 is the smallest, Cin-wide buffer; its pitch-padding columns are
    #  cleared by this full zero.  TODO(synk): chunk the transpose for large
    #  H*W so the (H*W, Cin) value does not live entirely in vregs.)
    pad1[...] = jnp.zeros_like(pad1)
    xt = jnp.transpose(x_ref[...]).astype(f32)                 # (H*W, Cin)
    for h in range(H):
        pad1[(h + 2) * Wp:(h + 2) * Wp + W, :] = xt[h * W:(h + 1) * W, :]

    # ---- halo-only zeroing for pad2 / pad3 (interiors fully rewritten below).
    pad2[0:2 * Wp, :] = jnp.zeros((2 * Wp, C), f32)
    pad2[(H + 2) * Wp:(H + 3 + s) * Wp, :] = jnp.zeros(((s + 1) * Wp, C), f32)
    pad3[0:2 * Wp, :] = jnp.zeros((2 * Wp, C), f32)
    pad3[(Ho + 2) * Wp:(Ho + 4) * Wp, :] = jnp.zeros((2 * Wp, C), f32)

    # column index within one pitch row, used to zero halo/pitch columns
    base_col = lax.broadcasted_iota(jnp.int32, (Wp, 1), 0)     # (Wp, 1)

    def conv_stage(src, w_ref, b_ref, n_rows, n_cols, stg_stride, emit):
        """3x3 / pad=1 / stride conv + bias + ReLU over a padded line buffer.

        Emits n_rows output rows of pitch Wp; columns >= n_cols are zeroed so
        the result can be stored full-pitch and still provide zero halos for
        the next stage."""
        bias = b_ref[...].astype(f32)                          # (1, Co)
        co = bias.shape[-1]
        # Strip size: fill the MXU M dimension (~256 rows) while keeping the
        # f32 accumulator a reasonable number of vregs.
        rb_max = max(1, min(n_rows, 256 // Wp))
        for r0 in range(0, n_rows, rb_max):
            rb = min(rb_max, n_rows - r0)
            m = rb * Wp
            acc = jnp.zeros((m, co), f32)
            for ky in range(3):
                for kx in range(3):
                    start = (ky + 1) * Wp + (kx - 1) + stg_stride * r0 * Wp
                    if stg_stride == 1:
                        xs = src[pl.ds(start, m), :]
                    else:
                        # strided gather of the kept rows/cols (no s^2
                        # over-compute, no selection matmul)
                        xs = src[pl.ds(start, m, stride=stg_stride), :]
                    acc = acc + jnp.dot(xs.astype(bf16), w_ref[ky * 3 + kx],
                                        preferred_element_type=f32)
            y = jnp.maximum(acc + bias, 0.0)                   # bias + ReLU
            # zero pitch-padding / halo columns before the full-pitch store
            col = jnp.concatenate([base_col] * rb, axis=0)     # (m, 1)
            y = jnp.where(col < n_cols, y, 0.0)
            emit(r0, rb, y)

    def to_pad2(r0, rb, y):      # one aligned full-pitch store per strip
        pad2[(2 + r0) * Wp:(2 + r0 + rb) * Wp, :] = y

    def to_pad3(r0, rb, y):
        pad3[(2 + r0) * Wp:(2 + r0 + rb) * Wp, :] = y

    def to_out(r0, rb, y):       # emit NCHW: one transpose per strip
        yt = jnp.transpose(y)                                  # (C, rb*Wp)
        for hh in range(rb):
            h = r0 + hh
            o_ref[:, h * Wo:(h + 1) * Wo] = (
                yt[:, hh * Wp:hh * Wp + Wo].astype(o_ref.dtype))

    conv_stage(pad1, w1_ref, b1_ref, H,  W,  1, to_pad2)       # conv1 + ReLU
    conv_stage(pad2, w2_ref, b2_ref, Ho, Wo, s, to_pad3)       # conv2 + ReLU (stride)
    conv_stage(pad3, w3_ref, b3_ref, Ho, Wo, 1, to_out)        # conv3 + ReLU


def conv_block(x_nchw, params, stride):
    """Pallas ConvBlock forward. x_nchw: (N, Cin, H, W) -> (N, Cout, H', W')."""
    w1, b1, w2, b2, w3, b3 = params
    N, Cin, H, W = x_nchw.shape
    C = w1.shape[0]
    s = int(stride)
    Ho = (H - 1) // s + 1          # == floor((H + 2 - 3)/s) + 1  (k=3, pad=1)
    Wo = (W - 1) // s + 1
    Wp = _round_up(W + 2, 8)       # 8-aligned padded row pitch (all stages)

    x_flat = x_nchw.reshape(N, Cin, H * W)       # free reshape, stays NCHW

    def taps(w):   # (Cout, Cin, 3, 3) -> bf16 (9, Cin, Cout), tap = ky*3 + kx
        return (jnp.transpose(w, (2, 3, 1, 0))
                .reshape(9, w.shape[1], w.shape[0]).astype(jnp.bfloat16))

    kernel = functools.partial(_fused_convblock_kernel,
                               H=H, W=W, Ho=Ho, Wo=Wo, Wp=Wp, stride=s)

    out_flat = pl.pallas_call(
        kernel,
        out_shape=jax.ShapeDtypeStruct((N, C, Ho * Wo), x_nchw.dtype),
        grid_spec=pltpu.PrefetchScalarGridSpec(
            num_scalar_prefetch=0,
            grid=(N,),
            in_specs=[
                pl.BlockSpec((None, Cin, H * W), lambda n: (n, 0, 0)),
                pl.BlockSpec((9, Cin, C), lambda n: (0, 0, 0)),
                pl.BlockSpec((1, C), lambda n: (0, 0)),
                pl.BlockSpec((9, C, C), lambda n: (0, 0, 0)),
                pl.BlockSpec((1, C), lambda n: (0, 0)),
                pl.BlockSpec((9, C, C), lambda n: (0, 0, 0)),
                pl.BlockSpec((1, C), lambda n: (0, 0)),
            ],
            out_specs=pl.BlockSpec((None, C, Ho * Wo), lambda n: (n, 0, 0)),
            scratch_shapes=[
                pltpu.VMEM(((H + 4) * Wp, Cin), jnp.float32),       # pad1
                pltpu.VMEM(((H + s + 3) * Wp, C), jnp.float32),     # pad2
                pltpu.VMEM(((Ho + 4) * Wp, C), jnp.float32),        # pad3
            ],
        ),
        compiler_params=pltpu.CompilerParams(
            dimension_semantics=("parallel",),
            vmem_limit_bytes=32 * 1024 * 1024),
    )(x_flat,
      taps(w1), b1.reshape(1, C).astype(jnp.float32),
      taps(w2), b2.reshape(1, C).astype(jnp.float32),
      taps(w3), b3.reshape(1, C).astype(jnp.float32))

    return out_flat.reshape(N, C, Ho, Wo)        # already NCHW


def _ref_conv_block(x_nchw, params, stride):
    """Pure-JAX f32 reference (lax conv) mirroring the PyTorch module."""
    w1, b1, w2, b2, w3, b3 = params

    def conv_relu(x, w, b, s):
        y = lax.conv_general_dilated(
            x, w, window_strides=(s, s), padding=((1, 1), (1, 1)),
            dimension_numbers=("NCHW", "OIHW", "NCHW"))
        return jnp.maximum(y + b[None, :, None, None], 0.0)

    x = conv_relu(x_nchw, w1, b1, 1)
    x = conv_relu(x, w2, b2, stride)
    x = conv_relu(x, w3, b3, 1)
    return x


if __name__ == "__main__":
    N, Cin, Cout, H, W, stride = 2, 4, 8, 16, 16, 2

    key = jax.random.PRNGKey(0)
    ks = jax.random.split(key, 7)
    x = jax.random.normal(ks[0], (N, Cin, H, W), jnp.float32)
    w1 = 0.1 * jax.random.normal(ks[1], (Cout, Cin, 3, 3), jnp.float32)
    b1 = 0.1 * jax.random.normal(ks[2], (Cout,), jnp.float32)
    w2 = 0.1 * jax.random.normal(ks[3], (Cout, Cout, 3, 3), jnp.float32)
    b2 = 0.1 * jax.random.normal(ks[4], (Cout,), jnp.float32)
    w3 = 0.1 * jax.random.normal(ks[5], (Cout, Cout, 3, 3), jnp.float32)
    b3 = 0.1 * jax.random.normal(ks[6], (Cout,), jnp.float32)
    params = (w1, b1, w2, b2, w3, b3)

    y = conv_block(x, params, stride)
    y = jax.block_until_ready(y)

    y_ref = _ref_conv_block(x, params, stride)
    assert y.shape == y_ref.shape, (y.shape, y_ref.shape)
    # bf16 MXU operands (f32 accumulation) vs. the pure-f32 lax reference.
    assert jnp.allclose(y, y_ref, atol=3e-2, rtol=3e-2), float(
        jnp.max(jnp.abs(y - y_ref)))

    print("KERNEL_OK")
</pallas_src>

<mosaic_0001>
module attributes {stable_mosaic.version = 11 : i64} {
  func.func @_fused_convblock_kernel(%arg0: i32, %arg1: memref<1x4x256xf32, #tpu.memory_space<vmem>>, %arg2: memref<9x4x8xbf16, #tpu.memory_space<vmem>>, %arg3: memref<1x8xf32, #tpu.memory_space<vmem>>, %arg4: memref<9x8x8xbf16, #tpu.memory_space<vmem>>, %arg5: memref<1x8xf32, #tpu.memory_space<vmem>>, %arg6: memref<9x8x8xbf16, #tpu.memory_space<vmem>>, %arg7: memref<1x8xf32, #tpu.memory_space<vmem>>, %arg8: memref<1x8x64xf32, #tpu.memory_space<vmem>>, %arg9: memref<480x4xf32, #tpu.memory_space<vmem>>, %arg10: memref<504x8xf32, #tpu.memory_space<vmem>>, %arg11: memref<288x8xf32, #tpu.memory_space<vmem>>) attributes {dimension_semantics = [#tpu.dimension_semantics<parallel>], iteration_bounds = array<i64: 2>, scalar_prefetch = 0 : i64, scratch_operands = 3 : i64, tpu.core_type = #tpu.core_type<tc>, window_params = [{transform_indices = @transform_0, window_bounds = array<i64: 1, 4, 256>}, {pipeline_mode = #tpu.pipeline_mode<synchronous>, transform_indices = @transform_1, window_bounds = array<i64: 9, 4, 8>}, {pipeline_mode = #tpu.pipeline_mode<synchronous>, transform_indices = @transform_2, window_bounds = array<i64: 1, 8>}, {pipeline_mode = #tpu.pipeline_mode<synchronous>, transform_indices = @transform_3, window_bounds = array<i64: 9, 8, 8>}, {pipeline_mode = #tpu.pipeline_mode<synchronous>, transform_indices = @transform_4, window_bounds = array<i64: 1, 8>}, {pipeline_mode = #tpu.pipeline_mode<synchronous>, transform_indices = @transform_5, window_bounds = array<i64: 9, 8, 8>}, {pipeline_mode = #tpu.pipeline_mode<synchronous>, transform_indices = @transform_6, window_bounds = array<i64: 1, 8>}, {transform_indices = @transform_7, window_bounds = array<i64: 1, 8, 64>}]} {
    %cst = arith.constant 0.000000e+00 : f32
    %0 = vector.broadcast %cst : f32 to vector<480x4xf32>
    %c0 = arith.constant 0 : index
    %c0_0 = arith.constant 0 : index
    %1 = vector.load %arg9[%c0, %c0_0] : memref<480x4xf32, #tpu.memory_space<vmem>>, vector<480x4xf32>
    tpu.vector_store %arg9[%c0, %c0_0], %0 {strides = array<i32>} : memref<480x4xf32, #tpu.memory_space<vmem>>, vector<480x4xf32>,
    %c0_1 = arith.constant 0 : index
    %c0_2 = arith.constant 0 : index
    %c0_3 = arith.constant 0 : index
    %2 = vector.load %arg1[%c0_1, %c0_2, %c0_3] : memref<1x4x256xf32, #tpu.memory_space<vmem>>, vector<1x4x256xf32>
    %3 = vector.shape_cast %2 : vector<1x4x256xf32> to vector<4x256xf32>
    %4 = tpu.transpose %3, [1, 0] : vector<4x256xf32> -> vector<256x4xf32>
    %5 = vector.extract_strided_slice %4 {offsets = [0, 0], sizes = [16, 4], strides = [1, 1]} : vector<256x4xf32> to vector<16x4xf32>
    %c48 = arith.constant 48 : index
    %c0_4 = arith.constant 0 : index
    %6 = vector.load %arg9[%c48, %c0_4] : memref<480x4xf32, #tpu.memory_space<vmem>>, vector<16x4xf32>
    tpu.vector_store %arg9[%c48, %c0_4], %5 {strides = array<i32>} : memref<480x4xf32, #tpu.memory_space<vmem>>, vector<16x4xf32>,
    %7 = vector.extract_strided_slice %4 {offsets = [16, 0], sizes = [16, 4], strides = [1, 1]} : vector<256x4xf32> to vector<16x4xf32>
    %c72 = arith.constant 72 : index
    %c0_5 = arith.constant 0 : index
    %8 = vector.load %arg9[%c72, %c0_5] : memref<480x4xf32, #tpu.memory_space<vmem>>, vector<16x4xf32>
    tpu.vector_store %arg9[%c72, %c0_5], %7 {strides = array<i32>} : memref<480x4xf32, #tpu.memory_space<vmem>>, vector<16x4xf32>,
    %9 = vector.extract_strided_slice %4 {offsets = [32, 0], sizes = [16, 4], strides = [1, 1]} : vector<256x4xf32> to vector<16x4xf32>
    %c96 = arith.constant 96 : index
    %c0_6 = arith.constant 0 : index
    %10 = vector.load %arg9[%c96, %c0_6] : memref<480x4xf32, #tpu.memory_space<vmem>>, vector<16x4xf32>
    tpu.vector_store %arg9[%c96, %c0_6], %9 {strides = array<i32>} : memref<480x4xf32, #tpu.memory_space<vmem>>, vector<16x4xf32>,
    %11 = vector.extract_strided_slice %4 {offsets = [48, 0], sizes = [16, 4], strides = [1, 1]} : vector<256x4xf32> to vector<16x4xf32>
    %c120 = arith.constant 120 : index
    %c0_7 = arith.constant 0 : index
    %12 = vector.load %arg9[%c120, %c0_7] : memref<480x4xf32, #tpu.memory_space<vmem>>, vector<16x4xf32>
    tpu.vector_store %arg9[%c120, %c0_7], %11 {strides = array<i32>} : memref<480x4xf32, #tpu.memory_space<vmem>>, vector<16x4xf32>,
    %13 = vector.extract_strided_slice %4 {offsets = [64, 0], sizes = [16, 4], strides = [1, 1]} : vector<256x4xf32> to vector<16x4xf32>
    %c144 = arith.constant 144 : index
    %c0_8 = arith.constant 0 : index
    %14 = vector.load %arg9[%c144, %c0_8] : memref<480x4xf32, #tpu.memory_space<vmem>>, vector<16x4xf32>
    tpu.vector_store %arg9[%c144, %c0_8], %13 {strides = array<i32>} : memref<480x4xf32, #tpu.memory_space<vmem>>, vector<16x4xf32>,
    %15 = vector.extract_strided_slice %4 {offsets = [80, 0], sizes = [16, 4], strides = [1, 1]} : vector<256x4xf32> to vector<16x4xf32>
    %c168 = arith.constant 168 : index
    %c0_9 = arith.constant 0 : index
    %16 = vector.load %arg9[%c168, %c0_9] : memref<480x4xf32, #tpu.memory_space<vmem>>, vector<16x4xf32>
    tpu.vector_store %arg9[%c168, %c0_9], %15 {strides = array<i32>} : memref<480x4xf32, #tpu.memory_space<vmem>>, vector<16x4xf32>,
    %17 = vector.extract_strided_slice %4 {offsets = [96, 0], sizes = [16, 4], strides = [1, 1]} : vector<256x4xf32> to vector<16x4xf32>
    %c192 = arith.constant 192 : index
    %c0_10 = arith.constant 0 : index
    %18 = vector.load %arg9[%c192, %c0_10] : memref<480x4xf32, #tpu.memory_space<vmem>>, vector<16x4xf32>
    tpu.vector_store %arg9[%c192, %c0_10], %17 {strides = array<i32>} : memref<480x4xf32, #tpu.memory_space<vmem>>, vector<16x4xf32>,
    %19 = vector.extract_strided_slice %4 {offsets = [112, 0], sizes = [16, 4], strides = [1, 1]} : vector<256x4xf32> to vector<16x4xf32>
    %c216 = arith.constant 216 : index
    %c0_11 = arith.constant 0 : index
    %20 = vector.load %arg9[%c216, %c0_11] : memref<480x4xf32, #tpu.memory_space<vmem>>, vector<16x4xf32>
    tpu.vector_store %arg9[%c216, %c0_11], %19 {strides = array<i32>} : memref<480x4xf32, #tpu.memory_space<vmem>>, vector<16x4xf32>,
    %21 = vector.extract_strided_slice %4 {offsets = [128, 0], sizes = [16, 4], strides = [1, 1]} : vector<256x4xf32> to vector<16x4xf32>
    %c240 = arith.constant 240 : index
    %c0_12 = arith.constant 0 : index
    %22 = vector.load %arg9[%c240, %c0_12] : memref<480x4xf32, #tpu.memory_space<vmem>>, vector<16x4xf32>
    tpu.vector_store %arg9[%c240, %c0_12], %21 {strides = array<i32>} : memref<480x4xf32, #tpu.memory_space<vmem>>, vector<16x4xf32>,
    %23 = vector.extract_strided_slice %4 {offsets = [144, 0], sizes = [16, 4], strides = [1, 1]} : vector<256x4xf32> to vector<16x4xf32>
    %c264 = arith.constant 264 : index
    %c0_13 = arith.constant 0 : index
    %24 = vector.load %arg9[%c264, %c0_13] : memref<480x4xf32, #tpu.memory_space<vmem>>, vector<16x4xf32>
    tpu.vector_store %arg9[%c264, %c0_13], %23 {strides = array<i32>} : memref<480x4xf32, #tpu.memory_space<vmem>>, vector<16x4xf32>,
    %25 = vector.extract_strided_slice %4 {offsets = [160, 0], sizes = [16, 4], strides = [1, 1]} : vector<256x4xf32> to vector<16x4xf32>
    %c288 = arith.constant 288 : index
    %c0_14 = arith.constant 0 : index
    %26 = vector.load %arg9[%c288, %c0_14] : memref<480x4xf32, #tpu.memory_space<vmem>>, vector<16x4xf32>
    tpu.vector_store %arg9[%c288, %c0_14], %25 {strides = array<i32>} : memref<480x4xf32, #tpu.memory_space<vmem>>, vector<16x4xf32>,
    %27 = vector.extract_strided_slice %4 {offsets = [176, 0], sizes = [16, 4], strides = [1, 1]} : vector<256x4xf32> to vector<16x4xf32>
    %c312 = arith.constant 312 : index
    %c0_15 = arith.constant 0 : index
    %28 = vector.load %arg9[%c312, %c0_15] : memref<480x4xf32, #tpu.memory_space<vmem>>, vector<16x4xf32>
    tpu.vector_store %arg9[%c312, %c0_15], %27 {strides = array<i32>} : memref<480x4xf32, #tpu.memory_space<vmem>>, vector<16x4xf32>,
    %29 = vector.extract_strided_slice %4 {offsets = [192, 0], sizes = [16, 4], strides = [1, 1]} : vector<256x4xf32> to vector<16x4xf32>
    %c336 = arith.constant 336 : index
    %c0_16 = arith.constant 0 : index
    %30 = vector.load %arg9[%c336, %c0_16] : memref<480x4xf32, #tpu.memory_space<vmem>>, vector<16x4xf32>
    tpu.vector_store %arg9[%c336, %c0_16], %29 {strides = array<i32>} : memref<480x4xf32, #tpu.memory_space<vmem>>, vector<16x4xf32>,
    %31 = vector.extract_strided_slice %4 {offsets = [208, 0], sizes = [16, 4], strides = [1, 1]} : vector<256x4xf32> to vector<16x4xf32>
    %c360 = arith.constant 360 : index
    %c0_17 = arith.constant 0 : index
    %32 = vector.load %arg9[%c360, %c0_17] : memref<480x4xf32, #tpu.memory_space<vmem>>, vector<16x4xf32>
    tpu.vector_store %arg9[%c360, %c0_17], %31 {strides = array<i32>} : memref<480x4xf32, #tpu.memory_space<vmem>>, vector<16x4xf32>,
    %33 = vector.extract_strided_slice %4 {offsets = [224, 0], sizes = [16, 4], strides = [1, 1]} : vector<256x4xf32> to vector<16x4xf32>
    %c384 = arith.constant 384 : index
    %c0_18 = arith.constant 0 : index
    %34 = vector.load %arg9[%c384, %c0_18] : memref<480x4xf32, #tpu.memory_space<vmem>>, vector<16x4xf32>
    tpu.vector_store %arg9[%c384, %c0_18], %33 {strides = array<i32>} : memref<480x4xf32, #tpu.memory_space<vmem>>, vector<16x4xf32>,
    %35 = vector.extract_strided_slice %4 {offsets = [240, 0], sizes = [16, 4], strides = [1, 1]} : vector<256x4xf32> to vector<16x4xf32>
    %c408 = arith.constant 408 : index
    %c0_19 = arith.constant 0 : index
    %36 = vector.load %arg9[%c408, %c0_19] : memref<480x4xf32, #tpu.memory_space<vmem>>, vector<16x4xf32>
    tpu.vector_store %arg9[%c408, %c0_19], %35 {strides = array<i32>} : memref<480x4xf32, #tpu.memory_space<vmem>>, vector<16x4xf32>,
    %cst_20 = arith.constant 0.000000e+00 : f32
    %37 = vector.broadcast %cst_20 : f32 to vector<48x8xf32>
    %c0_21 = arith.constant 0 : index
    %c0_22 = arith.constant 0 : index
    %38 = vector.load %arg10[%c0_21, %c0_22] : memref<504x8xf32, #tpu.memory_space<vmem>>, vector<48x8xf32>
    tpu.vector_store %arg10[%c0_21, %c0_22], %37 {strides = array<i32>} : memref<504x8xf32, #tpu.memory_space<vmem>>, vector<48x8xf32>,
    %cst_23 = arith.constant 0.000000e+00 : f32
    %39 = vector.broadcast %cst_23 : f32 to vector<72x8xf32>
    %c432 = arith.constant 432 : index
    %c0_24 = arith.constant 0 : index
    %40 = vector.load %arg10[%c432, %c0_24] : memref<504x8xf32, #tpu.memory_space<vmem>>, vector<72x8xf32>
    tpu.vector_store %arg10[%c432, %c0_24], %39 {strides = array<i32>} : memref<504x8xf32, #tpu.memory_space<vmem>>, vector<72x8xf32>,
    %cst_25 = arith.constant 0.000000e+00 : f32
    %41 = vector.broadcast %cst_25 : f32 to vector<48x8xf32>
    %c0_26 = arith.constant 0 : index
    %c0_27 = arith.constant 0 : index
    %42 = vector.load %arg11[%c0_26, %c0_27] : memref<288x8xf32, #tpu.memory_space<vmem>>, vector<48x8xf32>
    tpu.vector_store %arg11[%c0_26, %c0_27], %41 {strides = array<i32>} : memref<288x8xf32, #tpu.memory_space<vmem>>, vector<48x8xf32>,
    %cst_28 = arith.constant 0.000000e+00 : f32
    %43 = vector.broadcast %cst_28 : f32 to vector<48x8xf32>
    %c240_29 = arith.constant 240 : index
    %c0_30 = arith.constant 0 : index
    %44 = vector.load %arg11[%c240_29, %c0_30] : memref<288x8xf32, #tpu.memory_space<vmem>>, vector<48x8xf32>
    tpu.vector_store %arg11[%c240_29, %c0_30], %43 {strides = array<i32>} : memref<288x8xf32, #tpu.memory_space<vmem>>, vector<48x8xf32>,
    %45 = tpu.iota {dimensions = array<i32: 0>} : vector<24x1xi32>
    %c0_31 = arith.constant 0 : index
    %c0_32 = arith.constant 0 : index
    %46 = vector.load %arg3[%c0_31, %c0_32] : memref<1x8xf32, #tpu.memory_space<vmem>>, vector<1x8xf32>
    %cst_33 = arith.constant 0.000000e+00 : f32
    %47 = vector.broadcast %cst_33 : f32 to vector<240x8xf32>
    %c23 = arith.constant 23 : index
    %c0_34 = arith.constant 0 : index
    %48 = vector.load %arg9[%c23, %c0_34] : memref<480x4xf32, #tpu.memory_space<vmem>>, vector<240x4xf32>
    %49 = arith.truncf %48 : vector<240x4xf32> to vector<240x4xbf16>
    %c0_35 = arith.constant 0 : index
    %c0_36 = arith.constant 0 : index
    %c0_37 = arith.constant 0 : index
    %50 = vector.load %arg2[%c0_35, %c0_36, %c0_37] : memref<9x4x8xbf16, #tpu.memory_space<vmem>>, vector<1x4x8xbf16>
    %51 = vector.shape_cast %50 : vector<1x4x8xbf16> to vector<4x8xbf16>
    %cst_38 = arith.constant dense<0.000000e+00> : vector<240x8xf32>
    %52 = tpu.matmul %49, %51, %cst_38 {dimension_numbers = #tpu.dot_dimension_numbers<[1], [0], [0], [1], [0, 0, 1, 1], [], []>} : vector<240x4xbf16>, vector<4x8xbf16>, vector<240x8xf32> -> vector<240x8xf32>
    %53 = arith.addf %47, %52 : vector<240x8xf32>
    %c24 = arith.constant 24 : index
    %c0_39 = arith.constant 0 : index
    %54 = vector.load %arg9[%c24, %c0_39] : memref<480x4xf32, #tpu.memory_space<vmem>>, vector<240x4xf32>
    %55 = arith.truncf %54 : vector<240x4xf32> to vector<240x4xbf16>
    %c1 = arith.constant 1 : index
    %c0_40 = arith.constant 0 : index
    %c0_41 = arith.constant 0 : index
    %56 = vector.load %arg2[%c1, %c0_40, %c0_41] : memref<9x4x8xbf16, #tpu.memory_space<vmem>>, vector<1x4x8xbf16>
    %57 = vector.shape_cast %56 : vector<1x4x8xbf16> to vector<4x8xbf16>
    %cst_42 = arith.constant dense<0.000000e+00> : vector<240x8xf32>
    %58 = tpu.matmul %55, %57, %cst_42 {dimension_numbers = #tpu.dot_dimension_numbers<[1], [0], [0], [1], [0, 0, 1, 1], [], []>} : vector<240x4xbf16>, vector<4x8xbf16>, vector<240x8xf32> -> vector<240x8xf32>
    %59 = arith.addf %53, %58 : vector<240x8xf32>
    %c25 = arith.constant 25 : index
    %c0_43 = arith.constant 0 : index
    %60 = vector.load %arg9[%c25, %c0_43] : memref<480x4xf32, #tpu.memory_space<vmem>>, vector<240x4xf32>
    %61 = arith.truncf %60 : vector<240x4xf32> to vector<240x4xbf16>
    %c2 = arith.constant 2 : index
    %c0_44 = arith.constant 0 : index
    %c0_45 = arith.constant 0 : index
    %62 = vector.load %arg2[%c2, %c0_44, %c0_45] : memref<9x4x8xbf16, #tpu.memory_space<vmem>>, vector<1x4x8xbf16>
    %63 = vector.shape_cast %62 : vector<1x4x8xbf16> to vector<4x8xbf16>
    %cst_46 = arith.constant dense<0.000000e+00> : vector<240x8xf32>
    %64 = tpu.matmul %61, %63, %cst_46 {dimension_numbers = #tpu.dot_dimension_numbers<[1], [0], [0], [1], [0, 0, 1, 1], [], []>} : vector<240x4xbf16>, vector<4x8xbf16>, vector<240x8xf32> -> vector<240x8xf32>
    %65 = arith.addf %59, %64 : vector<240x8xf32>
    %c47 = arith.constant 47 : index
    %c0_47 = arith.constant 0 : index
    %66 = vector.load %arg9[%c47, %c0_47] : memref<480x4xf32, #tpu.memory_space<vmem>>, vector<240x4xf32>
    %67 = arith.truncf %66 : vector<240x4xf32> to vector<240x4xbf16>
    %c3 = arith.constant 3 : index
    %c0_48 = arith.constant 0 : index
    %c0_49 = arith.constant 0 : index
    %68 = vector.load %arg2[%c3, %c0_48, %c0_49] : memref<9x4x8xbf16, #tpu.memory_space<vmem>>, vector<1x4x8xbf16>
    %69 = vector.shape_cast %68 : vector<1x4x8xbf16> to vector<4x8xbf16>
    %cst_50 = arith.constant dense<0.000000e+00> : vector<240x8xf32>
    %70 = tpu.matmul %67, %69, %cst_50 {dimension_numbers = #tpu.dot_dimension_numbers<[1], [0], [0], [1], [0, 0, 1, 1], [], []>} : vector<240x4xbf16>, vector<4x8xbf16>, vector<240x8xf32> -> vector<240x8xf32>
    %71 = arith.addf %65, %70 : vector<240x8xf32>
    %c48_51 = arith.constant 48 : index
    %c0_52 = arith.constant 0 : index
    %72 = vector.load %arg9[%c48_51, %c0_52] : memref<480x4xf32, #tpu.memory_space<vmem>>, vector<240x4xf32>
    %73 = arith.truncf %72 : vector<240x4xf32> to vector<240x4xbf16>
    %c4 = arith.constant 4 : index
    %c0_53 = arith.constant 0 : index
    %c0_54 = arith.constant 0 : index
    %74 = vector.load %arg2[%c4, %c0_53, %c0_54] : memref<9x4x8xbf16, #tpu.memory_space<vmem>>, vector<1x4x8xbf16>
    %75 = vector.shape_cast %74 : vector<1x4x8xbf16> to vector<4x8xbf16>
    %cst_55 = arith.constant dense<0.000000e+00> : vector<240x8xf32>
    %76 = tpu.matmul %73, %75, %cst_55 {dimension_numbers = #tpu.dot_dimension_numbers<[1], [0], [0], [1], [0, 0, 1, 1], [], []>} : vector<240x4xbf16>, vector<4x8xbf16>, vector<240x8xf32> -> vector<240x8xf32>
    %77 = arith.addf %71, %76 : vector<240x8xf32>
    %c49 = arith.constant 49 : index
    %c0_56 = arith.constant 0 : index
    %78 = vector.load %arg9[%c49, %c0_56] : memref<480x4xf32, #tpu.memory_space<vmem>>, vector<240x4xf32>
    %79 = arith.truncf %78 : vector<240x4xf32> to vector<240x4xbf16>
    %c5 = arith.constant 5 : index
    %c0_57 = arith.constant 0 : index
    %c0_58 = arith.constant 0 : index
    %80 = vector.load %arg2[%c5, %c0_57, %c0_58] : memref<9x4x8xbf16, #tpu.memory_space<vmem>>, vector<1x4x8xbf16>
    %81 = vector.shape_cast %80 : vector<1x4x8xbf16> to vector<4x8xbf16>
    %cst_59 = arith.constant dense<0.000000e+00> : vector<240x8xf32>
    %82 = tpu.matmul %79, %81, %cst_59 {dimension_numbers = #tpu.dot_dimension_numbers<[1], [0], [0], [1], [0, 0, 1, 1], [], []>} : vector<240x4xbf16>, vector<4x8xbf16>, vector<240x8xf32> -> vector<240x8xf32>
    %83 = arith.addf %77, %82 : vector<240x8xf32>
    %c71 = arith.constant 71 : index
    %c0_60 = arith.constant 0 : index
    %84 = vector.load %arg9[%c71, %c0_60] : memref<480x4xf32, #tpu.memory_space<vmem>>, vector<240x4xf32>
    %85 = arith.truncf %84 : vector<240x4xf32> to vector<240x4xbf16>
    %c6 = arith.constant 6 : index
    %c0_61 = arith.constant 0 : index
    %c0_62 = arith.constant 0 : index
    %86 = vector.load %arg2[%c6, %c0_61, %c0_62] : memref<9x4x8xbf16, #tpu.memory_space<vmem>>, vector<1x4x8xbf16>
    %87 = vector.shape_cast %86 : vector<1x4x8xbf16> to vector<4x8xbf16>
    %cst_63 = arith.constant dense<0.000000e+00> : vector<240x8xf32>
    %88 = tpu.matmul %85, %87, %cst_63 {dimension_numbers = #tpu.dot_dimension_numbers<[1], [0], [0], [1], [0, 0, 1, 1], [], []>} : vector<240x4xbf16>, vector<4x8xbf16>, vector<240x8xf32> -> vector<240x8xf32>
    %89 = arith.addf %83, %88 : vector<240x8xf32>
    %c72_64 = arith.constant 72 : index
    %c0_65 = arith.constant 0 : index
    %90 = vector.load %arg9[%c72_64, %c0_65] : memref<480x4xf32, #tpu.memory_space<vmem>>, vector<240x4xf32>
    %91 = arith.truncf %90 : vector<240x4xf32> to vector<240x4xbf16>
    %c7 = arith.constant 7 : index
    %c0_66 = arith.constant 0 : index
    %c0_67 = arith.constant 0 : index
    %92 = vector.load %arg2[%c7, %c0_66, %c0_67] : memref<9x4x8xbf16, #tpu.memory_space<vmem>>, vector<1x4x8xbf16>
    %93 = vector.shape_cast %92 : vector<1x4x8xbf16> to vector<4x8xbf16>
    %cst_68 = arith.constant dense<0.000000e+00> : vector<240x8xf32>
    %94 = tpu.matmul %91, %93, %cst_68 {dimension_numbers = #tpu.dot_dimension_numbers<[1], [0], [0], [1], [0, 0, 1, 1], [], []>} : vector<240x4xbf16>, vector<4x8xbf16>, vector<240x8xf32> -> vector<240x8xf32>
    %95 = arith.addf %89, %94 : vector<240x8xf32>
    %c73 = arith.constant 73 : index
    %c0_69 = arith.constant 0 : index
    %96 = vector.load %arg9[%c73, %c0_69] : memref<480x4xf32, #tpu.memory_space<vmem>>, vector<240x4xf32>
    %97 = arith.truncf %96 : vector<240x4xf32> to vector<240x4xbf16>
    %c8 = arith.constant 8 : index
    %c0_70 = arith.constant 0 : index
    %c0_71 = arith.constant 0 : index
    %98 = vector.load %arg2[%c8, %c0_70, %c0_71] : memref<9x4x8xbf16, #tpu.memory_space<vmem>>, vector<1x4x8xbf16>
    %99 = vector.shape_cast %98 : vector<1x4x8xbf16> to vector<4x8xbf16>
    %cst_72 = arith.constant dense<0.000000e+00> : vector<240x8xf32>
    %100 = tpu.matmul %97, %99, %cst_72 {dimension_numbers = #tpu.dot_dimension_numbers<[1], [0], [0], [1], [0, 0, 1, 1], [], []>} : vector<240x4xbf16>, vector<4x8xbf16>, vector<240x8xf32> -> vector<240x8xf32>
    %101 = arith.addf %95, %100 : vector<240x8xf32>
    %102 = vector.broadcast %46 : vector<1x8xf32> to vector<240x8xf32>
    %103 = arith.addf %101, %102 : vector<240x8xf32>
    %cst_73 = arith.constant 0.000000e+00 : f32
    %104 = vector.broadcast %cst_73 : f32 to vector<240x8xf32>
    %105 = arith.maximumf %103, %104 : vector<240x8xf32>
    %106 = tpu.concatenate %45, %45, %45, %45, %45, %45, %45, %45, %45, %45 in 0 : vector<24x1xi32>, vector<24x1xi32>, vector<24x1xi32>, vector<24x1xi32>, vector<24x1xi32>, vector<24x1xi32>, vector<24x1xi32>, vector<24x1xi32>, vector<24x1xi32>, vector<24x1xi32> -> vector<240x1xi32>
    %c16_i32 = arith.constant 16 : i32
    %107 = vector.broadcast %c16_i32 : i32 to vector<240x1xi32>
    %108 = arith.cmpi slt, %106, %107 : vector<240x1xi32>
    %cst_74 = arith.constant 0.000000e+00 : f32
    %109 = vector.shape_cast %108 : vector<240x1xi1> to vector<240x1xi1>
    %110 = vector.broadcast %109 : vector<240x1xi1> to vector<240x8xi1>
    %111 = vector.broadcast %cst_74 : f32 to vector<240x8xf32>
    %112 = arith.select %110, %105, %111 : vector<240x8xi1>, vector<240x8xf32>
    %c48_75 = arith.constant 48 : index
    %c0_76 = arith.constant 0 : index
    %113 = vector.load %arg10[%c48_75, %c0_76] : memref<504x8xf32, #tpu.memory_space<vmem>>, vector<240x8xf32>
    tpu.vector_store %arg10[%c48_75, %c0_76], %112 {strides = array<i32>} : memref<504x8xf32, #tpu.memory_space<vmem>>, vector<240x8xf32>,
    %cst_77 = arith.constant 0.000000e+00 : f32
    %114 = vector.broadcast %cst_77 : f32 to vector<144x8xf32>
    %c263 = arith.constant 263 : index
    %c0_78 = arith.constant 0 : index
    %115 = vector.load %arg9[%c263, %c0_78] : memref<480x4xf32, #tpu.memory_space<vmem>>, vector<144x4xf32>
    %116 = arith.truncf %115 : vector<144x4xf32> to vector<144x4xbf16>
    %c0_79 = arith.constant 0 : index
    %c0_80 = arith.constant 0 : index
    %c0_81 = arith.constant 0 : index
    %117 = vector.load %arg2[%c0_79, %c0_80, %c0_81] : memref<9x4x8xbf16, #tpu.memory_space<vmem>>, vector<1x4x8xbf16>
    %118 = vector.shape_cast %117 : vector<1x4x8xbf16> to vector<4x8xbf16>
    %cst_82 = arith.constant dense<0.000000e+00> : vector<144x8xf32>
    %119 = tpu.matmul %116, %118, %cst_82 {dimension_numbers = #tpu.dot_dimension_numbers<[1], [0], [0], [1], [0, 0, 1, 1], [], []>} : vector<144x4xbf16>, vector<4x8xbf16>, vector<144x8xf32> -> vector<144x8xf32>
    %120 = arith.addf %114, %119 : vector<144x8xf32>
    %c264_83 = arith.constant 264 : index
    %c0_84 = arith.constant 0 : index
    %121 = vector.load %arg9[%c264_83, %c0_84] : memref<480x4xf32, #tpu.memory_space<vmem>>, vector<144x4xf32>
    %122 = arith.truncf %121 : vector<144x4xf32> to vector<144x4xbf16>
    %c1_85 = arith.constant 1 : index
    %c0_86 = arith.constant 0 : index
    %c0_87 = arith.constant 0 : index
    %123 = vector.load %arg2[%c1_85, %c0_86, %c0_87] : memref<9x4x8xbf16, #tpu.memory_space<vmem>>, vector<1x4x8xbf16>
    %124 = vector.shape_cast %123 : vector<1x4x8xbf16> to vector<4x8xbf16>
    %cst_88 = arith.constant dense<0.000000e+00> : vector<144x8xf32>
    %125 = tpu.matmul %122, %124, %cst_88 {dimension_numbers = #tpu.dot_dimension_numbers<[1], [0], [0], [1], [0, 0, 1, 1], [], []>} : vector<144x4xbf16>, vector<4x8xbf16>, vector<144x8xf32> -> vector<144x8xf32>
    %126 = arith.addf %120, %125 : vector<144x8xf32>
    %c265 = arith.constant 265 : index
    %c0_89 = arith.constant 0 : index
    %127 = vector.load %arg9[%c265, %c0_89] : memref<480x4xf32, #tpu.memory_space<vmem>>, vector<144x4xf32>
    %128 = arith.truncf %127 : vector<144x4xf32> to vector<144x4xbf16>
    %c2_90 = arith.constant 2 : index
    %c0_91 = arith.constant 0 : index
    %c0_92 = arith.constant 0 : index
    %129 = vector.load %arg2[%c2_90, %c0_91, %c0_92] : memref<9x4x8xbf16, #tpu.memory_space<vmem>>, vector<1x4x8xbf16>
    %130 = vector.shape_cast %129 : vector<1x4x8xbf16> to vector<4x8xbf16>
    %cst_93 = arith.constant dense<0.000000e+00> : vector<144x8xf32>
    %131 = tpu.matmul %128, %130, %cst_93 {dimension_numbers = #tpu.dot_dimension_numbers<[1], [0], [0], [1], [0, 0, 1, 1], [], []>} : vector<144x4xbf16>, vector<4x8xbf16>, vector<144x8xf32> -> vector<144x8xf32>
    %132 = arith.addf %126, %131 : vector<144x8xf32>
    %c287 = arith.constant 287 : index
    %c0_94 = arith.constant 0 : index
    %133 = vector.load %arg9[%c287, %c0_94] : memref<480x4xf32, #tpu.memory_space<vmem>>, vector<144x4xf32>
    %134 = arith.truncf %133 : vector<144x4xf32> to vector<144x4xbf16>
    %c3_95 = arith.constant 3 : index
    %c0_96 = arith.constant 0 : index
    %c0_97 = arith.constant 0 : index
    %135 = vector.load %arg2[%c3_95, %c0_96, %c0_97] : memref<9x4x8xbf16, #tpu.memory_space<vmem>>, vector<1x4x8xbf16>
    %136 = vector.shape_cast %135 : vector<1x4x8xbf16> to vector<4x8xbf16>
    %cst_98 = arith.constant dense<0.000000e+00> : vector<144x8xf32>
    %137 = tpu.matmul %134, %136, %cst_98 {dimension_numbers = #tpu.dot_dimension_numbers<[1], [0], [0], [1], [0, 0, 1, 1], [], []>} : vector<144x4xbf16>, vector<4x8xbf16>, vector<144x8xf32> -> vector<144x8xf32>
    %138 = arith.addf %132, %137 : vector<144x8xf32>
    %c288_99 = arith.constant 288 : index
    %c0_100 = arith.constant 0 : index
    %139 = vector.load %arg9[%c288_99, %c0_100] : memref<480x4xf32, #tpu.memory_space<vmem>>, vector<144x4xf32>
    %140 = arith.truncf %139 : vector<144x4xf32> to vector<144x4xbf16>
    %c4_101 = arith.constant 4 : index
    %c0_102 = arith.constant 0 : index
    %c0_103 = arith.constant 0 : index
    %141 = vector.load %arg2[%c4_101, %c0_102, %c0_103] : memref<9x4x8xbf16, #tpu.memory_space<vmem>>, vector<1x4x8xbf16>
    %142 = vector.shape_cast %141 : vector<1x4x8xbf16> to vector<4x8xbf16>
    %cst_104 = arith.constant dense<0.000000e+00> : vector<144x8xf32>
    %143 = tpu.matmul %140, %142, %cst_104 {dimension_numbers = #tpu.dot_dimension_numbers<[1], [0], [0], [1], [0, 0, 1, 1], [], []>} : vector<144x4xbf16>, vector<4x8xbf16>, vector<144x8xf32> -> vector<144x8xf32>
    %144 = arith.addf %138, %143 : vector<144x8xf32>
    %c289 = arith.constant 289 : index
    %c0_105 = arith.constant 0 : index
    %145 = vector.load %arg9[%c289, %c0_105] : memref<480x4xf32, #tpu.memory_space<vmem>>, vector<144x4xf32>
    %146 = arith.truncf %145 : vector<144x4xf32> to vector<144x4xbf16>
    %c5_106 = arith.constant 5 : index
    %c0_107 = arith.constant 0 : index
    %c0_108 = arith.constant 0 : index
    %147 = vector.load %arg2[%c5_106, %c0_107, %c0_108] : memref<9x4x8xbf16, #tpu.memory_space<vmem>>, vector<1x4x8xbf16>
    %148 = vector.shape_cast %147 : vector<1x4x8xbf16> to vector<4x8xbf16>
    %cst_109 = arith.constant dense<0.000000e+00> : vector<144x8xf32>
    %149 = tpu.matmul %146, %148, %cst_109 {dimension_numbers = #tpu.dot_dimension_numbers<[1], [0], [0], [1], [0, 0, 1, 1], [], []>} : vector<144x4xbf16>, vector<4x8xbf16>, vector<144x8xf32> -> vector<144x8xf32>
    %150 = arith.addf %144, %149 : vector<144x8xf32>
    %c311 = arith.constant 311 : index
    %c0_110 = arith.constant 0 : index
    %151 = vector.load %arg9[%c311, %c0_110] : memref<480x4xf32, #tpu.memory_space<vmem>>, vector<144x4xf32>
    %152 = arith.truncf %151 : vector<144x4xf32> to vector<144x4xbf16>
    %c6_111 = arith.constant 6 : index
    %c0_112 = arith.constant 0 : index
    %c0_113 = arith.constant 0 : index
    %153 = vector.load %arg2[%c6_111, %c0_112, %c0_113] : memref<9x4x8xbf16, #tpu.memory_space<vmem>>, vector<1x4x8xbf16>
    %154 = vector.shape_cast %153 : vector<1x4x8xbf16> to vector<4x8xbf16>
    %cst_114 = arith.constant dense<0.000000e+00> : vector<144x8xf32>
    %155 = tpu.matmul %152, %154, %cst_114 {dimension_numbers = #tpu.dot_dimension_numbers<[1], [0], [0], [1], [0, 0, 1, 1], [], []>} : vector<144x4xbf16>, vector<4x8xbf16>, vector<144x8xf32> -> vector<144x8xf32>
    %156 = arith.addf %150, %155 : vector<144x8xf32>
    %c312_115 = arith.constant 312 : index
    %c0_116 = arith.constant 0 : index
    %157 = vector.load %arg9[%c312_115, %c0_116] : memref<480x4xf32, #tpu.memory_space<vmem>>, vector<144x4xf32>
    %158 = arith.truncf %157 : vector<144x4xf32> to vector<144x4xbf16>
    %c7_117 = arith.constant 7 : index
    %c0_118 = arith.constant 0 : index
    %c0_119 = arith.constant 0 : index
    %159 = vector.load %arg2[%c7_117, %c0_118, %c0_119] : memref<9x4x8xbf16, #tpu.memory_space<vmem>>, vector<1x4x8xbf16>
    %160 = vector.shape_cast %159 : vector<1x4x8xbf16> to vector<4x8xbf16>
    %cst_120 = arith.constant dense<0.000000e+00> : vector<144x8xf32>
    %161 = tpu.matmul %158, %160, %cst_120 {dimension_numbers = #tpu.dot_dimension_numbers<[1], [0], [0], [1], [0, 0, 1, 1], [], []>} : vector<144x4xbf16>, vector<4x8xbf16>, vector<144x8xf32> -> vector<144x8xf32>
    %162 = arith.addf %156, %161 : vector<144x8xf32>
    %c313 = arith.constant 313 : index
    %c0_121 = arith.constant 0 : index
    %163 = vector.load %arg9[%c313, %c0_121] : memref<480x4xf32, #tpu.memory_space<vmem>>, vector<144x4xf32>
    %164 = arith.truncf %163 : vector<144x4xf32> to vector<144x4xbf16>
    %c8_122 = arith.constant 8 : index
    %c0_123 = arith.constant 0 : index
    %c0_124 = arith.constant 0 : index
    %165 = vector.load %arg2[%c8_122, %c0_123, %c0_124] : memref<9x4x8xbf16, #tpu.memory_space<vmem>>, vector<1x4x8xbf16>
    %166 = vector.shape_cast %165 : vector<1x4x8xbf16> to vector<4x8xbf16>
    %cst_125 = arith.constant dense<0.000000e+00> : vector<144x8xf32>
    %167 = tpu.matmul %164, %166, %cst_125 {dimension_numbers = #tpu.dot_dimension_numbers<[1], [0], [0], [1], [0, 0, 1, 1], [], []>} : vector<144x4xbf16>, vector<4x8xbf16>, vector<144x8xf32> -> vector<144x8xf32>
    %168 = arith.addf %162, %167 : vector<144x8xf32>
    %169 = vector.broadcast %46 : vector<1x8xf32> to vector<144x8xf32>
    %170 = arith.addf %168, %169 : vector<144x8xf32>
    %cst_126 = arith.constant 0.000000e+00 : f32
    %171 = vector.broadcast %cst_126 : f32 to vector<144x8xf32>
    %172 = arith.maximumf %170, %171 : vector<144x8xf32>
    %173 = tpu.concatenate %45, %45, %45, %45, %45, %45 in 0 : vector<24x1xi32>, vector<24x1xi32>, vector<24x1xi32>, vector<24x1xi32>, vector<24x1xi32>, vector<24x1xi32> -> vector<144x1xi32>
    %c16_i32_127 = arith.constant 16 : i32
    %174 = vector.broadcast %c16_i32_127 : i32 to vector<144x1xi32>
    %175 = arith.cmpi slt, %173, %174 : vector<144x1xi32>
    %cst_128 = arith.constant 0.000000e+00 : f32
    %176 = vector.shape_cast %175 : vector<144x1xi1> to vector<144x1xi1>
    %177 = vector.broadcast %176 : vector<144x1xi1> to vector<144x8xi1>
    %178 = vector.broadcast %cst_128 : f32 to vector<144x8xf32>
    %179 = arith.select %177, %172, %178 : vector<144x8xi1>, vector<144x8xf32>
    %c288_129 = arith.constant 288 : index
    %c0_130 = arith.constant 0 : index
    %180 = vector.load %arg10[%c288_129, %c0_130] : memref<504x8xf32, #tpu.memory_space<vmem>>, vector<144x8xf32>
    tpu.vector_store %arg10[%c288_129, %c0_130], %179 {strides = array<i32>} : memref<504x8xf32, #tpu.memory_space<vmem>>, vector<144x8xf32>,
    %c0_131 = arith.constant 0 : index
    %c0_132 = arith.constant 0 : index
    %181 = vector.load %arg5[%c0_131, %c0_132] : memref<1x8xf32, #tpu.memory_space<vmem>>, vector<1x8xf32>
    %cst_133 = arith.constant 0.000000e+00 : f32
    %182 = vector.broadcast %cst_133 : f32 to vector<192x8xf32>
    %c23_134 = arith.constant 23 : index
    %c0_135 = arith.constant 0 : index
    %183 = tpu.strided_load %arg10[%c23_134, %c0_135] {strides = array<i32: 2, 1>} : memref<504x8xf32, #tpu.memory_space<vmem>>, vector<192x8xf32>
    %184 = arith.truncf %183 : vector<192x8xf32> to vector<192x8xbf16>
    %c0_136 = arith.constant 0 : index
    %c0_137 = arith.constant 0 : index
    %c0_138 = arith.constant 0 : index
    %185 = vector.load %arg4[%c0_136, %c0_137, %c0_138] : memref<9x8x8xbf16, #tpu.memory_space<vmem>>, vector<1x8x8xbf16>
    %186 = vector.shape_cast %185 : vector<1x8x8xbf16> to vector<8x8xbf16>
    %cst_139 = arith.constant dense<0.000000e+00> : vector<192x8xf32>
    %187 = tpu.matmul %184, %186, %cst_139 {dimension_numbers = #tpu.dot_dimension_numbers<[1], [0], [0], [1], [0, 0, 1, 1], [], []>} : vector<192x8xbf16>, vector<8x8xbf16>, vector<192x8xf32> -> vector<192x8xf32>
    %188 = arith.addf %182, %187 : vector<192x8xf32>
    %c24_140 = arith.constant 24 : index
    %c0_141 = arith.constant 0 : index
    %189 = tpu.strided_load %arg10[%c24_140, %c0_141] {strides = array<i32: 2, 1>} : memref<504x8xf32, #tpu.memory_space<vmem>>, vector<192x8xf32>
    %190 = arith.truncf %189 : vector<192x8xf32> to vector<192x8xbf16>
    %c1_142 = arith.constant 1 : index
    %c0_143 = arith.constant 0 : index
    %c0_144 = arith.constant 0 : index
    %191 = vector.load %arg4[%c1_142, %c0_143, %c0_144] : memref<9x8x8xbf16, #tpu.memory_space<vmem>>, vector<1x8x8xbf16>
    %192 = vector.shape_cast %191 : vector<1x8x8xbf16> to vector<8x8xbf16>
    %cst_145 = arith.constant dense<0.000000e+00> : vector<192x8xf32>
    %193 = tpu.matmul %190, %192, %cst_145 {dimension_numbers = #tpu.dot_dimension_numbers<[1], [0], [0], [1], [0, 0, 1, 1], [], []>} : vector<192x8xbf16>, vector<8x8xbf16>, vector<192x8xf32> -> vector<192x8xf32>
    %194 = arith.addf %188, %193 : vector<192x8xf32>
    %c25_146 = arith.constant 25 : index
    %c0_147 = arith.constant 0 : index
    %195 = tpu.strided_load %arg10[%c25_146, %c0_147] {strides = array<i32: 2, 1>} : memref<504x8xf32, #tpu.memory_space<vmem>>, vector<192x8xf32>
    %196 = arith.truncf %195 : vector<192x8xf32> to vector<192x8xbf16>
    %c2_148 = arith.constant 2 : index
    %c0_149 = arith.constant 0 : index
    %c0_150 = arith.constant 0 : index
    %197 = vector.load %arg4[%c2_148, %c0_149, %c0_150] : memref<9x8x8xbf16, #tpu.memory_space<vmem>>, vector<1x8x8xbf16>
    %198 = vector.shape_cast %197 : vector<1x8x8xbf16> to vector<8x8xbf16>
    %cst_151 = arith.constant dense<0.000000e+00> : vector<192x8xf32>
    %199 = tpu.matmul %196, %198, %cst_151 {dimension_numbers = #tpu.dot_dimension_numbers<[1], [0], [0], [1], [0, 0, 1, 1], [], []>} : vector<192x8xbf16>, vector<8x8xbf16>, vector<192x8xf32> -> vector<192x8xf32>
    %200 = arith.addf %194, %199 : vector<192x8xf32>
    %c47_152 = arith.constant 47 : index
    %c0_153 = arith.constant 0 : index
    %201 = tpu.strided_load %arg10[%c47_152, %c0_153] {strides = array<i32: 2, 1>} : memref<504x8xf32, #tpu.memory_space<vmem>>, vector<192x8xf32>
    %202 = arith.truncf %201 : vector<192x8xf32> to vector<192x8xbf16>
    %c3_154 = arith.constant 3 : index
    %c0_155 = arith.constant 0 : index
    %c0_156 = arith.constant 0 : index
    %203 = vector.load %arg4[%c3_154, %c0_155, %c0_156] : memref<9x8x8xbf16, #tpu.memory_space<vmem>>, vector<1x8x8xbf16>
    %204 = vector.shape_cast %203 : vector<1x8x8xbf16> to vector<8x8xbf16>
    %cst_157 = arith.constant dense<0.000000e+00> : vector<192x8xf32>
    %205 = tpu.matmul %202, %204, %cst_157 {dimension_numbers = #tpu.dot_dimension_numbers<[1], [0], [0], [1], [0, 0, 1, 1], [], []>} : vector<192x8xbf16>, vector<8x8xbf16>, vector<192x8xf32> -> vector<192x8xf32>
    %206 = arith.addf %200, %205 : vector<192x8xf32>
    %c48_158 = arith.constant 48 : index
    %c0_159 = arith.constant 0 : index
    %207 = tpu.strided_load %arg10[%c48_158, %c0_159] {strides = array<i32: 2, 1>} : memref<504x8xf32, #tpu.memory_space<vmem>>, vector<192x8xf32>
    %208 = arith.truncf %207 : vector<192x8xf32> to vector<192x8xbf16>
    %c4_160 = arith.constant 4 : index
    %c0_161 = arith.constant 0 : index
    %c0_162 = arith.constant 0 : index
    %209 = vector.load %arg4[%c4_160, %c0_161, %c0_162] : memref<9x8x8xbf16, #tpu.memory_space<vmem>>, vector<1x8x8xbf16>
    %210 = vector.shape_cast %209 : vector<1x8x8xbf16> to vector<8x8xbf16>
    %cst_163 = arith.constant dense<0.000000e+00> : vector<192x8xf32>
    %211 = tpu.matmul %208, %210, %cst_163 {dimension_numbers = #tpu.dot_dimension_numbers<[1], [0], [0], [1], [0, 0, 1, 1], [], []>} : vector<192x8xbf16>, vector<8x8xbf16>, vector<192x8xf32> -> vector<192x8xf32>
    %212 = arith.addf %206, %211 : vector<192x8xf32>
    %c49_164 = arith.constant 49 : index
    %c0_165 = arith.constant 0 : index
    %213 = tpu.strided_load %arg10[%c49_164, %c0_165] {strides = array<i32: 2, 1>} : memref<504x8xf32, #tpu.memory_space<vmem>>, vector<192x8xf32>
    %214 = arith.truncf %213 : vector<192x8xf32> to vector<192x8xbf16>
    %c5_166 = arith.constant 5 : index
    %c0_167 = arith.constant 0 : index
    %c0_168 = arith.constant 0 : index
    %215 = vector.load %arg4[%c5_166, %c0_167, %c0_168] : memref<9x8x8xbf16, #tpu.memory_space<vmem>>, vector<1x8x8xbf16>
    %216 = vector.shape_cast %215 : vector<1x8x8xbf16> to vector<8x8xbf16>
    %cst_169 = arith.constant dense<0.000000e+00> : vector<192x8xf32>
    %217 = tpu.matmul %214, %216, %cst_169 {dimension_numbers = #tpu.dot_dimension_numbers<[1], [0], [0], [1], [0, 0, 1, 1], [], []>} : vector<192x8xbf16>, vector<8x8xbf16>, vector<192x8xf32> -> vector<192x8xf32>
    %218 = arith.addf %212, %217 : vector<192x8xf32>
    %c71_170 = arith.constant 71 : index
    %c0_171 = arith.constant 0 : index
    %219 = tpu.strided_load %arg10[%c71_170, %c0_171] {strides = array<i32: 2, 1>} : memref<504x8xf32, #tpu.memory_space<vmem>>, vector<192x8xf32>
    %220 = arith.truncf %219 : vector<192x8xf32> to vector<192x8xbf16>
    %c6_172 = arith.constant 6 : index
    %c0_173 = arith.constant 0 : index
    %c0_174 = arith.constant 0 : index
    %221 = vector.load %arg4[%c6_172, %c0_173, %c0_174] : memref<9x8x8xbf16, #tpu.memory_space<vmem>>, vector<1x8x8xbf16>
    %222 = vector.shape_cast %221 : vector<1x8x8xbf16> to vector<8x8xbf16>
    %cst_175 = arith.constant dense<0.000000e+00> : vector<192x8xf32>
    %223 = tpu.matmul %220, %222, %cst_175 {dimension_numbers = #tpu.dot_dimension_numbers<[1], [0], [0], [1], [0, 0, 1, 1], [], []>} : vector<192x8xbf16>, vector<8x8xbf16>, vector<192x8xf32> -> vector<192x8xf32>
    %224 = arith.addf %218, %223 : vector<192x8xf32>
    %c72_176 = arith.constant 72 : index
    %c0_177 = arith.constant 0 : index
    %225 = tpu.strided_load %arg10[%c72_176, %c0_177] {strides = array<i32: 2, 1>} : memref<504x8xf32, #tpu.memory_space<vmem>>, vector<192x8xf32>
    %226 = arith.truncf %225 : vector<192x8xf32> to vector<192x8xbf16>
    %c7_178 = arith.constant 7 : index
    %c0_179 = arith.constant 0 : index
    %c0_180 = arith.constant 0 : index
    %227 = vector.load %arg4[%c7_178, %c0_179, %c0_180] : memref<9x8x8xbf16, #tpu.memory_space<vmem>>, vector<1x8x8xbf16>
    %228 = vector.shape_cast %227 : vector<1x8x8xbf16> to vector<8x8xbf16>
    %cst_181 = arith.constant dense<0.000000e+00> : vector<192x8xf32>
    %229 = tpu.matmul %226, %228, %cst_181 {dimension_numbers = #tpu.dot_dimension_numbers<[1], [0], [0], [1], [0, 0, 1, 1], [], []>} : vector<192x8xbf16>, vector<8x8xbf16>, vector<192x8xf32> -> vector<192x8xf32>
    %230 = arith.addf %224, %229 : vector<192x8xf32>
    %c73_182 = arith.constant 73 : index
    %c0_183 = arith.constant 0 : index
    %231 = tpu.strided_load %arg10[%c73_182, %c0_183] {strides = array<i32: 2, 1>} : memref<504x8xf32, #tpu.memory_space<vmem>>, vector<192x8xf32>
    %232 = arith.truncf %231 : vector<192x8xf32> to vector<192x8xbf16>
    %c8_184 = arith.constant 8 : index
    %c0_185 = arith.constant 0 : index
    %c0_186 = arith.constant 0 : index
    %233 = vector.load %arg4[%c8_184, %c0_185, %c0_186] : memref<9x8x8xbf16, #tpu.memory_space<vmem>>, vector<1x8x8xbf16>
    %234 = vector.shape_cast %233 : vector<1x8x8xbf16> to vector<8x8xbf16>
    %cst_187 = arith.constant dense<0.000000e+00> : vector<192x8xf32>
    %235 = tpu.matmul %232, %234, %cst_187 {dimension_numbers = #tpu.dot_dimension_numbers<[1], [0], [0], [1], [0, 0, 1, 1], [], []>} : vector<192x8xbf16>, vector<8x8xbf16>, vector<192x8xf32> -> vector<192x8xf32>
    %236 = arith.addf %230, %235 : vector<192x8xf32>
    %237 = vector.broadcast %181 : vector<1x8xf32> to vector<192x8xf32>
    %238 = arith.addf %236, %237 : vector<192x8xf32>
    %cst_188 = arith.constant 0.000000e+00 : f32
    %239 = vector.broadcast %cst_188 : f32 to vector<192x8xf32>
    %240 = arith.maximumf %238, %239 : vector<192x8xf32>
    %241 = tpu.concatenate %45, %45, %45, %45, %45, %45, %45, %45 in 0 : vector<24x1xi32>, vector<24x1xi32>, vector<24x1xi32>, vector<24x1xi32>, vector<24x1xi32>, vector<24x1xi32>, vector<24x1xi32>, vector<24x1xi32> -> vector<192x1xi32>
    %c8_i32 = arith.constant 8 : i32
    %242 = vector.broadcast %c8_i32 : i32 to vector<192x1xi32>
    %243 = arith.cmpi slt, %241, %242 : vector<192x1xi32>
    %cst_189 = arith.constant 0.000000e+00 : f32
    %244 = vector.shape_cast %243 : vector<192x1xi1> to vector<192x1xi1>
    %245 = vector.broadcast %244 : vector<192x1xi1> to vector<192x8xi1>
    %246 = vector.broadcast %cst_189 : f32 to vector<192x8xf32>
    %247 = arith.select %245, %240, %246 : vector<192x8xi1>, vector<192x8xf32>
    %c48_190 = arith.constant 48 : index
    %c0_191 = arith.constant 0 : index
    %248 = vector.load %arg11[%c48_190, %c0_191] : memref<288x8xf32, #tpu.memory_space<vmem>>, vector<192x8xf32>
    tpu.vector_store %arg11[%c48_190, %c0_191], %247 {strides = array<i32>} : memref<288x8xf32, #tpu.memory_space<vmem>>, vector<192x8xf32>,
    %c0_192 = arith.constant 0 : index
    %c0_193 = arith.constant 0 : index
    %249 = vector.load %arg7[%c0_192, %c0_193] : memref<1x8xf32, #tpu.memory_space<vmem>>, vector<1x8xf32>
    %cst_194 = arith.constant 0.000000e+00 : f32
    %250 = vector.broadcast %cst_194 : f32 to vector<192x8xf32>
    %c23_195 = arith.constant 23 : index
    %c0_196 = arith.constant 0 : index
    %251 = vector.load %arg11[%c23_195, %c0_196] : memref<288x8xf32, #tpu.memory_space<vmem>>, vector<192x8xf32>
    %252 = arith.truncf %251 : vector<192x8xf32> to vector<192x8xbf16>
    %c0_197 = arith.constant 0 : index
    %c0_198 = arith.constant 0 : index
    %c0_199 = arith.constant 0 : index
    %253 = vector.load %arg6[%c0_197, %c0_198, %c0_199] : memref<9x8x8xbf16, #tpu.memory_space<vmem>>, vector<1x8x8xbf16>
    %254 = vector.shape_cast %253 : vector<1x8x8xbf16> to vector<8x8xbf16>
    %cst_200 = arith.constant dense<0.000000e+00> : vector<192x8xf32>
    %255 = tpu.matmul %252, %254, %cst_200 {dimension_numbers = #tpu.dot_dimension_numbers<[1], [0], [0], [1], [0, 0, 1, 1], [], []>} : vector<192x8xbf16>, vector<8x8xbf16>, vector<192x8xf32> -> vector<192x8xf32>
    %256 = arith.addf %250, %255 : vector<192x8xf32>
    %c24_201 = arith.constant 24 : index
    %c0_202 = arith.constant 0 : index
    %257 = vector.load %arg11[%c24_201, %c0_202] : memref<288x8xf32, #tpu.memory_space<vmem>>, vector<192x8xf32>
    %258 = arith.truncf %257 : vector<192x8xf32> to vector<192x8xbf16>
    %c1_203 = arith.constant 1 : index
    %c0_204 = arith.constant 0 : index
    %c0_205 = arith.constant 0 : index
    %259 = vector.load %arg6[%c1_203, %c0_204, %c0_205] : memref<9x8x8xbf16, #tpu.memory_space<vmem>>, vector<1x8x8xbf16>
    %260 = vector.shape_cast %259 : vector<1x8x8xbf16> to vector<8x8xbf16>
    %cst_206 = arith.constant dense<0.000000e+00> : vector<192x8xf32>
    %261 = tpu.matmul %258, %260, %cst_206 {dimension_numbers = #tpu.dot_dimension_numbers<[1], [0], [0], [1], [0, 0, 1, 1], [], []>} : vector<192x8xbf16>, vector<8x8xbf16>, vector<192x8xf32> -> vector<192x8xf32>
    %262 = arith.addf %256, %261 : vector<192x8xf32>
    %c25_207 = arith.constant 25 : index
    %c0_208 = arith.constant 0 : index
    %263 = vector.load %arg11[%c25_207, %c0_208] : memref<288x8xf32, #tpu.memory_space<vmem>>, vector<192x8xf32>
    %264 = arith.truncf %263 : vector<192x8xf32> to vector<192x8xbf16>
    %c2_209 = arith.constant 2 : index
    %c0_210 = arith.constant 0 : index
    %c0_211 = arith.constant 0 : index
    %265 = vector.load %arg6[%c2_209, %c0_210, %c0_211] : memref<9x8x8xbf16, #tpu.memory_space<vmem>>, vector<1x8x8xbf16>
    %266 = vector.shape_cast %265 : vector<1x8x8xbf16> to vector<8x8xbf16>
    %cst_212 = arith.constant dense<0.000000e+00> : vector<192x8xf32>
    %267 = tpu.matmul %264, %266, %cst_212 {dimension_numbers = #tpu.dot_dimension_numbers<[1], [0], [0], [1], [0, 0, 1, 1], [], []>} : vector<192x8xbf16>, vector<8x8xbf16>, vector<192x8xf32> -> vector<192x8xf32>
    %268 = arith.addf %262, %267 : vector<192x8xf32>
    %c47_213 = arith.constant 47 : index
    %c0_214 = arith.constant 0 : index
    %269 = vector.load %arg11[%c47_213, %c0_214] : memref<288x8xf32, #tpu.memory_space<vmem>>, vector<192x8xf32>
    %270 = arith.truncf %269 : vector<192x8xf32> to vector<192x8xbf16>
    %c3_215 = arith.constant 3 : index
    %c0_216 = arith.constant 0 : index
    %c0_217 = arith.constant 0 : index
    %271 = vector.load %arg6[%c3_215, %c0_216, %c0_217] : memref<9x8x8xbf16, #tpu.memory_space<vmem>>, vector<1x8x8xbf16>
    %272 = vector.shape_cast %271 : vector<1x8x8xbf16> to vector<8x8xbf16>
    %cst_218 = arith.constant dense<0.000000e+00> : vector<192x8xf32>
    %273 = tpu.matmul %270, %272, %cst_218 {dimension_numbers = #tpu.dot_dimension_numbers<[1], [0], [0], [1], [0, 0, 1, 1], [], []>} : vector<192x8xbf16>, vector<8x8xbf16>, vector<192x8xf32> -> vector<192x8xf32>
    %274 = arith.addf %268, %273 : vector<192x8xf32>
    %c48_219 = arith.constant 48 : index
    %c0_220 = arith.constant 0 : index
    %275 = vector.load %arg11[%c48_219, %c0_220] : memref<288x8xf32, #tpu.memory_space<vmem>>, vector<192x8xf32>
    %276 = arith.truncf %275 : vector<192x8xf32> to vector<192x8xbf16>
    %c4_221 = arith.constant 4 : index
    %c0_222 = arith.constant 0 : index
    %c0_223 = arith.constant 0 : index
    %277 = vector.load %arg6[%c4_221, %c0_222, %c0_223] : memref<9x8x8xbf16, #tpu.memory_space<vmem>>, vector<1x8x8xbf16>
    %278 = vector.shape_cast %277 : vector<1x8x8xbf16> to vector<8x8xbf16>
    %cst_224 = arith.constant dense<0.000000e+00> : vector<192x8xf32>
    %279 = tpu.matmul %276, %278, %cst_224 {dimension_numbers = #tpu.dot_dimension_numbers<[1], [0], [0], [1], [0, 0, 1, 1], [], []>} : vector<192x8xbf16>, vector<8x8xbf16>, vector<192x8xf32> -> vector<192x8xf32>
    %280 = arith.addf %274, %279 : vector<192x8xf32>
    %c49_225 = arith.constant 49 : index
    %c0_226 = arith.constant 0 : index
    %281 = vector.load %arg11[%c49_225, %c0_226] : memref<288x8xf32, #tpu.memory_space<vmem>>, vector<192x8xf32>
    %282 = arith.truncf %281 : vector<192x8xf32> to vector<192x8xbf16>
    %c5_227 = arith.constant 5 : index
    %c0_228 = arith.constant 0 : index
    %c0_229 = arith.constant 0 : index
    %283 = vector.load %arg6[%c5_227, %c0_228, %c0_229] : memref<9x8x8xbf16, #tpu.memory_space<vmem>>, vector<1x8x8xbf16>
    %284 = vector.shape_cast %283 : vector<1x8x8xbf16> to vector<8x8xbf16>
    %cst_230 = arith.constant dense<0.000000e+00> : vector<192x8xf32>
    %285 = tpu.matmul %282, %284, %cst_230 {dimension_numbers = #tpu.dot_dimension_numbers<[1], [0], [0], [1], [0, 0, 1, 1], [], []>} : vector<192x8xbf16>, vector<8x8xbf16>, vector<192x8xf32> -> vector<192x8xf32>
    %286 = arith.addf %280, %285 : vector<192x8xf32>
    %c71_231 = arith.constant 71 : index
    %c0_232 = arith.constant 0 : index
    %287 = vector.load %arg11[%c71_231, %c0_232] : memref<288x8xf32, #tpu.memory_space<vmem>>, vector<192x8xf32>
    %288 = arith.truncf %287 : vector<192x8xf32> to vector<192x8xbf16>
    %c6_233 = arith.constant 6 : index
    %c0_234 = arith.constant 0 : index
    %c0_235 = arith.constant 0 : index
    %289 = vector.load %arg6[%c6_233, %c0_234, %c0_235] : memref<9x8x8xbf16, #tpu.memory_space<vmem>>, vector<1x8x8xbf16>
    %290 = vector.shape_cast %289 : vector<1x8x8xbf16> to vector<8x8xbf16>
    %cst_236 = arith.constant dense<0.000000e+00> : vector<192x8xf32>
    %291 = tpu.matmul %288, %290, %cst_236 {dimension_numbers = #tpu.dot_dimension_numbers<[1], [0], [0], [1], [0, 0, 1, 1], [], []>} : vector<192x8xbf16>, vector<8x8xbf16>, vector<192x8xf32> -> vector<192x8xf32>
    %292 = arith.addf %286, %291 : vector<192x8xf32>
    %c72_237 = arith.constant 72 : index
    %c0_238 = arith.constant 0 : index
    %293 = vector.load %arg11[%c72_237, %c0_238] : memref<288x8xf32, #tpu.memory_space<vmem>>, vector<192x8xf32>
    %294 = arith.truncf %293 : vector<192x8xf32> to vector<192x8xbf16>
    %c7_239 = arith.constant 7 : index
    %c0_240 = arith.constant 0 : index
    %c0_241 = arith.constant 0 : index
    %295 = vector.load %arg6[%c7_239, %c0_240, %c0_241] : memref<9x8x8xbf16, #tpu.memory_space<vmem>>, vector<1x8x8xbf16>
    %296 = vector.shape_cast %295 : vector<1x8x8xbf16> to vector<8x8xbf16>
    %cst_242 = arith.constant dense<0.000000e+00> : vector<192x8xf32>
    %297 = tpu.matmul %294, %296, %cst_242 {dimension_numbers = #tpu.dot_dimension_numbers<[1], [0], [0], [1], [0, 0, 1, 1], [], []>} : vector<192x8xbf16>, vector<8x8xbf16>, vector<192x8xf32> -> vector<192x8xf32>
    %298 = arith.addf %292, %297 : vector<192x8xf32>
    %c73_243 = arith.constant 73 : index
    %c0_244 = arith.constant 0 : index
    %299 = vector.load %arg11[%c73_243, %c0_244] : memref<288x8xf32, #tpu.memory_space<vmem>>, vector<192x8xf32>
    %300 = arith.truncf %299 : vector<192x8xf32> to vector<192x8xbf16>
    %c8_245 = arith.constant 8 : index
    %c0_246 = arith.constant 0 : index
    %c0_247 = arith.constant 0 : index
    %301 = vector.load %arg6[%c8_245, %c0_246, %c0_247] : memref<9x8x8xbf16, #tpu.memory_space<vmem>>, vector<1x8x8xbf16>
    %302 = vector.shape_cast %301 : vector<1x8x8xbf16> to vector<8x8xbf16>
    %cst_248 = arith.constant dense<0.000000e+00> : vector<192x8xf32>
    %303 = tpu.matmul %300, %302, %cst_248 {dimension_numbers = #tpu.dot_dimension_numbers<[1], [0], [0], [1], [0, 0, 1, 1], [], []>} : vector<192x8xbf16>, vector<8x8xbf16>, vector<192x8xf32> -> vector<192x8xf32>
    %304 = arith.addf %298, %303 : vector<192x8xf32>
    %305 = vector.broadcast %249 : vector<1x8xf32> to vector<192x8xf32>
    %306 = arith.addf %304, %305 : vector<192x8xf32>
    %cst_249 = arith.constant 0.000000e+00 : f32
    %307 = vector.broadcast %cst_249 : f32 to vector<192x8xf32>
    %308 = arith.maximumf %306, %307 : vector<192x8xf32>
    %309 = tpu.concatenate %45, %45, %45, %45, %45, %45, %45, %45 in 0 : vector<24x1xi32>, vector<24x1xi32>, vector<24x1xi32>, vector<24x1xi32>, vector<24x1xi32>, vector<24x1xi32>, vector<24x1xi32>, vector<24x1xi32> -> vector<192x1xi32>
    %c8_i32_250 = arith.constant 8 : i32
    %310 = vector.broadcast %c8_i32_250 : i32 to vector<192x1xi32>
    %311 = arith.cmpi slt, %309, %310 : vector<192x1xi32>
    %cst_251 = arith.constant 0.000000e+00 : f32
    %312 = vector.shape_cast %311 : vector<192x1xi1> to vector<192x1xi1>
    %313 = vector.broadcast %312 : vector<192x1xi1> to vector<192x8xi1>
    %314 = vector.broadcast %cst_251 : f32 to vector<192x8xf32>
    %315 = arith.select %313, %308, %314 : vector<192x8xi1>, vector<192x8xf32>
    %316 = tpu.transpose %315, [1, 0] : vector<192x8xf32> -> vector<8x192xf32>
    %317 = vector.extract_strided_slice %316 {offsets = [0, 0], sizes = [8, 8], strides = [1, 1]} : vector<8x192xf32> to vector<8x8xf32>
    %c0_252 = arith.constant 0 : index
    %c0_253 = arith.constant 0 : index
    %c0_254 = arith.constant 0 : index
    %318 = vector.load %arg8[%c0_252, %c0_253, %c0_254] : memref<1x8x64xf32, #tpu.memory_space<vmem>>, vector<1x8x8xf32>
    %319 = vector.shape_cast %318 : vector<1x8x8xf32> to vector<8x8xf32>
    %320 = vector.shape_cast %317 : vector<8x8xf32> to vector<1x8x8xf32>
    tpu.vector_store %arg8[%c0_252, %c0_253, %c0_254], %320 {strides = array<i32>} : memref<1x8x64xf32, #tpu.memory_space<vmem>>, vector<1x8x8xf32>,
    %321 = vector.extract_strided_slice %316 {offsets = [0, 24], sizes = [8, 8], strides = [1, 1]} : vector<8x192xf32> to vector<8x8xf32>
    %c0_255 = arith.constant 0 : index
    %c0_256 = arith.constant 0 : index
    %c8_257 = arith.constant 8 : index
    %322 = vector.load %arg8[%c0_255, %c0_256, %c8_257] : memref<1x8x64xf32, #tpu.memory_space<vmem>>, vector<1x8x8xf32>
    %323 = vector.shape_cast %322 : vector<1x8x8xf32> to vector<8x8xf32>
    %324 = vector.shape_cast %321 : vector<8x8xf32> to vector<1x8x8xf32>
    tpu.vector_store %arg8[%c0_255, %c0_256, %c8_257], %324 {strides = array<i32>} : memref<1x8x64xf32, #tpu.memory_space<vmem>>, vector<1x8x8xf32>,
    %325 = vector.extract_strided_slice %316 {offsets = [0, 48], sizes = [8, 8], strides = [1, 1]} : vector<8x192xf32> to vector<8x8xf32>
    %c0_258 = arith.constant 0 : index
    %c0_259 = arith.constant 0 : index
    %c16 = arith.constant 16 : index
    %326 = vector.load %arg8[%c0_258, %c0_259, %c16] : memref<1x8x64xf32, #tpu.memory_space<vmem>>, vector<1x8x8xf32>
    %327 = vector.shape_cast %326 : vector<1x8x8xf32> to vector<8x8xf32>
    %328 = vector.shape_cast %325 : vector<8x8xf32> to vector<1x8x8xf32>
    tpu.vector_store %arg8[%c0_258, %c0_259, %c16], %328 {strides = array<i32>} : memref<1x8x64xf32, #tpu.memory_space<vmem>>, vector<1x8x8xf32>,
    %329 = vector.extract_strided_slice %316 {offsets = [0, 72], sizes = [8, 8], strides = [1, 1]} : vector<8x192xf32> to vector<8x8xf32>
    %c0_260 = arith.constant 0 : index
    %c0_261 = arith.constant 0 : index
    %c24_262 = arith.constant 24 : index
    %330 = vector.load %arg8[%c0_260, %c0_261, %c24_262] : memref<1x8x64xf32, #tpu.memory_space<vmem>>, vector<1x8x8xf32>
    %331 = vector.shape_cast %330 : vector<1x8x8xf32> to vector<8x8xf32>
    %332 = vector.shape_cast %329 : vector<8x8xf32> to vector<1x8x8xf32>
    tpu.vector_store %arg8[%c0_260, %c0_261, %c24_262], %332 {strides = array<i32>} : memref<1x8x64xf32, #tpu.memory_space<vmem>>, vector<1x8x8xf32>,
    %333 = vector.extract_strided_slice %316 {offsets = [0, 96], sizes = [8, 8], strides = [1, 1]} : vector<8x192xf32> to vector<8x8xf32>
    %c0_263 = arith.constant 0 : index
    %c0_264 = arith.constant 0 : index
    %c32 = arith.constant 32 : index
    %334 = vector.load %arg8[%c0_263, %c0_264, %c32] : memref<1x8x64xf32, #tpu.memory_space<vmem>>, vector<1x8x8xf32>
    %335 = vector.shape_cast %334 : vector<1x8x8xf32> to vector<8x8xf32>
    %336 = vector.shape_cast %333 : vector<8x8xf32> to vector<1x8x8xf32>
    tpu.vector_store %arg8[%c0_263, %c0_264, %c32], %336 {strides = array<i32>} : memref<1x8x64xf32, #tpu.memory_space<vmem>>, vector<1x8x8xf32>,
    %337 = vector.extract_strided_slice %316 {offsets = [0, 120], sizes = [8, 8], strides = [1, 1]} : vector<8x192xf32> to vector<8x8xf32>
    %c0_265 = arith.constant 0 : index
    %c0_266 = arith.constant 0 : index
    %c40 = arith.constant 40 : index
    %338 = vector.load %arg8[%c0_265, %c0_266, %c40] : memref<1x8x64xf32, #tpu.memory_space<vmem>>, vector<1x8x8xf32>
    %339 = vector.shape_cast %338 : vector<1x8x8xf32> to vector<8x8xf32>
    %340 = vector.shape_cast %337 : vector<8x8xf32> to vector<1x8x8xf32>
    tpu.vector_store %arg8[%c0_265, %c0_266, %c40], %340 {strides = array<i32>} : memref<1x8x64xf32, #tpu.memory_space<vmem>>, vector<1x8x8xf32>,
    %341 = vector.extract_strided_slice %316 {offsets = [0, 144], sizes = [8, 8], strides = [1, 1]} : vector<8x192xf32> to vector<8x8xf32>
    %c0_267 = arith.constant 0 : index
    %c0_268 = arith.constant 0 : index
    %c48_269 = arith.constant 48 : index
    %342 = vector.load %arg8[%c0_267, %c0_268, %c48_269] : memref<1x8x64xf32, #tpu.memory_space<vmem>>, vector<1x8x8xf32>
    %343 = vector.shape_cast %342 : vector<1x8x8xf32> to vector<8x8xf32>
    %344 = vector.shape_cast %341 : vector<8x8xf32> to vector<1x8x8xf32>
    tpu.vector_store %arg8[%c0_267, %c0_268, %c48_269], %344 {strides = array<i32>} : memref<1x8x64xf32, #tpu.memory_space<vmem>>, vector<1x8x8xf32>,
    %345 = vector.extract_strided_slice %316 {offsets = [0, 168], sizes = [8, 8], strides = [1, 1]} : vector<8x192xf32> to vector<8x8xf32>
    %c0_270 = arith.constant 0 : index
    %c0_271 = arith.constant 0 : index
    %c56 = arith.constant 56 : index
    %346 = vector.load %arg8[%c0_270, %c0_271, %c56] : memref<1x8x64xf32, #tpu.memory_space<vmem>>, vector<1x8x8xf32>
    %347 = vector.shape_cast %346 : vector<1x8x8xf32> to vector<8x8xf32>
    %348 = vector.shape_cast %345 : vector<8x8xf32> to vector<1x8x8xf32>
    tpu.vector_store %arg8[%c0_270, %c0_271, %c56], %348 {strides = array<i32>} : memref<1x8x64xf32, #tpu.memory_space<vmem>>, vector<1x8x8xf32>,
    return
  }
  func.func @transform_0(%arg0: i32) -> (i32, i32, i32) {
    %c0_i32 = arith.constant 0 : i32
    %c0_i32_0 = arith.constant 0 : i32
    %c0_i32_1 = arith.constant 0 : i32
    return %arg0, %c0_i32, %c0_i32_0 : i32, i32, i32
  }
  func.func @transform_1(%arg0: i32) -> (i32, i32, i32) {
    %c0_i32 = arith.constant 0 : i32
    %c0_i32_0 = arith.constant 0 : i32
    %c0_i32_1 = arith.constant 0 : i32
    %c0_i32_2 = arith.constant 0 : i32
    return %c0_i32, %c0_i32_0, %c0_i32_1 : i32, i32, i32
  }
  func.func @transform_2(%arg0: i32) -> (i32, i32) {
    %c0_i32 = arith.constant 0 : i32
    %c0_i32_0 = arith.constant 0 : i32
    %c0_i32_1 = arith.constant 0 : i32
    return %c0_i32, %c0_i32_0 : i32, i32
  }
  func.func @transform_3(%arg0: i32) -> (i32, i32, i32) {
    %c0_i32 = arith.constant 0 : i32
    %c0_i32_0 = arith.constant 0 : i32
    %c0_i32_1 = arith.constant 0 : i32
    %c0_i32_2 = arith.constant 0 : i32
    return %c0_i32, %c0_i32_0, %c0_i32_1 : i32, i32, i32
  }
  func.func @transform_4(%arg0: i32) -> (i32, i32) {
    %c0_i32 = arith.constant 0 : i32
    %c0_i32_0 = arith.constant 0 : i32
    %c0_i32_1 = arith.constant 0 : i32
    return %c0_i32, %c0_i32_0 : i32, i32
  }
  func.func @transform_5(%arg0: i32) -> (i32, i32, i32) {
    %c0_i32 = arith.constant 0 : i32
    %c0_i32_0 = arith.constant 0 : i32
    %c0_i32_1 = arith.constant 0 : i32
    %c0_i32_2 = arith.constant 0 : i32
    return %c0_i32, %c0_i32_0, %c0_i32_1 : i32, i32, i32
  }
  func.func @transform_6(%arg0: i32) -> (i32, i32) {
    %c0_i32 = arith.constant 0 : i32
    %c0_i32_0 = arith.constant 0 : i32
    %c0_i32_1 = arith.constant 0 : i32
    return %c0_i32, %c0_i32_0 : i32, i32
  }
  func.func @transform_7(%arg0: i32) -> (i32, i32, i32) {
    %c0_i32 = arith.constant 0 : i32
    %c0_i32_0 = arith.constant 0 : i32
    %c0_i32_1 = arith.constant 0 : i32
    return %arg0, %c0_i32, %c0_i32_0 : i32, i32, i32
  }
}

</mosaic_0001>

<bundles_post_ra>
// kernel: tpu_custom_call.1
= control target key start
LH: loop header
LB: loop body
LE: loop exit
PB: predicated region body
PF: predicated region fallthrough
CT: control target
= control target key end

     0   :  { %12 = vsyncpa [#allocation6], 0  ;;  %s16298_s0 = inlined_call_operand.vmem [shape: f32[2,4,256], index: 0, kind: input, shape index: {}]   ;;  %s16299_s1 = inlined_call_operand.vmem [shape: bf16[9,4,8], index: 1, kind: input, shape index: {}]   ;;  %s16300_s2 = inlined_call_operand.vmem [shape: f32[1,8], index: 2, kind: input, shape index: {}]   ;;  %s16301_s3 = inlined_call_operand.vmem [shape: bf16[9,8,8], index: 3, kind: input, shape index: {}]   ;;  %s16302_s4 = inlined_call_operand.vmem [shape: f32[1,8], index: 4, kind: input, shape index: {}]   ;;  %s16303_s5 = inlined_call_operand.vmem [shape: bf16[9,8,8], index: 5, kind: input, shape index: {}]   ;;  %s16304_s6 = inlined_call_operand.vmem [shape: f32[1,8], index: 6, kind: input, shape index: {}]   ;;  %s16305_s7 = inlined_call_operand.hbm [shape: f32[2,8,64], index: 7, kind: output, shape index: {}]  }
   0x1   :  { %14 = vsyncpa [#allocation6 + $0x1], 0  ;;  %s11812_s24 = smov 0   ;;  %s11814_s25 = smov 0  }
   0x2   :  { %s11816_s26 = smov 0   ;;  %s11818_s27 = smov 0  }
   0x3 LB: > { %s11833_s28 = sadd.s32 4294967295, %s11758_s27   ;;  %s9294_s29 = sadd.s32 4294967294, %s11758_s27   ;;  %s11758_s27 = sphi %s11818_s27, %s16730_s27   ;;  %s11754_s26 = sphi %s11816_s26, %s16729_s26   ;;  %s11750_s25 = sphi %s11814_s25, %s16728_s25   ;;  %s11746_s24 = sphi %s11812_s24, %s16727_s24  }
   0x4   : > { %s11837_s30 = sadd.s32 1, %s11758_s27   ;;  %s179_s8 = sadd.s32 1, %s11754_s26 }
   0x5   : > { %s176_s9 = ssub.s32 %s11758_s27, %s11837_s30  ;;  %p189_p0 = scmp.ne.s32.totalorder %s11754_s26, %s11750_s25 }
   0x6   : > { %p177_p1 = scmp.eq.s32.totalorder %s176_s9, 0  ;;  %p190_p2 = scmp.eq.s32.totalorder %s11833_s28, 1 }
   0x7   : > { %p195_p3 = scmp.ne.s32.totalorder %s11750_s25, %s11746_s24  ;;  %p196_p4 = scmp.eq.s32.totalorder %s9294_s29, 1 }
   0x8   : > { %s11848_s10 = scalar_select %p177_p1, %s11754_s26, %s179_s8  }
   0x9   : > { %p11850_p5 = por %p190_p2, %p189_p0  ;;  %p11854_p6 = por %p196_p4, %p195_p3 }
   0xa   : > { %p9297_p7 = scmp.ge.s32.totalorder %s11758_s27, 1  ;;  %p240_p8 = scmp.lt.s32.totalorder %s11758_s27, 3 }
   0xc   : > { %p241_p9 = pnand %p9297_p7, %p240_p8 }
   0xe   : > { %244 = sbr.rel (%p241_p9) target bundleno = 2329 (0x919), region = 48 }
  0x13   : > { %p272_p10 = scmp.lt.s32.totalorder %s11833_s28, 1  ;;  %v9301_v0 = vld [vmem:[%s16299_s1 + $0x2] sm:$0x3]  ;;  %vm610_vm0 = vcmask 1041408   ;;  %vm278_vm1 = vcmask 31744   ;;  %v16306_v1 = vmov 0.0  }
  0x14   : > { %10241 = vmatprep.subr.bf16.mxu0 %v16306_v1  ;;  %v612_v2 = vsel %vm610_vm0, %v9301_v0, 0  ;;  %285 = vst.msk [vmem:[#allocation2 + $0x30] sm:$0xff] %vm278_vm1, %v16306_v1  ;;  %281 = vst.msk [vmem:[#allocation2 + $0x10] sm:$0xff] %vm278_vm1, %v16306_v1  ;;  %11609 = vmatprep.subr.bf16.mxu1 %v16306_v1  ;;  %vm11761_vm2 = vmmov 0   ;;  %v9332_v8 = vld [vmem:[%s16299_s1 + $0x4] sm:$0x3] }
  0x15   : > { %282 = vst.msk [vmem:[#allocation2 + $0x18] sm:$0xff] %vm278_vm1, %v16306_v1  ;;  %283 = vst.msk [vmem:[#allocation2 + $0x20] sm:$0xff] %vm278_vm1, %v16306_v1  ;;  %s273_s15 = scalar_select %p272_p10, %s11833_s28, 1  ;;  %10242 = vmatpush3.bf16.msra.mxu0 %v612_v2  ;;  %11610 = vmatpush3.bf16.msra.mxu1 %v612_v2  ;;  %v1061_v9 = vsel %vm610_vm0, %v9332_v8, 0  ;;  %vm439_vm3 = vcmask 64512   ;;  %vm4883_vm7 = vcmask 1043456  }
  0x16   : > { %284 = vst.msk [vmem:[#allocation2 + $0x28] sm:$0xff] %vm278_vm1, %v16306_v1  ;;  %286 = vst.msk [vmem:[#allocation2 + $0x38] sm:$0xff] %vm278_vm1, %v16306_v1  ;;  %10303 = vmatprep.subr.bf16.mxu1 %v16306_v1  ;;  %10365 = vmatprep.subr.bf16.mxu0 %v16306_v1  ;;  %s269_s14 = sand.u32 1, %s11750_s25   ;;  %s11765_s17 = smov 80   ;;  %vm9188_vm11 = vcmask 130112   ;;  %vm9193_vm12 = vcmask 195712  }
  0x17   : > { %287 = vst.msk [vmem:[#allocation2 + $0x40] sm:$0xff] %vm278_vm1, %v16306_v1  ;;  %288 = vst.msk [vmem:[#allocation2 + $0x48] sm:$0xff] %vm278_vm1, %v16306_v1  ;;  %s9772_s16 = sshll.u32 %s273_s15, 3  ;;  %10243 = vmatprep.mubr.msk.bf16.mxu0 %vm11761_vm2, %v16306_v1  ;;  %10291 = vmatprep.mubr.msk.bf16.mxu1 %vm11761_vm2, %v16306_v1  ;;  %s9298_s15 = sshll.u32 %s269_s14, 3  ;;  %vm9198_vm13 = vcmask 261312   ;;  %vm9203_vm14 = vcmask 326912  }
  0x18   : > { %289 = vst.msk [vmem:[#allocation2 + $0x50] sm:$0xff] %vm278_vm1, %v16306_v1  ;;  %290 = vst.msk [vmem:[#allocation2 + $0x58] sm:$0xff] %vm278_vm1, %v16306_v1  ;;  %s276_s19 = scalar_lea.vmem %s16298_s0, %s9772_s16  ;;  %s11764_s16 = smov 112   ;;  %vm9208_vm15 = vcmask 392512  }
  0x19   : > { %291 = vst.msk [vmem:[#allocation2 + $0x60] sm:$0xff] %vm278_vm1, %v16306_v1  ;;  %292 = vst.msk [vmem:[#allocation2 + $0x68] sm:$0xff] %vm278_vm1, %v16306_v1  ;;  %v339_v3 = vld [vmem:[%s276_s19] sm:$0xff]  ;;  %s16245_s18 = scalar_lea.vmem [#allocation5], %s9298_s15  ;;  %s11766_s19 = smov 96  }
  0x1a   : > { %293 = vst.msk [vmem:[#allocation2 + $0x70] sm:$0xff] %vm278_vm1, %v16306_v1  ;;  %294 = vst.msk [vmem:[#allocation2 + $0x78] sm:$0xff] %vm278_vm1, %v16306_v1  ;;  %343 = vxpose.xlu0.b32.start.end [1/1] (short) %v339_v3, 128  ;;  %v341_v7 = vcombine.high %v339_v3, %v339_v3  ;;  %s11767_s20 = smov 64   ;;  %s11768_s21 = smov 48  }
  0x1b   : > { %295 = vst.msk [vmem:[#allocation2 + $0x80] sm:$0xff] %vm278_vm1, %v16306_v1  ;;  %296 = vst.msk [vmem:[#allocation2 + $0x88] sm:$0xff] %vm278_vm1, %v16306_v1  ;;  %s11769_s22 = smov 32   ;;  %s11770_s23 = smov 16  }
  0x1c   : > { %297 = vst.msk [vmem:[#allocation2 + $0x90] sm:$0xff] %vm278_vm1, %v16306_v1  ;;  %298 = vst.msk [vmem:[#allocation2 + $0x98] sm:$0xff] %vm278_vm1, %v16306_v1  ;;  %v518_v4 = vld [vmem:[#allocation2 + $0x18] sm:$0xff]  ;;  %v519_v5 = vld [vmem:[#allocation2 + $0x20] sm:$0xff]  ;;  %s9769_s29 = sshll.u32 %s11833_s28, 7  ;;  %s9235_s8 = sshll.u32 %s16245_s18, 4  ;;  %s9236_s8 = int_to_ptr.vmem [resolvable:$true] %s9235_s8 }
  0x1d   : > { %299 = vst.msk [vmem:[#allocation2 + $0xa0] sm:$0xff] %vm278_vm1, %v16306_v1  ;;  %300 = vst.msk [vmem:[#allocation2 + $0xa8] sm:$0xff] %vm278_vm1, %v16306_v1  ;;  %v548_v6 = vpack.c.bf16 %v519_v5, %v518_v4  ;;  %v520_v12 = vld [vmem:[#allocation2 + $0x28] sm:$0xff]  ;;  %s16260_s15 = scalar_lea.hbm %s16305_s7, %s9769_s29 }
  0x1e   : > { %301 = vst.msk [vmem:[#allocation2 + $0xb0] sm:$0xff] %vm278_vm1, %v16306_v1  ;;  %302 = vst.msk [vmem:[#allocation2 + $0xb8] sm:$0xff] %vm278_vm1, %v16306_v1  ;;  %v12023_v24 = vld [vmem:[#allocation2 + $0x40] sm:$0xff] }
  0x1f   : > { %303 = vst.msk [vmem:[#allocation2 + $0xc0] sm:$0xff] %vm278_vm1, %v16306_v1  ;;  %304 = vst.msk [vmem:[#allocation2 + $0xc8] sm:$0xff] %vm278_vm1, %v16306_v1  ;;  %10244 = vmatmul.mubr.msk.bf16.vlgmr.msra.gmra.mxu0 %vm278_vm1, %v548_v6  ;;  %v12040_v33 = vld [vmem:[#allocation2 + $0x58] sm:$0xff] }
  0x20   : > { %305 = vst.msk [vmem:[#allocation2 + $0xd0] sm:$0xff] %vm278_vm1, %v16306_v1  ;;  %306 = vst.msk [vmem:[#allocation2 + $0xd8] sm:$0xff] %vm278_vm1, %v16306_v1  ;;  %10247 = vmatprep.mubr.msk.bf16.mxu0 %vm11761_vm2, %v16306_v1  ;;  %10366 = vmatpush3.bf16.msra.mxu0 %v1061_v9 }
  0x21   : > { %307 = vst.msk [vmem:[#allocation2 + $0xe0] sm:$0xff] %vm278_vm1, %v16306_v1  ;;  %308 = vst.msk [vmem:[#allocation2 + $0xe8] sm:$0xff] %vm278_vm1, %v16306_v1  ;;  %10489 = vmatprep.subr.bf16.mxu0 %v16306_v1  ;;  %v12093_v58 = vld [vmem:[#allocation2 + $0x70] sm:$0xff] }
  0x22   : > { %309 = vst.msk [vmem:[#allocation2 + $0xf0] sm:$0xff] %vm278_vm1, %v16306_v1  ;;  %310 = vst.msk [vmem:[#allocation2 + $0xf8] sm:$0xff] %vm278_vm1, %v16306_v1  ;;  %v12108_v3 = vld [vmem:[#allocation2 + $0x88] sm:$0xff] }
  0x23   : > { %311 = vst.msk [vmem:[#allocation2 + $0x100] sm:$0xff] %vm278_vm1, %v16306_v1  ;;  %312 = vst.msk [vmem:[#allocation2 + $0x108] sm:$0xff] %vm278_vm1, %v16306_v1 }
  0x24   : > { %313 = vst.msk [vmem:[#allocation2 + $0x110] sm:$0xff] %vm278_vm1, %v16306_v1  ;;  %314 = vst.msk [vmem:[#allocation2 + $0x118] sm:$0xff] %vm278_vm1, %v16306_v1 }
  0x25   : > { %315 = vst.msk [vmem:[#allocation2 + $0x120] sm:$0xff] %vm278_vm1, %v16306_v1  ;;  %316 = vst.msk [vmem:[#allocation2 + $0x128] sm:$0xff] %vm278_vm1, %v16306_v1 }
  0x26   : > { %317 = vst.msk [vmem:[#allocation2 + $0x130] sm:$0xff] %vm278_vm1, %v16306_v1  ;;  %318 = vst.msk [vmem:[#allocation2 + $0x138] sm:$0xff] %vm278_vm1, %v16306_v1 }
  0x27   : > { %319 = vst.msk [vmem:[#allocation2 + $0x140] sm:$0xff] %vm278_vm1, %v16306_v1  ;;  %320 = vst.msk [vmem:[#allocation2 + $0x148] sm:$0xff] %vm278_vm1, %v16306_v1  ;;  %v12215_v32 = vld [vmem:[#allocation2 + $0xd0] sm:$0xff] }
  0x28   : > { %321 = vst.msk [vmem:[#allocation2 + $0x150] sm:$0xff] %vm278_vm1, %v16306_v1  ;;  %322 = vst.msk [vmem:[#allocation2 + $0x158] sm:$0xff] %vm278_vm1, %v16306_v1 }
  0x29   : > { %323 = vst.msk [vmem:[#allocation2 + $0x160] sm:$0xff] %vm278_vm1, %v16306_v1  ;;  %324 = vst.msk [vmem:[#allocation2 + $0x168] sm:$0xff] %vm278_vm1, %v16306_v1 }
  0x2a   : > { %325 = vst.msk [vmem:[#allocation2 + $0x170] sm:$0xff] %vm278_vm1, %v16306_v1  ;;  %326 = vst.msk [vmem:[#allocation2 + $0x178] sm:$0xff] %vm278_vm1, %v16306_v1 }
  0x2b   : > { %327 = vst.msk [vmem:[#allocation2 + $0x180] sm:$0xff] %vm278_vm1, %v16306_v1  ;;  %328 = vst.msk [vmem:[#allocation2 + $0x188] sm:$0xff] %vm278_vm1, %v16306_v1 }
  0x2c   : > { %329 = vst.msk [vmem:[#allocation2 + $0x190] sm:$0xff] %vm278_vm1, %v16306_v1  ;;  %330 = vst.msk [vmem:[#allocation2 + $0x198] sm:$0xff] %vm278_vm1, %v16306_v1 }
  0x2d   : > { %331 = vst.msk [vmem:[#allocation2 + $0x1a0] sm:$0xff] %vm278_vm1, %v16306_v1  ;;  %332 = vst.msk [vmem:[#allocation2 + $0x1a8] sm:$0xff] %vm278_vm1, %v16306_v1 }
  0x2e   : > { %333 = vst.msk [vmem:[#allocation2 + $0x1b0] sm:$0xff] %vm278_vm1, %v16306_v1  ;;  %334 = vst.msk [vmem:[#allocation2 + $0x1b8] sm:$0xff] %vm278_vm1, %v16306_v1 }
  0x2f   : > { %335 = vst.msk [vmem:[#allocation2 + $0x1c0] sm:$0xff] %vm278_vm1, %v16306_v1  ;;  %336 = vst.msk [vmem:[#allocation2 + $0x1c8] sm:$0xff] %vm278_vm1, %v16306_v1 }
  0x30   : > { %16376 = vst [vmem:[#allocation8_spill] sm:$0xff] %v12093_v58  ;;  %16378 = vst [vmem:[#allocation10_spill] sm:$0xff] %v12108_v3 }
  0x57   : > { %375 = vxpose.xlu0.b32.start.end [1/1] (short) %v341_v7, 128 }
  0x96   : > { %v359_v10 = vpop.trf.xlu0 }
  0x97   : > { %407 = vst.msk [vmem:[#allocation2 + $0x30] sm:$0xff] %vm278_vm1, %v359_v10 }
  0x9a   : > { %v360_v11 = vpop.trf.xlu0 }
  0x9b   : > { %408 = vst.msk [vmem:[#allocation2 + $0x38] sm:$0xff] %vm278_vm1, %v360_v11  ;;  %v12161_v11 = vld [vmem:[#allocation2 + $0xa0] sm:$0xff] }
  0x9c   : > { %16388 = vst [vmem:[#allocation20_spill] sm:$0xff] %v12161_v11 }
  0x9e   : > { %v361_v13 = vpop.trf.xlu0  ;;  %v12001_v14 = vld [vmem:[#allocation2 + $0x30] sm:$0xff] }
  0x9f   : > { %409 = vst.msk [vmem:[#allocation2 + $0x48] sm:$0xff] %vm278_vm1, %v361_v13  ;;  %v549_v15 = vpack.c.bf16 %v12001_v14, %v520_v12  ;;  %v12006_v16 = vld [vmem:[#allocation2 + $0x2f] sm:$0xff] }
  0xa1   : > { %10248 = vmatmul.mubr.msk.bf16.gmra.mxu0 %vm278_vm1, %v549_v15 }
  0xa2   : > { %v362_v17 = vpop.trf.xlu0  ;;  %10251 = vmatprep.mubr.msk.bf16.mxu0 %vm11761_vm2, %v16306_v1  ;;  %v12010_v18 = vld [vmem:[#allocation2 + $0x38] sm:$0xff] }
  0xa3   : > { %v12012_v19 = vld [vmem:[#allocation2 + $0x31] sm:$0xff]  ;;  %410 = vst.msk [vmem:[#allocation2 + $0x50] sm:$0xff] %vm278_vm1, %v362_v17  ;;  %v12017_v21 = vld [vmem:[#allocation2 + $0x39] sm:$0xff]  ;;  %v550_v30 = vpack.c.bf16 %v12023_v24, %v12010_v18 }
  0xa4   : > { %v12014_v20 = vld [vmem:[#allocation2 + $0x37] sm:$0xff]  ;;  %v12029_v28 = vld [vmem:[#allocation2 + $0x3f] sm:$0xff] }
  0xa6   : > { %v363_v26 = vpop.trf.xlu0  ;;  %v12027_v27 = vld [vmem:[#allocation2 + $0x48] sm:$0xff] }
  0xa7   : > { %v12031_v29 = vld [vmem:[#allocation2 + $0x47] sm:$0xff]  ;;  %411 = vst.msk [vmem:[#allocation2 + $0x60] sm:$0xff] %vm278_vm1, %v363_v26 }
  0xa8   : > { %v12043_v34 = vld [vmem:[#allocation2 + $0x41] sm:$0xff] }
  0xa9   : > { %10252 = vmatmul.mubr.msk.bf16.gmra.mxu0 %vm278_vm1, %v550_v30 }
  0xaa   : > { %v364_v35 = vpop.trf.xlu0  ;;  %10255 = vmatprep.mubr.msk.bf16.mxu0 %vm11761_vm2, %v16306_v1  ;;  %v12047_v36 = vld [vmem:[#allocation2 + $0x50] sm:$0xff] }
  0xab   : > { %v12049_v37 = vld [vmem:[#allocation2 + $0x4f] sm:$0xff]  ;;  %412 = vst.msk [vmem:[#allocation2 + $0x68] sm:$0xff] %vm278_vm1, %v364_v35  ;;  %v12054_v39 = vld [vmem:[#allocation2 + $0x57] sm:$0xff]  ;;  %v551_v46 = vpack.c.bf16 %v12047_v36, %v12027_v27 }
  0xac   : > { %v12051_v38 = vld [vmem:[#allocation2 + $0x49] sm:$0xff]  ;;  %v12062_v44 = vld [vmem:[#allocation2 + $0x51] sm:$0xff] }
  0xae   : > { %v365_v43 = vpop.trf.xlu0  ;;  %v12064_v45 = vld [vmem:[#allocation2 + $0x59] sm:$0xff] }
  0xaf   : > { %413 = vst.msk [vmem:[#allocation2 + $0x78] sm:$0xff] %vm278_vm1, %v365_v43  ;;  %v12072_v48 = vld [vmem:[#allocation2 + $0x60] sm:$0xff] }
  0xb0   : > { %v12074_v49 = vld [vmem:[#allocation2 + $0x5f] sm:$0xff]  ;;  %v552_v63 = vpack.c.bf16 %v12072_v48, %v12040_v33 }
  0xb1   : > { %10256 = vmatmul.mubr.msk.bf16.gmra.mxu0 %vm278_vm1, %v551_v46 }
  0xb2   : > { %v366_v50 = vpop.trf.xlu0  ;;  %10259 = vmatprep.mubr.msk.bf16.mxu0 %vm11761_vm2, %v16306_v1  ;;  %v12078_v51 = vld [vmem:[#allocation2 + $0x68] sm:$0xff] }
  0xb3   : > { %v12080_v52 = vld [vmem:[#allocation2 + $0x61] sm:$0xff]  ;;  %414 = vst.msk [vmem:[#allocation2 + $0x80] sm:$0xff] %vm278_vm1, %v366_v50  ;;  %v12085_v54 = vld [vmem:[#allocation2 + $0x69] sm:$0xff]  ;;  %v553_v26 = vpack.c.bf16 %v12093_v58, %v12078_v51 }
  0xb4   : > { %v12082_v53 = vld [vmem:[#allocation2 + $0x67] sm:$0xff]  ;;  %v12097_v61 = vld [vmem:[#allocation2 + $0x6f] sm:$0xff] }
  0xb6   : > { %v367_v59 = vpop.trf.xlu0  ;;  %v12095_v60 = vld [vmem:[#allocation2 + $0x78] sm:$0xff] }
  0xb7   : > { %16377 = vst [vmem:[#allocation9_spill] sm:$0xff] %v12095_v60  ;;  %v12099_v62 = vld [vmem:[#allocation2 + $0x77] sm:$0xff]  ;;  %415 = vst.msk [vmem:[#allocation2 + $0x90] sm:$0xff] %vm278_vm1, %v367_v59 }
  0xb8   : > { %v12111_v4 = vld [vmem:[#allocation2 + $0x71] sm:$0xff] }
  0xb9   : > { %10260 = vmatmul.mubr.msk.bf16.gmra.mxu0 %vm278_vm1, %v552_v63  ;;  %16379 = vst [vmem:[#allocation11_spill] sm:$0xff] %v12111_v4 }
  0xba   : > { %v368_v5 = vpop.trf.xlu0  ;;  %10263 = vmatprep.mubr.msk.bf16.mxu0 %vm11761_vm2, %v16306_v1  ;;  %v12115_v6 = vld [vmem:[#allocation2 + $0x80] sm:$0xff] }
  0xbb   : > { %16380 = vst [vmem:[#allocation12_spill] sm:$0xff] %v12115_v6  ;;  %v12117_v7 = vld [vmem:[#allocation2 + $0x7f] sm:$0xff]  ;;  %416 = vst.msk [vmem:[#allocation2 + $0x98] sm:$0xff] %vm278_vm1, %v368_v5  ;;  %v12122_v9 = vld [vmem:[#allocation2 + $0x87] sm:$0xff] }
  0xbc   : > { %v12119_v8 = vld [vmem:[#allocation2 + $0x79] sm:$0xff]  ;;  %v12130_v15 = vld [vmem:[#allocation2 + $0x81] sm:$0xff] }
  0xbd   : > { %16381 = vst [vmem:[#allocation13_spill] sm:$0xff] %v12119_v8  ;;  %16382 = vst [vmem:[#allocation14_spill] sm:$0xff] %v12130_v15 }
  0xbe   : > { %v369_v13 = vpop.trf.xlu0  ;;  %v12132_v17 = vld [vmem:[#allocation2 + $0x89] sm:$0xff] }
  0xbf   : > { %16383 = vst [vmem:[#allocation15_spill] sm:$0xff] %v12132_v17  ;;  %417 = vst.msk [vmem:[#allocation2 + $0xa8] sm:$0xff] %vm278_vm1, %v369_v13  ;;  %v12140_v35 = vld [vmem:[#allocation2 + $0x90] sm:$0xff]  ;;  %v12176_v13 = vld [vmem:[#allocation2 + $0xb8] sm:$0xff] }
  0xc0   : > { %16384 = vst [vmem:[#allocation16_spill] sm:$0xff] %v12140_v35  ;;  %v12142_v43 = vld [vmem:[#allocation2 + $0x8f] sm:$0xff] }
  0xc1   : > { %10264 = vmatmul.mubr.msk.bf16.gmra.mxu0 %vm278_vm1, %v553_v26 }
  0xc2   : > { %v370_v46 = vpop.trf.xlu0  ;;  %10267 = vmatprep.mubr.msk.bf16.mxu0 %vm11761_vm2, %v16306_v1  ;;  %v12146_v50 = vld [vmem:[#allocation2 + $0x98] sm:$0xff] }
  0xc3   : > { %16385 = vst [vmem:[#allocation17_spill] sm:$0xff] %v12146_v50  ;;  %v12148_v59 = vld [vmem:[#allocation2 + $0x91] sm:$0xff]  ;;  %418 = vst.msk [vmem:[#allocation2 + $0xb0] sm:$0xff] %vm278_vm1, %v370_v46  ;;  %v12153_v5 = vld [vmem:[#allocation2 + $0x99] sm:$0xff]  ;;  %v554_v46 = vpack.c.bf16 %v12115_v6, %v12095_v60 }
  0xc4   : > { %16386 = vst [vmem:[#allocation18_spill] sm:$0xff] %v12148_v59  ;;  %v12150_v63 = vld [vmem:[#allocation2 + $0x97] sm:$0xff]  ;;  %16387 = vst [vmem:[#allocation19_spill] sm:$0xff] %v12153_v5  ;;  %v12165_v41 = vld [vmem:[#allocation2 + $0x9f] sm:$0xff] }
  0xc6   : > { %v371_v57 = vpop.trf.xlu0  ;;  %v12163_v47 = vld [vmem:[#allocation2 + $0xa8] sm:$0xff] }
  0xc7   : > { %v12167_v25 = vld [vmem:[#allocation2 + $0xa7] sm:$0xff]  ;;  %419 = vst.msk [vmem:[#allocation2 + $0xc0] sm:$0xff] %vm278_vm1, %v371_v57 }
  0xc9   : > { %10268 = vmatmul.mubr.msk.bf16.gmra.mxu0 %vm278_vm1, %v554_v46  ;;  %v555_v46 = vpack.c.bf16 %v12140_v35, %v12108_v3 }
  0xca   : > { %v372_v10 = vpop.trf.xlu0  ;;  %10271 = vmatprep.mubr.msk.bf16.mxu0 %vm11761_vm2, %v16306_v1  ;;  %v12181_v12 = vld [vmem:[#allocation2 + $0xb0] sm:$0xff] }
  0xcb   : > { %16389 = vst [vmem:[#allocation21_spill] sm:$0xff] %v12181_v12  ;;  %v12183_v57 = vld [vmem:[#allocation2 + $0xaf] sm:$0xff]  ;;  %420 = vst.msk [vmem:[#allocation2 + $0xc8] sm:$0xff] %vm278_vm1, %v372_v10  ;;  %v12186_v2 = vld [vmem:[#allocation2 + $0xb7] sm:$0xff] }
  0xce   : > { %v373_v0 = vpop.trf.xlu0  ;;  %v12196_v56 = vld [vmem:[#allocation2 + $0xc0] sm:$0xff] }
  0xcf   : > { %421 = vst.msk [vmem:[#allocation2 + $0xd8] sm:$0xff] %vm278_vm1, %v373_v0  ;;  %v12202_v26 = vld [vmem:[#allocation2 + $0xbf] sm:$0xff] }
  0xd0   : > { %v12211_v30 = vld [vmem:[#allocation2 + $0xb9] sm:$0xff] }
  0xd1   : > { %10272 = vmatmul.mubr.msk.bf16.gmra.mxu0 %vm278_vm1, %v555_v46  ;;  %16390 = vst [vmem:[#allocation22_spill] sm:$0xff] %v12211_v30  ;;  %v556_v46 = vpack.c.bf16 %v12161_v11, %v12146_v50  ;;  %v517_v30 = vld [vmem:[%s16299_s1] sm:$0x3]  ;;  %v16397_v50 = vmov 0.0  }
  0xd2   : > { %v374_v55 = vpop.trf.xlu0  ;;  %10275 = vmatprep.mubr.msk.bf16.mxu0 %vm11761_vm2, %v16306_v1  ;;  %v12200_v10 = vld [vmem:[#allocation2 + $0xc8] sm:$0xff]  ;;  %v813_v58 = vsel %vm610_vm0, %v517_v30, 0  ;;  %442 = vst.msk [vmem:[#allocation3 + $0x10] sm:$0xff] %vm439_vm3, %v16397_v50  ;;  %443 = vst.msk [vmem:[#allocation3 + $0x18] sm:$0xff] %vm439_vm3, %v16397_v50 }
  0xd3   : > { %v12204_v40 = vld [vmem:[#allocation2 + $0xc7] sm:$0xff]  ;;  %422 = vst.msk [vmem:[#allocation2 + $0xe0] sm:$0xff] %vm278_vm1, %v374_v55  ;;  %v12221_v1 = vld [vmem:[#allocation2 + $0xcf] sm:$0xff] }
  0xd4   : > { %v12213_v42 = vld [vmem:[#allocation2 + $0xc1] sm:$0xff]  ;;  %v12232_v6 = vld [vmem:[#allocation2 + $0xc9] sm:$0xff]  ;;  %444 = vst.msk [vmem:[#allocation3 + $0x20] sm:$0xff] %vm439_vm3, %v16397_v50  ;;  %445 = vst.msk [vmem:[#allocation3 + $0x28] sm:$0xff] %vm439_vm3, %v16397_v50 }
  0xd5   : > { %16391 = vst [vmem:[#allocation23_spill] sm:$0xff] %v12213_v42  ;;  %16393 = vst [vmem:[#allocation25_spill] sm:$0xff] %v12232_v6  ;;  %v12239_v42 = vld [vmem:[#allocation2 + $0xe8] sm:$0xff] }
  0xd6   : > { %v391_v23 = vpop.trf.xlu0  ;;  %v12219_v22 = vld [vmem:[#allocation2 + $0xd8] sm:$0xff]  ;;  %16395 = vst [vmem:[#allocation27_spill] sm:$0xff] %v12239_v42  ;;  %446 = vst.msk [vmem:[#allocation3 + $0x1b0] sm:$0xff] %vm439_vm3, %v16397_v50 }
  0xd7   : > { %16392 = vst [vmem:[#allocation24_spill] sm:$0xff] %v12219_v22  ;;  %v12223_v55 = vld [vmem:[#allocation2 + $0xd7] sm:$0xff]  ;;  %423 = vst.msk [vmem:[#allocation2 + $0xf0] sm:$0xff] %vm278_vm1, %v391_v23  ;;  %v557_v23 = vpack.c.bf16 %v12181_v12, %v12163_v47  ;;  %v12303_v12 = vld [vmem:[#allocation2 + $0x100] sm:$0xff] }
  0xd8   : > { %v12234_v31 = vld [vmem:[#allocation2 + $0xd1] sm:$0xff]  ;;  %16406 = vst [vmem:[#allocation37_spill] sm:$0xff] %v12303_v12  ;;  %447 = vst.msk [vmem:[#allocation3 + $0x1b8] sm:$0xff] %vm439_vm3, %v16397_v50 }
  0xd9   : > { %16394 = vst [vmem:[#allocation26_spill] sm:$0xff] %v12234_v31  ;;  %10276 = vmatmul.mubr.msk.bf16.gmra.mxu0 %vm278_vm1, %v556_v46  ;;  %448 = vst.msk [vmem:[#allocation3 + $0x1c0] sm:$0xff] %vm439_vm3, %v16397_v50 }
  0xda   : > { %v392_v11 = vpop.trf.xlu0  ;;  %v12244_v0 = vld [vmem:[#allocation2 + $0xe0] sm:$0xff]  ;;  %10279 = vmatprep.mubr.msk.bf16.mxu0 %vm11761_vm2, %v16397_v50  ;;  %457 = vst.msk [vmem:[#allocation4 + $0x10] sm:$0xff] %vm439_vm3, %v16397_v50  ;;  %458 = vst.msk [vmem:[#allocation4 + $0x18] sm:$0xff] %vm439_vm3, %v16397_v50 }
  0xdb   : > { %16396 = vst [vmem:[#allocation28_spill] sm:$0xff] %v12244_v0  ;;  %v12248_v35 = vld [vmem:[#allocation2 + $0xdf] sm:$0xff]  ;;  %424 = vst.msk [vmem:[#allocation2 + $0xf8] sm:$0xff] %vm278_vm1, %v392_v11  ;;  %v560_v3 = vpack.c.bf16 %v12244_v0, %v12219_v22  ;;  %v12254_v60 = vld [vmem:[#allocation2 + $0xe7] sm:$0xff] }
  0xdc   : > { %v12260_v6 = vld [vmem:[#allocation2 + $0xd9] sm:$0xff]  ;;  %v12262_v31 = vld [vmem:[#allocation2 + $0xe1] sm:$0xff]  ;;  %459 = vst.msk [vmem:[#allocation4 + $0x20] sm:$0xff] %vm439_vm3, %v16397_v50  ;;  %460 = vst.msk [vmem:[#allocation4 + $0x28] sm:$0xff] %vm439_vm3, %v16397_v50 }
  0xdd   : > { %16398 = vst [vmem:[#allocation29_spill] sm:$0xff] %v12260_v6  ;;  %16399 = vst [vmem:[#allocation30_spill] sm:$0xff] %v12262_v31  ;;  %10292 = vmatmul.mubr.msk.bf16.vlgmr.msra.gmra.mxu1 %vm278_vm1, %v560_v3 }
  0xde   : > { %10304 = vmatpush3.bf16.msra.mxu1 %v813_v58  ;;  %v393_v22 = vpop.trf.xlu0  ;;  %10295 = vmatprep.mubr.msk.bf16.mxu1 %vm11761_vm2, %v16397_v50  ;;  %v12269_v30 = vld [vmem:[#allocation2 + $0xf0] sm:$0xff]  ;;  %461 = vst.msk [vmem:[#allocation4 + $0xf0] sm:$0xff] %vm439_vm3, %v16397_v50  ;;  %462 = vst.msk [vmem:[#allocation4 + $0xf8] sm:$0xff] %vm439_vm3, %v16397_v50 }
  0xdf   : > { %16400 = vst [vmem:[#allocation31_spill] sm:$0xff] %v12269_v30  ;;  %v12271_v46 = vpop.f32.mrf.mxu0  ;;  %425 = vst.msk [vmem:[#allocation2 + $0x108] sm:$0xff] %vm278_vm1, %v393_v22  ;;  %10427 = vmatprep.subr.bf16.mxu1 %v16397_v50  ;;  %v561_v58 = vpack.c.bf16 %v12269_v30, %v12239_v42  ;;  %v12286_v31 = vld [vmem:[#allocation2 + $0xef] sm:$0xff]  ;;  %v558_v22 = vpack.c.bf16 %v12196_v56, %v12176_v13  ;;  %v9364_v30 = vld [vmem:[%s16299_s1 + $0x8] sm:$0x3] }
  0xe0   : > { %16401 = vst [vmem:[#allocation32_spill] sm:$0xff] %v12271_v46  ;;  %v12294_v46 = vld [vmem:[#allocation2 + $0xe9] sm:$0xff]  ;;  %463 = vst.msk [vmem:[#allocation4 + $0x100] sm:$0xff] %vm439_vm3, %v16397_v50 }
  0xe1   : > { %v10245_v3 = vpop.f32.mrf.mxu0  ;;  %10280 = vmatmul.mubr.msk.bf16.gmra.mxu0 %vm278_vm1, %v557_v23  ;;  %16404 = vst [vmem:[#allocation35_spill] sm:$0xff] %v12294_v46  ;;  %v559_v23 = vpack.c.bf16 %v12215_v32, %v12200_v10  ;;  %464 = vst.msk [vmem:[#allocation4 + $0x108] sm:$0xff] %vm439_vm3, %v16397_v50 }
  0xe2   : > { %10283 = vmatprep.mubr.msk.bf16.mxu0 %vm11761_vm2, %v16397_v50  ;;  %v12282_v11 = vld [vmem:[#allocation2 + $0xf8] sm:$0xff] }
  0xe3   : > { %16402 = vst [vmem:[#allocation33_spill] sm:$0xff] %v12282_v11  ;;  %v12284_v6 = vpop.f32.mrf.mxu0  ;;  %v12288_v0 = vld [vmem:[#allocation2 + $0xf7] sm:$0xff] }
  0xe4   : > { %16403 = vst [vmem:[#allocation34_spill] sm:$0xff] %v12284_v6  ;;  %v12296_v42 = vld [vmem:[#allocation2 + $0xf1] sm:$0xff]  ;;  %v473_v6 = vld [vmem:[#allocation2 + $0x1f] sm:$0xff] }
  0xe5   : > { %v10246_v3 = vpop.f32.mrf.mxu0  ;;  %16405 = vst [vmem:[#allocation36_spill] sm:$0xff] %v12296_v42  ;;  %10296 = vmatmul.mubr.msk.bf16.gmra.mxu1 %vm278_vm1, %v561_v58  ;;  %v472_v58 = vld [vmem:[#allocation2 + $0x17] sm:$0xff] }
  0xe6   : > { %10299 = vmatprep.mubr.msk.bf16.mxu1 %vm11761_vm2, %v16397_v50  ;;  %v562_v3 = vpack.c.bf16 %v12303_v12, %v12282_v11  ;;  %v502_v46 = vpack.c.bf16 %v473_v6, %v472_v58  ;;  %v968_v42 = vld [vmem:[#allocation2 + $0x19] sm:$0xff]  ;;  %v1617_v6 = vsel %vm610_vm0, %v9364_v30, 0  ;;  %v12356_v30 = vpack.c.bf16 %v12049_v37, %v12031_v29 }
  0xe9   : > { %10284 = vmatmul.mubr.msk.bf16.gmra.mxu0 %vm278_vm1, %v558_v22  ;;  %v9348_v22 = vld [vmem:[%s16299_s1 + $0x6] sm:$0x3] }
  0xea   : > { %10287 = vmatprep.mubr.msk.bf16.mxu0 %vm11761_vm2, %v16397_v50  ;;  %v1339_v12 = vsel %vm610_vm0, %v9348_v22, 0  ;;  %v1001_v22 = vpack.c.bf16 %v12062_v44, %v12051_v38 }
  0xed   : > { %10300 = vmatmul.mubr.msk.bf16.gmra.mxu1 %vm278_vm1, %v562_v3  ;;  %v969_v3 = vld [vmem:[#allocation2 + $0x21] sm:$0xff] }
  0xee   : > { %10305 = vmatprep.mubr.msk.bf16.mxu1 %vm11761_vm2, %v16397_v50  ;;  %v998_v11 = vpack.c.bf16 %v969_v3, %v968_v42  ;;  %v970_v42 = vld [vmem:[#allocation2 + $0x29] sm:$0xff]  ;;  %v12369_v3 = vpack.c.bf16 %v12074_v49, %v12054_v39 }
  0xf1   : > { %10288 = vmatmul.mubr.msk.bf16.gmra.mxu0 %vm278_vm1, %v559_v23  ;;  %v474_v23 = vld [vmem:[#allocation2 + $0x27] sm:$0xff] }
  0xf2   : > { %10367 = vmatprep.mubr.msk.bf16.mxu0 %vm11761_vm2, %v16397_v50  ;;  %v503_v58 = vpack.c.bf16 %v12006_v16, %v474_v23  ;;  %v12382_v23 = vpack.c.bf16 %v12097_v61, %v12082_v53 }
  0xf5   : > { %10306 = vmatmul.mubr.msk.bf16.vlgmr.msra.gmra.mxu1 %vm278_vm1, %v502_v46  ;;  %v504_v46 = vpack.c.bf16 %v12029_v28, %v12014_v20 }
  0xf6   : > { %10428 = vmatpush3.bf16.msra.mxu1 %v1339_v12  ;;  %10309 = vmatprep.mubr.msk.bf16.mxu1 %vm11761_vm2, %v16397_v50  ;;  %v999_v12 = vpack.c.bf16 %v12012_v19, %v970_v42  ;;  %v12395_v42 = vpack.c.bf16 %v12117_v7, %v12099_v62 }
  0xf7   : > { %10551 = vmatprep.subr.bf16.mxu1 %v16397_v50 }
  0xf9   : > { %10368 = vmatmul.mubr.msk.bf16.vlgmr.msra.gmra.mxu0 %vm278_vm1, %v998_v11  ;;  %v1000_v11 = vpack.c.bf16 %v12043_v34, %v12017_v21 }
  0xfa   : > { %10371 = vmatprep.mubr.msk.bf16.mxu0 %vm11761_vm2, %v16397_v50  ;;  %10490 = vmatpush3.bf16.msra.mxu0 %v1617_v6  ;;  %v1002_v6 = vpack.c.bf16 %v12080_v52, %v12064_v45 }
  0xfb   : > { %10613 = vmatprep.subr.bf16.mxu0 %v16397_v50 }
  0xfd   : > { %10310 = vmatmul.mubr.msk.bf16.gmra.mxu1 %vm278_vm1, %v503_v58  ;;  %v1003_v58 = vpack.c.bf16 %v12111_v4, %v12085_v54 }
  0xfe   : > { %10313 = vmatprep.mubr.msk.bf16.mxu1 %vm11761_vm2, %v16397_v50 }
 0x101   : > { %10372 = vmatmul.mubr.msk.bf16.gmra.mxu0 %vm278_vm1, %v999_v12  ;;  %v394_v12 = vpop.trf.xlu0 }
 0x102   : > { %10375 = vmatprep.mubr.msk.bf16.mxu0 %vm11761_vm2, %v16397_v50  ;;  %426 = vst.msk [vmem:[#allocation2 + $0x110] sm:$0xff] %vm278_vm1, %v394_v12 }
 0x105   : > { %10314 = vmatmul.mubr.msk.bf16.gmra.mxu1 %vm278_vm1, %v504_v46  ;;  %v1004_v46 = vpack.c.bf16 %v12130_v15, %v12119_v8  ;;  %v985_v15 = vld [vmem:[#allocation2 + $0xa1] sm:$0xff] }
 0x106   : > { %10317 = vmatprep.mubr.msk.bf16.mxu1 %vm11761_vm2, %v16397_v50 }
 0x109   : > { %10376 = vmatmul.mubr.msk.bf16.gmra.mxu0 %vm278_vm1, %v1000_v11  ;;  %v12409_v11 = vpack.c.bf16 %v12142_v43, %v12122_v9 }
 0x10a   : > { %10379 = vmatprep.mubr.msk.bf16.mxu0 %vm11761_vm2, %v16397_v50 }
 0x10b   : > { %16407 = vst [vmem:[#allocation38_spill] sm:$0xff] %v12409_v11 }
 0x10d   : > { %10318 = vmatmul.mubr.msk.bf16.gmra.mxu1 %vm278_vm1, %v12356_v30 }
 0x10e   : > { %10321 = vmatprep.mubr.msk.bf16.mxu1 %vm11761_vm2, %v16397_v50 }
 0x111   : > { %10380 = vmatmul.mubr.msk.bf16.gmra.mxu0 %vm278_vm1, %v1001_v22  ;;  %v1829_v22 = vld [vmem:[#allocation2 + $0x109] sm:$0xff] }
 0x112   : > { %10383 = vmatprep.mubr.msk.bf16.mxu0 %vm11761_vm2, %v16397_v50 }
 0x115   : > { %10322 = vmatmul.mubr.msk.bf16.gmra.mxu1 %vm278_vm1, %v12369_v3 }
 0x116   : > { %10325 = vmatprep.mubr.msk.bf16.mxu1 %vm11761_vm2, %v16397_v50 }
 0x119   : > { %10384 = vmatmul.mubr.msk.bf16.gmra.mxu0 %vm278_vm1, %v1002_v6  ;;  %v1830_v6 = vld [vmem:[#allocation2 + $0x111] sm:$0xff] }
 0x11a   : > { %10387 = vmatprep.mubr.msk.bf16.mxu0 %vm11761_vm2, %v16397_v50  ;;  %v12417_v12 = vpack.c.bf16 %v1830_v6, %v1829_v22  ;;  %v12436_v22 = vpack.c.bf16 %v12183_v57, %v12167_v25  ;;  %v12438_v6 = vld [vmem:[#allocation2 + $0xa9] sm:$0xff] }
 0x11b   : > { %16411 = vst [vmem:[#allocation42_spill] sm:$0xff] %v12438_v6 }
 0x11c   : > { %16408 = vst [vmem:[#allocation39_spill] sm:$0xff] %v12417_v12  ;;  %16410 = vst [vmem:[#allocation41_spill] sm:$0xff] %v12436_v22  ;;  %v989_v12 = vld [vmem:[#allocation2 + $0xc1] sm:$0xff] }
 0x11d   : > { %10326 = vmatmul.mubr.msk.bf16.gmra.mxu1 %vm278_vm1, %v12382_v23 }
 0x11e   : > { %10329 = vmatprep.mubr.msk.bf16.mxu1 %vm11761_vm2, %v16397_v50 }
 0x121   : > { %10388 = vmatmul.mubr.msk.bf16.gmra.mxu0 %vm278_vm1, %v1003_v58  ;;  %v1005_v58 = vpack.c.bf16 %v12148_v59, %v12132_v17  ;;  %v1006_v59 = vpack.c.bf16 %v985_v15, %v12153_v5  ;;  %v988_v5 = vld [vmem:[#allocation2 + $0xb9] sm:$0xff] }
 0x122   : > { %10391 = vmatprep.mubr.msk.bf16.mxu0 %vm11761_vm2, %v16397_v50 }
 0x125   : > { %10330 = vmatmul.mubr.msk.bf16.gmra.mxu1 %vm278_vm1, %v12395_v42 }
 0x126   : > { %10333 = vmatprep.mubr.msk.bf16.mxu1 %vm11761_vm2, %v16397_v50 }
 0x129   : > { %10392 = vmatmul.mubr.msk.bf16.gmra.mxu0 %vm278_vm1, %v1004_v46  ;;  %v12424_v46 = vpack.c.bf16 %v12165_v41, %v12150_v63 }
 0x12a   : > { %10395 = vmatprep.mubr.msk.bf16.mxu0 %vm11761_vm2, %v16397_v50 }
 0x12b   : > { %16409 = vst [vmem:[#allocation40_spill] sm:$0xff] %v12424_v46 }
 0x12d   : > { %10334 = vmatmul.mubr.msk.bf16.gmra.mxu1 %vm278_vm1, %v12409_v11  ;;  %v997_v11 = vld [vmem:[#allocation2 + $0x101] sm:$0xff] }
 0x12e   : > { %10337 = vmatprep.mubr.msk.bf16.mxu1 %vm11761_vm2, %v16397_v50 }
 0x131   : > { %10396 = vmatmul.mubr.msk.bf16.gmra.mxu0 %vm278_vm1, %v1005_v58  ;;  %v987_v58 = vld [vmem:[#allocation2 + $0xb1] sm:$0xff] }
 0x132   : > { %10399 = vmatprep.mubr.msk.bf16.mxu0 %vm11761_vm2, %v16397_v50  ;;  %v1007_v15 = vpack.c.bf16 %v987_v58, %v12438_v6  ;;  %v513_v58 = vpack.c.bf16 %v12221_v1, %v12204_v40  ;;  %v990_v6 = vld [vmem:[#allocation2 + $0xc9] sm:$0xff] }
 0x135   : > { %10338 = vmatmul.mubr.msk.bf16.gmra.mxu1 %vm278_vm1, %v12424_v46  ;;  %v993_v46 = vld [vmem:[#allocation2 + $0xe1] sm:$0xff] }
 0x136   : > { %10341 = vmatprep.mubr.msk.bf16.mxu1 %vm11761_vm2, %v16397_v50 }
 0x139   : > { %10400 = vmatmul.mubr.msk.bf16.gmra.mxu0 %vm278_vm1, %v1006_v59  ;;  %v512_v59 = vpack.c.bf16 %v12202_v26, %v12186_v2 }
 0x13a   : > { %10403 = vmatprep.mubr.msk.bf16.mxu0 %vm11761_vm2, %v16397_v50 }
 0x13d   : > { %10342 = vmatmul.mubr.msk.bf16.gmra.mxu1 %vm278_vm1, %v12436_v22  ;;  %v1008_v22 = vpack.c.bf16 %v989_v12, %v988_v5  ;;  %v395_v5 = vpop.trf.xlu0  ;;  %v514_v12 = vpack.c.bf16 %v12248_v35, %v12223_v55 }
 0x13e   : > { %10345 = vmatprep.mubr.msk.bf16.mxu1 %vm11761_vm2, %v16397_v50  ;;  %427 = vst.msk [vmem:[#allocation2 + $0x120] sm:$0xff] %vm278_vm1, %v395_v5 }
 0x141   : > { %10404 = vmatmul.mubr.msk.bf16.gmra.mxu0 %vm278_vm1, %v1007_v15  ;;  %v991_v15 = vld [vmem:[#allocation2 + $0xd1] sm:$0xff] }
 0x142   : > { %10407 = vmatprep.mubr.msk.bf16.mxu0 %vm11761_vm2, %v16397_v50 }
 0x145   : > { %10346 = vmatmul.mubr.msk.bf16.gmra.mxu1 %vm278_vm1, %v512_v59  ;;  %v1009_v59 = vpack.c.bf16 %v991_v15, %v990_v6  ;;  %v515_v6 = vpack.c.bf16 %v12286_v31, %v12254_v60  ;;  %v994_v15 = vld [vmem:[#allocation2 + $0xe9] sm:$0xff] }
 0x146   : > { %10349 = vmatprep.mubr.msk.bf16.mxu1 %vm11761_vm2, %v16397_v50 }
 0x149   : > { %10408 = vmatmul.mubr.msk.bf16.gmra.mxu0 %vm278_vm1, %v1008_v22  ;;  %v992_v22 = vld [vmem:[#allocation2 + $0xd9] sm:$0xff] }
 0x14a   : > { %10411 = vmatprep.mubr.msk.bf16.mxu0 %vm11761_vm2, %v16397_v50 }
 0x14d   : > { %10350 = vmatmul.mubr.msk.bf16.gmra.mxu1 %vm278_vm1, %v513_v58  ;;  %v1010_v58 = vpack.c.bf16 %v993_v46, %v992_v22 }
 0x14e   : > { %10353 = vmatprep.mubr.msk.bf16.mxu1 %vm11761_vm2, %v16397_v50 }
 0x151   : > { %10412 = vmatmul.mubr.msk.bf16.gmra.mxu0 %vm278_vm1, %v1009_v59  ;;  %v995_v59 = vld [vmem:[#allocation2 + $0xf1] sm:$0xff] }
 0x152   : > { %10415 = vmatprep.mubr.msk.bf16.mxu0 %vm11761_vm2, %v16397_v50  ;;  %v1011_v5 = vpack.c.bf16 %v995_v59, %v994_v15 }
 0x155   : > { %10354 = vmatmul.mubr.msk.bf16.gmra.mxu1 %vm278_vm1, %v514_v12  ;;  %v12478_v12 = vld [vmem:[#allocation2 + $0xff] sm:$0xff] }
 0x156   : > { %10357 = vmatprep.mubr.msk.bf16.mxu1 %vm11761_vm2, %v16397_v50  ;;  %v516_v22 = vpack.c.bf16 %v12478_v12, %v12288_v0 }
 0x159   : > { %10416 = vmatmul.mubr.msk.bf16.gmra.mxu0 %vm278_vm1, %v1010_v58  ;;  %v996_v58 = vld [vmem:[#allocation2 + $0xf9] sm:$0xff] }
 0x15a   : > { %10419 = vmatprep.mubr.msk.bf16.mxu0 %vm11761_vm2, %v16397_v50  ;;  %v1012_v59 = vpack.c.bf16 %v997_v11, %v996_v58  ;;  %v16412_v11 = vpack.c.bf16 %v12014_v20, %v12006_v16 }
 0x15d   : > { %10358 = vmatmul.mubr.msk.bf16.gmra.mxu1 %vm278_vm1, %v515_v6 }
 0x15e   : > { %10361 = vmatprep.mubr.msk.bf16.mxu1 %vm11761_vm2, %v16397_v50 }
 0x161   : > { %v12480_v17 = vpop.f32.mrf.mxu0  ;;  %10420 = vmatmul.mubr.msk.bf16.gmra.mxu0 %vm278_vm1, %v1011_v5  ;;  %v9380_v5 = vld [vmem:[%s16299_s1 + $0xa] sm:$0x3] }
 0x162   : > { %10423 = vmatprep.mubr.msk.bf16.mxu0 %vm11761_vm2, %v16397_v50  ;;  %v1895_v8 = vsel %vm610_vm0, %v9380_v5, 0 }
 0x163   : > { %v10249_v46 = vpop.f32.mrf.mxu0 }
 0x165   : > { %v12487_v6 = vpop.f32.mrf.mxu0  ;;  %10362 = vmatmul.mubr.msk.bf16.gmra.mxu1 %vm278_vm1, %v516_v22  ;;  %v9396_v22 = vld [vmem:[%s16299_s1 + $0xc] sm:$0x3] }
 0x166   : > { %10429 = vmatprep.mubr.msk.bf16.mxu1 %vm11761_vm2, %v16397_v50 }
 0x167   : > { %v10250_v15 = vpop.f32.mrf.mxu0 }
 0x169   : > { %v12495_v4 = vpop.f32.mrf.mxu0  ;;  %10424 = vmatmul.mubr.msk.bf16.gmra.mxu0 %vm278_vm1, %v1012_v59  ;;  %v2173_v59 = vsel %vm610_vm0, %v9396_v22, 0  ;;  %v16415_v22 = vpack.c.bf16 %v12027_v27, %v12023_v24  ;;  %v16417_v24 = vpack.c.bf16 %v12040_v33, %v12047_v36  ;;  %v16419_v33 = vpack.c.bf16 %v12078_v51, %v12072_v48  ;;  %v16421_v48 = vld [vmem:[#allocation9_spill] sm:$0xff]  ;;  %v16422_v51 = vld [vmem:[#allocation8_spill] sm:$0xff] }
 0x16a   : > { %10491 = vmatprep.mubr.msk.bf16.mxu0 %vm11761_vm2, %v16397_v50 }
 0x16b   : > { %v10253_v46 = vpop.f32.mrf.mxu0 }
 0x16c   : > { %v16413_v46 = vpack.c.bf16 %v12010_v18, %v12001_v14 }
 0x16d   : > { %v12504_v15 = vpop.f32.mrf.mxu0  ;;  %10430 = vmatmul.mubr.msk.bf16.vlgmr.msra.gmra.mxu1 %vm278_vm1, %v16412_v11 }
 0x16e   : > { %10552 = vmatpush3.bf16.msra.mxu1 %v1895_v8  ;;  %10433 = vmatprep.mubr.msk.bf16.mxu1 %vm11761_vm2, %v16397_v50  ;;  %v16414_v8 = vpack.c.bf16 %v12031_v29, %v12029_v28  ;;  %v16416_v28 = vpack.c.bf16 %v12054_v39, %v12049_v37  ;;  %v16418_v37 = vpack.c.bf16 %v12082_v53, %v12074_v49 }
 0x16f   : > { %v10254_v58 = vpop.f32.mrf.mxu0  ;;  %10675 = vmatprep.subr.bf16.mxu1 %v16397_v50  ;;  %v16420_v49 = vpack.c.bf16 %v12099_v62, %v12097_v61  ;;  %v16424_v61 = vpack.c.bf16 %v12122_v9, %v12117_v7  ;;  %v16428_v9 = vpack.c.bf16 %v12150_v63, %v12142_v43 }
 0x171   : > { %v12514_v5 = vpop.f32.mrf.mxu0  ;;  %10492 = vmatmul.mubr.msk.bf16.vlgmr.msra.gmra.mxu0 %vm278_vm1, %v16413_v46 }
 0x172   : > { %10495 = vmatprep.mubr.msk.bf16.mxu0 %vm11761_vm2, %v16397_v50  ;;  %10614 = vmatpush3.bf16.msra.mxu0 %v2173_v59 }
 0x173   : > { %v10257_v16 = vpop.f32.mrf.mxu0  ;;  %10737 = vmatprep.subr.bf16.mxu0 %v16397_v50 }
 0x175   : > { %v12523_v20 = vpop.f32.mrf.mxu0  ;;  %10434 = vmatmul.mubr.msk.bf16.gmra.mxu1 %vm278_vm1, %v16414_v8 }
 0x176   : > { %10437 = vmatprep.mubr.msk.bf16.mxu1 %vm11761_vm2, %v16397_v50 }
 0x177   : > { %v10258_v14 = vpop.f32.mrf.mxu0 }
 0x179   : > { %v12531_v18 = vpop.f32.mrf.mxu0  ;;  %10496 = vmatmul.mubr.msk.bf16.gmra.mxu0 %vm278_vm1, %v16415_v22  ;;  %v16423_v22 = vpack.c.bf16 %v16421_v48, %v16422_v51  ;;  %v16429_v51 = vld [vmem:[#allocation17_spill] sm:$0xff] }
 0x17a   : > { %10499 = vmatprep.mubr.msk.bf16.mxu0 %vm11761_vm2, %v16397_v50 }
 0x17b   : > { %v10261_v11 = vpop.f32.mrf.mxu0 }
 0x17d   : > { %v12539_v58 = vpop.f32.mrf.mxu0  ;;  %10438 = vmatmul.mubr.msk.bf16.gmra.mxu1 %vm278_vm1, %v16416_v28 }
 0x17e   : > { %10441 = vmatprep.mubr.msk.bf16.mxu1 %vm11761_vm2, %v16397_v50 }
 0x17f   : > { %v10262_v29 = vpop.f32.mrf.mxu0 }
 0x181   : > { %v12547_v59 = vpop.f32.mrf.mxu0  ;;  %10500 = vmatmul.mubr.msk.bf16.gmra.mxu0 %vm278_vm1, %v16417_v24  ;;  %v16425_v24 = vld [vmem:[#allocation10_spill] sm:$0xff] }
 0x182   : > { %10503 = vmatprep.mubr.msk.bf16.mxu0 %vm11761_vm2, %v16397_v50 }
 0x183   : > { %v10265_v27 = vpop.f32.mrf.mxu0 }
 0x184   : > { %v16426_v27 = vld [vmem:[#allocation12_spill] sm:$0xff] }
 0x185   : > { %v12555_v46 = vpop.f32.mrf.mxu0  ;;  %10442 = vmatmul.mubr.msk.bf16.gmra.mxu1 %vm278_vm1, %v16418_v37  ;;  %v16427_v37 = vpack.c.bf16 %v16425_v24, %v16426_v27  ;;  %v16432_v24 = vpack.c.bf16 %v12167_v25, %v12165_v41 }
 0x186   : > { %10445 = vmatprep.mubr.msk.bf16.mxu1 %vm11761_vm2, %v16397_v50 }
 0x187   : > { %v10266_v39 = vpop.f32.mrf.mxu0 }
 0x189   : > { %v12563_v16 = vpop.f32.mrf.mxu0  ;;  %10504 = vmatmul.mubr.msk.bf16.gmra.mxu0 %vm278_vm1, %v16419_v33 }
 0x18a   : > { %10507 = vmatprep.mubr.msk.bf16.mxu0 %vm11761_vm2, %v16397_v50 }
 0x18b   : > { %v10269_v36 = vpop.f32.mrf.mxu0 }
 0x18d   : > { %v12571_v8 = vpop.f32.mrf.mxu0  ;;  %10446 = vmatmul.mubr.msk.bf16.gmra.mxu1 %vm278_vm1, %v16420_v49 }
 0x18e   : > { %10449 = vmatprep.mubr.msk.bf16.mxu1 %vm11761_vm2, %v16397_v50 }
 0x18f   : > { %v10270_v53 = vpop.f32.mrf.mxu0 }
 0x191   : > { %v12579_v14 = vpop.f32.mrf.mxu0  ;;  %10508 = vmatmul.mubr.msk.bf16.gmra.mxu0 %vm278_vm1, %v16423_v22  ;;  %v16430_v22 = vld [vmem:[#allocation16_spill] sm:$0xff] }
 0x192   : > { %10511 = vmatprep.mubr.msk.bf16.mxu0 %vm11761_vm2, %v16397_v50 }
 0x193   : > { %v10273_v11 = vpop.f32.mrf.mxu0 }
 0x194   : > { %v16431_v11 = vpack.c.bf16 %v16429_v51, %v16430_v22 }
 0x195   : > { %v12587_v28 = vpop.f32.mrf.mxu0  ;;  %10450 = vmatmul.mubr.msk.bf16.gmra.mxu1 %vm278_vm1, %v16424_v61 }
 0x196   : > { %10453 = vmatprep.mubr.msk.bf16.mxu1 %vm11761_vm2, %v16397_v50 }
 0x197   : > { %v10274_v62 = vpop.f32.mrf.mxu0 }
 0x199   : > { %v12595_v29 = vpop.f32.mrf.mxu0  ;;  %10512 = vmatmul.mubr.msk.bf16.gmra.mxu0 %vm278_vm1, %v16427_v37 }
 0x19a   : > { %10515 = vmatprep.mubr.msk.bf16.mxu0 %vm11761_vm2, %v16397_v50 }
 0x19b   : > { %v10277_v39 = vpop.f32.mrf.mxu0 }
 0x19d   : > { %v12603_v33 = vpop.f32.mrf.mxu0  ;;  %v12605_v7 = vpop.f32.mrf.mxu1  ;;  %10454 = vmatmul.mubr.msk.bf16.gmra.mxu1 %vm278_vm1, %v16428_v9 }
 0x19e   : > { %10457 = vmatprep.mubr.msk.bf16.mxu1 %vm11761_vm2, %v16397_v50 }
 0x19f   : > { %v10278_v36 = vpop.f32.mrf.mxu0  ;;  %v10293_v49 = vpop.f32.mrf.mxu1 }
 0x1a0   : > { %v16433_v36 = vld [vmem:[#allocation20_spill] sm:$0xff] }
 0x1a1   : > { %v12613_v53 = vpop.f32.mrf.mxu0  ;;  %v12615_v48 = vpop.f32.mrf.mxu1  ;;  %10516 = vmatmul.mubr.msk.bf16.gmra.mxu0 %vm278_vm1, %v16431_v11  ;;  %v16434_v49 = vpack.c.bf16 %v12163_v47, %v16433_v36  ;;  %v16435_v11 = vpack.c.bf16 %v12186_v2, %v12183_v57 }
 0x1a2   : > { %10519 = vmatprep.mubr.msk.bf16.mxu0 %vm11761_vm2, %v16397_v50 }
 0x1a3   : > { %v10281_v43 = vpop.f32.mrf.mxu0  ;;  %v10294_v63 = vpop.f32.mrf.mxu1 }
 0x1a5   : > { %v12623_v61 = vpop.f32.mrf.mxu0  ;;  %v12625_v62 = vpop.f32.mrf.mxu1  ;;  %10458 = vmatmul.mubr.msk.bf16.gmra.mxu1 %vm278_vm1, %v16432_v24 }
 0x1a6   : > { %10461 = vmatprep.mubr.msk.bf16.mxu1 %vm11761_vm2, %v16397_v50 }
 0x1a7   : > { %v10282_v27 = vpop.f32.mrf.mxu0  ;;  %v10297_v37 = vpop.f32.mrf.mxu1 }
 0x1a8   : > { %v16436_v27 = vld [vmem:[#allocation21_spill] sm:$0xff] }
 0x1a9   : > { %v12633_v39 = vpop.f32.mrf.mxu0  ;;  %v12635_v9 = vpop.f32.mrf.mxu1  ;;  %10520 = vmatmul.mubr.msk.bf16.gmra.mxu0 %vm278_vm1, %v16434_v49  ;;  %v16437_v37 = vpack.c.bf16 %v12176_v13, %v16436_v27 }
 0x1aa   : > { %10523 = vmatprep.mubr.msk.bf16.mxu0 %vm11761_vm2, %v16397_v50 }
 0x1ab   : > { %v10285_v25 = vpop.f32.mrf.mxu0  ;;  %v10298_v41 = vpop.f32.mrf.mxu1 }
 0x1ac   : > { %v16438_v25 = vpack.c.bf16 %v12204_v40, %v12202_v26 }
 0x1ad   : > { %v12643_v51 = vpop.f32.mrf.mxu0  ;;  %v12645_v22 = vpop.f32.mrf.mxu1  ;;  %10462 = vmatmul.mubr.msk.bf16.gmra.mxu1 %vm278_vm1, %v16435_v11  ;;  %v16439_v11 = vld [vmem:[#allocation32_spill] sm:$0xff] }
 0x1ae   : > { %10465 = vmatprep.mubr.msk.bf16.mxu1 %vm11761_vm2, %v16397_v50 }
 0x1af   : > { %v10286_v47 = vpop.f32.mrf.mxu0  ;;  %v10301_v43 = vpop.f32.mrf.mxu1 }
 0x1b1   : > { %v12653_v63 = vpop.f32.mrf.mxu0  ;;  %v12655_v24 = vpop.f32.mrf.mxu1  ;;  %10524 = vmatmul.mubr.msk.bf16.gmra.mxu0 %vm278_vm1, %v16437_v37  ;;  %v16440_v37 = vpack.c.bf16 %v12200_v10, %v12196_v56 }
 0x1b2   : > { %10527 = vmatprep.mubr.msk.bf16.mxu0 %vm11761_vm2, %v16397_v50 }
 0x1b3   : > { %v10289_v2 = vpop.f32.mrf.mxu0  ;;  %v10302_v57 = vpop.f32.mrf.mxu1 }
 0x1b4   : > { %v16441_v57 = vld [vmem:[#allocation34_spill] sm:$0xff] }
 0x1b5   : > { %v12663_v36 = vpop.f32.mrf.mxu0  ;;  %v849_v49 = vpop.f32.mrf.mxu1  ;;  %10466 = vmatmul.mubr.msk.bf16.gmra.mxu1 %vm278_vm1, %v16438_v25 }
 0x1b6   : > { %10469 = vmatprep.mubr.msk.bf16.mxu1 %vm11761_vm2, %v16397_v50  ;;  %v850_v47 = vadd.f32 %v849_v49, %v16439_v11  ;;  %v16442_v49 = vpack.c.bf16 %v12223_v55, %v12221_v1 }
 0x1b7   : > { %v10290_v41 = vpop.f32.mrf.mxu0  ;;  %v10307_v13 = vpop.f32.mrf.mxu1 }
 0x1b9   : > { %v852_v43 = vpop.f32.mrf.mxu1  ;;  %v1097_v27 = vpop.f32.mrf.mxu0  ;;  %10528 = vmatmul.mubr.msk.bf16.gmra.mxu0 %vm278_vm1, %v16440_v37 }
 0x1ba   : > { %v12676_v2 = vadd.f32 %v1097_v27, %v850_v47  ;;  %10531 = vmatprep.mubr.msk.bf16.mxu0 %vm11761_vm2, %v16397_v50  ;;  %v853_v25 = vadd.f32 %v852_v43, %v16441_v57 }
 0x1bb   : > { %v10308_v40 = vpop.f32.mrf.mxu1  ;;  %v10369_v26 = vpop.f32.mrf.mxu0 }
 0x1bc   : > { %v16443_v40 = vld [vmem:[#allocation24_spill] sm:$0xff] }
 0x1bd   : > { %v857_v41 = vpop.f32.mrf.mxu1  ;;  %v1100_v13 = vpop.f32.mrf.mxu0  ;;  %10470 = vmatmul.mubr.msk.bf16.gmra.mxu1 %vm278_vm1, %v16442_v49  ;;  %v16444_v43 = vpack.c.bf16 %v16443_v40, %v12215_v32 }
 0x1be   : > { %v12685_v11 = vadd.f32 %v1100_v13, %v853_v25  ;;  %10473 = vmatprep.mubr.msk.bf16.mxu1 %vm11761_vm2, %v16397_v50  ;;  %v858_v47 = vadd.f32 %v857_v41, %v12480_v17  ;;  %v16445_v17 = vpack.c.bf16 %v12254_v60, %v12248_v35  ;;  %v396_v60 = vpop.trf.xlu0 }
 0x1bf   : > { %v10311_v56 = vpop.f32.mrf.mxu1  ;;  %v10370_v10 = vpop.f32.mrf.mxu0  ;;  %428 = vst.msk [vmem:[#allocation2 + $0x128] sm:$0xff] %vm278_vm1, %v396_v60  ;;  %v1551_v60 = vld [vmem:[#allocation2 + $0x108] sm:$0xff] }
 0x1c1   : > { %v860_v27 = vpop.f32.mrf.mxu1  ;;  %v1105_v37 = vpop.f32.mrf.mxu0  ;;  %10532 = vmatmul.mubr.msk.bf16.gmra.mxu0 %vm278_vm1, %v16444_v43 }
 0x1c2   : > { %v12694_v26 = vadd.f32 %v1105_v37, %v858_v47  ;;  %10535 = vmatprep.mubr.msk.bf16.mxu0 %vm11761_vm2, %v16397_v50  ;;  %v861_v57 = vadd.f32 %v860_v27, %v12487_v6  ;;  %v16446_v37 = vld [vmem:[#allocation27_spill] sm:$0xff]  ;;  %v16447_v6 = vld [vmem:[#allocation28_spill] sm:$0xff] }
 0x1c3   : > { %v10312_v1 = vpop.f32.mrf.mxu1  ;;  %v10373_v55 = vpop.f32.mrf.mxu0  ;;  %v16448_v27 = vpack.c.bf16 %v16446_v37, %v16447_v6 }
 0x1c5   : > { %v865_v25 = vpop.f32.mrf.mxu1  ;;  %v1108_v13 = vpop.f32.mrf.mxu0  ;;  %10474 = vmatmul.mubr.msk.bf16.gmra.mxu1 %vm278_vm1, %v16445_v17 }
 0x1c6   : > { %v12703_v41 = vadd.f32 %v1108_v13, %v861_v57  ;;  %10477 = vmatprep.mubr.msk.bf16.mxu1 %vm11761_vm2, %v16397_v50  ;;  %v866_v56 = vadd.f32 %v865_v25, %v12495_v4  ;;  %v16449_v57 = vpack.c.bf16 %v12288_v0, %v12286_v31 }
 0x1c7   : > { %v10315_v32 = vpop.f32.mrf.mxu1  ;;  %v10374_v49 = vpop.f32.mrf.mxu0 }
 0x1c8   : > { %v12727_v49 = vld [vmem:[#allocation2 + $0x107] sm:$0xff] }
 0x1c9   : > { %v868_v10 = vpop.f32.mrf.mxu1  ;;  %v1113_v47 = vpop.f32.mrf.mxu0  ;;  %10536 = vmatmul.mubr.msk.bf16.gmra.mxu0 %vm278_vm1, %v16448_v27  ;;  %v1289_v27 = vpack.c.bf16 %v12727_v49, %v12478_v12  ;;  %v12749_v12 = vld [vmem:[#allocation2 + $0x117] sm:$0xff] }
 0x1ca   : > { %v12712_v40 = vadd.f32 %v1113_v47, %v866_v56  ;;  %10539 = vmatprep.mubr.msk.bf16.mxu0 %vm11761_vm2, %v16397_v50  ;;  %v869_v1 = vadd.f32 %v868_v10, %v12504_v15  ;;  %v16450_v10 = vld [vmem:[#allocation33_spill] sm:$0xff]  ;;  %v16451_v47 = vld [vmem:[#allocation31_spill] sm:$0xff] }
 0x1cb   : > { %v10316_v35 = vpop.f32.mrf.mxu1  ;;  %v10377_v43 = vpop.f32.mrf.mxu0  ;;  %v16452_v37 = vpack.c.bf16 %v16450_v10, %v16451_v47 }
 0x1cd   : > { %v873_v4 = vpop.f32.mrf.mxu1  ;;  %v1116_v55 = vpop.f32.mrf.mxu0  ;;  %10478 = vmatmul.mubr.msk.bf16.gmra.mxu1 %vm278_vm1, %v16449_v57  ;;  %v16453_v57 = vld [vmem:[#allocation37_spill] sm:$0xff] }
 0x1ce   : > { %v12722_v25 = vadd.f32 %v1116_v55, %v869_v1  ;;  %10481 = vmatprep.mubr.msk.bf16.mxu1 %vm11761_vm2, %v16397_v50  ;;  %v874_v32 = vadd.f32 %v873_v4, %v12514_v5 }
 0x1cf   : > { %v10319_v13 = vpop.f32.mrf.mxu1  ;;  %v10378_v17 = vpop.f32.mrf.mxu0 }
 0x1d0   : > { %v1567_v13 = vpack.c.bf16 %v1551_v60, %v16453_v57 }
 0x1d1   : > { %v876_v56 = vpop.f32.mrf.mxu1  ;;  %v1121_v15 = vpop.f32.mrf.mxu0  ;;  %10540 = vmatmul.mubr.msk.bf16.gmra.mxu0 %vm278_vm1, %v16452_v37 }
 0x1d2   : > { %v12733_v31 = vadd.f32 %v1121_v15, %v874_v32  ;;  %10543 = vmatprep.mubr.msk.bf16.mxu0 %vm11761_vm2, %v16397_v50  ;;  %v877_v5 = vadd.f32 %v876_v56, %v12523_v20  ;;  %v12747_v32 = vld [vmem:[#allocation2 + $0x10f] sm:$0xff] }
 0x1d3   : > { %v10320_v0 = vpop.f32.mrf.mxu1  ;;  %v10381_v6 = vpop.f32.mrf.mxu0  ;;  %v1290_v37 = vpack.c.bf16 %v12749_v12, %v12747_v32 }
 0x1d4   : > { %v1552_v0 = vld [vmem:[#allocation2 + $0x110] sm:$0xff]  ;;  %v1553_v6 = vld [vmem:[#allocation2 + $0x118] sm:$0xff] }
 0x1d5   : > { %v881_v35 = vpop.f32.mrf.mxu1  ;;  %v1124_v43 = vpop.f32.mrf.mxu0  ;;  %10482 = vmatmul.mubr.msk.bf16.gmra.mxu1 %vm278_vm1, %v1289_v27 }
 0x1d6   : > { %v12741_v1 = vadd.f32 %v1124_v43, %v877_v5  ;;  %10485 = vmatprep.mubr.msk.bf16.mxu1 %vm11761_vm2, %v16397_v50  ;;  %v882_v17 = vadd.f32 %v881_v35, %v12531_v18 }
 0x1d7   : > { %v10323_v4 = vpop.f32.mrf.mxu1  ;;  %v10382_v55 = vpop.f32.mrf.mxu0 }
 0x1d8   : > { %v1568_v4 = vpack.c.bf16 %v1553_v6, %v1552_v0  ;;  %v16454_v0 = vpack.c.bf16 %v12017_v21, %v12012_v19 }
 0x1d9   : > { %v884_v20 = vpop.f32.mrf.mxu1  ;;  %v1129_v56 = vpop.f32.mrf.mxu0  ;;  %10544 = vmatmul.mubr.msk.bf16.gmra.mxu0 %vm278_vm1, %v1567_v13 }
 0x1da   : > { %v12752_v15 = vadd.f32 %v1129_v56, %v882_v17  ;;  %10547 = vmatprep.mubr.msk.bf16.mxu0 %vm11761_vm2, %v16397_v50  ;;  %v885_v18 = vadd.f32 %v884_v20, %v12539_v58  ;;  %v9412_v58 = vld [vmem:[%s16299_s1 + $0xe] sm:$0x3] }
 0x1db   : > { %v10324_v10 = vpop.f32.mrf.mxu1  ;;  %v10385_v47 = vpop.f32.mrf.mxu0 }
 0x1dc   : > { %v2451_v10 = vsel %vm610_vm0, %v9412_v58, 0 }
 0x1dd   : > { %v889_v27 = vpop.f32.mrf.mxu1  ;;  %v1132_v5 = vpop.f32.mrf.mxu0  ;;  %10486 = vmatmul.mubr.msk.bf16.gmra.mxu1 %vm278_vm1, %v1290_v37 }
 0x1de   : > { %v12760_v60 = vadd.f32 %v1132_v5, %v885_v18  ;;  %10553 = vmatprep.mubr.msk.bf16.mxu1 %vm11761_vm2, %v16397_v50  ;;  %v890_v55 = vadd.f32 %v889_v27, %v12547_v59  ;;  %v9428_v59 = vld [vmem:[%s16299_s1 + $0x10] sm:$0x3] }
 0x1df   : > { %v10327_v35 = vpop.f32.mrf.mxu1  ;;  %v10386_v43 = vpop.f32.mrf.mxu0 }
 0x1e1   : > { %v892_v57 = vpop.f32.mrf.mxu1  ;;  %v1137_v13 = vpop.f32.mrf.mxu0  ;;  %10548 = vmatmul.mubr.msk.bf16.gmra.mxu0 %vm278_vm1, %v1568_v4 }
 0x1e2   : > { %v12769_v17 = vadd.f32 %v1137_v13, %v890_v55  ;;  %10615 = vmatprep.mubr.msk.bf16.mxu0 %vm11761_vm2, %v16397_v50  ;;  %v893_v47 = vadd.f32 %v892_v57, %v12555_v46  ;;  %v2729_v46 = vsel %vm610_vm0, %v9428_v59, 0 }
 0x1e3   : > { %v10328_v20 = vpop.f32.mrf.mxu1  ;;  %v10389_v56 = vpop.f32.mrf.mxu0 }
 0x1e5   : > { %v897_v37 = vpop.f32.mrf.mxu1  ;;  %v1140_v18 = vpop.f32.mrf.mxu0  ;;  %10554 = vmatmul.mubr.msk.bf16.vlgmr.msra.gmra.mxu1 %vm278_vm1, %v16454_v0 }
 0x1e6   : > { %v12782_v6 = vadd.f32 %v1140_v18, %v893_v47  ;;  %10676 = vmatpush3.bf16.msra.mxu1 %v2451_v10  ;;  %10557 = vmatprep.mubr.msk.bf16.mxu1 %vm11761_vm2, %v16397_v50  ;;  %v898_v35 = vadd.f32 %v897_v37, %v12563_v16  ;;  %v16455_v16 = vpack.c.bf16 %v12051_v38, %v12043_v34 }
 0x1e7   : > { %v10331_v27 = vpop.f32.mrf.mxu1  ;;  %v10390_v5 = vpop.f32.mrf.mxu0  ;;  %10799 = vmatprep.subr.bf16.mxu1 %v16397_v50 }
 0x1e8   : > { %v16456_v27 = vpack.c.bf16 %v12064_v45, %v12062_v44 }
 0x1e9   : > { %v900_v43 = vpop.f32.mrf.mxu1  ;;  %v1145_v4 = vpop.f32.mrf.mxu0  ;;  %10616 = vmatmul.mubr.msk.bf16.vlgmr.msra.gmra.mxu0 %vm278_vm1, %v12356_v30 }
 0x1ea   : > { %v12791_v19 = vadd.f32 %v1145_v4, %v898_v35  ;;  %10619 = vmatprep.mubr.msk.bf16.mxu0 %vm11761_vm2, %v16397_v50  ;;  %10738 = vmatpush3.bf16.msra.mxu0 %v2729_v46  ;;  %v901_v58 = vadd.f32 %v900_v43, %v12571_v8 }
 0x1eb   : > { %v10332_v21 = vpop.f32.mrf.mxu1  ;;  %v10393_v55 = vpop.f32.mrf.mxu0  ;;  %10875 = vmatprep.subr.bf16.mxu0 %v16397_v50 }
 0x1ed   : > { %v905_v57 = vpop.f32.mrf.mxu1  ;;  %v1148_v13 = vpop.f32.mrf.mxu0  ;;  %10558 = vmatmul.mubr.msk.bf16.gmra.mxu1 %vm278_vm1, %v16455_v16 }
 0x1ee   : > { %v12801_v30 = vadd.f32 %v1148_v13, %v901_v58  ;;  %10561 = vmatprep.mubr.msk.bf16.mxu1 %vm11761_vm2, %v16397_v50  ;;  %v906_v10 = vadd.f32 %v905_v57, %v12579_v14  ;;  %v16457_v58 = vpack.c.bf16 %v12085_v54, %v12080_v52 }
 0x1ef   : > { %v10335_v20 = vpop.f32.mrf.mxu1  ;;  %v10394_v56 = vpop.f32.mrf.mxu0 }
 0x1f1   : > { %v908_v47 = vpop.f32.mrf.mxu1  ;;  %v1153_v59 = vpop.f32.mrf.mxu0  ;;  %10620 = vmatmul.mubr.msk.bf16.gmra.mxu0 %vm278_vm1, %v12369_v3 }
 0x1f2   : > { %v12808_v8 = vadd.f32 %v1153_v59, %v906_v10  ;;  %10623 = vmatprep.mubr.msk.bf16.mxu0 %vm11761_vm2, %v16397_v50  ;;  %v909_v37 = vadd.f32 %v908_v47, %v12587_v28  ;;  %v16458_v59 = vld [vmem:[#allocation13_spill] sm:$0xff] }
 0x1f3   : > { %v10336_v34 = vpop.f32.mrf.mxu1  ;;  %v10397_v38 = vpop.f32.mrf.mxu0 }
 0x1f4   : > { %v16459_v34 = vld [vmem:[#allocation11_spill] sm:$0xff] }
 0x1f5   : > { %v913_v18 = vpop.f32.mrf.mxu1  ;;  %v1156_v0 = vpop.f32.mrf.mxu0  ;;  %10562 = vmatmul.mubr.msk.bf16.gmra.mxu1 %vm278_vm1, %v16456_v27  ;;  %v16460_v38 = vpack.c.bf16 %v16458_v59, %v16459_v34  ;;  %v16466_v59 = vld [vmem:[#allocation19_spill] sm:$0xff]  ;;  %v16467_v34 = vld [vmem:[#allocation18_spill] sm:$0xff] }
 0x1f6   : > { %v12817_v14 = vadd.f32 %v1156_v0, %v909_v37  ;;  %10565 = vmatprep.mubr.msk.bf16.mxu1 %vm11761_vm2, %v16397_v50  ;;  %v914_v46 = vadd.f32 %v913_v18, %v12595_v29 }
 0x1f7   : > { %v10339_v3 = vpop.f32.mrf.mxu1  ;;  %v10398_v5 = vpop.f32.mrf.mxu0 }
 0x1f8   : > { %v16461_v3 = vld [vmem:[#allocation38_spill] sm:$0xff] }
 0x1f9   : > { %v916_v35 = vpop.f32.mrf.mxu1  ;;  %v1161_v43 = vpop.f32.mrf.mxu0  ;;  %10624 = vmatmul.mubr.msk.bf16.gmra.mxu0 %vm278_vm1, %v12382_v23 }
 0x1fa   : > { %v12824_v28 = vadd.f32 %v1161_v43, %v914_v46  ;;  %10627 = vmatprep.mubr.msk.bf16.mxu0 %vm11761_vm2, %v16397_v50  ;;  %v917_v4 = vadd.f32 %v916_v35, %v12603_v33 }
 0x1fb   : > { %v10340_v44 = vpop.f32.mrf.mxu1  ;;  %v10401_v45 = vpop.f32.mrf.mxu0 }
 0x1fc   : > { %v16462_v45 = vld [vmem:[#allocation15_spill] sm:$0xff] }
 0x1fd   : > { %v921_v21 = vpop.f32.mrf.mxu1  ;;  %v1164_v55 = vpop.f32.mrf.mxu0  ;;  %10566 = vmatmul.mubr.msk.bf16.gmra.mxu1 %vm278_vm1, %v16457_v58 }
 0x1fe   : > { %v12833_v29 = vadd.f32 %v1164_v55, %v917_v4  ;;  %10569 = vmatprep.mubr.msk.bf16.mxu1 %vm11761_vm2, %v16397_v50  ;;  %v922_v13 = vadd.f32 %v921_v21, %v12613_v53  ;;  %v16463_v4 = vld [vmem:[#allocation14_spill] sm:$0xff] }
 0x1ff   : > { %v10343_v23 = vpop.f32.mrf.mxu1  ;;  %v10402_v57 = vpop.f32.mrf.mxu0  ;;  %v16464_v21 = vpack.c.bf16 %v16462_v45, %v16463_v4 }
 0x201   : > { %v924_v16 = vpop.f32.mrf.mxu1  ;;  %v1169_v20 = vpop.f32.mrf.mxu0  ;;  %10628 = vmatmul.mubr.msk.bf16.gmra.mxu0 %vm278_vm1, %v12395_v42 }
 0x202   : > { %v12840_v33 = vadd.f32 %v1169_v20, %v922_v13  ;;  %10631 = vmatprep.mubr.msk.bf16.mxu0 %vm11761_vm2, %v16397_v50  ;;  %v925_v56 = vadd.f32 %v924_v16, %v12623_v61  ;;  %v16465_v16 = vld [vmem:[#allocation40_spill] sm:$0xff] }
 0x203   : > { %v10344_v52 = vpop.f32.mrf.mxu1  ;;  %v10405_v54 = vpop.f32.mrf.mxu0 }
 0x205   : > { %v929_v10 = vpop.f32.mrf.mxu1  ;;  %v1172_v47 = vpop.f32.mrf.mxu0  ;;  %10570 = vmatmul.mubr.msk.bf16.gmra.mxu1 %vm278_vm1, %v16460_v38 }
 0x206   : > { %v12849_v53 = vadd.f32 %v1172_v47, %v925_v56  ;;  %10573 = vmatprep.mubr.msk.bf16.mxu1 %vm11761_vm2, %v16397_v50  ;;  %v930_v18 = vadd.f32 %v929_v10, %v12633_v39  ;;  %v397_v56 = vpop.trf.xlu0 }
 0x207   : > { %v10347_v42 = vpop.f32.mrf.mxu1  ;;  %v10406_v37 = vpop.f32.mrf.mxu0  ;;  %429 = vst.msk [vmem:[#allocation2 + $0x138] sm:$0xff] %vm278_vm1, %v397_v56 }
 0x209   : > { %v932_v0 = vpop.f32.mrf.mxu1  ;;  %v1177_v27 = vpop.f32.mrf.mxu0  ;;  %10632 = vmatmul.mubr.msk.bf16.gmra.mxu0 %vm278_vm1, %v16461_v3 }
 0x20a   : > { %v12856_v61 = vadd.f32 %v1177_v27, %v930_v18  ;;  %10635 = vmatprep.mubr.msk.bf16.mxu0 %vm11761_vm2, %v16397_v50  ;;  %v933_v35 = vadd.f32 %v932_v0, %v12643_v51  ;;  %v16469_v27 = vld [vmem:[#allocation41_spill] sm:$0xff] }
 0x20b   : > { %v10348_v5 = vpop.f32.mrf.mxu1  ;;  %v10409_v46 = vpop.f32.mrf.mxu0 }
 0x20c   : > { %v12891_v5 = vld [vmem:[#allocation2 + $0xa1] sm:$0xff] }
 0x20d   : > { %v937_v43 = vpop.f32.mrf.mxu1  ;;  %v1180_v44 = vpop.f32.mrf.mxu0  ;;  %10574 = vmatmul.mubr.msk.bf16.gmra.mxu1 %vm278_vm1, %v16464_v21 }
 0x20e   : > { %v12865_v39 = vadd.f32 %v1180_v44, %v933_v35  ;;  %10577 = vmatprep.mubr.msk.bf16.mxu1 %vm11761_vm2, %v16397_v50  ;;  %v938_v23 = vadd.f32 %v937_v43, %v12653_v63  ;;  %v16468_v63 = vpack.c.bf16 %v16466_v59, %v16467_v34  ;;  %v16470_v43 = vld [vmem:[#allocation42_spill] sm:$0xff] }
 0x20f   : > { %v10351_v55 = vpop.f32.mrf.mxu1  ;;  %v10410_v58 = vpop.f32.mrf.mxu0  ;;  %v1839_v44 = vpack.c.bf16 %v16470_v43, %v12891_v5 }
 0x210   : > { %v2094_v58 = vld [vmem:[#allocation2 + $0xb7] sm:$0xff] }
 0x211   : > { %v940_v57 = vpop.f32.mrf.mxu1  ;;  %v1185_v13 = vpop.f32.mrf.mxu0  ;;  %10636 = vmatmul.mubr.msk.bf16.gmra.mxu0 %vm278_vm1, %v16465_v16 }
 0x212   : > { %v12872_v51 = vadd.f32 %v1185_v13, %v938_v23  ;;  %10639 = vmatprep.mubr.msk.bf16.mxu0 %vm11761_vm2, %v16397_v50  ;;  %v941_v54 = vadd.f32 %v940_v57, %v12663_v36 }
 0x213   : > { %v10352_v20 = vpop.f32.mrf.mxu1  ;;  %v10413_v52 = vpop.f32.mrf.mxu0 }
 0x215   : > { %v945_v10 = vpop.f32.mrf.mxu1  ;;  %v1188_v47 = vpop.f32.mrf.mxu0  ;;  %10578 = vmatmul.mubr.msk.bf16.gmra.mxu1 %vm278_vm1, %v16468_v63  ;;  %v2096_v63 = vld [vmem:[#allocation2 + $0xc7] sm:$0xff] }
 0x216   : > { %v12882_v38 = vadd.f32 %v1188_v47, %v941_v54  ;;  %10581 = vmatprep.mubr.msk.bf16.mxu1 %vm11761_vm2, %v16397_v50  ;;  %v946_v18 = vadd.f32 %v945_v10, %v12605_v7  ;;  %v2095_v7 = vld [vmem:[#allocation2 + $0xbf] sm:$0xff]  ;;  %v12907_v54 = vld [vmem:[#allocation2 + $0xb1] sm:$0xff] }
 0x217   : > { %v10355_v42 = vpop.f32.mrf.mxu1  ;;  %v10414_v37 = vpop.f32.mrf.mxu0  ;;  %v2117_v13 = vpack.c.bf16 %v2095_v7, %v2094_v58  ;;  %v11687_v47 = vld [vmem:[#allocation2 + $0xb9] sm:$0xff]  ;;  %v11688_v7 = vld [vmem:[#allocation2 + $0xc1] sm:$0xff]  ;;  %v16341_v58 = vmov 0  }
 0x218   : > { %v1840_v59 = vpack.c.bf16 %v11687_v47, %v12907_v54  ;;  %11679 = vset.pattern.permute.xlu1 %v16341_v58 }
 0x219   : > { %v948_v36 = vpop.f32.mrf.mxu1  ;;  %v1193_v0 = vpop.f32.mrf.mxu0  ;;  %10640 = vmatmul.mubr.msk.bf16.gmra.mxu0 %vm278_vm1, %v16469_v27 }
 0x21a   : > { %v12889_v3 = vadd.f32 %v1193_v0, %v946_v18  ;;  %10643 = vmatprep.mubr.msk.bf16.mxu0 %vm11761_vm2, %v16397_v50  ;;  %v949_v45 = vadd.f32 %v948_v36, %v12615_v48 }
 0x21b   : > { %v10356_v46 = vpop.f32.mrf.mxu1  ;;  %v10417_v35 = vpop.f32.mrf.mxu0 }
 0x21d   : > { %v953_v4 = vpop.f32.mrf.mxu1  ;;  %v1196_v21 = vpop.f32.mrf.mxu0  ;;  %10582 = vmatmul.mubr.msk.bf16.gmra.mxu1 %vm278_vm1, %v1839_v44 }
 0x21e   : > { %v12899_v55 = vadd.f32 %v1196_v21, %v949_v45  ;;  %10585 = vmatprep.mubr.msk.bf16.mxu1 %vm11761_vm2, %v16397_v50  ;;  %v954_v16 = vadd.f32 %v953_v4, %v12625_v62  ;;  %v2097_v62 = vld [vmem:[#allocation2 + $0xcf] sm:$0xff] }
 0x21f   : > { %v10359_v23 = vpop.f32.mrf.mxu1  ;;  %v10418_v57 = vpop.f32.mrf.mxu0  ;;  %v2118_v27 = vpack.c.bf16 %v2097_v62, %v2096_v63  ;;  %v11689_v4 = vld [vmem:[#allocation2 + $0xc9] sm:$0xff] }
 0x220   : > { %v1841_v21 = vpack.c.bf16 %v11689_v4, %v11688_v7  ;;  %v11763_v57 = vmov 1  }
 0x221   : > { %v956_v20 = vpop.f32.mrf.mxu1  ;;  %v1201_v52 = vpop.f32.mrf.mxu0  ;;  %10644 = vmatmul.mubr.msk.bf16.gmra.mxu0 %vm278_vm1, %v2117_v13  ;;  %2987 = vperm.xlu1 %11679, %v11763_v57  }
 0x222   : > { %v12905_v48 = vadd.f32 %v1201_v52, %v954_v16  ;;  %10647 = vmatprep.mubr.msk.bf16.mxu0 %vm11761_vm2, %v16397_v50  ;;  %v957_v34 = vadd.f32 %v956_v20, %v12635_v9 }
 0x223   : > { %v10360_v56 = vpop.f32.mrf.mxu1  ;;  %v10421_v10 = vpop.f32.mrf.mxu0 }
 0x224   : > { %v2098_v56 = vld [vmem:[#allocation2 + $0xd7] sm:$0xff] }
 0x225   : > { %v961_v42 = vpop.f32.mrf.mxu1  ;;  %v1204_v37 = vpop.f32.mrf.mxu0  ;;  %10586 = vmatmul.mubr.msk.bf16.gmra.mxu1 %vm278_vm1, %v1840_v59  ;;  %2990 = vperm.xlu1 %11679, %v11763_v57  }
 0x226   : > { %v12914_v18 = vadd.f32 %v1204_v37, %v957_v34  ;;  %10589 = vmatprep.mubr.msk.bf16.mxu1 %vm11761_vm2, %v16397_v50  ;;  %v962_v46 = vadd.f32 %v961_v42, %v12645_v22  ;;  %v2099_v22 = vld [vmem:[#allocation2 + $0xdf] sm:$0xff]  ;;  %v11690_v37 = vld [vmem:[#allocation2 + $0xd1] sm:$0xff] }
 0x227   : > { %v10363_v36 = vpop.f32.mrf.mxu1  ;;  %v10422_v0 = vpop.f32.mrf.mxu0  ;;  %v2119_v59 = vpack.c.bf16 %v2099_v22, %v2098_v56  ;;  %v11693_v56 = vld [vmem:[#allocation2 + $0xe9] sm:$0xff] }
 0x228   : > { %v11691_v36 = vld [vmem:[#allocation2 + $0xd9] sm:$0xff] }
 0x229   : > { %v964_v35 = vpop.f32.mrf.mxu1  ;;  %v1209_v43 = vpop.f32.mrf.mxu0  ;;  %10648 = vmatmul.mubr.msk.bf16.gmra.mxu0 %vm278_vm1, %v2118_v27  ;;  %v1842_v0 = vpack.c.bf16 %v11691_v36, %v11690_v37  ;;  %v2101_v27 = vld [vmem:[#allocation2 + $0xef] sm:$0xff]  ;;  %2993 = vperm.xlu1 %11679, %v16341_v58   ;;  %v12957_v37 = vld [vmem:[#allocation2 + $0xf9] sm:$0xff] }
 0x22a   : > { %v12920_v9 = vadd.f32 %v1209_v43, %v962_v46  ;;  %10651 = vmatprep.mubr.msk.bf16.mxu0 %vm11761_vm2, %v16397_v50  ;;  %v965_v23 = vadd.f32 %v964_v35, %v12655_v24 }
 0x22b   : > { %v10364_v44 = vpop.f32.mrf.mxu1  ;;  %v10425_v45 = vpop.f32.mrf.mxu0 }
 0x22c   : > { %v2100_v44 = vld [vmem:[#allocation2 + $0xe7] sm:$0xff] }
 0x22d   : > { %v1212_v13 = vpop.f32.mrf.mxu0  ;;  %v1375_v16 = vpop.f32.mrf.mxu1  ;;  %10590 = vmatmul.mubr.msk.bf16.gmra.mxu1 %vm278_vm1, %v1841_v21  ;;  %v2120_v4 = vpack.c.bf16 %v2101_v27, %v2100_v44  ;;  %6960 = vperm.xlu1 %11679, %v11763_v57  }
 0x22e   : > { %v12927_v20 = vadd.f32 %v1212_v13, %v965_v23  ;;  %v1494_v52 = vadd.f32 %v1375_v16, %v12676_v2  ;;  %10593 = vmatprep.mubr.msk.bf16.mxu1 %vm11761_vm2, %v16397_v50 }
 0x22f   : > { %v10426_v10 = vpop.f32.mrf.mxu0  ;;  %v10431_v47 = vpop.f32.mrf.mxu1 }
 0x230   : > { %v2102_v47 = vld [vmem:[#allocation2 + $0xf7] sm:$0xff] }
 0x231   : > { %v1378_v24 = vpop.f32.mrf.mxu1  ;;  %v1653_v34 = vpop.f32.mrf.mxu0  ;;  %10652 = vmatmul.mubr.msk.bf16.gmra.mxu0 %vm278_vm1, %v2119_v59  ;;  %v2103_v59 = vld [vmem:[#allocation2 + $0xff] sm:$0xff]  ;;  %11681 = vperm.xlu1 %11679, %v16341_v58  }
 0x232   : > { %v1495_v63 = vadd.f32 %v1378_v24, %v12685_v11  ;;  %v12934_v62 = vadd.f32 %v1653_v34, %v1494_v52  ;;  %10655 = vmatprep.mubr.msk.bf16.mxu0 %vm11761_vm2, %v16397_v50  ;;  %v11692_v52 = vld [vmem:[#allocation2 + $0xe1] sm:$0xff]  ;;  %v4289_v58 = vld [vmem:[#allocation2 + $0x138] sm:$0xff] }
 0x233   : > { %v10432_v2 = vpop.f32.mrf.mxu1  ;;  %v10493_v42 = vpop.f32.mrf.mxu0  ;;  %v1843_v10 = vpack.c.bf16 %v11693_v56, %v11692_v52 }
 0x234   : > { %v2121_v42 = vpack.c.bf16 %v2103_v59, %v2102_v47  ;;  %v11695_v59 = vld [vmem:[#allocation2 + $0x109] sm:$0xff] }
 0x235   : > { %v1383_v46 = vpop.f32.mrf.mxu1  ;;  %v1656_v35 = vpop.f32.mrf.mxu0  ;;  %10594 = vmatmul.mubr.msk.bf16.gmra.mxu1 %vm278_vm1, %v1842_v0 }
 0x236   : > { %v1496_v43 = vadd.f32 %v1383_v46, %v12694_v26  ;;  %v12941_v11 = vadd.f32 %v1656_v35, %v1495_v63  ;;  %10597 = vmatprep.mubr.msk.bf16.mxu1 %vm11761_vm2, %v16397_v50 }
 0x237   : > { %v10435_v45 = vpop.f32.mrf.mxu1  ;;  %v10494_v7 = vpop.f32.mrf.mxu0 }
 0x239   : > { %v1386_v21 = vpop.f32.mrf.mxu1  ;;  %v1661_v23 = vpop.f32.mrf.mxu0  ;;  %10656 = vmatmul.mubr.msk.bf16.gmra.mxu0 %vm278_vm1, %v2120_v4 }
 0x23a   : > { %v1497_v22 = vadd.f32 %v1386_v21, %v12703_v41  ;;  %v12947_v13 = vadd.f32 %v1661_v23, %v1496_v43  ;;  %10659 = vmatprep.mubr.msk.bf16.mxu0 %vm11761_vm2, %v16397_v50  ;;  %v11694_v43 = vld [vmem:[#allocation2 + $0xf1] sm:$0xff] }
 0x23b   : > { %v10436_v26 = vpop.f32.mrf.mxu1  ;;  %v10497_v16 = vpop.f32.mrf.mxu0  ;;  %v1844_v44 = vpack.c.bf16 %v12957_v37, %v11694_v43 }
 0x23d   : > { %v1391_v24 = vpop.f32.mrf.mxu1  ;;  %v1664_v57 = vpop.f32.mrf.mxu0  ;;  %10598 = vmatmul.mubr.msk.bf16.gmra.mxu1 %vm278_vm1, %v1843_v10  ;;  %v12978_v10 = vld [vmem:[#allocation2 + $0x101] sm:$0xff] }
 0x23e   : > { %v1498_v34 = vadd.f32 %v1391_v24, %v12712_v40  ;;  %v12953_v63 = vadd.f32 %v1664_v57, %v1497_v22  ;;  %10601 = vmatprep.mubr.msk.bf16.mxu1 %vm11761_vm2, %v16397_v50  ;;  %v2122_v22 = vpack.c.bf16 %v12747_v32, %v12727_v49  ;;  %v1845_v24 = vpack.c.bf16 %v11695_v59, %v12978_v10  ;;  %v2107_v57 = vld [vmem:[#allocation2 + $0x11f] sm:$0xff] }
 0x23f   : > { %v10439_v41 = vpop.f32.mrf.mxu1  ;;  %v10498_v2 = vpop.f32.mrf.mxu0 }
 0x241   : > { %v1394_v36 = vpop.f32.mrf.mxu1  ;;  %v1669_v0 = vpop.f32.mrf.mxu0  ;;  %10660 = vmatmul.mubr.msk.bf16.gmra.mxu0 %vm278_vm1, %v2121_v42  ;;  %v2123_v42 = vpack.c.bf16 %v2107_v57, %v12749_v12  ;;  %v2109_v12 = vld [vmem:[#allocation2 + $0x12f] sm:$0xff] }
 0x242   : > { %v1499_v27 = vadd.f32 %v1394_v36, %v12722_v25  ;;  %v12961_v46 = vadd.f32 %v1669_v0, %v1498_v34  ;;  %10663 = vmatprep.mubr.msk.bf16.mxu0 %vm11761_vm2, %v16397_v50  ;;  %v12990_v36 = vld [vmem:[#allocation2 + $0x119] sm:$0xff]  ;;  %v2358_v57 = vld [vmem:[#allocation2 + $0x48] sm:$0xff] }
 0x243   : > { %v10440_v40 = vpop.f32.mrf.mxu1  ;;  %v10501_v35 = vpop.f32.mrf.mxu0 }
 0x245   : > { %v1399_v45 = vpop.f32.mrf.mxu1  ;;  %v1672_v7 = vpop.f32.mrf.mxu0  ;;  %10602 = vmatmul.mubr.msk.bf16.gmra.mxu1 %vm278_vm1, %v1844_v44  ;;  %v11696_v44 = vld [vmem:[#allocation2 + $0x111] sm:$0xff] }
 0x246   : > { %v1500_v4 = vadd.f32 %v1399_v45, %v12733_v31  ;;  %v12968_v21 = vadd.f32 %v1672_v7, %v1499_v27  ;;  %10605 = vmatprep.mubr.msk.bf16.mxu1 %vm11761_vm2, %v16397_v50  ;;  %v1846_v45 = vpack.c.bf16 %v12990_v36, %v11696_v44  ;;  %v2108_v7 = vld [vmem:[#allocation2 + $0x127] sm:$0xff] }
 0x247   : > { %v10443_v25 = vpop.f32.mrf.mxu1  ;;  %v10502_v23 = vpop.f32.mrf.mxu0 }
 0x249   : > { %v1402_v26 = vpop.f32.mrf.mxu1  ;;  %v1677_v16 = vpop.f32.mrf.mxu0  ;;  %10664 = vmatmul.mubr.msk.bf16.gmra.mxu0 %vm278_vm1, %v2122_v22 }
 0x24a   : > { %v1501_v52 = vadd.f32 %v1402_v26, %v12741_v1  ;;  %v12976_v56 = vadd.f32 %v1677_v16, %v1500_v4  ;;  %10667 = vmatprep.mubr.msk.bf16.mxu0 %vm11761_vm2, %v16397_v50  ;;  %v2124_v16 = vpack.c.bf16 %v2109_v12, %v2108_v7 }
 0x24b   : > { %v10444_v31 = vpop.f32.mrf.mxu1  ;;  %v10505_v47 = vpop.f32.mrf.mxu0 }
 0x24c   : > { %v9445_v31 = vld [vmem:[%s16299_s1 + $0x2] sm:$0x3] }
 0x24d   : > { %v1407_v49 = vpop.f32.mrf.mxu1  ;;  %v1680_v32 = vpop.f32.mrf.mxu0  ;;  %10606 = vmatmul.mubr.msk.bf16.gmra.mxu1 %vm278_vm1, %v1845_v24 }
 0x24e   : > { %v1502_v34 = vadd.f32 %v1407_v49, %v12752_v15  ;;  %v12985_v1 = vadd.f32 %v1680_v32, %v1501_v52  ;;  %10609 = vmatprep.mubr.msk.bf16.mxu1 %vm11761_vm2, %v16397_v50  ;;  %v2359_v52 = vld [vmem:[#allocation2 + $0x50] sm:$0xff] }
 0x24f   : > { %v10447_v41 = vpop.f32.mrf.mxu1  ;;  %v10506_v2 = vpop.f32.mrf.mxu0 }
 0x250   : > { %v3142_v41 = vsel %vm610_vm0, %v9445_v31, 0  ;;  %v2636_v2 = vld [vmem:[#allocation2 + $0x49] sm:$0xff] }
 0x251   : > { %v1410_v0 = vpop.f32.mrf.mxu1  ;;  %v1685_v27 = vpop.f32.mrf.mxu0  ;;  %10668 = vmatmul.mubr.msk.bf16.gmra.mxu0 %vm278_vm1, %v2123_v42  ;;  %v2637_v42 = vld [vmem:[#allocation2 + $0x51] sm:$0xff] }
 0x252   : > { %v1503_v40 = vadd.f32 %v1410_v0, %v12760_v60  ;;  %v12994_v35 = vadd.f32 %v1685_v27, %v1502_v34  ;;  %10671 = vmatprep.mubr.msk.bf16.mxu0 %vm11761_vm2, %v16397_v50  ;;  %v2388_v34 = vpack.c.bf16 %v2359_v52, %v2358_v57  ;;  %v9464_v0 = vld [vmem:[%s16299_s1 + $0x4] sm:$0x3]  ;;  %v2666_v7 = vpack.c.bf16 %v2637_v42, %v2636_v2  ;;  %v2362_v42 = vld [vmem:[#allocation2 + $0x68] sm:$0xff] }
 0x253   : > { %v10448_v15 = vpop.f32.mrf.mxu1  ;;  %v10509_v43 = vpop.f32.mrf.mxu0  ;;  %v3440_v12 = vsel %vm610_vm0, %v9464_v0, 0  ;;  %v2363_v0 = vld [vmem:[#allocation2 + $0x70] sm:$0xff] }
 0x254   : > { %v398_v43 = vpop.trf.xlu0 }
 0x255   : > { %v1415_v4 = vpop.f32.mrf.mxu1  ;;  %v1688_v25 = vpop.f32.mrf.mxu0  ;;  %10610 = vmatmul.mubr.msk.bf16.gmra.mxu1 %vm278_vm1, %v1846_v45  ;;  %430 = vst.msk [vmem:[#allocation2 + $0x140] sm:$0xff] %vm278_vm1, %v398_v43 }
 0x256   : > { %v1504_v23 = vadd.f32 %v1415_v4, %v12769_v17  ;;  %v13001_v22 = vadd.f32 %v1688_v25, %v1503_v40  ;;  %10677 = vmatprep.mubr.msk.bf16.mxu1 %vm11761_vm2, %v16397_v50  ;;  %v2360_v4 = vld [vmem:[#allocation2 + $0x58] sm:$0xff]  ;;  %v2361_v25 = vld [vmem:[#allocation2 + $0x60] sm:$0xff] }
 0x257   : > { %v10451_v60 = vpop.f32.mrf.mxu1  ;;  %v10510_v26 = vpop.f32.mrf.mxu0 }
 0x259   : > { %v1418_v47 = vpop.f32.mrf.mxu1  ;;  %v1693_v59 = vpop.f32.mrf.mxu0  ;;  %10672 = vmatmul.mubr.msk.bf16.gmra.mxu0 %vm278_vm1, %v2124_v16 }
 0x25a   : > { %v1505_v24 = vadd.f32 %v1418_v47, %v12782_v6  ;;  %v13010_v17 = vadd.f32 %v1693_v59, %v1504_v23  ;;  %10739 = vmatprep.mubr.msk.bf16.mxu0 %vm11761_vm2, %v16397_v50  ;;  %v399_v16 = vpop.trf.xlu0  ;;  %v2389_v47 = vpack.c.bf16 %v2361_v25, %v2360_v4  ;;  %v2639_v59 = vld [vmem:[#allocation2 + $0x61] sm:$0xff] }
 0x25b   : > { %v10452_v49 = vpop.f32.mrf.mxu1  ;;  %v10513_v32 = vpop.f32.mrf.mxu0  ;;  %431 = vst.msk [vmem:[#allocation2 + $0x150] sm:$0xff] %vm278_vm1, %v399_v16 }
 0x25c   : > { %v2638_v32 = vld [vmem:[#allocation2 + $0x59] sm:$0xff] }
 0x25d   : > { %v1423_v27 = vpop.f32.mrf.mxu1  ;;  %v1696_v40 = vpop.f32.mrf.mxu0  ;;  %10678 = vmatmul.mubr.msk.bf16.vlgmr.msra.gmra.mxu1 %vm278_vm1, %v2388_v34  ;;  %v2667_v2 = vpack.c.bf16 %v2639_v59, %v2638_v32 }
 0x25e   : > { %v1506_v6 = vadd.f32 %v1423_v27, %v12791_v19  ;;  %v13020_v15 = vadd.f32 %v1696_v40, %v1505_v24  ;;  %10800 = vmatpush3.bf16.msra.mxu1 %v3142_v41  ;;  %10681 = vmatprep.mubr.msk.bf16.mxu1 %vm11761_vm2, %v16397_v50 }
 0x25f   : > { %v10455_v44 = vpop.f32.mrf.mxu1  ;;  %v10514_v45 = vpop.f32.mrf.mxu0  ;;  %10837 = vmatprep.subr.bf16.mxu1 %v16397_v50 }
 0x261   : > { %v1426_v23 = vpop.f32.mrf.mxu1  ;;  %v1701_v19 = vpop.f32.mrf.mxu0  ;;  %10740 = vmatmul.mubr.msk.bf16.vlgmr.msra.gmra.mxu0 %vm278_vm1, %v2666_v7  ;;  %v2390_v7 = vpack.c.bf16 %v2363_v0, %v2362_v42  ;;  %v2643_v42 = vld [vmem:[#allocation2 + $0x81] sm:$0xff] }
 0x262   : > { %v1507_v60 = vadd.f32 %v1426_v23, %v12801_v30  ;;  %v13029_v26 = vadd.f32 %v1701_v19, %v1506_v6  ;;  %10743 = vmatprep.mubr.msk.bf16.mxu0 %vm11761_vm2, %v16397_v50  ;;  %10876 = vmatpush3.bf16.msra.mxu0 %v3440_v12  ;;  %v2641_v12 = vld [vmem:[#allocation2 + $0x71] sm:$0xff] }
 0x263   : > { %v10456_v52 = vpop.f32.mrf.mxu1  ;;  %v10517_v31 = vpop.f32.mrf.mxu0  ;;  %10951 = vmatprep.subr.bf16.mxu0 %v16397_v50 }
 0x264   : > { %v2365_v31 = vld [vmem:[#allocation2 + $0x80] sm:$0xff] }
 0x265   : > { %v1431_v24 = vpop.f32.mrf.mxu1  ;;  %v1704_v57 = vpop.f32.mrf.mxu0  ;;  %10682 = vmatmul.mubr.msk.bf16.gmra.mxu1 %vm278_vm1, %v2389_v47 }
 0x266   : > { %v1508_v30 = vadd.f32 %v1431_v24, %v12808_v8  ;;  %v13037_v49 = vadd.f32 %v1704_v57, %v1507_v60  ;;  %10685 = vmatprep.mubr.msk.bf16.mxu1 %vm11761_vm2, %v16397_v50  ;;  %v400_v8 = vpop.trf.xlu0 }
 0x267   : > { %v10459_v34 = vpop.f32.mrf.mxu1  ;;  %v10518_v41 = vpop.f32.mrf.mxu0  ;;  %432 = vst.msk [vmem:[#allocation2 + $0x158] sm:$0xff] %vm278_vm1, %v400_v8 }
 0x269   : > { %v1434_v27 = vpop.f32.mrf.mxu1  ;;  %v1709_v40 = vpop.f32.mrf.mxu0  ;;  %10744 = vmatmul.mubr.msk.bf16.gmra.mxu0 %vm278_vm1, %v2667_v2  ;;  %v2642_v2 = vld [vmem:[#allocation2 + $0x79] sm:$0xff] }
 0x26a   : > { %v1509_v6 = vadd.f32 %v1434_v27, %v12817_v14  ;;  %v13043_v43 = vadd.f32 %v1709_v40, %v1508_v30  ;;  %10747 = vmatprep.mubr.msk.bf16.mxu0 %vm11761_vm2, %v16397_v50  ;;  %v2640_v14 = vld [vmem:[#allocation2 + $0x69] sm:$0xff]  ;;  %v2364_v30 = vld [vmem:[#allocation2 + $0x78] sm:$0xff] }
 0x26b   : > { %v10460_v44 = vpop.f32.mrf.mxu1  ;;  %v10521_v45 = vpop.f32.mrf.mxu0  ;;  %v2668_v52 = vpack.c.bf16 %v2641_v12, %v2640_v14  ;;  %v2391_v41 = vpack.c.bf16 %v2365_v31, %v2364_v30  ;;  %v2367_v12 = vld [vmem:[#allocation2 + $0x90] sm:$0xff] }
 0x26c   : > { %v2669_v45 = vpack.c.bf16 %v2643_v42, %v2642_v2  ;;  %v2645_v31 = vld [vmem:[#allocation2 + $0x91] sm:$0xff]  ;;  %v2369_v2 = vld [vmem:[#allocation2 + $0xa0] sm:$0xff] }
 0x26d   : > { %v1439_v4 = vpop.f32.mrf.mxu1  ;;  %v1712_v25 = vpop.f32.mrf.mxu0  ;;  %10686 = vmatmul.mubr.msk.bf16.gmra.mxu1 %vm278_vm1, %v2390_v7  ;;  %v2366_v7 = vld [vmem:[#allocation2 + $0x88] sm:$0xff] }
 0x26e   : > { %v1510_v23 = vadd.f32 %v1439_v4, %v12824_v28  ;;  %v13050_v19 = vadd.f32 %v1712_v25, %v1509_v6  ;;  %10689 = vmatprep.mubr.msk.bf16.mxu1 %vm11761_vm2, %v16397_v50  ;;  %v401_v28 = vpop.trf.xlu0 }
 0x26f   : > { %v10463_v60 = vpop.f32.mrf.mxu1  ;;  %v10522_v16 = vpop.f32.mrf.mxu0  ;;  %433 = vst.msk [vmem:[#allocation2 + $0x168] sm:$0xff] %vm278_vm1, %v401_v28 }
 0x271   : > { %v1442_v47 = vpop.f32.mrf.mxu1  ;;  %v1717_v59 = vpop.f32.mrf.mxu0  ;;  %10748 = vmatmul.mubr.msk.bf16.gmra.mxu0 %vm278_vm1, %v2668_v52  ;;  %v2392_v52 = vpack.c.bf16 %v2367_v12, %v2366_v7 }
 0x272   : > { %v1511_v24 = vadd.f32 %v1442_v47, %v12833_v29  ;;  %v13056_v57 = vadd.f32 %v1717_v59, %v1510_v23  ;;  %10751 = vmatprep.mubr.msk.bf16.mxu0 %vm11761_vm2, %v16397_v50  ;;  %v402_v6 = vpop.trf.xlu0 }
 0x273   : > { %v10464_v32 = vpop.f32.mrf.mxu1  ;;  %v10525_v34 = vpop.f32.mrf.mxu0  ;;  %434 = vst.msk [vmem:[#allocation2 + $0x170] sm:$0xff] %vm278_vm1, %v402_v6 }
 0x275   : > { %v1447_v0 = vpop.f32.mrf.mxu1  ;;  %v1720_v27 = vpop.f32.mrf.mxu0  ;;  %10690 = vmatmul.mubr.msk.bf16.gmra.mxu1 %vm278_vm1, %v2391_v41  ;;  %v2368_v41 = vld [vmem:[#allocation2 + $0x98] sm:$0xff] }
 0x276   : > { %v1512_v29 = vadd.f32 %v1447_v0, %v12840_v33  ;;  %v13063_v40 = vadd.f32 %v1720_v27, %v1511_v24  ;;  %10693 = vmatprep.mubr.msk.bf16.mxu1 %vm11761_vm2, %v16397_v50  ;;  %v403_v14 = vpop.trf.xlu0 }
 0x277   : > { %v10467_v8 = vpop.f32.mrf.mxu1  ;;  %v10526_v44 = vpop.f32.mrf.mxu0  ;;  %435 = vst.msk [vmem:[#allocation2 + $0x180] sm:$0xff] %vm278_vm1, %v403_v14 }
 0x278   : > { %v2393_v44 = vpack.c.bf16 %v2369_v2, %v2368_v41 }
 0x279   : > { %v1450_v4 = vpop.f32.mrf.mxu1  ;;  %v1725_v25 = vpop.f32.mrf.mxu0  ;;  %10752 = vmatmul.mubr.msk.bf16.gmra.mxu0 %vm278_vm1, %v2669_v45 }
 0x27a   : > { %v1513_v23 = vadd.f32 %v1450_v4, %v12849_v53  ;;  %v13070_v33 = vadd.f32 %v1725_v25, %v1512_v29  ;;  %10755 = vmatprep.mubr.msk.bf16.mxu0 %vm11761_vm2, %v16397_v50  ;;  %v2644_v53 = vld [vmem:[#allocation2 + $0x89] sm:$0xff] }
 0x27b   : > { %v10468_v60 = vpop.f32.mrf.mxu1  ;;  %v10529_v16 = vpop.f32.mrf.mxu0  ;;  %v2670_v34 = vpack.c.bf16 %v2645_v31, %v2644_v53 }
 0x27c   : > { %v2371_v60 = vld [vmem:[#allocation2 + $0xb0] sm:$0xff] }
 0x27d   : > { %v1455_v47 = vpop.f32.mrf.mxu1  ;;  %v1728_v59 = vpop.f32.mrf.mxu0  ;;  %10694 = vmatmul.mubr.msk.bf16.gmra.mxu1 %vm278_vm1, %v2392_v52 }
 0x27e   : > { %v1514_v24 = vadd.f32 %v1455_v47, %v12856_v61  ;;  %v13077_v30 = vadd.f32 %v1728_v59, %v1513_v23  ;;  %10697 = vmatprep.mubr.msk.bf16.mxu1 %vm11761_vm2, %v16397_v50  ;;  %v404_v61 = vpop.trf.xlu0 }
 0x27f   : > { %v10471_v28 = vpop.f32.mrf.mxu1  ;;  %v10530_v32 = vpop.f32.mrf.mxu0  ;;  %436 = vst.msk [vmem:[#allocation2 + $0x188] sm:$0xff] %vm278_vm1, %v404_v61  ;;  %v2373_v61 = vld [vmem:[#allocation2 + $0xc0] sm:$0xff] }
 0x281   : > { %v1458_v42 = vpop.f32.mrf.mxu1  ;;  %v1733_v0 = vpop.f32.mrf.mxu0  ;;  %10756 = vmatmul.mubr.msk.bf16.gmra.mxu0 %vm278_vm1, %v2670_v34 }
 0x282   : > { %v1515_v27 = vadd.f32 %v1458_v42, %v12865_v39  ;;  %v13083_v29 = vadd.f32 %v1733_v0, %v1514_v24  ;;  %10759 = vmatprep.mubr.msk.bf16.mxu0 %vm11761_vm2, %v16397_v50  ;;  %v2646_v39 = vld [vmem:[#allocation2 + $0x99] sm:$0xff]  ;;  %v405_v59 = vpop.trf.xlu0 }
 0x283   : > { %v10472_v6 = vpop.f32.mrf.mxu1  ;;  %v10533_v8 = vpop.f32.mrf.mxu0  ;;  %v2671_v14 = vpack.c.bf16 %v12891_v5, %v2646_v39  ;;  %437 = vst.msk [vmem:[#allocation2 + $0x198] sm:$0xff] %vm278_vm1, %v405_v59  ;;  %v2648_v5 = vld [vmem:[#allocation2 + $0xa9] sm:$0xff]  ;;  %v16472_v59 = vld [vmem:[#allocation22_spill] sm:$0xff] }
 0x284   : > { %v2672_v0 = vpack.c.bf16 %v12907_v54, %v2648_v5 }
 0x285   : > { %v1463_v45 = vpop.f32.mrf.mxu1  ;;  %v1736_v7 = vpop.f32.mrf.mxu0  ;;  %10698 = vmatmul.mubr.msk.bf16.gmra.mxu1 %vm278_vm1, %v2393_v44 }
 0x286   : > { %v1516_v12 = vadd.f32 %v1463_v45, %v12872_v51  ;;  %v13090_v4 = vadd.f32 %v1736_v7, %v1515_v27  ;;  %10701 = vmatprep.mubr.msk.bf16.mxu1 %vm11761_vm2, %v16397_v50  ;;  %v2370_v51 = vld [vmem:[#allocation2 + $0xa8] sm:$0xff]  ;;  %v2372_v27 = vld [vmem:[#allocation2 + $0xb8] sm:$0xff] }
 0x287   : > { %v10475_v25 = vpop.f32.mrf.mxu1  ;;  %v10534_v23 = vpop.f32.mrf.mxu0  ;;  %v2394_v28 = vpack.c.bf16 %v2371_v60, %v2370_v51  ;;  %v2374_v60 = vld [vmem:[#allocation2 + $0xc8] sm:$0xff]  ;;  %v16471_v51 = vld [vmem:[#allocation23_spill] sm:$0xff] }
 0x289   : > { %v1466_v16 = vpop.f32.mrf.mxu1  ;;  %v1741_v52 = vpop.f32.mrf.mxu0  ;;  %10760 = vmatmul.mubr.msk.bf16.gmra.mxu0 %vm278_vm1, %v2671_v14 }
 0x28a   : > { %v1517_v31 = vadd.f32 %v1466_v16, %v12882_v38  ;;  %v13097_v47 = vadd.f32 %v1741_v52, %v1516_v12  ;;  %10763 = vmatprep.mubr.msk.bf16.mxu0 %vm11761_vm2, %v16397_v50  ;;  %v2395_v12 = vpack.c.bf16 %v2373_v61, %v2372_v27  ;;  %v2375_v16 = vld [vmem:[#allocation2 + $0xd0] sm:$0xff]  ;;  %v2377_v27 = vld [vmem:[#allocation2 + $0xe0] sm:$0xff] }
 0x28b   : > { %v10476_v24 = vpop.f32.mrf.mxu1  ;;  %v10537_v53 = vpop.f32.mrf.mxu0 }
 0x28c   : > { %v16473_v24 = vpack.c.bf16 %v16471_v51, %v16472_v59  ;;  %v2379_v51 = vld [vmem:[#allocation2 + $0xf0] sm:$0xff] }
 0x28d   : > { %v1471_v32 = vpop.f32.mrf.mxu1  ;;  %v1744_v34 = vpop.f32.mrf.mxu0  ;;  %10702 = vmatmul.mubr.msk.bf16.gmra.mxu1 %vm278_vm1, %v2394_v28 }
 0x28e   : > { %v1518_v41 = vadd.f32 %v1471_v32, %v12889_v3  ;;  %v13104_v38 = vadd.f32 %v1744_v34, %v1517_v31  ;;  %10705 = vmatprep.mubr.msk.bf16.mxu1 %vm11761_vm2, %v16397_v50  ;;  %v2396_v32 = vpack.c.bf16 %v2375_v16, %v2374_v60 }
 0x28f   : > { %v10479_v2 = vpop.f32.mrf.mxu1  ;;  %v10538_v42 = vpop.f32.mrf.mxu0 }
 0x291   : > { %v1474_v6 = vpop.f32.mrf.mxu1  ;;  %v1749_v8 = vpop.f32.mrf.mxu0  ;;  %10764 = vmatmul.mubr.msk.bf16.gmra.mxu0 %vm278_vm1, %v2672_v0 }
 0x292   : > { %v1519_v44 = vadd.f32 %v1474_v6, %v12899_v55  ;;  %v13111_v45 = vadd.f32 %v1749_v8, %v1518_v41  ;;  %10767 = vmatprep.mubr.msk.bf16.mxu0 %vm11761_vm2, %v16397_v50  ;;  %v16474_v8 = vld [vmem:[#allocation26_spill] sm:$0xff] }
 0x293   : > { %v10480_v3 = vpop.f32.mrf.mxu1  ;;  %v10541_v7 = vpop.f32.mrf.mxu0 }
 0x295   : > { %v1479_v39 = vpop.f32.mrf.mxu1  ;;  %v1752_v25 = vpop.f32.mrf.mxu0  ;;  %10706 = vmatmul.mubr.msk.bf16.gmra.mxu1 %vm278_vm1, %v2395_v12 }
 0x296   : > { %v1520_v54 = vadd.f32 %v1479_v39, %v12905_v48  ;;  %v13117_v23 = vadd.f32 %v1752_v25, %v1519_v44  ;;  %10709 = vmatprep.mubr.msk.bf16.mxu1 %vm11761_vm2, %v16397_v50  ;;  %v16475_v44 = vld [vmem:[#allocation25_spill] sm:$0xff] }
 0x297   : > { %v10483_v55 = vpop.f32.mrf.mxu1  ;;  %v10542_v14 = vpop.f32.mrf.mxu0  ;;  %v16476_v3 = vpack.c.bf16 %v16474_v8, %v16475_v44  ;;  %v2380_v8 = vld [vmem:[#allocation2 + $0xf8] sm:$0xff]  ;;  %v2381_v44 = vld [vmem:[#allocation2 + $0x100] sm:$0xff] }
 0x299   : > { %v1482_v52 = vpop.f32.mrf.mxu1  ;;  %v1757_v31 = vpop.f32.mrf.mxu0  ;;  %10768 = vmatmul.mubr.msk.bf16.gmra.mxu0 %vm278_vm1, %v16473_v24 }
 0x29a   : > { %v1521_v53 = vadd.f32 %v1482_v52, %v12914_v18  ;;  %v13126_v28 = vadd.f32 %v1757_v31, %v1520_v54  ;;  %10771 = vmatprep.mubr.msk.bf16.mxu0 %vm11761_vm2, %v16397_v50  ;;  %v2378_v31 = vld [vmem:[#allocation2 + $0xe8] sm:$0xff] }
 0x29b   : > { %v10484_v48 = vpop.f32.mrf.mxu1  ;;  %v10545_v5 = vpop.f32.mrf.mxu0 }
 0x29c   : > { %v16478_v48 = vld [vmem:[#allocation29_spill] sm:$0xff] }
 0x29d   : > { %v1487_v34 = vpop.f32.mrf.mxu1  ;;  %v1760_v41 = vpop.f32.mrf.mxu0  ;;  %10710 = vmatmul.mubr.msk.bf16.gmra.mxu1 %vm278_vm1, %v2396_v32 }
 0x29e   : > { %v1522_v2 = vadd.f32 %v1487_v34, %v12920_v9  ;;  %v13132_v42 = vadd.f32 %v1760_v41, %v1521_v53  ;;  %10713 = vmatprep.mubr.msk.bf16.mxu1 %vm11761_vm2, %v16397_v50  ;;  %v2376_v9 = vld [vmem:[#allocation2 + $0xd8] sm:$0xff] }
 0x29f   : > { %v10487_v18 = vpop.f32.mrf.mxu1  ;;  %v10546_v0 = vpop.f32.mrf.mxu0  ;;  %v2397_v54 = vpack.c.bf16 %v2377_v27, %v2376_v9  ;;  %v16477_v53 = vld [vmem:[#allocation30_spill] sm:$0xff]  ;;  %v16480_v9 = vld [vmem:[#allocation36_spill] sm:$0xff] }
 0x2a0   : > { %v16479_v5 = vpack.c.bf16 %v16477_v53, %v16478_v48  ;;  %v2382_v53 = vld [vmem:[#allocation2 + $0x108] sm:$0xff]  ;;  %v2383_v48 = vld [vmem:[#allocation2 + $0x110] sm:$0xff] }
 0x2a1   : > { %v1490_v61 = vpop.f32.mrf.mxu1  ;;  %v1765_v6 = vpop.f32.mrf.mxu0  ;;  %10772 = vmatmul.mubr.msk.bf16.gmra.mxu0 %vm278_vm1, %v16476_v3 }
 0x2a2   : > { %v1523_v7 = vadd.f32 %v1490_v61, %v12927_v20  ;;  %v13141_v12 = vadd.f32 %v1765_v6, %v1522_v2  ;;  %10775 = vmatprep.mubr.msk.bf16.mxu0 %vm11761_vm2, %v16397_v50  ;;  %v2398_v2 = vpack.c.bf16 %v2379_v51, %v2378_v31 }
 0x2a3   : > { %v10488_v39 = vpop.f32.mrf.mxu1  ;;  %v10549_v25 = vpop.f32.mrf.mxu0 }
 0x2a4   : > { %v16481_v39 = vld [vmem:[#allocation35_spill] sm:$0xff] }
 0x2a5   : > { %v1768_v55 = vpop.f32.mrf.mxu0  ;;  %v1931_v14 = vpop.f32.mrf.mxu1  ;;  %10714 = vmatmul.mubr.msk.bf16.gmra.mxu1 %vm278_vm1, %v2397_v54  ;;  %v16482_v25 = vpack.c.bf16 %v16480_v9, %v16481_v39 }
 0x2a6   : > { %v13146_v60 = vadd.f32 %v1768_v55, %v1523_v7  ;;  %v2050_v16 = vadd.f32 %v1931_v14, %v12934_v62  ;;  %10717 = vmatprep.mubr.msk.bf16.mxu1 %vm11761_vm2, %v16397_v50 }
 0x2a7   : > { %v10550_v20 = vpop.f32.mrf.mxu0  ;;  %v10555_v52 = vpop.f32.mrf.mxu1 }
 0x2a9   : > { %v1934_v59 = vpop.f32.mrf.mxu1  ;;  %v2209_v24 = vpop.f32.mrf.mxu0  ;;  %10776 = vmatmul.mubr.msk.bf16.gmra.mxu0 %vm278_vm1, %v16479_v5 }
 0x2aa   : > { %v2051_v32 = vadd.f32 %v1934_v59, %v12941_v11  ;;  %v13156_v34 = vadd.f32 %v2209_v24, %v2050_v16  ;;  %10779 = vmatprep.mubr.msk.bf16.mxu0 %vm11761_vm2, %v16397_v50  ;;  %v2399_v16 = vpack.c.bf16 %v2381_v44, %v2380_v8  ;;  %v2677_v24 = vpack.c.bf16 %v12978_v10, %v12957_v37  ;;  %v13228_v8 = vld [vmem:[#allocation2 + $0x120] sm:$0xff] }
 0x2ab   : > { %v10556_v62 = vpop.f32.mrf.mxu1  ;;  %v10617_v41 = vpop.f32.mrf.mxu0 }
 0x2ad   : > { %v1939_v11 = vpop.f32.mrf.mxu1  ;;  %v2212_v18 = vpop.f32.mrf.mxu0  ;;  %10718 = vmatmul.mubr.msk.bf16.gmra.mxu1 %vm278_vm1, %v2398_v2 }
 0x2ae   : > { %v2052_v0 = vadd.f32 %v1939_v11, %v12947_v13  ;;  %v13192_v27 = vadd.f32 %v2212_v18, %v2051_v32  ;;  %10721 = vmatprep.mubr.msk.bf16.mxu1 %vm11761_vm2, %v16397_v50  ;;  %v13219_v11 = vpack.c.bf16 %v2383_v48, %v2382_v53 }
 0x2af   : > { %v10559_v61 = vpop.f32.mrf.mxu1  ;;  %v10618_v6 = vpop.f32.mrf.mxu0 }
 0x2b0   : > { %v2384_v6 = vld [vmem:[#allocation2 + $0x118] sm:$0xff] }
 0x2b1   : > { %v1942_v3 = vpop.f32.mrf.mxu1  ;;  %v2217_v7 = vpop.f32.mrf.mxu0  ;;  %10780 = vmatmul.mubr.msk.bf16.gmra.mxu0 %vm278_vm1, %v16482_v25 }
 0x2b2   : > { %v2053_v54 = vadd.f32 %v1942_v3, %v12953_v63  ;;  %v13201_v55 = vadd.f32 %v2217_v7, %v2052_v0  ;;  %10783 = vmatprep.mubr.msk.bf16.mxu0 %vm11761_vm2, %v16397_v50  ;;  %v16483_v7 = vld [vmem:[#allocation39_spill] sm:$0xff] }
 0x2b3   : > { %v10560_v13 = vpop.f32.mrf.mxu1  ;;  %v10621_v14 = vpop.f32.mrf.mxu0 }
 0x2b4   : > { %v2663_v13 = vld [vmem:[#allocation2 + $0x121] sm:$0xff] }
 0x2b5   : > { %v1947_v20 = vpop.f32.mrf.mxu1  ;;  %v2220_v52 = vpop.f32.mrf.mxu0  ;;  %10722 = vmatmul.mubr.msk.bf16.gmra.mxu1 %vm278_vm1, %v2399_v16 }
 0x2b6   : > { %v2054_v31 = vadd.f32 %v1947_v20, %v12961_v46  ;;  %v13207_v51 = vadd.f32 %v2220_v52, %v2053_v54  ;;  %10725 = vmatprep.mubr.msk.bf16.mxu1 %vm11761_vm2, %v16397_v50  ;;  %v13238_v54 = vpack.c.bf16 %v13228_v8, %v2384_v6 }
 0x2b7   : > { %v10563_v63 = vpop.f32.mrf.mxu1  ;;  %v10622_v59 = vpop.f32.mrf.mxu0 }
 0x2b8   : > { %v13248_v63 = vpack.c.bf16 %v2663_v13, %v12990_v36  ;;  %v13250_v59 = vld [vmem:[#allocation2 + $0x130] sm:$0xff] }
 0x2b9   : > { %v1950_v5 = vpop.f32.mrf.mxu1  ;;  %v2225_v32 = vpop.f32.mrf.mxu0  ;;  %10784 = vmatmul.mubr.msk.bf16.gmra.mxu0 %vm278_vm1, %v2677_v24 }
 0x2ba   : > { %v2055_v62 = vadd.f32 %v1950_v5, %v12968_v21  ;;  %v13215_v41 = vadd.f32 %v2225_v32, %v2054_v31  ;;  %10787 = vmatprep.mubr.msk.bf16.mxu0 %vm11761_vm2, %v16397_v50  ;;  %v13257_v5 = vld [vmem:[#allocation2 + $0x128] sm:$0xff] }
 0x2bb   : > { %v10564_v46 = vpop.f32.mrf.mxu1  ;;  %v10625_v2 = vpop.f32.mrf.mxu0  ;;  %v13263_v36 = vpack.c.bf16 %v13250_v59, %v13257_v5 }
 0x2bc   : > { %v2664_v46 = vld [vmem:[#allocation2 + $0x129] sm:$0xff]  ;;  %v2665_v2 = vld [vmem:[#allocation2 + $0x131] sm:$0xff] }
 0x2bd   : > { %v1955_v18 = vpop.f32.mrf.mxu1  ;;  %v2228_v0 = vpop.f32.mrf.mxu0  ;;  %10726 = vmatmul.mubr.msk.bf16.gmra.mxu1 %vm278_vm1, %v13219_v11  ;;  %v13272_v6 = vpack.c.bf16 %v2665_v2, %v2664_v46 }
 0x2be   : > { %v2056_v37 = vadd.f32 %v1955_v18, %v12976_v56  ;;  %v13224_v10 = vadd.f32 %v2228_v0, %v2055_v62  ;;  %10729 = vmatprep.mubr.msk.bf16.mxu1 %vm11761_vm2, %v16397_v50 }
 0x2bf   : > { %v10567_v21 = vpop.f32.mrf.mxu1  ;;  %v10626_v61 = vpop.f32.mrf.mxu0 }
 0x2c1   : > { %v1958_v44 = vpop.f32.mrf.mxu1  ;;  %v2233_v3 = vpop.f32.mrf.mxu0  ;;  %10788 = vmatmul.mubr.msk.bf16.gmra.mxu0 %vm278_vm1, %v16483_v7 }
 0x2c2   : > { %v2057_v9 = vadd.f32 %v1958_v44, %v12985_v1  ;;  %v13233_v39 = vadd.f32 %v2233_v3, %v2056_v37  ;;  %10791 = vmatprep.mubr.msk.bf16.mxu0 %vm11761_vm2, %v16397_v50  ;;  %v3085_v44 = vld [vmem:[%s16299_s1] sm:$0x3] }
 0x2c3   : > { %v10568_v56 = vpop.f32.mrf.mxu1  ;;  %v10629_v25 = vpop.f32.mrf.mxu0 }
 0x2c5   : > { %v1963_v14 = vpop.f32.mrf.mxu1  ;;  %v2236_v16 = vpop.f32.mrf.mxu0  ;;  %10730 = vmatmul.mubr.msk.bf16.gmra.mxu1 %vm278_vm1, %v13238_v54 }
 0x2c6   : > { %v2058_v20 = vadd.f32 %v1963_v14, %v12994_v35  ;;  %v13243_v52 = vadd.f32 %v2236_v16, %v2057_v9  ;;  %10733 = vmatprep.mubr.msk.bf16.mxu1 %vm11761_vm2, %v16397_v50  ;;  %v3277_v14 = vsel %vm610_vm0, %v3085_v44, 0  ;;  %v9484_v16 = vld [vmem:[%s16299_s1 + $0x8] sm:$0x3] }
 0x2c7   : > { %v10571_v1 = vpop.f32.mrf.mxu1  ;;  %v10630_v31 = vpop.f32.mrf.mxu0 }
 0x2c9   : > { %v1966_v24 = vpop.f32.mrf.mxu1  ;;  %v2241_v53 = vpop.f32.mrf.mxu0  ;;  %10792 = vmatmul.mubr.msk.bf16.gmra.mxu0 %vm278_vm1, %v13248_v63 }
 0x2ca   : > { %v2059_v48 = vadd.f32 %v1966_v24, %v13001_v22  ;;  %v13255_v35 = vadd.f32 %v2241_v53, %v2058_v20  ;;  %10795 = vmatprep.mubr.msk.bf16.mxu0 %vm11761_vm2, %v16397_v50 }
 0x2cb   : > { %v10572_v32 = vpop.f32.mrf.mxu1  ;;  %v10633_v62 = vpop.f32.mrf.mxu0 }
 0x2cc   : > { %v406_v32 = vpop.trf.xlu0 }
 0x2cd   : > { %v1971_v18 = vpop.f32.mrf.mxu1  ;;  %v2244_v0 = vpop.f32.mrf.mxu0  ;;  %10734 = vmatmul.mubr.msk.bf16.gmra.mxu1 %vm278_vm1, %v13263_v36  ;;  %438 = vst.msk [vmem:[#allocation2 + $0x1a0] sm:$0xff] %vm278_vm1, %v406_v32 }
 0x2ce   : > { %v2060_v22 = vadd.f32 %v1971_v18, %v13010_v17  ;;  %v13268_v37 = vadd.f32 %v2244_v0, %v2059_v48  ;;  %10801 = vmatprep.mubr.msk.bf16.mxu1 %vm11761_vm2, %v16397_v50  ;;  %v3802_v48 = vsel %vm610_vm0, %v9484_v16, 0 }
 0x2cf   : > { %v10575_v21 = vpop.f32.mrf.mxu1  ;;  %v10634_v61 = vpop.f32.mrf.mxu0 }
 0x2d1   : > { %v1974_v3 = vpop.f32.mrf.mxu1  ;;  %v2249_v9 = vpop.f32.mrf.mxu0  ;;  %10796 = vmatmul.mubr.msk.bf16.gmra.mxu0 %vm278_vm1, %v13272_v6 }
 0x2d2   : > { %v2061_v17 = vadd.f32 %v1974_v3, %v13020_v15  ;;  %v13280_v56 = vadd.f32 %v2249_v9, %v2060_v22  ;;  %10877 = vmatprep.mubr.msk.bf16.mxu0 %vm11761_vm2, %v16397_v50 }
 0x2d3   : > { %v10576_v25 = vpop.f32.mrf.mxu1  ;;  %v10637_v13 = vpop.f32.mrf.mxu0 }
 0x2d5   : > { %v1979_v20 = vpop.f32.mrf.mxu1  ;;  %v2252_v1 = vpop.f32.mrf.mxu0  ;;  %10802 = vmatmul.mubr.msk.bf16.vlgmr.msra.gmra.mxu1 %vm278_vm1, %v13219_v11 }
 0x2d6   : > { %v2062_v15 = vadd.f32 %v1979_v20, %v13029_v26  ;;  %v13291_v31 = vadd.f32 %v2252_v1, %v2061_v17  ;;  %10838 = vmatpush3.bf16.msra.mxu1 %v3277_v14  ;;  %10805 = vmatprep.mubr.msk.bf16.mxu1 %vm11761_vm2, %v16397_v50  ;;  %v13327_v20 = vld [vmem:[#allocation2 + $0x138] sm:$0xff]  ;;  %v13329_v1 = vld [vmem:[#allocation2 + $0x140] sm:$0xff] }
 0x2d7   : > { %v10579_v24 = vpop.f32.mrf.mxu1  ;;  %v10638_v53 = vpop.f32.mrf.mxu0  ;;  %10913 = vmatprep.subr.bf16.mxu1 %v16397_v50  ;;  %v3107_v32 = vpack.c.bf16 %v13329_v1, %v13327_v20 }
 0x2d9   : > { %v1982_v62 = vpop.f32.mrf.mxu1  ;;  %v2257_v46 = vpop.f32.mrf.mxu0  ;;  %10878 = vmatmul.mubr.msk.bf16.vlgmr.msra.gmra.mxu0 %vm278_vm1, %v16483_v7 }
 0x2da   : > { %v2063_v26 = vadd.f32 %v1982_v62, %v13037_v49  ;;  %v13301_v11 = vadd.f32 %v2257_v46, %v2062_v15  ;;  %10881 = vmatprep.mubr.msk.bf16.mxu0 %vm11761_vm2, %v16397_v50  ;;  %10952 = vmatpush3.bf16.msra.mxu0 %v3802_v48  ;;  %v3390_v62 = vld [vmem:[#allocation2 + $0x139] sm:$0xff]  ;;  %v3391_v46 = vld [vmem:[#allocation2 + $0x141] sm:$0xff] }
 0x2db   : > { %v10580_v2 = vpop.f32.mrf.mxu1  ;;  %v10641_v18 = vpop.f32.mrf.mxu0  ;;  %11027 = vmatprep.subr.bf16.mxu0 %v16397_v50 }
 0x2dd   : > { %v1987_v0 = vpop.f32.mrf.mxu1  ;;  %v2260_v22 = vpop.f32.mrf.mxu0  ;;  %10806 = vmatmul.mubr.msk.bf16.gmra.mxu1 %vm278_vm1, %v13238_v54 }
 0x2de   : > { %v2064_v7 = vadd.f32 %v1987_v0, %v13043_v43  ;;  %v13309_v21 = vadd.f32 %v2260_v22, %v2063_v26  ;;  %10809 = vmatprep.mubr.msk.bf16.mxu1 %vm11761_vm2, %v16397_v50 }
 0x2df   : > { %v10583_v49 = vpop.f32.mrf.mxu1  ;;  %v10642_v61 = vpop.f32.mrf.mxu0 }
 0x2e0   : > { %v13348_v49 = vld [vmem:[#allocation2 + $0x148] sm:$0xff] }
 0x2e1   : > { %v1990_v44 = vpop.f32.mrf.mxu1  ;;  %v2265_v3 = vpop.f32.mrf.mxu0  ;;  %10882 = vmatmul.mubr.msk.bf16.gmra.mxu0 %vm278_vm1, %v13248_v63 }
 0x2e2   : > { %v2065_v9 = vadd.f32 %v1990_v44, %v13050_v19  ;;  %v13316_v17 = vadd.f32 %v2265_v3, %v2064_v7  ;;  %10885 = vmatprep.mubr.msk.bf16.mxu0 %vm11761_vm2, %v16397_v50  ;;  %v3405_v7 = vpack.c.bf16 %v3391_v46, %v3390_v62 }
 0x2e3   : > { %v10584_v43 = vpop.f32.mrf.mxu1  ;;  %v10645_v54 = vpop.f32.mrf.mxu0 }
 0x2e5   : > { %v1995_v25 = vpop.f32.mrf.mxu1  ;;  %v2268_v13 = vpop.f32.mrf.mxu0  ;;  %10810 = vmatmul.mubr.msk.bf16.gmra.mxu1 %vm278_vm1, %v13263_v36 }
 0x2e6   : > { %v2066_v14 = vadd.f32 %v1995_v25, %v13056_v57  ;;  %v13323_v16 = vadd.f32 %v2268_v13, %v2065_v9  ;;  %10813 = vmatprep.mubr.msk.bf16.mxu1 %vm11761_vm2, %v16397_v50  ;;  %v3392_v25 = vld [vmem:[#allocation2 + $0x149] sm:$0xff]  ;;  %v3393_v13 = vld [vmem:[#allocation2 + $0x151] sm:$0xff] }
 0x2e7   : > { %v10587_v19 = vpop.f32.mrf.mxu1  ;;  %v10646_v63 = vpop.f32.mrf.mxu0 }
 0x2e9   : > { %v1998_v15 = vpop.f32.mrf.mxu1  ;;  %v2273_v24 = vpop.f32.mrf.mxu0  ;;  %10886 = vmatmul.mubr.msk.bf16.gmra.mxu0 %vm278_vm1, %v13272_v6 }
 0x2ea   : > { %v2067_v36 = vadd.f32 %v1998_v15, %v13063_v40  ;;  %v13334_v53 = vadd.f32 %v2273_v24, %v2066_v14  ;;  %10889 = vmatprep.mubr.msk.bf16.mxu0 %vm11761_vm2, %v16397_v50  ;;  %v13346_v40 = vld [vmem:[#allocation2 + $0x150] sm:$0xff] }
 0x2eb   : > { %v10588_v57 = vpop.f32.mrf.mxu1  ;;  %v10649_v48 = vpop.f32.mrf.mxu0  ;;  %v3108_v3 = vpack.c.bf16 %v13346_v40, %v13348_v49 }
 0x2ec   : > { %v3406_v57 = vpack.c.bf16 %v3393_v13, %v3392_v25  ;;  %v13366_v48 = vld [vmem:[#allocation2 + $0x158] sm:$0xff]  ;;  %v13384_v25 = vld [vmem:[#allocation2 + $0x170] sm:$0xff] }
 0x2ed   : > { %v2003_v26 = vpop.f32.mrf.mxu1  ;;  %v2276_v2 = vpop.f32.mrf.mxu0  ;;  %10814 = vmatmul.mubr.msk.bf16.gmra.mxu1 %vm278_vm1, %v3107_v32 }
 0x2ee   : > { %v2068_v6 = vadd.f32 %v2003_v26, %v13070_v33  ;;  %v13342_v18 = vadd.f32 %v2276_v2, %v2067_v36  ;;  %10817 = vmatprep.mubr.msk.bf16.mxu1 %vm11761_vm2, %v16397_v50 }
 0x2ef   : > { %v10591_v0 = vpop.f32.mrf.mxu1  ;;  %v10650_v22 = vpop.f32.mrf.mxu0 }
 0x2f0   : > { %v3394_v0 = vld [vmem:[#allocation2 + $0x159] sm:$0xff]  ;;  %v3395_v22 = vld [vmem:[#allocation2 + $0x161] sm:$0xff] }
 0x2f1   : > { %v2006_v61 = vpop.f32.mrf.mxu1  ;;  %v2281_v44 = vpop.f32.mrf.mxu0  ;;  %10890 = vmatmul.mubr.msk.bf16.gmra.mxu0 %vm278_vm1, %v3405_v7 }
 0x2f2   : > { %v2069_v33 = vadd.f32 %v2006_v61, %v13077_v30  ;;  %v13354_v9 = vadd.f32 %v2281_v44, %v2068_v6  ;;  %10893 = vmatprep.mubr.msk.bf16.mxu0 %vm11761_vm2, %v16397_v50  ;;  %v13364_v30 = vld [vmem:[#allocation2 + $0x160] sm:$0xff] }
 0x2f3   : > { %v10592_v43 = vpop.f32.mrf.mxu1  ;;  %v10653_v54 = vpop.f32.mrf.mxu0  ;;  %v3109_v46 = vpack.c.bf16 %v13364_v30, %v13366_v48 }
 0x2f4   : > { %v3407_v43 = vpack.c.bf16 %v3395_v22, %v3394_v0  ;;  %v13382_v54 = vld [vmem:[#allocation2 + $0x168] sm:$0xff] }
 0x2f5   : > { %v2011_v14 = vpop.f32.mrf.mxu1  ;;  %v2284_v19 = vpop.f32.mrf.mxu0  ;;  %10818 = vmatmul.mubr.msk.bf16.gmra.mxu1 %vm278_vm1, %v3108_v3 }
 0x2f6   : > { %v2070_v63 = vadd.f32 %v2011_v14, %v13083_v29  ;;  %v13360_v15 = vadd.f32 %v2284_v19, %v2069_v33  ;;  %10821 = vmatprep.mubr.msk.bf16.mxu1 %vm11761_vm2, %v16397_v50 }
 0x2f7   : > { %v10595_v24 = vpop.f32.mrf.mxu1  ;;  %v10654_v36 = vpop.f32.mrf.mxu0 }
 0x2f8   : > { %v3110_v36 = vpack.c.bf16 %v13384_v25, %v13382_v54 }
 0x2f9   : > { %v2014_v32 = vpop.f32.mrf.mxu1  ;;  %v2289_v62 = vpop.f32.mrf.mxu0  ;;  %10894 = vmatmul.mubr.msk.bf16.gmra.mxu0 %vm278_vm1, %v3406_v57  ;;  %v3396_v57 = vld [vmem:[#allocation2 + $0x169] sm:$0xff] }
 0x2fa   : > { %v2071_v29 = vadd.f32 %v2014_v32, %v13090_v4  ;;  %v13372_v26 = vadd.f32 %v2289_v62, %v2070_v63  ;;  %10897 = vmatprep.mubr.msk.bf16.mxu0 %vm11761_vm2, %v16397_v50  ;;  %v3397_v32 = vld [vmem:[#allocation2 + $0x171] sm:$0xff] }
 0x2fb   : > { %v10596_v2 = vpop.f32.mrf.mxu1  ;;  %v10657_v6 = vpop.f32.mrf.mxu0  ;;  %v3408_v22 = vpack.c.bf16 %v3397_v32, %v3396_v57 }
 0x2fd   : > { %v2019_v7 = vpop.f32.mrf.mxu1  ;;  %v2292_v61 = vpop.f32.mrf.mxu0  ;;  %10822 = vmatmul.mubr.msk.bf16.gmra.mxu1 %vm278_vm1, %v3109_v46 }
 0x2fe   : > { %v2072_v44 = vadd.f32 %v2019_v7, %v13097_v47  ;;  %v13378_v3 = vadd.f32 %v2292_v61, %v2071_v29  ;;  %10825 = vmatprep.mubr.msk.bf16.mxu1 %vm11761_vm2, %v16397_v50  ;;  %v13402_v7 = vld [vmem:[#allocation2 + $0x178] sm:$0xff] }
 0x2ff   : > { %v10599_v4 = vpop.f32.mrf.mxu1  ;;  %v10658_v33 = vpop.f32.mrf.mxu0 }
 0x301   : > { %v2022_v13 = vpop.f32.mrf.mxu1  ;;  %v2297_v14 = vpop.f32.mrf.mxu0  ;;  %10898 = vmatmul.mubr.msk.bf16.gmra.mxu0 %vm278_vm1, %v3407_v43 }
 0x302   : > { %v2073_v19 = vadd.f32 %v2022_v13, %v13104_v38  ;;  %v13388_v63 = vadd.f32 %v2297_v14, %v2072_v44  ;;  %10901 = vmatprep.mubr.msk.bf16.mxu0 %vm11761_vm2, %v16397_v50  ;;  %v13400_v38 = vld [vmem:[#allocation2 + $0x180] sm:$0xff] }
 0x303   : > { %v10600_v47 = vpop.f32.mrf.mxu1  ;;  %v10661_v24 = vpop.f32.mrf.mxu0  ;;  %v3111_v4 = vpack.c.bf16 %v13400_v38, %v13402_v7  ;;  %v3398_v14 = vld [vmem:[#allocation2 + $0x179] sm:$0xff] }
 0x305   : > { %v2027_v62 = vpop.f32.mrf.mxu1  ;;  %v2300_v46 = vpop.f32.mrf.mxu0  ;;  %10826 = vmatmul.mubr.msk.bf16.gmra.mxu1 %vm278_vm1, %v3110_v36 }
 0x306   : > { %v2074_v29 = vadd.f32 %v2027_v62, %v13111_v45  ;;  %v13396_v2 = vadd.f32 %v2300_v46, %v2073_v19  ;;  %10829 = vmatprep.mubr.msk.bf16.mxu1 %vm11761_vm2, %v16397_v50  ;;  %v3399_v19 = vld [vmem:[#allocation2 + $0x181] sm:$0xff] }
 0x307   : > { %v10603_v6 = vpop.f32.mrf.mxu1  ;;  %v10662_v0 = vpop.f32.mrf.mxu0  ;;  %v3409_v46 = vpack.c.bf16 %v3399_v19, %v3398_v14 }
 0x309   : > { %v2030_v61 = vpop.f32.mrf.mxu1  ;;  %v2305_v44 = vpop.f32.mrf.mxu0  ;;  %10902 = vmatmul.mubr.msk.bf16.gmra.mxu0 %vm278_vm1, %v3408_v22 }
 0x30a   : > { %v2075_v45 = vadd.f32 %v2030_v61, %v13117_v23  ;;  %v13408_v33 = vadd.f32 %v2305_v44, %v2074_v29  ;;  %10905 = vmatprep.mubr.msk.bf16.mxu0 %vm11761_vm2, %v16397_v50  ;;  %v13418_v23 = vld [vmem:[#allocation2 + $0x190] sm:$0xff]  ;;  %v13420_v29 = vld [vmem:[#allocation2 + $0x188] sm:$0xff] }
 0x30b   : > { %v10604_v43 = vpop.f32.mrf.mxu1  ;;  %v10665_v13 = vpop.f32.mrf.mxu0  ;;  %v3112_v22 = vpack.c.bf16 %v13418_v23, %v13420_v29 }
 0x30c   : > { %v3401_v43 = vld [vmem:[#allocation2 + $0x191] sm:$0xff] }
 0x30d   : > { %v2035_v47 = vpop.f32.mrf.mxu1  ;;  %v2308_v24 = vpop.f32.mrf.mxu0  ;;  %10830 = vmatmul.mubr.msk.bf16.gmra.mxu1 %vm278_vm1, %v3111_v4 }
 0x30e   : > { %v2076_v36 = vadd.f32 %v2035_v47, %v13126_v28  ;;  %v13414_v57 = vadd.f32 %v2308_v24, %v2075_v45  ;;  %10833 = vmatprep.mubr.msk.bf16.mxu1 %vm11761_vm2, %v16397_v50  ;;  %v3400_v45 = vld [vmem:[#allocation2 + $0x189] sm:$0xff] }
 0x30f   : > { %v10607_v32 = vpop.f32.mrf.mxu1  ;;  %v10666_v62 = vpop.f32.mrf.mxu0 }
 0x310   : > { %v3058_v32 = vld [vmem:[#allocation2 + $0x107] sm:$0xff]  ;;  %v3059_v62 = vld [vmem:[#allocation2 + $0x10f] sm:$0xff] }
 0x311   : > { %v2038_v6 = vpop.f32.mrf.mxu1  ;;  %v2313_v0 = vpop.f32.mrf.mxu0  ;;  %10906 = vmatmul.mubr.msk.bf16.gmra.mxu0 %vm278_vm1, %v3409_v46  ;;  %v9474_v46 = vld [vmem:[%s16299_s1 + $0x6] sm:$0x3] }
 0x312   : > { %v2077_v28 = vadd.f32 %v2038_v6, %v13132_v42  ;;  %v13426_v61 = vadd.f32 %v2313_v0, %v2076_v36  ;;  %10909 = vmatprep.mubr.msk.bf16.mxu0 %vm11761_vm2, %v16397_v50  ;;  %v3410_v36 = vpack.c.bf16 %v3401_v43, %v3400_v45  ;;  %v3621_v45 = vsel %vm610_vm0, %v9474_v46, 0  ;;  %v9504_v43 = vld [vmem:[%s16299_s1 + $0xc] sm:$0x3]  ;;  %v3060_v46 = vld [vmem:[#allocation2 + $0x117] sm:$0xff] }
 0x313   : > { %v10608_v44 = vpop.f32.mrf.mxu1  ;;  %v10669_v4 = vpop.f32.mrf.mxu0 }
 0x314   : > { %v3076_v4 = vpack.c.bf16 %v3059_v62, %v3058_v32  ;;  %v4164_v32 = vsel %vm610_vm0, %v9504_v43, 0 }
 0x315   : > { %v2043_v13 = vpop.f32.mrf.mxu1  ;;  %v2316_v14 = vpop.f32.mrf.mxu0  ;;  %10834 = vmatmul.mubr.msk.bf16.gmra.mxu1 %vm278_vm1, %v3112_v22 }
 0x316   : > { %v2078_v19 = vadd.f32 %v2043_v13, %v13141_v12  ;;  %v13432_v47 = vadd.f32 %v2316_v14, %v2077_v28  ;;  %10839 = vmatprep.mubr.msk.bf16.mxu1 %vm11761_vm2, %v16397_v50 }
 0x317   : > { %v10611_v42 = vpop.f32.mrf.mxu1  ;;  %v10670_v24 = vpop.f32.mrf.mxu0 }
 0x319   : > { %v2046_v6 = vpop.f32.mrf.mxu1  ;;  %v2321_v0 = vpop.f32.mrf.mxu0  ;;  %10910 = vmatmul.mubr.msk.bf16.gmra.mxu0 %vm278_vm1, %v3410_v36  ;;  %v3764_v36 = vpack.c.bf16 %v13257_v5, %v13228_v8 }
 0x31a   : > { %v2079_v12 = vadd.f32 %v2046_v6, %v13146_v60  ;;  %v13441_v22 = vadd.f32 %v2321_v0, %v2078_v19  ;;  %10953 = vmatprep.mubr.msk.bf16.mxu0 %vm11761_vm2, %v16397_v50  ;;  %v13454_v60 = vpop.permute.xlu1 %2987  ;;  %v13461_v6 = vld [vmem:[#allocation2 + $0x11f] sm:$0xff] }
 0x31b   : > { %v10612_v28 = vpop.f32.mrf.mxu1  ;;  %v10673_v44 = vpop.f32.mrf.mxu0  ;;  %16484 = vst [vmem:[#allocation9_spill] sm:$0xff] %v13454_v60  ;;  %vm2995_vm4 = vcmp.eq.s32.totalorder %v13454_v60, 1 }
 0x31d   : > { %v2324_v13 = vpop.f32.mrf.mxu0  ;;  %v2487_v14 = vpop.f32.mrf.mxu1  ;;  %10840 = vmatmul.mubr.msk.bf16.vlgmr.msra.gmra.mxu1 %vm278_vm1, %v3076_v4 }
 0x31e   : > { %v13450_v42 = vadd.f32 %v2324_v13, %v2079_v12  ;;  %10914 = vmatpush3.bf16.msra.mxu1 %v3621_v45  ;;  %10843 = vmatprep.mubr.msk.bf16.mxu1 %vm11761_vm2, %v16397_v50  ;;  %v2606_v62 = vadd.f32 %v2487_v14, %v13156_v34  ;;  %v13466_v12 = vld [vmem:[%s16300_s2] ss:$0 sm:$0xff]  ;;  %v3077_v34 = vpack.c.bf16 %v13461_v6, %v3060_v46  ;;  %v13475_v43 = vpop.permute.xlu1 %2990 }
 0x31f   : > { %v10674_v19 = vpop.f32.mrf.mxu0  ;;  %v10679_v24 = vpop.f32.mrf.mxu1  ;;  %10989 = vmatprep.subr.bf16.mxu1 %v16397_v50  ;;  %16485 = vst [vmem:[#allocation8_spill] sm:$0xff] %v13475_v43  ;;  %vm2996_vm5 = vcmp.eq.s32.totalorder %v13475_v43, 1 }
 0x321   : > { %v2490_v0 = vpop.f32.mrf.mxu1  ;;  %v2765_v28 = vpop.f32.mrf.mxu0  ;;  %10954 = vmatmul.mubr.msk.bf16.vlgmr.msra.gmra.mxu0 %vm278_vm1, %v3764_v36 }
 0x322   : > { %v2884_v44 = vadd.f32 %v2765_v28, %v2606_v62  ;;  %10957 = vmatprep.mubr.msk.bf16.mxu0 %vm11761_vm2, %v16397_v50  ;;  %11028 = vmatpush3.bf16.msra.mxu0 %v4164_v32  ;;  %v2607_v4 = vadd.f32 %v2490_v0, %v13192_v27  ;;  %v3765_v27 = vpack.c.bf16 %v13327_v20, %v13250_v59  ;;  %v13485_v0 = vld [vmem:[#allocation2 + $0x127] sm:$0xff]  ;;  %v13487_v28 = vld [vmem:[#allocation2 + $0x12f] sm:$0xff] }
 0x323   : > { %v10680_v8 = vpop.f32.mrf.mxu1  ;;  %v10741_v5 = vpop.f32.mrf.mxu0  ;;  %11103 = vmatprep.subr.bf16.mxu0 %v16397_v50 }
 0x324   : > { %v2920_v45 = vadd.f32 %v13466_v12, %v2884_v44 }
 0x325   : > { %v2495_v13 = vpop.f32.mrf.mxu1  ;;  %v2768_v14 = vpop.f32.mrf.mxu0  ;;  %10844 = vmatmul.mubr.msk.bf16.gmra.mxu1 %vm278_vm1, %v3077_v34 }
 0x326   : > { %v2950_v19 = vmax.f32 %v2920_v45, 0.0  ;;  %v2885_v24 = vadd.f32 %v2768_v14, %v2607_v4  ;;  %10847 = vmatprep.mubr.msk.bf16.mxu1 %vm11761_vm2, %v16397_v50  ;;  %v2608_v62 = vadd.f32 %v2495_v13, %v13201_v55  ;;  %v13494_v55 = vpop.permute.xlu1 %2993  ;;  %v3078_v45 = vpack.c.bf16 %v13487_v28, %v13485_v0 }
 0x327   : > { %v10683_v36 = vpop.f32.mrf.mxu1  ;;  %v10742_v32 = vpop.f32.mrf.mxu0  ;;  %16486 = vst [vmem:[#allocation10_spill] sm:$0xff] %v13494_v55  ;;  %vm2997_vm6 = vcmp.eq.s32.totalorder %v13494_v55, 1  ;;  %v4290_v55 = vld [vmem:[#allocation2 + $0x140] sm:$0xff] }
 0x328   : > { %v2921_v46 = vadd.f32 %v13466_v12, %v2885_v24  ;;  %v2998_v44 = vsel %vm2995_vm4, %v2950_v19, 0.0 }
 0x329   : > { %v2498_v8 = vpop.f32.mrf.mxu1  ;;  %v2773_v5 = vpop.f32.mrf.mxu0  ;;  %10958 = vmatmul.mubr.msk.bf16.gmra.mxu0 %vm278_vm1, %v3765_v27  ;;  %3028 = vst.msk [vmem:[#allocation3 + $0x30] sm:$0xff] %vm439_vm3, %v2998_v44 }
 0x32a   : > { %v2951_v59 = vmax.f32 %v2921_v46, 0.0  ;;  %v2886_v20 = vadd.f32 %v2773_v5, %v2608_v62  ;;  %10961 = vmatprep.mubr.msk.bf16.mxu0 %vm11761_vm2, %v16397_v50  ;;  %v2609_v13 = vadd.f32 %v2498_v8, %v13207_v51  ;;  %v3766_v46 = vpack.c.bf16 %v13348_v49, %v13329_v1  ;;  %v13513_v5 = vld [vmem:[#allocation2 + $0x13f] sm:$0xff] }
 0x32b   : > { %v10684_v34 = vpop.f32.mrf.mxu1  ;;  %v10745_v4 = vpop.f32.mrf.mxu0 }
 0x32c   : > { %v2922_v14 = vadd.f32 %v13466_v12, %v2886_v20  ;;  %v2999_v19 = vsel %vm2996_vm5, %v2951_v59, 0.0 }
 0x32d   : > { %v2503_v24 = vpop.f32.mrf.mxu1  ;;  %v2776_v36 = vpop.f32.mrf.mxu0  ;;  %10848 = vmatmul.mubr.msk.bf16.gmra.mxu1 %vm278_vm1, %v3078_v45  ;;  %3029 = vst.msk [vmem:[#allocation3 + $0x38] sm:$0xff] %vm439_vm3, %v2999_v19 }
 0x32e   : > { %v2952_v32 = vmax.f32 %v2922_v14, 0.0  ;;  %v2887_v27 = vadd.f32 %v2776_v36, %v2609_v13  ;;  %10851 = vmatprep.mubr.msk.bf16.mxu1 %vm11761_vm2, %v16397_v50  ;;  %v2610_v44 = vadd.f32 %v2503_v24, %v13215_v41  ;;  %v13519_v13 = vld [vmem:[#allocation2 + $0x137] sm:$0xff] }
 0x32f   : > { %v10687_v62 = vpop.f32.mrf.mxu1  ;;  %v10746_v51 = vpop.f32.mrf.mxu0  ;;  %v13525_v49 = vpack.c.bf16 %v13513_v5, %v13519_v13 }
 0x330   : > { %v2923_v8 = vadd.f32 %v13466_v12, %v2887_v27  ;;  %v3000_v59 = vsel %vm2997_vm6, %v2952_v32, 0.0 }
 0x331   : > { %v2506_v20 = vpop.f32.mrf.mxu1  ;;  %v2781_v34 = vpop.f32.mrf.mxu0  ;;  %10962 = vmatmul.mubr.msk.bf16.gmra.mxu0 %vm278_vm1, %v3766_v46  ;;  %3030 = vst.msk [vmem:[#allocation3 + $0x40] sm:$0xff] %vm439_vm3, %v3000_v59 }
 0x332   : > { %v2953_v4 = vmax.f32 %v2923_v8, 0.0  ;;  %v2888_v45 = vadd.f32 %v2781_v34, %v2610_v44  ;;  %10965 = vmatprep.mubr.msk.bf16.mxu0 %vm11761_vm2, %v16397_v50  ;;  %v2611_v19 = vadd.f32 %v2506_v20, %v13224_v10  ;;  %v3767_v44 = vpack.c.bf16 %v13366_v48, %v13346_v40  ;;  %v13542_v20 = vld [vmem:[#allocation2 + $0x14f] sm:$0xff] }
 0x333   : > { %v10688_v41 = vpop.f32.mrf.mxu1  ;;  %v10749_v1 = vpop.f32.mrf.mxu0 }
 0x334   : > { %v3001_v14 = vsel %vm2995_vm4, %v2953_v4, 0.0  ;;  %v2924_v24 = vadd.f32 %v13466_v12, %v2888_v45  ;;  %v13546_v1 = vld [vmem:[#allocation2 + $0x147] sm:$0xff] }
 0x335   : > { %3031 = vst.msk [vmem:[#allocation3 + $0x48] sm:$0xff] %vm439_vm3, %v3001_v14  ;;  %v2511_v36 = vpop.f32.mrf.mxu1  ;;  %v2784_v32 = vpop.f32.mrf.mxu0  ;;  %10852 = vmatmul.mubr.msk.bf16.gmra.mxu1 %vm278_vm1, %v13525_v49 }
 0x336   : > { %v2954_v27 = vmax.f32 %v2924_v24, 0.0  ;;  %v2889_v62 = vadd.f32 %v2784_v32, %v2611_v19  ;;  %10855 = vmatprep.mubr.msk.bf16.mxu1 %vm11761_vm2, %v16397_v50  ;;  %v2612_v8 = vadd.f32 %v2511_v36, %v13233_v39  ;;  %v13552_v39 = vpack.c.bf16 %v13542_v20, %v13546_v1 }
 0x337   : > { %v10691_v51 = vpop.f32.mrf.mxu1  ;;  %v10750_v46 = vpop.f32.mrf.mxu0 }
 0x338   : > { %v3002_v10 = vsel %vm2996_vm5, %v2954_v27, 0.0  ;;  %v2925_v59 = vadd.f32 %v13466_v12, %v2889_v62 }
 0x339   : > { %3032 = vst.msk [vmem:[#allocation3 + $0x50] sm:$0xff] %vm439_vm3, %v3002_v10  ;;  %v2514_v34 = vpop.f32.mrf.mxu1  ;;  %v2789_v4 = vpop.f32.mrf.mxu0  ;;  %10966 = vmatmul.mubr.msk.bf16.gmra.mxu0 %vm278_vm1, %v3767_v44  ;;  %v3768_v44 = vpack.c.bf16 %v13382_v54, %v13364_v30 }
 0x33a   : > { %v2955_v45 = vmax.f32 %v2925_v59, 0.0  ;;  %v2890_v41 = vadd.f32 %v2789_v4, %v2612_v8  ;;  %10969 = vmatprep.mubr.msk.bf16.mxu0 %vm11761_vm2, %v16397_v50  ;;  %v2613_v19 = vadd.f32 %v2514_v34, %v13243_v52  ;;  %v13569_v59 = vld [vmem:[#allocation2 + $0x157] sm:$0xff]  ;;  %v13571_v34 = vld [vmem:[#allocation2 + $0x15f] sm:$0xff] }
 0x33b   : > { %v10692_v40 = vpop.f32.mrf.mxu1  ;;  %v10753_v48 = vpop.f32.mrf.mxu0 }
 0x33c   : > { %v3003_v14 = vsel %vm2997_vm6, %v2955_v45, 0.0  ;;  %v2926_v24 = vadd.f32 %v13466_v12, %v2890_v41 }
 0x33d   : > { %3033 = vst.msk [vmem:[#allocation3 + $0x58] sm:$0xff] %vm439_vm3, %v3003_v14  ;;  %v2519_v36 = vpop.f32.mrf.mxu1  ;;  %v2792_v32 = vpop.f32.mrf.mxu0  ;;  %10856 = vmatmul.mubr.msk.bf16.gmra.mxu1 %vm278_vm1, %v13552_v39 }
 0x33e   : > { %v2956_v27 = vmax.f32 %v2926_v24, 0.0  ;;  %v2891_v62 = vadd.f32 %v2792_v32, %v2613_v19  ;;  %10859 = vmatprep.mubr.msk.bf16.mxu1 %vm11761_vm2, %v16397_v50  ;;  %v2614_v10 = vadd.f32 %v2519_v36, %v13255_v35  ;;  %v13579_v35 = vpack.c.bf16 %v13571_v34, %v13569_v59 }
 0x33f   : > { %v10695_v51 = vpop.f32.mrf.mxu1  ;;  %v10754_v46 = vpop.f32.mrf.mxu0 }
 0x340   : > { %v3004_v52 = vsel %vm2995_vm4, %v2956_v27, 0.0  ;;  %v2927_v8 = vadd.f32 %v13466_v12, %v2891_v62  ;;  %v3769_v46 = vpack.c.bf16 %v13402_v7, %v13384_v25 }
 0x341   : > { %3034 = vst.msk [vmem:[#allocation3 + $0x60] sm:$0xff] %vm439_vm3, %v3004_v52  ;;  %v2522_v4 = vpop.f32.mrf.mxu1  ;;  %v2797_v45 = vpop.f32.mrf.mxu0  ;;  %10970 = vmatmul.mubr.msk.bf16.gmra.mxu0 %vm278_vm1, %v3768_v44 }
 0x342   : > { %v2957_v41 = vmax.f32 %v2927_v8, 0.0  ;;  %v2892_v40 = vadd.f32 %v2797_v45, %v2614_v10  ;;  %10973 = vmatprep.mubr.msk.bf16.mxu0 %vm11761_vm2, %v16397_v50  ;;  %v2615_v14 = vadd.f32 %v2522_v4, %v13268_v37  ;;  %v13596_v10 = vld [vmem:[#allocation2 + $0x16f] sm:$0xff] }
 0x343   : > { %v10696_v30 = vpop.f32.mrf.mxu1  ;;  %v10757_v54 = vpop.f32.mrf.mxu0 }
 0x344   : > { %v3005_v48 = vsel %vm2996_vm5, %v2957_v41, 0.0  ;;  %v2928_v19 = vadd.f32 %v13466_v12, %v2892_v40  ;;  %v13600_v40 = vld [vmem:[#allocation2 + $0x167] sm:$0xff] }
 0x345   : > { %3035 = vst.msk [vmem:[#allocation3 + $0x68] sm:$0xff] %vm439_vm3, %v3005_v48  ;;  %v2527_v24 = vpop.f32.mrf.mxu1  ;;  %v2800_v36 = vpop.f32.mrf.mxu0  ;;  %10860 = vmatmul.mubr.msk.bf16.gmra.mxu1 %vm278_vm1, %v13579_v35 }
 0x346   : > { %v2958_v32 = vmax.f32 %v2928_v19, 0.0  ;;  %v2893_v27 = vadd.f32 %v2800_v36, %v2615_v14  ;;  %10863 = vmatprep.mubr.msk.bf16.mxu1 %vm11761_vm2, %v16397_v50  ;;  %v2616_v44 = vadd.f32 %v2527_v24, %v13280_v56  ;;  %v13606_v56 = vpack.c.bf16 %v13596_v10, %v13600_v40 }
 0x347   : > { %v10699_v62 = vpop.f32.mrf.mxu1  ;;  %v10758_v51 = vpop.f32.mrf.mxu0 }
 0x348   : > { %v3006_v37 = vsel %vm2997_vm6, %v2958_v32, 0.0  ;;  %v2929_v52 = vadd.f32 %v13466_v12, %v2893_v27  ;;  %v3770_v62 = vpack.c.bf16 %v13420_v29, %v13400_v38  ;;  %v3761_v38 = vld [vmem:[#allocation2 + $0x198] sm:$0xff] }
 0x349   : > { %3036 = vst.msk [vmem:[#allocation3 + $0x70] sm:$0xff] %vm439_vm3, %v3006_v37  ;;  %v2530_v8 = vpop.f32.mrf.mxu1  ;;  %v2805_v4 = vpop.f32.mrf.mxu0  ;;  %10974 = vmatmul.mubr.msk.bf16.gmra.mxu0 %vm278_vm1, %v3769_v46  ;;  %v13623_v37 = vld [vmem:[#allocation2 + $0x17f] sm:$0xff] }
 0x34a   : > { %v2959_v45 = vmax.f32 %v2929_v52, 0.0  ;;  %v2894_v41 = vadd.f32 %v2805_v4, %v2616_v44  ;;  %10977 = vmatprep.mubr.msk.bf16.mxu0 %vm11761_vm2, %v16397_v50  ;;  %v2617_v54 = vadd.f32 %v2530_v8, %v13291_v31 }
 0x34b   : > { %v10700_v25 = vpop.f32.mrf.mxu1  ;;  %v10761_v7 = vpop.f32.mrf.mxu0 }
 0x34c   : > { %v3007_v30 = vsel %vm2995_vm4, %v2959_v45, 0.0  ;;  %v2930_v48 = vadd.f32 %v13466_v12, %v2894_v41  ;;  %v13627_v45 = vld [vmem:[#allocation2 + $0x177] sm:$0xff] }
 0x34d   : > { %3037 = vst.msk [vmem:[#allocation3 + $0x78] sm:$0xff] %vm439_vm3, %v3007_v30  ;;  %v2535_v14 = vpop.f32.mrf.mxu1  ;;  %v2808_v19 = vpop.f32.mrf.mxu0  ;;  %10864 = vmatmul.mubr.msk.bf16.gmra.mxu1 %vm278_vm1, %v13606_v56  ;;  %v13633_v41 = vpack.c.bf16 %v13623_v37, %v13627_v45 }
 0x34e   : > { %v2960_v24 = vmax.f32 %v2930_v48, 0.0  ;;  %v2895_v36 = vadd.f32 %v2808_v19, %v2617_v54  ;;  %10867 = vmatprep.mubr.msk.bf16.mxu1 %vm11761_vm2, %v16397_v50  ;;  %v2618_v51 = vadd.f32 %v2535_v14, %v13301_v11  ;;  %v3771_v14 = vpack.c.bf16 %v3761_v38, %v13418_v23 }
 0x34f   : > { %v10703_v32 = vpop.f32.mrf.mxu1  ;;  %v10762_v27 = vpop.f32.mrf.mxu0 }
 0x350   : > { %v3008_v31 = vsel %vm2996_vm5, %v2960_v24, 0.0  ;;  %v2931_v46 = vadd.f32 %v13466_v12, %v2895_v36 }
 0x351   : > { %3038 = vst.msk [vmem:[#allocation3 + $0x80] sm:$0xff] %vm439_vm3, %v3008_v31  ;;  %v2538_v44 = vpop.f32.mrf.mxu1  ;;  %v2813_v52 = vpop.f32.mrf.mxu0  ;;  %10978 = vmatmul.mubr.msk.bf16.gmra.mxu0 %vm278_vm1, %v3770_v62  ;;  %v13649_v31 = vld [vmem:[#allocation2 + $0x187] sm:$0xff] }
 0x352   : > { %v2961_v8 = vmax.f32 %v2931_v46, 0.0  ;;  %v2896_v4 = vadd.f32 %v2813_v52, %v2618_v51  ;;  %10981 = vmatprep.mubr.msk.bf16.mxu0 %vm11761_vm2, %v16397_v50  ;;  %v2619_v7 = vadd.f32 %v2538_v44, %v13309_v21  ;;  %v13651_v51 = vld [vmem:[#allocation2 + $0x18f] sm:$0xff] }
 0x353   : > { %v10704_v29 = vpop.f32.mrf.mxu1  ;;  %v10765_v11 = vpop.f32.mrf.mxu0 }
 0x354   : > { %v3009_v25 = vsel %vm2997_vm6, %v2961_v8, 0.0  ;;  %v2932_v30 = vadd.f32 %v13466_v12, %v2896_v4  ;;  %v3762_v8 = vld [vmem:[#allocation2 + $0x1a0] sm:$0xff]  ;;  %v3763_v4 = vld [vmem:[#allocation2 + $0x1a8] sm:$0xff]  ;;  %v13659_v29 = vpack.c.bf16 %v13651_v51, %v13649_v31 }
 0x355   : > { %3039 = vst.msk [vmem:[#allocation3 + $0x88] sm:$0xff] %vm439_vm3, %v3009_v25  ;;  %v2543_v54 = vpop.f32.mrf.mxu1  ;;  %v2816_v48 = vpop.f32.mrf.mxu0  ;;  %10868 = vmatmul.mubr.msk.bf16.gmra.mxu1 %vm278_vm1, %v13633_v41 }
 0x356   : > { %v2962_v19 = vmax.f32 %v2932_v30, 0.0  ;;  %v2897_v24 = vadd.f32 %v2816_v48, %v2619_v7  ;;  %10871 = vmatprep.mubr.msk.bf16.mxu1 %vm11761_vm2, %v16397_v50  ;;  %v2620_v27 = vadd.f32 %v2543_v54, %v13316_v17  ;;  %v3772_v48 = vpack.c.bf16 %v3763_v4, %v3762_v8 }
 0x357   : > { %v10707_v36 = vpop.f32.mrf.mxu1  ;;  %v10766_v32 = vpop.f32.mrf.mxu0 }
 0x358   : > { %v3010_v21 = vsel %vm2995_vm4, %v2962_v19, 0.0  ;;  %v2933_v62 = vadd.f32 %v13466_v12, %v2897_v24 }
 0x359   : > { %3040 = vst.msk [vmem:[#allocation3 + $0x90] sm:$0xff] %vm439_vm3, %v3010_v21  ;;  %v2546_v23 = vpop.f32.mrf.mxu1  ;;  %v2821_v46 = vpop.f32.mrf.mxu0  ;;  %10982 = vmatmul.mubr.msk.bf16.gmra.mxu0 %vm278_vm1, %v3771_v14 }
 0x35a   : > { %v2963_v44 = vmax.f32 %v2933_v62, 0.0  ;;  %v2898_v52 = vadd.f32 %v2821_v46, %v2620_v27  ;;  %10985 = vmatprep.mubr.msk.bf16.mxu0 %vm11761_vm2, %v16397_v50  ;;  %v2621_v25 = vadd.f32 %v2546_v23, %v13323_v16  ;;  %v9494_v27 = vld [vmem:[%s16299_s1 + $0xa] sm:$0x3] }
 0x35b   : > { %v10708_v17 = vpop.f32.mrf.mxu1  ;;  %v10769_v38 = vpop.f32.mrf.mxu0  ;;  %v3983_v4 = vsel %vm610_vm0, %v9494_v27, 0 }
 0x35c   : > { %v3011_v11 = vsel %vm2996_vm5, %v2963_v44, 0.0  ;;  %v2934_v7 = vadd.f32 %v13466_v12, %v2898_v52 }
 0x35d   : > { %3041 = vst.msk [vmem:[#allocation3 + $0x98] sm:$0xff] %vm439_vm3, %v3011_v11  ;;  %v2551_v30 = vpop.f32.mrf.mxu1  ;;  %v2824_v54 = vpop.f32.mrf.mxu0  ;;  %10872 = vmatmul.mubr.msk.bf16.gmra.mxu1 %vm278_vm1, %v13659_v29 }
 0x35e   : > { %v2964_v14 = vmax.f32 %v2934_v7, 0.0  ;;  %v2899_v19 = vadd.f32 %v2824_v54, %v2621_v25  ;;  %10915 = vmatprep.mubr.msk.bf16.mxu1 %vm11761_vm2, %v16397_v50  ;;  %v2622_v32 = vadd.f32 %v2551_v30, %v13334_v53  ;;  %v3583_v53 = vpack.c.bf16 %v13485_v0, %v13461_v6  ;;  %v9524_v25 = vld [vmem:[%s16299_s1 + $0x10] sm:$0x3] }
 0x35f   : > { %v10711_v24 = vpop.f32.mrf.mxu1  ;;  %v10770_v36 = vpop.f32.mrf.mxu0 }
 0x360   : > { %v3012_v16 = vsel %vm2997_vm6, %v2964_v14, 0.0  ;;  %v2935_v21 = vadd.f32 %v13466_v12, %v2899_v19 }
 0x361   : > { %3042 = vst.msk [vmem:[#allocation3 + $0xa0] sm:$0xff] %vm439_vm3, %v3012_v16  ;;  %v2554_v62 = vpop.f32.mrf.mxu1  ;;  %v2829_v23 = vpop.f32.mrf.mxu0  ;;  %10986 = vmatmul.mubr.msk.bf16.gmra.mxu0 %vm278_vm1, %v3772_v48  ;;  %v4526_v48 = vsel %vm610_vm0, %v9524_v25, 0 }
 0x362   : > { %v2965_v46 = vmax.f32 %v2935_v21, 0.0  ;;  %v2900_v44 = vadd.f32 %v2829_v23, %v2622_v32  ;;  %11029 = vmatprep.mubr.msk.bf16.mxu0 %vm11761_vm2, %v16397_v50  ;;  %v2623_v38 = vadd.f32 %v2554_v62, %v13342_v18 }
 0x363   : > { %v10712_v52 = vpop.f32.mrf.mxu1  ;;  %v10773_v8 = vpop.f32.mrf.mxu0 }
 0x364   : > { %v3013_v17 = vsel %vm2995_vm4, %v2965_v46, 0.0  ;;  %v2936_v11 = vadd.f32 %v13466_v12, %v2900_v44 }
 0x365   : > { %3043 = vst.msk [vmem:[#allocation3 + $0xa8] sm:$0xff] %vm439_vm3, %v3013_v17  ;;  %v2559_v7 = vpop.f32.mrf.mxu1  ;;  %v2832_v30 = vpop.f32.mrf.mxu0  ;;  %10916 = vmatmul.mubr.msk.bf16.vlgmr.msra.gmra.mxu1 %vm278_vm1, %v3583_v53 }
 0x366   : > { %v2966_v6 = vmax.f32 %v2936_v11, 0.0  ;;  %v2901_v0 = vadd.f32 %v2832_v30, %v2623_v38  ;;  %10990 = vmatpush3.bf16.msra.mxu1 %v3983_v4  ;;  %10919 = vmatprep.mubr.msk.bf16.mxu1 %vm11761_vm2, %v16397_v50  ;;  %v2624_v19 = vadd.f32 %v2559_v7, %v13354_v9  ;;  %v3584_v9 = vpack.c.bf16 %v13519_v13, %v13487_v28 }
 0x367   : > { %v10715_v54 = vpop.f32.mrf.mxu1  ;;  %v10774_v18 = vpop.f32.mrf.mxu0  ;;  %11065 = vmatprep.subr.bf16.mxu1 %v16397_v50 }
 0x368   : > { %v3014_v14 = vsel %vm2996_vm5, %v2966_v6, 0.0  ;;  %v2937_v24 = vadd.f32 %v13466_v12, %v2901_v0  ;;  %v3585_v0 = vpack.c.bf16 %v13546_v1, %v13513_v5  ;;  %v13738_v5 = vld [vmem:[%s16301_s3] sm:$0xf] }
 0x369   : > { %3044 = vst.msk [vmem:[#allocation3 + $0xb0] sm:$0xff] %vm439_vm3, %v3014_v14  ;;  %v2562_v36 = vpop.f32.mrf.mxu1  ;;  %v2837_v16 = vpop.f32.mrf.mxu0  ;;  %11030 = vmatmul.mubr.msk.bf16.vlgmr.msra.gmra.mxu0 %vm278_vm1, %v13525_v49 }
 0x36a   : > { %v2967_v32 = vmax.f32 %v2937_v24, 0.0  ;;  %v2902_v21 = vadd.f32 %v2837_v16, %v2624_v19  ;;  %11033 = vmatprep.mubr.msk.bf16.mxu0 %vm11761_vm2, %v16397_v50  ;;  %11104 = vmatpush3.bf16.msra.mxu0 %v4526_v48  ;;  %v2625_v46 = vadd.f32 %v2562_v36, %v13360_v15 }
 0x36b   : > { %v10716_v27 = vpop.f32.mrf.mxu1  ;;  %v10777_v62 = vpop.f32.mrf.mxu0  ;;  %11612 = vmatprep.subr.msk.bf16.mxu0 %vm4883_vm7, %v13738_v5 }
 0x36c   : > { %v3015_v23 = vsel %vm2997_vm6, %v2967_v32, 0.0  ;;  %v2938_v44 = vadd.f32 %v13466_v12, %v2902_v21 }
 0x36d   : > { %3045 = vst.msk [vmem:[#allocation3 + $0xb8] sm:$0xff] %vm439_vm3, %v3015_v23  ;;  %v2567_v49 = vpop.f32.mrf.mxu1  ;;  %v2840_v52 = vpop.f32.mrf.mxu0  ;;  %10920 = vmatmul.mubr.msk.bf16.gmra.mxu1 %vm278_vm1, %v3584_v9 }
 0x36e   : > { %v2968_v8 = vmax.f32 %v2938_v44, 0.0  ;;  %v2903_v53 = vadd.f32 %v2840_v52, %v2625_v46  ;;  %10923 = vmatprep.mubr.msk.bf16.mxu1 %vm11761_vm2, %v16397_v50  ;;  %v2626_v15 = vadd.f32 %v2567_v49, %v13372_v26  ;;  %v3586_v46 = vpack.c.bf16 %v13569_v59, %v13542_v20 }
 0x36f   : > { %v10719_v4 = vpop.f32.mrf.mxu1  ;;  %v10778_v28 = vpop.f32.mrf.mxu0 }
 0x370   : > { %v3016_v13 = vsel %vm2995_vm4, %v2968_v8, 0.0  ;;  %v2939_v17 = vadd.f32 %v13466_v12, %v2903_v53 }
 0x371   : > { %3046 = vst.msk [vmem:[#allocation3 + $0xc0] sm:$0xff] %vm439_vm3, %v3016_v13  ;;  %v2570_v38 = vpop.f32.mrf.mxu1  ;;  %v2845_v11 = vpop.f32.mrf.mxu0  ;;  %11034 = vmatmul.mubr.msk.bf16.gmra.mxu0 %vm278_vm1, %v13552_v39 }
 0x372   : > { %v2969_v25 = vmax.f32 %v2939_v17, 0.0  ;;  %v2904_v7 = vadd.f32 %v2845_v11, %v2626_v15  ;;  %11037 = vmatprep.mubr.msk.bf16.mxu0 %vm11761_vm2, %v16397_v50  ;;  %v2627_v54 = vadd.f32 %v2570_v38, %v13378_v3 }
 0x373   : > { %v10720_v30 = vpop.f32.mrf.mxu1  ;;  %v10781_v6 = vpop.f32.mrf.mxu0 }
 0x374   : > { %v3017_v26 = vsel %vm2996_vm5, %v2969_v25, 0.0  ;;  %v2940_v18 = vadd.f32 %v13466_v12, %v2904_v7  ;;  %v3587_v7 = vpack.c.bf16 %v13600_v40, %v13571_v34 }
 0x375   : > { %3047 = vst.msk [vmem:[#allocation3 + $0xc8] sm:$0xff] %vm439_vm3, %v3017_v26  ;;  %v2575_v39 = vpop.f32.mrf.mxu1  ;;  %v2848_v48 = vpop.f32.mrf.mxu0  ;;  %10924 = vmatmul.mubr.msk.bf16.gmra.mxu1 %vm278_vm1, %v3585_v0 }
 0x376   : > { %v2970_v14 = vmax.f32 %v2940_v18, 0.0  ;;  %v2905_v19 = vadd.f32 %v2848_v48, %v2627_v54  ;;  %10927 = vmatprep.mubr.msk.bf16.mxu1 %vm11761_vm2, %v16397_v50  ;;  %v2628_v36 = vadd.f32 %v2575_v39, %v13388_v63 }
 0x377   : > { %v10723_v3 = vpop.f32.mrf.mxu1  ;;  %v10782_v1 = vpop.f32.mrf.mxu0 }
 0x378   : > { %v3018_v24 = vsel %vm2997_vm6, %v2970_v14, 0.0  ;;  %v2941_v16 = vadd.f32 %v13466_v12, %v2905_v19 }
 0x379   : > { %3048 = vst.msk [vmem:[#allocation3 + $0xd0] sm:$0xff] %vm439_vm3, %v3018_v24  ;;  %v2578_v32 = vpop.f32.mrf.mxu1  ;;  %v2853_v21 = vpop.f32.mrf.mxu0  ;;  %11038 = vmatmul.mubr.msk.bf16.gmra.mxu0 %vm278_vm1, %v13579_v35 }
 0x37a   : > { %v2971_v27 = vmax.f32 %v2941_v16, 0.0  ;;  %v2906_v62 = vadd.f32 %v2853_v21, %v2628_v36  ;;  %11041 = vmatprep.mubr.msk.bf16.mxu0 %vm11761_vm2, %v16397_v50  ;;  %v2629_v44 = vadd.f32 %v2578_v32, %v13396_v2  ;;  %v3588_v36 = vpack.c.bf16 %v13627_v45, %v13596_v10 }
 0x37b   : > { %v10724_v9 = vpop.f32.mrf.mxu1  ;;  %v10785_v23 = vpop.f32.mrf.mxu0 }
 0x37c   : > { %v3019_v63 = vsel %vm2995_vm4, %v2971_v27, 0.0  ;;  %v2942_v49 = vadd.f32 %v13466_v12, %v2906_v62 }
 0x37d   : > { %3049 = vst.msk [vmem:[#allocation3 + $0xd8] sm:$0xff] %vm439_vm3, %v3019_v63  ;;  %v2583_v35 = vpop.f32.mrf.mxu1  ;;  %v2856_v52 = vpop.f32.mrf.mxu0  ;;  %10928 = vmatmul.mubr.msk.bf16.gmra.mxu1 %vm278_vm1, %v3586_v46 }
 0x37e   : > { %v2972_v8 = vmax.f32 %v2942_v49, 0.0  ;;  %v2907_v53 = vadd.f32 %v2856_v52, %v2629_v44  ;;  %10931 = vmatprep.mubr.msk.bf16.mxu1 %vm11761_vm2, %v16397_v50  ;;  %v2630_v2 = vadd.f32 %v2583_v35, %v13408_v33 }
 0x37f   : > { %v10727_v4 = vpop.f32.mrf.mxu1  ;;  %v10786_v20 = vpop.f32.mrf.mxu0 }
 0x380   : > { %v3020_v59 = vsel %vm2996_vm5, %v2972_v8, 0.0  ;;  %v2943_v28 = vadd.f32 %v13466_v12, %v2907_v53  ;;  %v3589_v8 = vpack.c.bf16 %v13649_v31, %v13623_v37  ;;  %v4121_v20 = vld [vmem:[#allocation2 + $0x19f] sm:$0xff] }
 0x381   : > { %3050 = vst.msk [vmem:[#allocation3 + $0xe0] sm:$0xff] %vm439_vm3, %v3020_v59  ;;  %v2586_v13 = vpop.f32.mrf.mxu1  ;;  %v2861_v15 = vpop.f32.mrf.mxu0  ;;  %11042 = vmatmul.mubr.msk.bf16.gmra.mxu0 %vm278_vm1, %v13606_v56 }
 0x382   : > { %v2973_v17 = vmax.f32 %v2943_v28, 0.0  ;;  %v2908_v38 = vadd.f32 %v2861_v15, %v2630_v2  ;;  %11045 = vmatprep.mubr.msk.bf16.mxu0 %vm11761_vm2, %v16397_v50  ;;  %v2631_v30 = vadd.f32 %v2586_v13, %v13414_v57  ;;  %v4120_v13 = vld [vmem:[#allocation2 + $0x197] sm:$0xff] }
 0x383   : > { %v10728_v11 = vpop.f32.mrf.mxu1  ;;  %v10789_v25 = vpop.f32.mrf.mxu0  ;;  %v4132_v15 = vpack.c.bf16 %v4121_v20, %v4120_v13 }
 0x384   : > { %v3021_v33 = vsel %vm2997_vm6, %v2973_v17, 0.0  ;;  %v2944_v6 = vadd.f32 %v13466_v12, %v2908_v38 }
 0x385   : > { %3051 = vst.msk [vmem:[#allocation3 + $0xe8] sm:$0xff] %vm439_vm3, %v3021_v33  ;;  %v2591_v56 = vpop.f32.mrf.mxu1  ;;  %v2864_v0 = vpop.f32.mrf.mxu0  ;;  %10932 = vmatmul.mubr.msk.bf16.gmra.mxu1 %vm278_vm1, %v3587_v7  ;;  %v4123_v7 = vld [vmem:[#allocation2 + $0x1af] sm:$0xff] }
 0x386   : > { %v2974_v26 = vmax.f32 %v2944_v6, 0.0  ;;  %v2909_v54 = vadd.f32 %v2864_v0, %v2631_v30  ;;  %10935 = vmatprep.mubr.msk.bf16.mxu1 %vm11761_vm2, %v16397_v50  ;;  %v2632_v57 = vadd.f32 %v2591_v56, %v13426_v61  ;;  %v3590_v6 = vpack.c.bf16 %v4120_v13, %v13651_v51  ;;  %v4122_v56 = vld [vmem:[#allocation2 + $0x1a7] sm:$0xff] }
 0x387   : > { %v10731_v18 = vpop.f32.mrf.mxu1  ;;  %v10790_v34 = vpop.f32.mrf.mxu0 }
 0x388   : > { %v3022_v40 = vsel %vm2995_vm4, %v2974_v26, 0.0  ;;  %v2945_v39 = vadd.f32 %v13466_v12, %v2909_v54  ;;  %v4133_v54 = vpack.c.bf16 %v4123_v7, %v4122_v56 }
 0x389   : > { %3052 = vst.msk [vmem:[#allocation3 + $0xf0] sm:$0xff] %vm439_vm3, %v3022_v40  ;;  %v2594_v48 = vpop.f32.mrf.mxu1  ;;  %v2869_v14 = vpop.f32.mrf.mxu0  ;;  %11046 = vmatmul.mubr.msk.bf16.gmra.mxu0 %vm278_vm1, %v13633_v41 }
 0x38a   : > { %v2975_v19 = vmax.f32 %v2945_v39, 0.0  ;;  %v2910_v3 = vadd.f32 %v2869_v14, %v2632_v57  ;;  %11049 = vmatprep.mubr.msk.bf16.mxu0 %vm11761_vm2, %v16397_v50  ;;  %v2633_v16 = vadd.f32 %v2594_v48, %v13432_v47  ;;  %v4124_v57 = vld [vmem:[#allocation2 + $0x1b7] sm:$0xff]  ;;  %v4125_v39 = vld [vmem:[#allocation2 + $0x1bf] sm:$0xff] }
 0x38b   : > { %v10732_v1 = vpop.f32.mrf.mxu1  ;;  %v10793_v24 = vpop.f32.mrf.mxu0 }
 0x38c   : > { %v3023_v61 = vsel %vm2996_vm5, %v2975_v19, 0.0  ;;  %v2946_v32 = vadd.f32 %v13466_v12, %v2910_v3  ;;  %v3591_v19 = vpack.c.bf16 %v4122_v56, %v4121_v20  ;;  %v4134_v24 = vpack.c.bf16 %v4125_v39, %v4124_v57 }
 0x38d   : > { %3053 = vst.msk [vmem:[#allocation3 + $0xf8] sm:$0xff] %vm439_vm3, %v3023_v61  ;;  %v2599_v41 = vpop.f32.mrf.mxu1  ;;  %v2872_v21 = vpop.f32.mrf.mxu0  ;;  %10936 = vmatmul.mubr.msk.bf16.gmra.mxu1 %vm278_vm1, %v3588_v36 }
 0x38e   : > { %v2976_v27 = vmax.f32 %v2946_v32, 0.0  ;;  %v2911_v62 = vadd.f32 %v2872_v21, %v2633_v16  ;;  %10939 = vmatprep.mubr.msk.bf16.mxu1 %vm11761_vm2, %v16397_v50  ;;  %v2634_v47 = vadd.f32 %v2599_v41, %v13441_v22  ;;  %v3927_v16 = vld [vmem:[#allocation2 + $0x121] sm:$0xff]  ;;  %v3928_v32 = vld [vmem:[#allocation2 + $0x129] sm:$0xff] }
 0x38f   : > { %v10735_v9 = vpop.f32.mrf.mxu1  ;;  %v10794_v10 = vpop.f32.mrf.mxu0  ;;  %v9514_v41 = vld [vmem:[%s16299_s1 + $0xe] sm:$0x3] }
 0x390   : > { %v3024_v45 = vsel %vm2997_vm6, %v2976_v27, 0.0  ;;  %v2947_v23 = vadd.f32 %v13466_v12, %v2911_v62  ;;  %v3945_v10 = vpack.c.bf16 %v3928_v32, %v3927_v16 }
 0x391   : > { %3054 = vst.msk [vmem:[#allocation3 + $0x100] sm:$0xff] %vm439_vm3, %v3024_v45  ;;  %v2602_v46 = vpop.f32.mrf.mxu1  ;;  %v2877_v63 = vpop.f32.mrf.mxu0  ;;  %11050 = vmatmul.mubr.msk.bf16.gmra.mxu0 %vm278_vm1, %v13659_v29  ;;  %v4345_v45 = vsel %vm610_vm0, %v9514_v41, 0  ;;  %vm9214_vm0 = vcmask 458112  }
 0x392   : > { %v2977_v44 = vmax.f32 %v2947_v23, 0.0  ;;  %v2912_v49 = vadd.f32 %v2877_v63, %v2634_v47  ;;  %11053 = vmatprep.mubr.msk.bf16.mxu0 %vm11761_vm2, %v16397_v50  ;;  %v2635_v53 = vadd.f32 %v2602_v46, %v13450_v42  ;;  %v4470_v47 = vld [vmem:[#allocation2 + $0x139] sm:$0xff]  ;;  %v4471_v23 = vld [vmem:[#allocation2 + $0x141] sm:$0xff] }
 0x393   : > { %v10736_v35 = vpop.f32.mrf.mxu1  ;;  %v10797_v52 = vpop.f32.mrf.mxu0 }
 0x394   : > { %v3025_v22 = vsel %vm2995_vm4, %v2977_v44, 0.0  ;;  %v2948_v4 = vadd.f32 %v13466_v12, %v2912_v49  ;;  %v4488_v35 = vpack.c.bf16 %v4471_v23, %v4470_v47  ;;  %v5053_v52 = vsel %vm4883_vm7, %v13738_v5, 0  ;;  %v4472_v5 = vld [vmem:[#allocation2 + $0x149] sm:$0xff] }
 0x395   : > { %3055 = vst.msk [vmem:[#allocation3 + $0x108] sm:$0xff] %vm439_vm3, %v3025_v22  ;;  %v2880_v29 = vpop.f32.mrf.mxu0  ;;  %v13815_v59 = vpop.f32.mrf.mxu1  ;;  %10940 = vmatmul.mubr.msk.bf16.gmra.mxu1 %vm278_vm1, %v3589_v8  ;;  %v3929_v8 = vld [vmem:[#allocation2 + $0x131] sm:$0xff] }
 0x396   : > { %v2978_v2 = vmax.f32 %v2948_v4, 0.0  ;;  %v2913_v28 = vadd.f32 %v2880_v29, %v2635_v53  ;;  %10943 = vmatprep.mubr.msk.bf16.mxu1 %vm11761_vm2, %v16397_v50  ;;  %v3946_v29 = vpack.c.bf16 %v4470_v47, %v3929_v8  ;;  %v4478_v8 = vld [vmem:[#allocation2 + $0x179] sm:$0xff] }
 0x397   : > { %v10798_v37 = vpop.f32.mrf.mxu0  ;;  %v10803_v31 = vpop.f32.mrf.mxu1 }
 0x398   : > { %v3026_v42 = vsel %vm2996_vm5, %v2978_v2, 0.0  ;;  %v2949_v17 = vadd.f32 %v13466_v12, %v2913_v28  ;;  %v4473_v2 = vld [vmem:[#allocation2 + $0x151] sm:$0xff] }
 0x399   : > { %3056 = vst.msk [vmem:[#allocation3 + $0x110] sm:$0xff] %vm439_vm3, %v3026_v42  ;;  %v13824_v38 = vpop.f32.mrf.mxu1  ;;  %v13826_v11 = vpop.f32.mrf.mxu0  ;;  %11054 = vmatmul.mubr.msk.bf16.gmra.mxu0 %vm278_vm1, %v4132_v15  ;;  %v4489_v15 = vpack.c.bf16 %v4473_v2, %v4472_v5 }
 0x39a   : > { %v2979_v25 = vmax.f32 %v2949_v17, 0.0  ;;  %11057 = vmatprep.mubr.msk.bf16.mxu0 %vm11761_vm2, %v16397_v50 }
 0x39b   : > { %v10804_v33 = vpop.f32.mrf.mxu1  ;;  %v10879_v30 = vpop.f32.mrf.mxu0 }
 0x39c   : > { %v3027_v12 = vsel %vm2997_vm6, %v2979_v25, 0.0  ;;  %v13900_v25 = vld [vmem:[%s16301_s3 + $0x4] sm:$0xf]  ;;  %v3947_v30 = vpack.c.bf16 %v4472_v5, %v4471_v23 }
 0x39d   : > { %3057 = vst.msk [vmem:[#allocation3 + $0x118] sm:$0xff] %vm439_vm3, %v3027_v12  ;;  %v13835_v0 = vpop.f32.mrf.mxu1  ;;  %v13837_v26 = vpop.f32.mrf.mxu0  ;;  %10944 = vmatmul.mubr.msk.bf16.gmra.mxu1 %vm278_vm1, %v3590_v6  ;;  %v4475_v6 = vld [vmem:[#allocation2 + $0x161] sm:$0xff] }
 0x39e   : > { %10947 = vmatprep.mubr.msk.bf16.mxu1 %vm11761_vm2, %v16397_v50 }
 0x39f   : > { %v10807_v18 = vpop.f32.mrf.mxu1  ;;  %v10880_v34 = vpop.f32.mrf.mxu0 }
 0x3a1   : > { %v13842_v40 = vpop.f32.mrf.mxu1  ;;  %v13844_v51 = vpop.f32.mrf.mxu0  ;;  %11058 = vmatmul.mubr.msk.bf16.gmra.mxu0 %vm278_vm1, %v4133_v54  ;;  %v4474_v54 = vld [vmem:[#allocation2 + $0x159] sm:$0xff] }
 0x3a2   : > { %11061 = vmatprep.mubr.msk.bf16.mxu0 %vm11761_vm2, %v16397_v50  ;;  %v4490_v57 = vpack.c.bf16 %v4475_v6, %v4474_v54 }
 0x3a3   : > { %v10808_v48 = vpop.f32.mrf.mxu1  ;;  %v10883_v14 = vpop.f32.mrf.mxu0 }
 0x3a5   : > { %v13849_v3 = vpop.f32.mrf.mxu1  ;;  %v13851_v1 = vpop.f32.mrf.mxu0  ;;  %10948 = vmatmul.mubr.msk.bf16.gmra.mxu1 %vm278_vm1, %v3591_v19 }
 0x3a6   : > { %10991 = vmatprep.mubr.msk.bf16.mxu1 %vm11761_vm2, %v16397_v50 }
 0x3a7   : > { %v10811_v36 = vpop.f32.mrf.mxu1  ;;  %v10884_v61 = vpop.f32.mrf.mxu0 }
 0x3a8   : > { %v4476_v36 = vld [vmem:[#allocation2 + $0x169] sm:$0xff]  ;;  %v4477_v61 = vld [vmem:[#allocation2 + $0x171] sm:$0xff] }
 0x3a9   : > { %v13859_v21 = vpop.f32.mrf.mxu1  ;;  %v13861_v27 = vpop.f32.mrf.mxu0  ;;  %11062 = vmatmul.mubr.msk.bf16.gmra.mxu0 %vm278_vm1, %v4134_v24  ;;  %v3948_v24 = vpack.c.bf16 %v4474_v54, %v4473_v2 }
 0x3aa   : > { %11105 = vmatprep.mubr.msk.bf16.mxu0 %vm11761_vm2, %v16397_v50 }
 0x3ab   : > { %v10812_v62 = vpop.f32.mrf.mxu1  ;;  %v10887_v9 = vpop.f32.mrf.mxu0 }
 0x3ac   : > { %v4491_v9 = vpack.c.bf16 %v4477_v61, %v4476_v36 }
 0x3ad   : > { %v13867_v46 = vpop.f32.mrf.mxu1  ;;  %v13869_v63 = vpop.f32.mrf.mxu0  ;;  %10992 = vmatmul.mubr.msk.bf16.vlgmr.msra.gmra.mxu1 %vm278_vm1, %v3945_v10 }
 0x3ae   : > { %11066 = vmatpush3.bf16.msra.mxu1 %v4345_v45  ;;  %10995 = vmatprep.mubr.msk.bf16.mxu1 %vm11761_vm2, %v16397_v50 }
 0x3af   : > { %v10815_v44 = vpop.f32.mrf.mxu1  ;;  %v10888_v49 = vpop.f32.mrf.mxu0  ;;  %11611 = vmatprep.subr.msk.bf16.mxu1 %vm4883_vm7, %v13900_v25 }
 0x3b0   : > { %v3949_v44 = vpack.c.bf16 %v4476_v36, %v4475_v6  ;;  %v4479_v49 = vld [vmem:[#allocation2 + $0x181] sm:$0xff]  ;;  %v4480_v6 = vld [vmem:[#allocation2 + $0x189] sm:$0xff] }
 0x3b1   : > { %v13876_v22 = vpop.f32.mrf.mxu1  ;;  %v13878_v53 = vpop.f32.mrf.mxu0  ;;  %11106 = vmatmul.mubr.msk.bf16.vlgmr.msra.gmra.mxu0 %vm278_vm1, %v4488_v35  ;;  %v3951_v36 = vpack.c.bf16 %v4480_v6, %v4479_v49 }
 0x3b2   : > { %11109 = vmatprep.mubr.msk.bf16.mxu0 %vm11761_vm2, %v16397_v50  ;;  %11168 = vmatpush3.bf16.msra.mxu0 %v5053_v52 }
 0x3b3   : > { %v10816_v4 = vpop.f32.mrf.mxu1  ;;  %v10891_v20 = vpop.f32.mrf.mxu0 }
 0x3b5   : > { %v13883_v28 = vpop.f32.mrf.mxu1  ;;  %v13885_v13 = vpop.f32.mrf.mxu0  ;;  %10996 = vmatmul.mubr.msk.bf16.gmra.mxu1 %vm278_vm1, %v3946_v29  ;;  %v4492_v29 = vpack.c.bf16 %v4479_v49, %v4478_v8  ;;  %v4485_v49 = vld [vmem:[#allocation2 + $0x1b1] sm:$0xff] }
 0x3b6   : > { %10999 = vmatprep.mubr.msk.bf16.mxu1 %vm11761_vm2, %v16397_v50 }
 0x3b7   : > { %v10819_v37 = vpop.f32.mrf.mxu1  ;;  %v10892_v31 = vpop.f32.mrf.mxu0 }
 0x3b9   : > { %v13890_v42 = vpop.f32.mrf.mxu1  ;;  %v13892_v17 = vpop.f32.mrf.mxu0  ;;  %11110 = vmatmul.mubr.msk.bf16.gmra.mxu0 %vm278_vm1, %v4489_v15  ;;  %v3950_v15 = vpack.c.bf16 %v4478_v8, %v4477_v61  ;;  %v4482_v61 = vld [vmem:[#allocation2 + $0x199] sm:$0xff] }
 0x3ba   : > { %11113 = vmatprep.mubr.msk.bf16.mxu0 %vm11761_vm2, %v16397_v50 }
 0x3bb   : > { %v10820_v7 = vpop.f32.mrf.mxu1  ;;  %v10895_v33 = vpop.f32.mrf.mxu0 }
 0x3bc   : > { %v4481_v7 = vld [vmem:[#allocation2 + $0x191] sm:$0xff] }
 0x3bd   : > { %v13904_v12 = vpop.f32.mrf.mxu1  ;;  %v13906_v56 = vpop.f32.mrf.mxu0  ;;  %11000 = vmatmul.mubr.msk.bf16.gmra.mxu1 %vm278_vm1, %v3947_v30 }
 0x3be   : > { %11003 = vmatprep.mubr.msk.bf16.mxu1 %vm11761_vm2, %v16397_v50 }
 0x3bf   : > { %v10823_v18 = vpop.f32.mrf.mxu1  ;;  %v10896_v34 = vpop.f32.mrf.mxu0 }
 0x3c0   : > { %v4493_v34 = vpack.c.bf16 %v4481_v7, %v4480_v6 }
 0x3c1   : > { %v13911_v39 = vpop.f32.mrf.mxu1  ;;  %v13913_v48 = vpop.f32.mrf.mxu0  ;;  %11114 = vmatmul.mubr.msk.bf16.gmra.mxu0 %vm278_vm1, %v4490_v57 }
 0x3c2   : > { %11117 = vmatprep.mubr.msk.bf16.mxu0 %vm11761_vm2, %v16397_v50 }
 0x3c3   : > { %v10824_v14 = vpop.f32.mrf.mxu1  ;;  %v10899_v19 = vpop.f32.mrf.mxu0 }
 0x3c5   : > { %v13918_v16 = vpop.f32.mrf.mxu1  ;;  %v13920_v32 = vpop.f32.mrf.mxu0  ;;  %11004 = vmatmul.mubr.msk.bf16.gmra.mxu1 %vm278_vm1, %v3948_v24 }
 0x3c6   : > { %11007 = vmatprep.mubr.msk.bf16.mxu1 %vm11761_vm2, %v16397_v50 }
 0x3c7   : > { %v10827_v41 = vpop.f32.mrf.mxu1  ;;  %v10900_v62 = vpop.f32.mrf.mxu0 }
 0x3c8   : > { %v4483_v41 = vld [vmem:[#allocation2 + $0x1a1] sm:$0xff] }
 0x3c9   : > { %v13925_v10 = vpop.f32.mrf.mxu1  ;;  %v13927_v45 = vpop.f32.mrf.mxu0  ;;  %11118 = vmatmul.mubr.msk.bf16.gmra.mxu0 %vm278_vm1, %v4491_v9 }
 0x3ca   : > { %11121 = vmatprep.mubr.msk.bf16.mxu0 %vm11761_vm2, %v16397_v50 }
 0x3cb   : > { %v10828_v47 = vpop.f32.mrf.mxu1  ;;  %v10903_v23 = vpop.f32.mrf.mxu0 }
 0x3cd   : > { %v13933_v35 = vpop.f32.mrf.mxu1  ;;  %v13935_v52 = vpop.f32.mrf.mxu0  ;;  %11008 = vmatmul.mubr.msk.bf16.gmra.mxu1 %vm278_vm1, %v3949_v44  ;;  %v4494_v44 = vpack.c.bf16 %v4483_v41, %v4482_v61 }
 0x3ce   : > { %11011 = vmatprep.mubr.msk.bf16.mxu1 %vm11761_vm2, %v16397_v50 }
 0x3cf   : > { %v10831_v4 = vpop.f32.mrf.mxu1  ;;  %v10904_v20 = vpop.f32.mrf.mxu0 }
 0x3d1   : > { %v13940_v2 = vpop.f32.mrf.mxu1  ;;  %v13942_v5 = vpop.f32.mrf.mxu0  ;;  %11122 = vmatmul.mubr.msk.bf16.gmra.mxu0 %vm278_vm1, %v4492_v29 }
 0x3d2   : > { %11125 = vmatprep.mubr.msk.bf16.mxu0 %vm11761_vm2, %v16397_v50 }
 0x3d3   : > { %v10832_v37 = vpop.f32.mrf.mxu1  ;;  %v10907_v31 = vpop.f32.mrf.mxu0 }
 0x3d4   : > { %v3952_v37 = vpack.c.bf16 %v4482_v61, %v4481_v7  ;;  %v4484_v31 = vld [vmem:[#allocation2 + $0x1a9] sm:$0xff]  ;;  %v4486_v7 = vld [vmem:[#allocation2 + $0x1b9] sm:$0xff] }
 0x3d5   : > { %v13947_v33 = vpop.f32.mrf.mxu1  ;;  %v13949_v30 = vpop.f32.mrf.mxu0  ;;  %11012 = vmatmul.mubr.msk.bf16.gmra.mxu1 %vm278_vm1, %v3950_v15 }
 0x3d6   : > { %11015 = vmatprep.mubr.msk.bf16.mxu1 %vm11761_vm2, %v16397_v50 }
 0x3d7   : > { %v10835_v54 = vpop.f32.mrf.mxu1  ;;  %v10908_v18 = vpop.f32.mrf.mxu0 }
 0x3d8   : > { %v4495_v54 = vpack.c.bf16 %v4485_v49, %v4484_v31 }
 0x3d9   : > { %v13954_v57 = vpop.f32.mrf.mxu1  ;;  %v13956_v14 = vpop.f32.mrf.mxu0  ;;  %11126 = vmatmul.mubr.msk.bf16.gmra.mxu0 %vm278_vm1, %v4493_v34 }
 0x3da   : > { %16487 = vst [vmem:[#allocation12_spill] sm:$0xff] %v13954_v57  ;;  %16488 = vst [vmem:[#allocation17_spill] sm:$0xff] %v13956_v14  ;;  %11129 = vmatprep.mubr.msk.bf16.mxu0 %vm11761_vm2, %v16397_v50  ;;  %v4302_v14 = vld [vmem:[#allocation2 + $0x1a0] sm:$0xff] }
 0x3db   : > { %v10836_v19 = vpop.f32.mrf.mxu1  ;;  %v10911_v24 = vpop.f32.mrf.mxu0 }
 0x3dd   : > { %v13961_v62 = vpop.f32.mrf.mxu1  ;;  %v13963_v9 = vpop.f32.mrf.mxu0  ;;  %11016 = vmatmul.mubr.msk.bf16.gmra.mxu1 %vm278_vm1, %v3951_v36  ;;  %v4487_v36 = vld [vmem:[#allocation2 + $0x1c1] sm:$0xff] }
 0x3de   : > { %16489 = vst [vmem:[#allocation16_spill] sm:$0xff] %v13963_v9  ;;  %11019 = vmatprep.mubr.msk.bf16.mxu1 %vm11761_vm2, %v16397_v50 }
 0x3df   : > { %v10841_v47 = vpop.f32.mrf.mxu1  ;;  %v10912_v23 = vpop.f32.mrf.mxu0 }
 0x3e0   : > { %v3953_v23 = vpack.c.bf16 %v4484_v31, %v4483_v41 }
 0x3e1   : > { %v13968_v8 = vpop.f32.mrf.mxu1  ;;  %v13970_v4 = vpop.f32.mrf.mxu0  ;;  %11130 = vmatmul.mubr.msk.bf16.gmra.mxu0 %vm278_vm1, %v4494_v44 }
 0x3e2   : > { %16490 = vst [vmem:[#allocation20_spill] sm:$0xff] %v13970_v4  ;;  %11133 = vmatprep.mubr.msk.bf16.mxu0 %vm11761_vm2, %v16397_v50  ;;  %v4755_v4 = vld [vmem:[#allocation3 + $0x107] ss:$2 sm:$0xff] }
 0x3e3   : > { %v10842_v20 = vpop.f32.mrf.mxu1  ;;  %v10955_v29 = vpop.f32.mrf.mxu0 }
 0x3e4   : > { %v4496_v20 = vpack.c.bf16 %v4487_v36, %v4486_v7  ;;  %v4725_v29 = vld [vmem:[#allocation3 + $0x17] ss:$2 sm:$0xff]  ;;  %v4307_v36 = vpack.c.bf16 %v4290_v55, %v4289_v58 }
 0x3e5   : > { %v13975_v15 = vpop.f32.mrf.mxu1  ;;  %v13977_v6 = vpop.f32.mrf.mxu0  ;;  %11020 = vmatmul.mubr.msk.bf16.gmra.mxu1 %vm278_vm1, %v3952_v37  ;;  %v4727_v37 = vld [vmem:[#allocation3 + $0x27] ss:$2 sm:$0xff]  ;;  %v4733_v58 = vld [vmem:[#allocation3 + $0x57] ss:$2 sm:$0xff] }
 0x3e6   : > { %16491 = vst [vmem:[#allocation21_spill] sm:$0xff] %v13977_v6  ;;  %11023 = vmatprep.mubr.msk.bf16.mxu1 %vm11761_vm2, %v16397_v50 }
 0x3e7   : > { %v10845_v18 = vpop.f32.mrf.mxu1  ;;  %v10956_v34 = vpop.f32.mrf.mxu0 }
 0x3e8   : > { %v4772_v34 = vpack.c.bf16 %v4727_v37, %v4725_v29  ;;  %v4735_v37 = vld [vmem:[#allocation3 + $0x67] ss:$2 sm:$0xff] }
 0x3e9   : > { %v13982_v19 = vpop.f32.mrf.mxu1  ;;  %v13984_v24 = vpop.f32.mrf.mxu0  ;;  %11134 = vmatmul.mubr.msk.bf16.gmra.mxu0 %vm278_vm1, %v4495_v54  ;;  %v4774_v55 = vpack.c.bf16 %v4735_v37, %v4733_v58  ;;  %v4737_v37 = vld [vmem:[#allocation3 + $0x77] ss:$2 sm:$0xff] }
 0x3ea   : > { %16492 = vst [vmem:[#allocation32_spill] sm:$0xff] %v13984_v24  ;;  %11137 = vmatprep.mubr.msk.bf16.mxu0 %vm11761_vm2, %v16397_v50  ;;  %v4741_v58 = vld [vmem:[#allocation3 + $0x97] ss:$2 sm:$0xff]  ;;  %v4747_v24 = vld [vmem:[#allocation3 + $0xc7] ss:$2 sm:$0xff] }
 0x3eb   : > { %v10846_v61 = vpop.f32.mrf.mxu1  ;;  %v10959_v47 = vpop.f32.mrf.mxu0 }
 0x3ec   : > { %v4885_v47 = vsel %vm4883_vm7, %v13900_v25, 0  ;;  %v4292_v25 = vld [vmem:[#allocation2 + $0x150] sm:$0xff] }
 0x3ed   : > { %v13989_v44 = vpop.f32.mrf.mxu1  ;;  %v13991_v49 = vpop.f32.mrf.mxu0  ;;  %11024 = vmatmul.mubr.msk.bf16.gmra.mxu1 %vm278_vm1, %v3953_v23  ;;  %v4731_v23 = vld [vmem:[#allocation3 + $0x47] ss:$2 sm:$0xff] }
 0x3ee   : > { %16493 = vst [vmem:[#allocation34_spill] sm:$0xff] %v13991_v49  ;;  %11067 = vmatprep.mubr.msk.bf16.mxu1 %vm11761_vm2, %v16397_v50  ;;  %v4739_v49 = vld [vmem:[#allocation3 + $0x87] ss:$2 sm:$0xff] }
 0x3ef   : > { %v10849_v54 = vpop.f32.mrf.mxu1  ;;  %v10960_v18 = vpop.f32.mrf.mxu0 }
 0x3f0   : > { %v4729_v18 = vld [vmem:[#allocation3 + $0x37] ss:$2 sm:$0xff] }
 0x3f1   : > { %v13996_v61 = vpop.f32.mrf.mxu1  ;;  %v13998_v41 = vpop.f32.mrf.mxu0  ;;  %11138 = vmatmul.mubr.msk.bf16.gmra.mxu0 %vm278_vm1, %v4496_v20 }
 0x3f2   : > { %16494 = vst [vmem:[#allocation24_spill] sm:$0xff] %v13998_v41  ;;  %11169 = vmatprep.mubr.msk.bf16.mxu0 %vm439_vm3, %v4772_v34 }
 0x3f3   : > { %v10850_v31 = vpop.f32.mrf.mxu1  ;;  %v10963_v7 = vpop.f32.mrf.mxu0 }
 0x3f4   : > { %v4773_v31 = vpack.c.bf16 %v4731_v23, %v4729_v18  ;;  %v4291_v7 = vld [vmem:[#allocation2 + $0x148] sm:$0xff] }
 0x3f5   : > { %v14004_v54 = vpop.f32.mrf.mxu1  ;;  %v14006_v29 = vpop.f32.mrf.mxu0  ;;  %11068 = vmatmul.mubr.msk.bf16.vlgmr.msra.gmra.mxu1 %vm278_vm1, %v4307_v36  ;;  %v4308_v41 = vpack.c.bf16 %v4292_v25, %v4291_v7  ;;  %v4743_v23 = vld [vmem:[#allocation3 + $0xa7] ss:$2 sm:$0xff] }
 0x3f6   : > { %16495 = vst [vmem:[#allocation27_spill] sm:$0xff] %v14006_v29  ;;  %11071 = vmatprep.mubr.msk.bf16.mxu1 %vm11761_vm2, %v16397_v50  ;;  %11142 = vmatpush3.bf16.msra.mxu1 %v4885_v47 }
 0x3f7   : > { %v10853_v20 = vpop.f32.mrf.mxu1  ;;  %v10964_v34 = vpop.f32.mrf.mxu0 }
 0x3f9   : > { %v14011_v43 = vpop.f32.mrf.mxu1  ;;  %v14013_v60 = vpop.f32.mrf.mxu0  ;;  %11170 = vmatmul.mubr.msk.bf16.vlgmr.msra.gmra.mxu0 %vm439_vm3, %v4773_v31  ;;  %v4775_v31 = vpack.c.bf16 %v4739_v49, %v4737_v37  ;;  %v4751_v49 = vld [vmem:[#allocation3 + $0xe7] ss:$2 sm:$0xff] }
 0x3fa   : > { %16496 = vst [vmem:[#allocation28_spill] sm:$0xff] %v14013_v60  ;;  %11173 = vmatprep.mubr.msk.bf16.mxu0 %vm439_vm3, %v4774_v55  ;;  %v4776_v55 = vpack.c.bf16 %v4743_v23, %v4741_v58  ;;  %v4745_v23 = vld [vmem:[#allocation3 + $0xb7] ss:$2 sm:$0xff] }
 0x3fb   : > { %v10854_v36 = vpop.f32.mrf.mxu1  ;;  %v10967_v29 = vpop.f32.mrf.mxu0  ;;  %v4749_v58 = vld [vmem:[#allocation3 + $0xd7] ss:$2 sm:$0xff] }
 0x3fc   : > { %v4293_v36 = vld [vmem:[#allocation2 + $0x158] sm:$0xff]  ;;  %v4294_v29 = vld [vmem:[#allocation2 + $0x160] sm:$0xff] }
 0x3fd   : > { %v14017_v47 = vpop.f32.mrf.mxu1  ;;  %v14019_v20 = vpop.f32.mrf.mxu0  ;;  %11072 = vmatmul.mubr.msk.bf16.gmra.mxu1 %vm278_vm1, %v4308_v41  ;;  %v4309_v60 = vpack.c.bf16 %v4294_v29, %v4293_v36 }
 0x3fe   : > { %16497 = vst [vmem:[#allocation33_spill] sm:$0xff] %v14019_v20  ;;  %11075 = vmatprep.mubr.msk.bf16.mxu1 %vm11761_vm2, %v16397_v50 }
 0x3ff   : > { %v10857_v18 = vpop.f32.mrf.mxu1  ;;  %v10968_v34 = vpop.f32.mrf.mxu0 }
 0x401   : > { %v14024_v7 = vpop.f32.mrf.mxu1  ;;  %v14026_v25 = vpop.f32.mrf.mxu0  ;;  %11174 = vmatmul.mubr.msk.bf16.gmra.mxu0 %vm439_vm3, %v4775_v31  ;;  %v4777_v31 = vpack.c.bf16 %v4747_v24, %v4745_v23  ;;  %v4753_v24 = vld [vmem:[#allocation3 + $0xf7] ss:$2 sm:$0xff] }
 0x402   : > { %16498 = vst [vmem:[#allocation31_spill] sm:$0xff] %v14026_v25  ;;  %11177 = vmatprep.mubr.msk.bf16.mxu0 %vm439_vm3, %v4776_v55  ;;  %v4778_v55 = vpack.c.bf16 %v4751_v49, %v4749_v58  ;;  %v4298_v58 = vld [vmem:[#allocation2 + $0x180] sm:$0xff] }
 0x403   : > { %v10858_v41 = vpop.f32.mrf.mxu1  ;;  %v10971_v20 = vpop.f32.mrf.mxu0 }
 0x404   : > { %v4295_v41 = vld [vmem:[#allocation2 + $0x168] sm:$0xff]  ;;  %v4296_v20 = vld [vmem:[#allocation2 + $0x170] sm:$0xff] }
 0x405   : > { %v14030_v6 = vpop.f32.mrf.mxu1  ;;  %v14032_v18 = vpop.f32.mrf.mxu0  ;;  %11076 = vmatmul.mubr.msk.bf16.gmra.mxu1 %vm278_vm1, %v4309_v60  ;;  %v4310_v25 = vpack.c.bf16 %v4296_v20, %v4295_v41 }
 0x406   : > { %16499 = vst [vmem:[#allocation37_spill] sm:$0xff] %v14032_v18  ;;  %11079 = vmatprep.mubr.msk.bf16.mxu1 %vm11761_vm2, %v16397_v50 }
 0x407   : > { %v10861_v37 = vpop.f32.mrf.mxu1  ;;  %v10972_v34 = vpop.f32.mrf.mxu0 }
 0x408   : > { %v4779_v34 = vpack.c.bf16 %v4755_v4, %v4753_v24 }
 0x409   : > { %v14037_v36 = vpop.f32.mrf.mxu1  ;;  %v14039_v29 = vpop.f32.mrf.mxu0  ;;  %11178 = vmatmul.mubr.msk.bf16.gmra.mxu0 %vm439_vm3, %v4777_v31  ;;  %v4297_v31 = vld [vmem:[#allocation2 + $0x178] sm:$0xff] }
 0x40a   : > { %16500 = vst [vmem:[#allocation13_spill] sm:$0xff] %v14039_v29  ;;  %11181 = vmatprep.mubr.msk.bf16.mxu0 %vm439_vm3, %v4778_v55 }
 0x40b   : > { %v10862_v60 = vpop.f32.mrf.mxu1  ;;  %v10975_v18 = vpop.f32.mrf.mxu0 }
 0x40c   : > { %v4311_v60 = vpack.c.bf16 %v4298_v58, %v4297_v31 }
 0x40d   : > { %v14043_v9 = vpop.f32.mrf.mxu1  ;;  %v14045_v37 = vpop.f32.mrf.mxu0  ;;  %11080 = vmatmul.mubr.msk.bf16.gmra.mxu1 %vm278_vm1, %v4310_v25 }
 0x40e   : > { %16501 = vst [vmem:[#allocation11_spill] sm:$0xff] %v14045_v37  ;;  %11083 = vmatprep.mubr.msk.bf16.mxu1 %vm11761_vm2, %v16397_v50 }
 0x40f   : > { %v10865_v49 = vpop.f32.mrf.mxu1  ;;  %v10976_v23 = vpop.f32.mrf.mxu0 }
 0x410   : > { %v4299_v49 = vld [vmem:[#allocation2 + $0x188] sm:$0xff]  ;;  %v4300_v23 = vld [vmem:[#allocation2 + $0x190] sm:$0xff] }
 0x411   : > { %v14050_v55 = vpop.f32.mrf.mxu1  ;;  %v14052_v18 = vpop.f32.mrf.mxu0  ;;  %11182 = vmatmul.mubr.msk.bf16.gmra.mxu0 %vm439_vm3, %v4779_v34  ;;  %v4312_v31 = vpack.c.bf16 %v4300_v23, %v4299_v49 }
 0x412   : > { %16502 = vst [vmem:[#allocation38_spill] sm:$0xff] %v14052_v18 }
 0x413   : > { %v10866_v41 = vpop.f32.mrf.mxu1  ;;  %v10979_v20 = vpop.f32.mrf.mxu0 }
 0x415   : > { %v14055_v37 = vpop.f32.mrf.mxu1  ;;  %v14057_v25 = vpop.f32.mrf.mxu0  ;;  %11084 = vmatmul.mubr.msk.bf16.gmra.mxu1 %vm278_vm1, %v4311_v60 }
 0x416   : > { %16503 = vst [vmem:[#allocation15_spill] sm:$0xff] %v14057_v25  ;;  %11087 = vmatprep.mubr.msk.bf16.mxu1 %vm11761_vm2, %v16397_v50  ;;  %v4301_v25 = vld [vmem:[#allocation2 + $0x198] sm:$0xff] }
 0x417   : > { %v10869_v4 = vpop.f32.mrf.mxu1  ;;  %v10980_v24 = vpop.f32.mrf.mxu0 }
 0x418   : > { %v3314_v24 = vadd.f32 %v13961_v62, %v13815_v59  ;;  %v4303_v62 = vld [vmem:[#allocation2 + $0x1a8] sm:$0xff] }
 0x419   : > { %v14062_v29 = vpop.f32.mrf.mxu1  ;;  %v14064_v18 = vpop.f32.mrf.mxu0 }
 0x41a   : > { %16504 = vst [vmem:[#allocation14_spill] sm:$0xff] %v14064_v18 }
 0x41b   : > { %v10870_v34 = vpop.f32.mrf.mxu1  ;;  %v10983_v41 = vpop.f32.mrf.mxu0 }
 0x41c   : > { %v4313_v41 = vpack.c.bf16 %v4302_v14, %v4301_v25  ;;  %v3322_v14 = vadd.f32 %v13975_v15, %v13835_v0  ;;  %v4306_v15 = vld [vmem:[#allocation2 + $0x1c0] sm:$0xff] }
 0x41d   : > { %v14066_v58 = vpop.f32.mrf.mxu1  ;;  %v14068_v20 = vpop.f32.mrf.mxu0  ;;  %11088 = vmatmul.mubr.msk.bf16.gmra.mxu1 %vm278_vm1, %v4312_v31  ;;  %v3317_v31 = vadd.f32 %v13968_v8, %v13824_v38 }
 0x41e   : > { %16505 = vst [vmem:[#allocation40_spill] sm:$0xff] %v14068_v20  ;;  %11091 = vmatprep.mubr.msk.bf16.mxu1 %vm11761_vm2, %v16397_v50  ;;  %v3547_v20 = vadd.f32 %v13826_v11, %v3314_v24 }
 0x41f   : > { %v10873_v60 = vpop.f32.mrf.mxu1  ;;  %v10984_v4 = vpop.f32.mrf.mxu0  ;;  %v3548_v38 = vadd.f32 %v13837_v26, %v3317_v31  ;;  %v4305_v26 = vld [vmem:[#allocation2 + $0x1b8] sm:$0xff] }
 0x420   : > { %v4304_v4 = vld [vmem:[#allocation2 + $0x1b0] sm:$0xff] }
 0x421   : > { %v14075_v18 = vpop.f32.mrf.mxu1  ;;  %v14077_v34 = vpop.f32.mrf.mxu0  ;;  %v4314_v25 = vpack.c.bf16 %v4304_v4, %v4303_v62  ;;  %v3330_v4 = vadd.f32 %v13989_v44, %v13849_v3 }
 0x423   : > { %v10874_v49 = vpop.f32.mrf.mxu1  ;;  %v10987_v23 = vpop.f32.mrf.mxu0 }
 0x425   : > { %v3657_v57 = vpop.f32.mrf.mxu1  ;;  %v14082_v60 = vpop.f32.mrf.mxu0  ;;  %11092 = vmatmul.mubr.msk.bf16.gmra.mxu1 %vm278_vm1, %v4313_v41  ;;  %v3325_v41 = vadd.f32 %v13982_v19, %v13842_v40 }
 0x426   : > { %16506 = vst [vmem:[#allocation19_spill] sm:$0xff] %v14082_v60  ;;  %v14085_v59 = vadd.f32 %v3657_v57, %v3547_v20  ;;  %11095 = vmatprep.mubr.msk.bf16.mxu1 %vm11761_vm2, %v16397_v50  ;;  %v3549_v60 = vadd.f32 %v13844_v51, %v3322_v14  ;;  %v4315_v14 = vpack.c.bf16 %v4306_v15, %v4305_v26 }
 0x427   : > { %v10917_v49 = vpop.f32.mrf.mxu1  ;;  %v10988_v23 = vpop.f32.mrf.mxu0  ;;  %v3550_v40 = vadd.f32 %v13851_v1, %v3325_v41  ;;  %v3338_v26 = vadd.f32 %v14004_v54, %v13867_v46 }
 0x429   : > { %v3660_v11 = vpop.f32.mrf.mxu1  ;;  %v14092_v8 = vpop.f32.mrf.mxu0 }
 0x42a   : > { %v14094_v24 = vadd.f32 %v3660_v11, %v3548_v38  ;;  %v4786_v38 = vld [vmem:[#allocation3 + $0x18] ss:$2 sm:$0xff]  ;;  %v4788_v11 = vld [vmem:[#allocation3 + $0x28] ss:$2 sm:$0xff] }
 0x42b   : > { %v10918_v57 = vpop.f32.mrf.mxu1  ;;  %v11031_v20 = vpop.f32.mrf.mxu0 }
 0x42c   : > { %v3551_v20 = vadd.f32 %v13861_v27, %v3330_v4 }
 0x42d   : > { %v3665_v49 = vpop.f32.mrf.mxu1  ;;  %v14099_v23 = vpop.f32.mrf.mxu0  ;;  %11096 = vmatmul.mubr.msk.bf16.gmra.mxu1 %vm278_vm1, %v4314_v25 }
 0x42e   : > { %v14102_v0 = vadd.f32 %v3665_v49, %v3549_v60  ;;  %11099 = vmatprep.mubr.msk.bf16.mxu1 %vm11761_vm2, %v16397_v50  ;;  %v3333_v50 = vadd.f32 %v13996_v61, %v13859_v21  ;;  %v4833_v49 = vpack.c.bf16 %v4788_v11, %v4786_v38  ;;  %v4792_v21 = vld [vmem:[#allocation3 + $0x48] ss:$2 sm:$0xff]  ;;  %v4794_v11 = vld [vmem:[#allocation3 + $0x58] ss:$2 sm:$0xff] }
 0x42f   : > { %v10921_v31 = vpop.f32.mrf.mxu1  ;;  %v11032_v62 = vpop.f32.mrf.mxu0 }
 0x430   : > { %v3552_v15 = vadd.f32 %v13869_v63, %v3333_v50  ;;  %v4796_v62 = vld [vmem:[#allocation3 + $0x68] ss:$2 sm:$0xff] }
 0x431   : > { %v3668_v51 = vpop.f32.mrf.mxu1  ;;  %v14109_v19 = vpop.f32.mrf.mxu0  ;;  %v4835_v46 = vpack.c.bf16 %v4796_v62, %v4794_v11 }
 0x432   : > { %v14111_v60 = vadd.f32 %v3668_v51, %v3550_v40  ;;  %v4790_v40 = vld [vmem:[#allocation3 + $0x38] ss:$2 sm:$0xff] }
 0x433   : > { %v10922_v25 = vpop.f32.mrf.mxu1  ;;  %v11035_v57 = vpop.f32.mrf.mxu0  ;;  %v4834_v38 = vpack.c.bf16 %v4792_v21, %v4790_v40  ;;  %v4802_v40 = vld [vmem:[#allocation3 + $0x98] ss:$2 sm:$0xff] }
 0x434   : > { %v3341_v25 = vadd.f32 %v14011_v43, %v13876_v22  ;;  %v3553_v57 = vadd.f32 %v13878_v53, %v3338_v26  ;;  %v4800_v43 = vld [vmem:[#allocation3 + $0x88] ss:$2 sm:$0xff] }
 0x435   : > { %v3673_v31 = vpop.f32.mrf.mxu1  ;;  %v14116_v3 = vpop.f32.mrf.mxu0  ;;  %11100 = vmatmul.mubr.msk.bf16.gmra.mxu1 %vm278_vm1, %v4315_v14  ;;  %vm9219_vm1 = vcmask 523712  }
 0x436   : > { %v14119_v1 = vadd.f32 %v3673_v31, %v3551_v20  ;;  %11143 = vmatprep.mubr.msk.bf16.mxu1 %vm439_vm3, %v4833_v49  ;;  %v3346_v31 = vadd.f32 %v14017_v47, %v13883_v28 }
 0x437   : > { %v10925_v44 = vpop.f32.mrf.mxu1  ;;  %v11036_v41 = vpop.f32.mrf.mxu0 }
 0x438   : > { %v3554_v44 = vadd.f32 %v13885_v13, %v3341_v25  ;;  %v4804_v41 = vld [vmem:[#allocation3 + $0xa8] ss:$2 sm:$0xff] }
 0x439   : > { %v3676_v61 = vpop.f32.mrf.mxu1  ;;  %v14125_v27 = vpop.f32.mrf.mxu0  ;;  %v4837_v28 = vpack.c.bf16 %v4804_v41, %v4802_v40  ;;  %v3357_v41 = vadd.f32 %v14037_v36, %v13911_v39  ;;  %v3362_v40 = vadd.f32 %v14043_v9, %v13918_v16  ;;  %v4816_v39 = vld [vmem:[#allocation3 + $0x108] ss:$2 sm:$0xff] }
 0x43a   : > { %v14127_v4 = vadd.f32 %v3676_v61, %v3552_v15  ;;  %v4798_v15 = vld [vmem:[#allocation3 + $0x78] ss:$2 sm:$0xff] }
 0x43b   : > { %v10926_v51 = vpop.f32.mrf.mxu1  ;;  %v11039_v14 = vpop.f32.mrf.mxu0  ;;  %v4836_v62 = vpack.c.bf16 %v4800_v43, %v4798_v15 }
 0x43c   : > { %v3349_v51 = vadd.f32 %v14024_v7, %v13890_v42  ;;  %v3555_v14 = vadd.f32 %v13892_v17, %v3346_v31  ;;  %v4808_v42 = vld [vmem:[#allocation3 + $0xc8] ss:$2 sm:$0xff] }
 0x43d   : > { %v3681_v54 = vpop.f32.mrf.mxu1  ;;  %v14132_v63 = vpop.f32.mrf.mxu0  ;;  %11144 = vmatmul.mubr.msk.bf16.vlgmr.msra.gmra.mxu1 %vm439_vm3, %v4834_v38 }
 0x43e   : > { %v14135_v50 = vadd.f32 %v3681_v54, %v3553_v57  ;;  %11147 = vmatprep.mubr.msk.bf16.mxu1 %vm439_vm3, %v4835_v46  ;;  %v3354_v57 = vadd.f32 %v14030_v6, %v13904_v12  ;;  %v3556_v46 = vadd.f32 %v13906_v56, %v3349_v51  ;;  %v4812_v54 = vld [vmem:[#allocation3 + $0xe8] ss:$2 sm:$0xff]  ;;  %v3558_v51 = vadd.f32 %v13920_v32, %v3357_v41 }
 0x43f   : > { %v10929_v20 = vpop.f32.mrf.mxu1  ;;  %v11040_v49 = vpop.f32.mrf.mxu0 }
 0x440   : > { %v4806_v49 = vld [vmem:[#allocation3 + $0xb8] ss:$2 sm:$0xff]  ;;  %v3557_v15 = vadd.f32 %v13913_v48, %v3354_v57  ;;  %v3365_v57 = vadd.f32 %v14050_v55, %v13925_v10 }
 0x441   : > { %v3684_v22 = vpop.f32.mrf.mxu1  ;;  %v14141_v53 = vpop.f32.mrf.mxu0  ;;  %v4838_v43 = vpack.c.bf16 %v4808_v42, %v4806_v49 }
 0x442   : > { %v14143_v26 = vadd.f32 %v3684_v22, %v3554_v44  ;;  %v4810_v22 = vld [vmem:[#allocation3 + $0xd8] ss:$2 sm:$0xff]  ;;  %v3560_v49 = vadd.f32 %v13935_v52, %v3365_v57  ;;  %v9559_v52 = vld [vmem:[%s16301_s3 + $0x8] sm:$0xf] }
 0x443   : > { %v10930_v21 = vpop.f32.mrf.mxu1  ;;  %v11043_v61 = vpop.f32.mrf.mxu0  ;;  %v4839_v12 = vpack.c.bf16 %v4812_v54, %v4810_v22  ;;  %v3370_v54 = vadd.f32 %v14055_v37, %v13933_v35  ;;  %11613 = vmatprep.subr.msk.bf16.mxu1 %vm4883_vm7, %v9559_v52  ;;  %v16509_v57 = vld [vmem:[#allocation16_spill] sm:$0xff] }
 0x445   : > { %v3689_v47 = vpop.f32.mrf.mxu1  ;;  %v14148_v13 = vpop.f32.mrf.mxu0  ;;  %11148 = vmatmul.mubr.msk.bf16.gmra.mxu1 %vm439_vm3, %v4836_v62  ;;  %v3561_v22 = vadd.f32 %v13942_v5, %v3370_v54 }
 0x446   : > { %v14151_v38 = vadd.f32 %v3689_v47, %v3555_v14  ;;  %11151 = vmatprep.mubr.msk.bf16.mxu1 %vm439_vm3, %v4837_v28  ;;  %v4814_v28 = vld [vmem:[#allocation3 + $0xf8] ss:$2 sm:$0xff] }
 0x447   : > { %v10933_v11 = vpop.f32.mrf.mxu1  ;;  %v11044_v25 = vpop.f32.mrf.mxu0 }
 0x448   : > { %v4840_v25 = vpack.c.bf16 %v4816_v39, %v4814_v28  ;;  %v16507_v39 = vld [vmem:[#allocation12_spill] sm:$0xff]  ;;  %v16508_v28 = vld [vmem:[#allocation17_spill] sm:$0xff] }
 0x449   : > { %v3692_v7 = vpop.f32.mrf.mxu1  ;;  %v14157_v17 = vpop.f32.mrf.mxu0 }
 0x44a   : > { %v14159_v20 = vadd.f32 %v3692_v7, %v3556_v46  ;;  %v3559_v46 = vadd.f32 %v13927_v45, %v3362_v40 }
 0x44b   : > { %v10934_v31 = vpop.f32.mrf.mxu1  ;;  %v11047_v44 = vpop.f32.mrf.mxu0 }
 0x44d   : > { %v3697_v6 = vpop.f32.mrf.mxu1  ;;  %v14164_v56 = vpop.f32.mrf.mxu0  ;;  %11152 = vmatmul.mubr.msk.bf16.gmra.mxu1 %vm439_vm3, %v4838_v43  ;;  %v3373_v43 = vadd.f32 %v14062_v29, %v13940_v2 }
 0x44e   : > { %v14167_v21 = vadd.f32 %v3697_v6, %v3557_v15  ;;  %11155 = vmatprep.mubr.msk.bf16.mxu1 %vm439_vm3, %v4839_v12  ;;  %v3378_v6 = vadd.f32 %v14066_v58, %v13947_v33 }
 0x44f   : > { %v10937_v61 = vpop.f32.mrf.mxu1  ;;  %v11048_v62 = vpop.f32.mrf.mxu0 }
 0x450   : > { %v3562_v61 = vadd.f32 %v13949_v30, %v3373_v43 }
 0x451   : > { %v3700_v36 = vpop.f32.mrf.mxu1  ;;  %v14173_v48 = vpop.f32.mrf.mxu0 }
 0x452   : > { %v14175_v14 = vadd.f32 %v3700_v36, %v3558_v51  ;;  %v5283_v51 = vsel %vm4883_vm7, %v9559_v52, 0  ;;  %v3381_v36 = vadd.f32 %v14075_v18, %v16507_v39  ;;  %v16511_v18 = vld [vmem:[#allocation20_spill] sm:$0xff] }
 0x453   : > { %v10938_v47 = vpop.f32.mrf.mxu1  ;;  %v11051_v11 = vpop.f32.mrf.mxu0  ;;  %11194 = vmatpush3.bf16.msra.mxu1 %v5283_v51 }
 0x454   : > { %v3563_v47 = vadd.f32 %v16508_v28, %v3378_v6 }
 0x455   : > { %v3705_v42 = vpop.f32.mrf.mxu1  ;;  %v14180_v7 = vpop.f32.mrf.mxu0  ;;  %11156 = vmatmul.mubr.msk.bf16.gmra.mxu1 %vm439_vm3, %v4840_v25 }
 0x456   : > { %v14183_v16 = vadd.f32 %v3705_v42, %v3559_v46  ;;  %v3564_v46 = vadd.f32 %v16509_v57, %v3381_v36 }
 0x457   : > { %v10941_v32 = vpop.f32.mrf.mxu1  ;;  %v11052_v9 = vpop.f32.mrf.mxu0 }
 0x459   : > { %v3708_v31 = vpop.f32.mrf.mxu1  ;;  %v14188_v44 = vpop.f32.mrf.mxu0 }
 0x45a   : > { %v14190_v10 = vadd.f32 %v3708_v31, %v3560_v49  ;;  %v3909_v31 = vadd.f32 %v16511_v18, %v14085_v59 }
 0x45b   : > { %v10942_v45 = vpop.f32.mrf.mxu1  ;;  %v11055_v55 = vpop.f32.mrf.mxu0 }
 0x45d   : > { %v3713_v41 = vpop.f32.mrf.mxu1  ;;  %v14195_v15 = vpop.f32.mrf.mxu0 }
 0x45e   : > { %v14197_v12 = vadd.f32 %v3713_v41, %v3561_v22 }
 0x45f   : > { %v10945_v35 = vpop.f32.mrf.mxu1  ;;  %v11056_v37 = vpop.f32.mrf.mxu0 }
 0x460   : > { %v16513_v35 = vld [vmem:[#allocation21_spill] sm:$0xff] }
 0x461   : > { %v3716_v2 = vpop.f32.mrf.mxu1  ;;  %v14206_v5 = vpop.f32.mrf.mxu0  ;;  %v3910_v37 = vadd.f32 %v16513_v35, %v14094_v24 }
 0x462   : > { %v14208_v29 = vadd.f32 %v3716_v2, %v3562_v61 }
 0x463   : > { %v10946_v62 = vpop.f32.mrf.mxu1  ;;  %v11059_v40 = vpop.f32.mrf.mxu0 }
 0x464   : > { %v16514_v40 = vld [vmem:[#allocation32_spill] sm:$0xff] }
 0x465   : > { %v3721_v33 = vpop.f32.mrf.mxu1  ;;  %v14214_v58 = vpop.f32.mrf.mxu0  ;;  %v3911_v59 = vadd.f32 %v16514_v40, %v14102_v0  ;;  %v16518_v40 = vld [vmem:[#allocation28_spill] sm:$0xff] }
 0x466   : > { %v14216_v30 = vadd.f32 %v3721_v33, %v3563_v47  ;;  %v16515_v33 = vld [vmem:[#allocation34_spill] sm:$0xff] }
 0x467   : > { %v10949_v11 = vpop.f32.mrf.mxu1  ;;  %v11060_v25 = vpop.f32.mrf.mxu0  ;;  %v3912_v24 = vadd.f32 %v16515_v33, %v14111_v60 }
 0x469   : > { %v3724_v42 = vpop.f32.mrf.mxu1  ;;  %v14219_v32 = vpop.f32.mrf.mxu0 }
 0x46a   : > { %16510 = vst [vmem:[#allocation18_spill] sm:$0xff] %v14219_v32  ;;  %v14221_v9 = vadd.f32 %v3724_v42, %v3564_v46 }
 0x46b   : > { %v10950_v54 = vpop.f32.mrf.mxu1  ;;  %v11063_v49 = vpop.f32.mrf.mxu0 }
 0x46c   : > { %v16516_v54 = vld [vmem:[#allocation24_spill] sm:$0xff] }
 0x46d   : > { %v4019_v45 = vpop.f32.mrf.mxu1  ;;  %v14225_v55 = vpop.f32.mrf.mxu0  ;;  %v3913_v0 = vadd.f32 %v16516_v54, %v14119_v1  ;;  %v3915_v1 = vadd.f32 %v16518_v40, %v14135_v50  ;;  %v14275_v50 = vld [vmem:[%s16301_s3 + $0x10] sm:$0xf] }
 0x46e   : > { %16512 = vst [vmem:[#allocation41_spill] sm:$0xff] %v14225_v55  ;;  %v14227_v43 = vadd.f32 %v4019_v45, %v3909_v31  ;;  %16520 = vst [vmem:[#allocation42_spill] sm:$0xff] %v14275_v50  ;;  %11615 = vmatprep.subr.msk.bf16.mxu1 %vm4883_vm7, %v14275_v50  ;;  %v16522_v40 = vld [vmem:[#allocation37_spill] sm:$0xff] }
 0x46f   : > { %v10993_v22 = vpop.f32.mrf.mxu1  ;;  %v11064_v41 = vpop.f32.mrf.mxu0 }
 0x470   : > { %v16517_v41 = vld [vmem:[#allocation27_spill] sm:$0xff] }
 0x471   : > { %v4022_v52 = vpop.f32.mrf.mxu1  ;;  %v14231_v6 = vpop.f32.mrf.mxu0  ;;  %v3914_v60 = vadd.f32 %v16517_v41, %v14127_v4 }
 0x472   : > { %v14233_v61 = vadd.f32 %v4022_v52, %v3910_v37 }
 0x473   : > { %v10994_v2 = vpop.f32.mrf.mxu1  ;;  %v11107_v62 = vpop.f32.mrf.mxu0 }
 0x475   : > { %v4027_v51 = vpop.f32.mrf.mxu1  ;;  %v14237_v39 = vpop.f32.mrf.mxu0 }
 0x476   : > { %v14239_v36 = vadd.f32 %v4027_v51, %v3911_v59 }
 0x477   : > { %v10997_v28 = vpop.f32.mrf.mxu1  ;;  %v11108_v47 = vpop.f32.mrf.mxu0 }
 0x478   : > { %v9572_v47 = vld [vmem:[%s16301_s3 + $0xc] sm:$0xf] }
 0x479   : > { %v4030_v11 = vpop.f32.mrf.mxu1  ;;  %v14243_v25 = vpop.f32.mrf.mxu0  ;;  %11614 = vmatprep.subr.msk.bf16.mxu0 %vm4883_vm7, %v9572_v47 }
 0x47a   : > { %v14245_v57 = vadd.f32 %v4030_v11, %v3912_v24  ;;  %v5537_v24 = vsel %vm4883_vm7, %v9572_v47, 0  ;;  %v16519_v11 = vld [vmem:[#allocation33_spill] sm:$0xff] }
 0x47b   : > { %v10998_v46 = vpop.f32.mrf.mxu1  ;;  %v11111_v42 = vpop.f32.mrf.mxu0  ;;  %11220 = vmatpush3.bf16.msra.mxu0 %v5537_v24 }
 0x47c   : > { %v3916_v46 = vadd.f32 %v16519_v11, %v14143_v26  ;;  %v16523_v11 = vld [vmem:[#allocation13_spill] sm:$0xff] }
 0x47d   : > { %v4035_v49 = vpop.f32.mrf.mxu1  ;;  %v14249_v18 = vpop.f32.mrf.mxu0 }
 0x47e   : > { %v14251_v31 = vadd.f32 %v4035_v49, %v3913_v0 }
 0x47f   : > { %v11001_v45 = vpop.f32.mrf.mxu1  ;;  %v11112_v22 = vpop.f32.mrf.mxu0 }
 0x480   : > { %v16521_v22 = vld [vmem:[#allocation31_spill] sm:$0xff] }
 0x481   : > { %v4038_v35 = vpop.f32.mrf.mxu1  ;;  %v14255_v37 = vpop.f32.mrf.mxu0  ;;  %v3917_v41 = vadd.f32 %v16521_v22, %v14151_v38  ;;  %v3919_v38 = vadd.f32 %v16523_v11, %v14167_v21 }
 0x482   : > { %v14257_v52 = vadd.f32 %v4038_v35, %v3914_v60 }
 0x483   : > { %v11002_v2 = vpop.f32.mrf.mxu1  ;;  %v11115_v62 = vpop.f32.mrf.mxu0 }
 0x485   : > { %v4043_v59 = vpop.f32.mrf.mxu1  ;;  %v14261_v51 = vpop.f32.mrf.mxu0 }
 0x486   : > { %v14263_v28 = vadd.f32 %v4043_v59, %v3915_v1  ;;  %v3918_v1 = vadd.f32 %v16522_v40, %v14159_v20 }
 0x487   : > { %v11005_v4 = vpop.f32.mrf.mxu1  ;;  %v11116_v33 = vpop.f32.mrf.mxu0 }
 0x489   : > { %v4046_v42 = vpop.f32.mrf.mxu1  ;;  %v14277_v54 = vpop.f32.mrf.mxu0 }
 0x48a   : > { %v14281_v0 = vadd.f32 %v4046_v42, %v3916_v46 }
 0x48b   : > { %v11006_v49 = vpop.f32.mrf.mxu1  ;;  %v11119_v45 = vpop.f32.mrf.mxu0 }
 0x48d   : > { %v4051_v26 = vpop.f32.mrf.mxu1  ;;  %v14285_v60 = vpop.f32.mrf.mxu0 }
 0x48e   : > { %v14287_v35 = vadd.f32 %v4051_v26, %v3917_v41  ;;  %v16524_v41 = vld [vmem:[#allocation11_spill] sm:$0xff] }
 0x48f   : > { %v11009_v2 = vpop.f32.mrf.mxu1  ;;  %v11120_v62 = vpop.f32.mrf.mxu0  ;;  %v3920_v20 = vadd.f32 %v16524_v41, %v14175_v14 }
 0x491   : > { %v4054_v59 = vpop.f32.mrf.mxu1  ;;  %v14291_v47 = vpop.f32.mrf.mxu0 }
 0x492   : > { %v14293_v4 = vadd.f32 %v4054_v59, %v3918_v1  ;;  %v16525_v59 = vld [vmem:[#allocation38_spill] sm:$0xff] }
 0x493   : > { %v11010_v33 = vpop.f32.mrf.mxu1  ;;  %v11123_v24 = vpop.f32.mrf.mxu0  ;;  %v3921_v21 = vadd.f32 %v16525_v59, %v14183_v16 }
 0x495   : > { %v4059_v46 = vpop.f32.mrf.mxu1  ;;  %v14297_v42 = vpop.f32.mrf.mxu0 }
 0x496   : > { %v14299_v49 = vadd.f32 %v4059_v46, %v3919_v38 }
 0x497   : > { %v11013_v45 = vpop.f32.mrf.mxu1  ;;  %v11124_v22 = vpop.f32.mrf.mxu0 }
 0x498   : > { %v16526_v45 = vld [vmem:[#allocation15_spill] sm:$0xff] }
 0x499   : > { %v4062_v26 = vpop.f32.mrf.mxu1  ;;  %v14303_v2 = vpop.f32.mrf.mxu0  ;;  %v3922_v14 = vadd.f32 %v16526_v45, %v14190_v10 }
 0x49a   : > { %v14305_v62 = vadd.f32 %v4062_v26, %v3920_v20 }
 0x49b   : > { %v11014_v40 = vpop.f32.mrf.mxu1  ;;  %v11127_v1 = vpop.f32.mrf.mxu0 }
 0x49c   : > { %v16527_v1 = vld [vmem:[#allocation14_spill] sm:$0xff] }
 0x49d   : > { %v4067_v33 = vpop.f32.mrf.mxu1  ;;  %v14309_v24 = vpop.f32.mrf.mxu0  ;;  %v3923_v16 = vadd.f32 %v16527_v1, %v14197_v12  ;;  %v3925_v12 = vadd.f32 %v14077_v34, %v14216_v30 }
 0x49e   : > { %v14311_v11 = vadd.f32 %v4067_v33, %v3921_v21 }
 0x49f   : > { %v11017_v38 = vpop.f32.mrf.mxu1  ;;  %v11128_v46 = vpop.f32.mrf.mxu0 }
 0x4a0   : > { %v16528_v46 = vld [vmem:[#allocation40_spill] sm:$0xff] }
 0x4a1   : > { %v4070_v22 = vpop.f32.mrf.mxu1  ;;  %v14315_v41 = vpop.f32.mrf.mxu0  ;;  %v3924_v10 = vadd.f32 %v16528_v46, %v14208_v29 }
 0x4a2   : > { %v14317_v20 = vadd.f32 %v4070_v22, %v3922_v14 }
 0x4a3   : > { %v11018_v26 = vpop.f32.mrf.mxu1  ;;  %v11131_v40 = vpop.f32.mrf.mxu0 }
 0x4a5   : > { %v4075_v59 = vpop.f32.mrf.mxu1  ;;  %v14321_v50 = vpop.f32.mrf.mxu0 }
 0x4a6   : > { %v14323_v21 = vadd.f32 %v4075_v59, %v3923_v16 }
 0x4a7   : > { %v11021_v33 = vpop.f32.mrf.mxu1  ;;  %v11132_v38 = vpop.f32.mrf.mxu0 }
 0x4a8   : > { %v16529_v38 = vld [vmem:[#allocation19_spill] sm:$0xff] }
 0x4a9   : > { %v4078_v45 = vpop.f32.mrf.mxu1  ;;  %v14327_v55 = vpop.f32.mrf.mxu0  ;;  %v3926_v29 = vadd.f32 %v16529_v38, %v14221_v9  ;;  %v4272_v38 = vadd.f32 %v14099_v23, %v14233_v61 }
 0x4aa   : > { %v14329_v14 = vadd.f32 %v4078_v45, %v3924_v10  ;;  %v14346_v45 = vld [vmem:[%s16301_s3 + $0x14] sm:$0xf] }
 0x4ab   : > { %v11022_v22 = vpop.f32.mrf.mxu1  ;;  %v11135_v26 = vpop.f32.mrf.mxu0  ;;  %16530 = vst [vmem:[#allocation23_spill] sm:$0xff] %v14346_v45  ;;  %11616 = vmatprep.subr.msk.bf16.mxu0 %vm4883_vm7, %v14346_v45 }
 0x4ac   : > { %v4271_v22 = vadd.f32 %v14092_v8, %v14227_v43 }
 0x4ad   : > { %v4083_v40 = vpop.f32.mrf.mxu1  ;;  %v14333_v1 = vpop.f32.mrf.mxu0 }
 0x4ae   : > { %v14335_v16 = vadd.f32 %v4083_v40, %v3925_v12 }
 0x4af   : > { %v11025_v59 = vpop.f32.mrf.mxu1  ;;  %v11136_v33 = vpop.f32.mrf.mxu0 }
 0x4b1   : > { %v4086_v46 = vpop.f32.mrf.mxu1  ;;  %v14339_v32 = vpop.f32.mrf.mxu0 }
 0x4b2   : > { %v14341_v10 = vadd.f32 %v4086_v46, %v3926_v29  ;;  %v14360_v46 = vld [vmem:[%s16300_s2] ss:$0 sm:$0xff] }
 0x4b3   : > { %v11026_v34 = vpop.f32.mrf.mxu1  ;;  %v11139_v30 = vpop.f32.mrf.mxu0 }
 0x4b5   : > { %v4381_v26 = vpop.f32.mrf.mxu1  ;;  %v14352_v9 = vpop.f32.mrf.mxu0 }
 0x4b6   : > { %v4452_v12 = vadd.f32 %v4381_v26, %v4271_v22  ;;  %v4273_v26 = vadd.f32 %v14109_v19, %v14239_v36 }
 0x4b7   : > { %v11069_v40 = vpop.f32.mrf.mxu1  ;;  %v11140_v59 = vpop.f32.mrf.mxu0 }
 0x4b8   : > { %v4633_v33 = vadd.f32 %v14231_v6, %v4452_v12 }
 0x4b9   : > { %v4384_v29 = vpop.f32.mrf.mxu1 }
 0x4ba   : > { %v4651_v34 = vadd.f32 %v14360_v46, %v4633_v33  ;;  %v4453_v8 = vadd.f32 %v4384_v29, %v4272_v38  ;;  %v4274_v38 = vadd.f32 %v14116_v3, %v14245_v57 }
 0x4bb   : > { %v11070_v43 = vpop.f32.mrf.mxu1 }
 0x4bc   : > { %v4669_v30 = vmax.f32 %v4651_v34, 0.0  ;;  %v4634_v22 = vadd.f32 %v14237_v39, %v4453_v8 }
 0x4bd   : > { %v4389_v6 = vpop.f32.mrf.mxu1 }
 0x4be   : > { %v4687_v23 = vsel %vm2995_vm4, %v4669_v30, 0.0  ;;  %v4652_v61 = vadd.f32 %v14360_v46, %v4634_v22  ;;  %v4454_v40 = vadd.f32 %v4389_v6, %v4273_v26  ;;  %v4275_v22 = vadd.f32 %v14125_v27, %v14251_v31 }
 0x4bf   : > { %4705 = vst.msk [vmem:[#allocation3 + $0x120] sm:$0xff] %vm439_vm3, %v4687_v23  ;;  %v11073_v59 = vpop.f32.mrf.mxu1 }
 0x4c0   : > { %v4670_v45 = vmax.f32 %v4652_v61, 0.0  ;;  %v4635_v33 = vadd.f32 %v14243_v25, %v4454_v40  ;;  %v4276_v40 = vadd.f32 %v14132_v63, %v14257_v52 }
 0x4c1   : > { %v4392_v39 = vpop.f32.mrf.mxu1 }
 0x4c2   : > { %v4688_v19 = vsel %vm2996_vm5, %v4670_v45, 0.0  ;;  %v4653_v36 = vadd.f32 %v14360_v46, %v4635_v33  ;;  %v4455_v34 = vadd.f32 %v4392_v39, %v4274_v38 }
 0x4c3   : > { %4706 = vst.msk [vmem:[#allocation3 + $0x128] sm:$0xff] %vm439_vm3, %v4688_v19  ;;  %v11074_v8 = vpop.f32.mrf.mxu1  ;;  %v4277_v19 = vadd.f32 %v14141_v53, %v14263_v28  ;;  %v4278_v53 = vadd.f32 %v14148_v13, %v14281_v0  ;;  %v4279_v13 = vadd.f32 %v14157_v17, %v14287_v35 }
 0x4c4   : > { %v4671_v43 = vmax.f32 %v4653_v36, 0.0  ;;  %v4636_v30 = vadd.f32 %v14249_v18, %v4455_v34 }
 0x4c5   : > { %v4397_v25 = vpop.f32.mrf.mxu1 }
 0x4c6   : > { %v4689_v3 = vsel %vm2997_vm6, %v4671_v43, 0.0  ;;  %v4654_v57 = vadd.f32 %v14360_v46, %v4636_v30  ;;  %v4456_v6 = vadd.f32 %v4397_v25, %v4275_v22  ;;  %v4818_v36 = vld [vmem:[#allocation3 + $0x118] ss:$2 sm:$0xff]  ;;  %v4757_v34 = vld [vmem:[#allocation3 + $0x117] ss:$2 sm:$0xff] }
 0x4c7   : > { %4707 = vst.msk [vmem:[#allocation3 + $0x130] sm:$0xff] %vm439_vm3, %v4689_v3  ;;  %v11077_v45 = vpop.f32.mrf.mxu1 }
 0x4c8   : > { %v4672_v23 = vmax.f32 %v4654_v57, 0.0  ;;  %v4637_v61 = vadd.f32 %v14255_v37, %v4456_v6 }
 0x4c9   : > { %v4400_v18 = vpop.f32.mrf.mxu1 }
 0x4ca   : > { %v4690_v27 = vsel %vm2995_vm4, %v4672_v23, 0.0  ;;  %v4655_v31 = vadd.f32 %v14360_v46, %v4637_v61  ;;  %v4457_v59 = vadd.f32 %v4400_v18, %v4276_v40 }
 0x4cb   : > { %4708 = vst.msk [vmem:[#allocation3 + $0x138] sm:$0xff] %vm439_vm3, %v4690_v27  ;;  %v11078_v33 = vpop.f32.mrf.mxu1 }
 0x4cc   : > { %v4673_v38 = vmax.f32 %v4655_v31, 0.0  ;;  %v4638_v39 = vadd.f32 %v14261_v51, %v4457_v59 }
 0x4cd   : > { %v4405_v37 = vpop.f32.mrf.mxu1 }
 0x4ce   : > { %v4691_v63 = vsel %vm2996_vm5, %v4673_v38, 0.0  ;;  %v4656_v52 = vadd.f32 %v14360_v46, %v4638_v39  ;;  %v4458_v8 = vadd.f32 %v4405_v37, %v4277_v19  ;;  %v4820_v43 = vld [vmem:[#allocation3 + $0x128] ss:$2 sm:$0xff]  ;;  %v4759_v30 = vld [vmem:[#allocation3 + $0x127] ss:$2 sm:$0xff]  ;;  %v4280_v39 = vadd.f32 %v14164_v56, %v14293_v4 }
 0x4cf   : > { %4709 = vst.msk [vmem:[#allocation3 + $0x140] sm:$0xff] %vm439_vm3, %v4691_v63  ;;  %v11081_v22 = vpop.f32.mrf.mxu1  ;;  %v4841_v25 = vpack.c.bf16 %v4820_v43, %v4818_v36  ;;  %v4780_v3 = vpack.c.bf16 %v4759_v30, %v4757_v34  ;;  %v4281_v63 = vadd.f32 %v14173_v48, %v14299_v49  ;;  %v4282_v48 = vadd.f32 %v14180_v7, %v14305_v62 }
 0x4d0   : > { %v4674_v51 = vmax.f32 %v4656_v52, 0.0  ;;  %v4639_v57 = vadd.f32 %v14277_v54, %v4458_v8  ;;  %v4283_v7 = vadd.f32 %v14188_v44, %v14311_v11 }
 0x4d1   : > { %v4408_v28 = vpop.f32.mrf.mxu1  ;;  %11159 = vmatprep.mubr.msk.bf16.mxu1 %vm439_vm3, %v4841_v25  ;;  %11185 = vmatprep.mubr.msk.bf16.mxu0 %vm439_vm3, %v4780_v3 }
 0x4d2   : > { %v4692_v6 = vsel %vm2997_vm6, %v4674_v51, 0.0  ;;  %v4657_v45 = vadd.f32 %v14360_v46, %v4639_v57  ;;  %v4459_v23 = vadd.f32 %v4408_v28, %v4278_v53 }
 0x4d3   : > { %4710 = vst.msk [vmem:[#allocation3 + $0x148] sm:$0xff] %vm439_vm3, %v4692_v6  ;;  %v11082_v61 = vpop.f32.mrf.mxu1 }
 0x4d4   : > { %v4675_v40 = vmax.f32 %v4657_v45, 0.0  ;;  %v4640_v54 = vadd.f32 %v14285_v60, %v4459_v23 }
 0x4d5   : > { %v4413_v0 = vpop.f32.mrf.mxu1 }
 0x4d6   : > { %v4693_v18 = vsel %vm2995_vm4, %v4675_v40, 0.0  ;;  %v4658_v27 = vadd.f32 %v14360_v46, %v4640_v54  ;;  %v4460_v31 = vadd.f32 %v4413_v0, %v4279_v13  ;;  %v4822_v52 = vld [vmem:[#allocation3 + $0x138] ss:$2 sm:$0xff]  ;;  %v4761_v8 = vld [vmem:[#allocation3 + $0x137] ss:$2 sm:$0xff] }
 0x4d7   : > { %4711 = vst.msk [vmem:[#allocation3 + $0x150] sm:$0xff] %vm439_vm3, %v4693_v18  ;;  %v11085_v59 = vpop.f32.mrf.mxu1 }
 0x4d8   : > { %v4676_v33 = vmax.f32 %v4658_v27, 0.0  ;;  %v4641_v38 = vadd.f32 %v14291_v47, %v4460_v31  ;;  %v4284_v27 = vadd.f32 %v14195_v15, %v14317_v20 }
 0x4d9   : > { %v4416_v60 = vpop.f32.mrf.mxu1 }
 0x4da   : > { %v4694_v17 = vsel %vm2996_vm5, %v4676_v33, 0.0  ;;  %v4659_v35 = vadd.f32 %v14360_v46, %v4641_v38  ;;  %v4461_v19 = vadd.f32 %v4416_v60, %v4280_v39  ;;  %v4285_v39 = vadd.f32 %v14206_v5, %v14323_v21 }
 0x4db   : > { %4712 = vst.msk [vmem:[#allocation3 + $0x158] sm:$0xff] %vm439_vm3, %v4694_v17  ;;  %v11086_v37 = vpop.f32.mrf.mxu1  ;;  %v4286_v5 = vadd.f32 %v14214_v58, %v14329_v14 }
 0x4dc   : > { %v4677_v36 = vmax.f32 %v4659_v35, 0.0  ;;  %v4642_v34 = vadd.f32 %v14297_v42, %v4461_v19 }
 0x4dd   : > { %v4421_v47 = vpop.f32.mrf.mxu1 }
 0x4de   : > { %v4695_v56 = vsel %vm2997_vm6, %v4677_v36, 0.0  ;;  %v4660_v4 = vadd.f32 %v14360_v46, %v4642_v34  ;;  %v4462_v43 = vadd.f32 %v4421_v47, %v4281_v63  ;;  %v4824_v30 = vld [vmem:[#allocation3 + $0x148] ss:$2 sm:$0xff]  ;;  %v4763_v22 = vld [vmem:[#allocation3 + $0x147] ss:$2 sm:$0xff] }
 0x4df   : > { %4713 = vst.msk [vmem:[#allocation3 + $0x160] sm:$0xff] %vm439_vm3, %v4695_v56  ;;  %v11089_v25 = vpop.f32.mrf.mxu1  ;;  %v4842_v3 = vpack.c.bf16 %v4824_v30, %v4822_v52  ;;  %v4781_v51 = vpack.c.bf16 %v4763_v22, %v4761_v8  ;;  %v16534_v30 = vld [vmem:[#allocation18_spill] sm:$0xff] }
 0x4e0   : > { %v4678_v42 = vmax.f32 %v4660_v4, 0.0  ;;  %v4643_v57 = vadd.f32 %v14303_v2, %v4462_v43  ;;  %v4287_v58 = vadd.f32 %v16534_v30, %v14335_v16  ;;  %v5207_v30 = vld [vmem:[#allocation3 + $0xc9] ss:$2 sm:$0xff] }
 0x4e1   : > { %v4424_v49 = vpop.f32.mrf.mxu1  ;;  %11160 = vmatmul.mubr.msk.bf16.gmra.mxu1 %vm439_vm3, %v4842_v3  ;;  %11186 = vmatmul.mubr.msk.bf16.gmra.mxu0 %vm439_vm3, %v4781_v51 }
 0x4e2   : > { %v4696_v53 = vsel %vm2995_vm4, %v4678_v42, 0.0  ;;  %v4661_v28 = vadd.f32 %v14360_v46, %v4643_v57  ;;  %v4463_v6 = vadd.f32 %v4424_v49, %v4282_v48  ;;  %v16535_v48 = vld [vmem:[#allocation41_spill] sm:$0xff] }
 0x4e3   : > { %4714 = vst.msk [vmem:[#allocation3 + $0x168] sm:$0xff] %vm439_vm3, %v4696_v53  ;;  %v11090_v45 = vpop.f32.mrf.mxu1  ;;  %v4288_v49 = vadd.f32 %v16535_v48, %v14341_v10  ;;  %v5463_v48 = vld [vmem:[#allocation3 + $0xef] ss:$2 sm:$0xff] }
 0x4e4   : > { %v4679_v23 = vmax.f32 %v4661_v28, 0.0  ;;  %v4644_v2 = vadd.f32 %v14309_v24, %v4463_v6 }
 0x4e5   : > { %v4429_v62 = vpop.f32.mrf.mxu1 }
 0x4e6   : > { %v4697_v61 = vsel %vm2996_vm5, %v4679_v23, 0.0  ;;  %v4662_v40 = vadd.f32 %v14360_v46, %v4644_v2  ;;  %v4464_v54 = vadd.f32 %v4429_v62, %v4283_v7  ;;  %v4826_v60 = vld [vmem:[#allocation3 + $0x158] ss:$2 sm:$0xff]  ;;  %v4765_v17 = vld [vmem:[#allocation3 + $0x157] ss:$2 sm:$0xff] }
 0x4e7   : > { %4715 = vst.msk [vmem:[#allocation3 + $0x170] sm:$0xff] %vm439_vm3, %v4697_v61  ;;  %v11093_v13 = vpop.f32.mrf.mxu1  ;;  %v5185_v2 = vld [vmem:[#allocation3 + $0x19] ss:$2 sm:$0xff]  ;;  %v5187_v7 = vld [vmem:[#allocation3 + $0x29] ss:$2 sm:$0xff] }
 0x4e8   : > { %v4680_v0 = vmax.f32 %v4662_v40, 0.0  ;;  %v4645_v18 = vadd.f32 %v14315_v41, %v4464_v54  ;;  %v5441_v61 = vld [vmem:[#allocation3 + $0x3f] ss:$2 sm:$0xff] }
 0x4e9   : > { %v4432_v24 = vpop.f32.mrf.mxu1 }
 0x4ea   : > { %v4698_v44 = vsel %vm2997_vm6, %v4680_v0, 0.0  ;;  %v4663_v11 = vadd.f32 %v14360_v46, %v4645_v18  ;;  %v4465_v31 = vadd.f32 %v4432_v24, %v4284_v27  ;;  %v5439_v18 = vld [vmem:[#allocation3 + $0x2f] ss:$2 sm:$0xff]  ;;  %v5232_v24 = vpack.c.bf16 %v5187_v7, %v5185_v2 }
 0x4eb   : > { %4716 = vst.msk [vmem:[#allocation3 + $0x178] sm:$0xff] %vm439_vm3, %v4698_v44  ;;  %v11094_v59 = vpop.f32.mrf.mxu1  ;;  %v5445_v44 = vld [vmem:[#allocation3 + $0x5f] ss:$2 sm:$0xff] }
 0x4ec   : > { %v4681_v33 = vmax.f32 %v4663_v11, 0.0  ;;  %v4646_v38 = vadd.f32 %v14321_v50, %v4465_v31  ;;  %v5195_v11 = vld [vmem:[#allocation3 + $0x69] ss:$2 sm:$0xff]  ;;  %v5189_v31 = vld [vmem:[#allocation3 + $0x39] ss:$2 sm:$0xff] }
 0x4ed   : > { %v4437_v41 = vpop.f32.mrf.mxu1  ;;  %v5443_v59 = vld [vmem:[#allocation3 + $0x4f] ss:$2 sm:$0xff] }
 0x4ee   : > { %v4699_v15 = vsel %vm2995_vm4, %v4681_v33, 0.0  ;;  %v4664_v20 = vadd.f32 %v14360_v46, %v4646_v38  ;;  %v4466_v35 = vadd.f32 %v4437_v41, %v4285_v39  ;;  %v4828_v19 = vld [vmem:[#allocation3 + $0x168] ss:$2 sm:$0xff]  ;;  %v4767_v37 = vld [vmem:[#allocation3 + $0x167] ss:$2 sm:$0xff]  ;;  %v5487_v39 = vpack.c.bf16 %v5445_v44, %v5443_v59  ;;  %v16536_v41 = vld [vmem:[#allocation42_spill] sm:$0xff] }
 0x4ef   : > { %4717 = vst.msk [vmem:[#allocation3 + $0x180] sm:$0xff] %vm439_vm3, %v4699_v15  ;;  %v11097_v36 = vpop.f32.mrf.mxu1  ;;  %v4843_v34 = vpack.c.bf16 %v4828_v19, %v4826_v60  ;;  %v4782_v63 = vpack.c.bf16 %v4767_v37, %v4765_v17  ;;  %v5449_v33 = vld [vmem:[#allocation3 + $0x7f] ss:$2 sm:$0xff]  ;;  %v5791_v60 = vsel %vm4883_vm7, %v16536_v41, 0  ;;  %v5447_v15 = vld [vmem:[#allocation3 + $0x6f] ss:$2 sm:$0xff] }
 0x4f0   : > { %v4682_v50 = vmax.f32 %v4664_v20, 0.0  ;;  %v4647_v47 = vadd.f32 %v14327_v55, %v4466_v35  ;;  %v5193_v17 = vld [vmem:[#allocation3 + $0x59] ss:$2 sm:$0xff]  ;;  %v5488_v19 = vpack.c.bf16 %v5449_v33, %v5447_v15  ;;  %v5695_v59 = vld [vmem:[#allocation3 + $0x40] ss:$2 sm:$0xff] }
 0x4f1   : > { %v4440_v21 = vpop.f32.mrf.mxu1  ;;  %11163 = vmatprep.mubr.msk.bf16.mxu1 %vm439_vm3, %v4843_v34  ;;  %11189 = vmatprep.mubr.msk.bf16.mxu0 %vm439_vm3, %v4782_v63  ;;  %v5234_v26 = vpack.c.bf16 %v5195_v11, %v5193_v17  ;;  %v16537_v20 = vld [vmem:[#allocation23_spill] sm:$0xff]  ;;  %v14502_v37 = vld [vmem:[%s16301_s3 + $0x18] sm:$0xf]  ;;  %v14507_v36 = vld [vmem:[%s16301_s3 + $0x1c] sm:$0xf] }
 0x4f2   : > { %v4700_v52 = vsel %vm2996_vm5, %v4682_v50, 0.0  ;;  %v4665_v8 = vadd.f32 %v14360_v46, %v4647_v47  ;;  %v4467_v56 = vadd.f32 %v4440_v21, %v4286_v5  ;;  %v6045_v35 = vsel %vm4883_vm7, %v16537_v20, 0  ;;  %v5199_v34 = vld [vmem:[#allocation3 + $0x89] ss:$2 sm:$0xff]  ;;  %v5197_v5 = vld [vmem:[#allocation3 + $0x79] ss:$2 sm:$0xff] }
 0x4f3   : > { %4718 = vst.msk [vmem:[#allocation3 + $0x188] sm:$0xff] %vm439_vm3, %v4700_v52  ;;  %v11098_v4 = vpop.f32.mrf.mxu1  ;;  %v5453_v63 = vld [vmem:[#allocation3 + $0x9f] ss:$2 sm:$0xff]  ;;  %v5451_v21 = vld [vmem:[#allocation3 + $0x8f] ss:$2 sm:$0xff]  ;;  %v5235_v52 = vpack.c.bf16 %v5199_v34, %v5197_v5 }
 0x4f4   : > { %v4683_v43 = vmax.f32 %v4665_v8, 0.0  ;;  %v4648_v55 = vadd.f32 %v14333_v1, %v4467_v56  ;;  %v5203_v50 = vld [vmem:[#allocation3 + $0xa9] ss:$2 sm:$0xff]  ;;  %v5489_v8 = vpack.c.bf16 %v5453_v63, %v5451_v21  ;;  %v5201_v56 = vld [vmem:[#allocation3 + $0x99] ss:$2 sm:$0xff] }
 0x4f5   : > { %v4445_v14 = vpop.f32.mrf.mxu1  ;;  %v5457_v47 = vld [vmem:[#allocation3 + $0xbf] ss:$2 sm:$0xff]  ;;  %v5455_v4 = vld [vmem:[#allocation3 + $0xaf] ss:$2 sm:$0xff]  ;;  %v5693_v17 = vld [vmem:[#allocation3 + $0x30] ss:$2 sm:$0xff] }
 0x4f6   : > { %v4701_v22 = vsel %vm2997_vm6, %v4683_v43, 0.0  ;;  %v4666_v25 = vadd.f32 %v14360_v46, %v4648_v55  ;;  %v4468_v3 = vadd.f32 %v4445_v14, %v4287_v58  ;;  %v4830_v62 = vld [vmem:[#allocation3 + $0x178] ss:$2 sm:$0xff]  ;;  %v5236_v43 = vpack.c.bf16 %v5203_v50, %v5201_v56  ;;  %v5461_v58 = vld [vmem:[#allocation3 + $0xdf] ss:$2 sm:$0xff] }
 0x4f7   : > { %4719 = vst.msk [vmem:[#allocation3 + $0x190] sm:$0xff] %vm439_vm3, %v4701_v22  ;;  %v11101_v51 = vpop.f32.mrf.mxu1  ;;  %v5490_v55 = vpack.c.bf16 %v5457_v47, %v5455_v4  ;;  %v5211_v14 = vld [vmem:[#allocation3 + $0xe9] ss:$2 sm:$0xff]  ;;  %v5740_v15 = vpack.c.bf16 %v5695_v59, %v5693_v17  ;;  %v5703_v34 = vld [vmem:[#allocation3 + $0x80] ss:$2 sm:$0xff] }
 0x4f8   : > { %v4684_v42 = vmax.f32 %v4666_v25, 0.0  ;;  %v4649_v57 = vadd.f32 %v14339_v32, %v4468_v3  ;;  %v4769_v32 = vld [vmem:[#allocation3 + $0x177] ss:$2 sm:$0xff]  ;;  %v5697_v63 = vld [vmem:[#allocation3 + $0x50] ss:$2 sm:$0xff] }
 0x4f9   : > { %v4448_v1 = vpop.f32.mrf.mxu1  ;;  %v5465_v22 = vld [vmem:[#allocation3 + $0xff] ss:$2 sm:$0xff]  ;;  %v5459_v3 = vld [vmem:[#allocation3 + $0xcf] ss:$2 sm:$0xff] }
 0x4fa   : > { %v4702_v16 = vsel %vm2995_vm4, %v4684_v42, 0.0  ;;  %v4667_v53 = vadd.f32 %v14360_v46, %v4649_v57  ;;  %v4469_v28 = vadd.f32 %v4448_v1, %v4288_v49  ;;  %v5205_v25 = vld [vmem:[#allocation3 + $0xb9] ss:$2 sm:$0xff]  ;;  %v5491_v42 = vpack.c.bf16 %v5461_v58, %v5459_v3 }
 0x4fb   : > { %4720 = vst.msk [vmem:[#allocation3 + $0x198] sm:$0xff] %vm439_vm3, %v4702_v16  ;;  %v11102_v6 = vpop.f32.mrf.mxu1  ;;  %v5237_v51 = vpack.c.bf16 %v5207_v30, %v5205_v25  ;;  %v5209_v57 = vld [vmem:[#allocation3 + $0xd9] ss:$2 sm:$0xff]  ;;  %v5492_v1 = vpack.c.bf16 %v5465_v22, %v5463_v48  ;;  %v5215_v16 = vld [vmem:[#allocation3 + $0x109] ss:$2 sm:$0xff] }
 0x4fc   : > { %v4685_v45 = vmax.f32 %v4667_v53, 0.0  ;;  %v4650_v23 = vadd.f32 %v14352_v9, %v4469_v28  ;;  %v5486_v9 = vpack.c.bf16 %v5441_v61, %v5439_v18  ;;  %v5238_v49 = vpack.c.bf16 %v5211_v14, %v5209_v57  ;;  %v5469_v53 = vld [vmem:[#allocation3 + $0x11f] ss:$2 sm:$0xff]  ;;  %v5475_v18 = vld [vmem:[#allocation3 + $0x14f] ss:$2 sm:$0xff] }
 0x4fd   : > { %v5219_v28 = vld [vmem:[#allocation3 + $0x129] ss:$2 sm:$0xff]  ;;  %v14544_v30 = vld [vmem:[%s16301_s3 + $0x20] sm:$0xf]  ;;  %v5705_v22 = vld [vmem:[#allocation3 + $0x90] ss:$2 sm:$0xff] }
 0x4fe   : > { %v4703_v10 = vsel %vm2996_vm5, %v4685_v45, 0.0  ;;  %v4668_v12 = vadd.f32 %v14360_v46, %v4650_v23  ;;  %v4832_v40 = vld [vmem:[#allocation3 + $0x188] ss:$2 sm:$0xff]  ;;  %v4771_v54 = vld [vmem:[#allocation3 + $0x187] ss:$2 sm:$0xff] }
 0x4ff   : > { %4721 = vst.msk [vmem:[#allocation3 + $0x1a0] sm:$0xff] %vm439_vm3, %v4703_v10  ;;  %v4844_v13 = vpack.c.bf16 %v4832_v40, %v4830_v62  ;;  %v4783_v0 = vpack.c.bf16 %v4771_v54, %v4769_v32  ;;  %v5191_v46 = vld [vmem:[#allocation3 + $0x49] ss:$2 sm:$0xff]  ;;  %v5213_v45 = vld [vmem:[#allocation3 + $0xf9] ss:$2 sm:$0xff] }
 0x500   : > { %v4686_v27 = vmax.f32 %v4668_v12, 0.0  ;;  %v5233_v38 = vpack.c.bf16 %v5191_v46, %v5189_v31  ;;  %v5473_v6 = vld [vmem:[#allocation3 + $0x13f] ss:$2 sm:$0xff]  ;;  %v5467_v23 = vld [vmem:[#allocation3 + $0x10f] ss:$2 sm:$0xff]  ;;  %v5239_v2 = vpack.c.bf16 %v5215_v16, %v5213_v45 }
 0x501   : > { %11164 = vmatmul.mubr.msk.bf16.gmra.mxu1 %vm439_vm3, %v4844_v13  ;;  %11190 = vmatmul.mubr.msk.bf16.gmra.mxu0 %vm439_vm3, %v4783_v0  ;;  %v5493_v7 = vpack.c.bf16 %v5469_v53, %v5467_v23  ;;  %v5217_v62 = vld [vmem:[#allocation3 + $0x119] ss:$2 sm:$0xff]  ;;  %v5223_v12 = vld [vmem:[#allocation3 + $0x149] ss:$2 sm:$0xff]  ;;  %v5719_v53 = vld [vmem:[#allocation3 + $0x100] ss:$2 sm:$0xff] }
 0x502   : > { %v4704_v29 = vsel %vm2997_vm6, %v4686_v27, 0.0  ;;  %11195 = vmatprep.mubr.msk.bf16.mxu1 %vm439_vm3, %v5232_v24  ;;  %11221 = vmatprep.mubr.msk.bf16.mxu0 %vm439_vm3, %v5486_v9  ;;  %v5471_v32 = vld [vmem:[#allocation3 + $0x12f] ss:$2 sm:$0xff]  ;;  %v5240_v61 = vpack.c.bf16 %v5219_v28, %v5217_v62  ;;  %v5477_v40 = vld [vmem:[#allocation3 + $0x15f] ss:$2 sm:$0xff] }
 0x503   : > { %4722 = vst.msk [vmem:[#allocation3 + $0x1a8] sm:$0xff] %vm439_vm3, %v4704_v29  ;;  %v5494_v10 = vpack.c.bf16 %v5473_v6, %v5471_v32  ;;  %v5227_v54 = vld [vmem:[#allocation3 + $0x169] ss:$2 sm:$0xff]  ;;  %v5221_v0 = vld [vmem:[#allocation3 + $0x139] ss:$2 sm:$0xff]  ;;  %v5495_v24 = vpack.c.bf16 %v5477_v40, %v5475_v18 }
 0x504   : > { %v5481_v13 = vld [vmem:[#allocation3 + $0x17f] ss:$2 sm:$0xff]  ;;  %v5241_v27 = vpack.c.bf16 %v5223_v12, %v5221_v0  ;;  %v5479_v29 = vld [vmem:[#allocation3 + $0x16f] ss:$2 sm:$0xff]  ;;  %v5713_v6 = vld [vmem:[#allocation3 + $0xd0] ss:$2 sm:$0xff] }
 0x505   : > { %v5225_v9 = vld [vmem:[#allocation3 + $0x159] ss:$2 sm:$0xff]  ;;  %v5496_v44 = vpack.c.bf16 %v5481_v13, %v5479_v29  ;;  %v5231_v11 = vld [vmem:[#allocation3 + $0x189] ss:$2 sm:$0xff]  ;;  %v5727_v40 = vld [vmem:[#allocation3 + $0x140] ss:$2 sm:$0xff] }
 0x506   : > { %v5242_v46 = vpack.c.bf16 %v5227_v54, %v5225_v9  ;;  %v5949_v33 = vld [vmem:[#allocation3 + $0x41] ss:$2 sm:$0xff]  ;;  %v5951_v50 = vld [vmem:[#allocation3 + $0x51] ss:$2 sm:$0xff]  ;;  %v5721_v13 = vld [vmem:[#allocation3 + $0x110] ss:$2 sm:$0xff] }
 0x507   : > { %v5957_v47 = vld [vmem:[#allocation3 + $0x81] ss:$2 sm:$0xff]  ;;  %v5955_v4 = vld [vmem:[#allocation3 + $0x71] ss:$2 sm:$0xff] }
 0x508   : > { %v5961_v58 = vld [vmem:[#allocation3 + $0xa1] ss:$2 sm:$0xff]  ;;  %v5959_v25 = vld [vmem:[#allocation3 + $0x91] ss:$2 sm:$0xff] }
 0x509   : > { %11196 = vmatmul.mubr.msk.bf16.vlgmr.msra.gmra.mxu1 %vm439_vm3, %v5233_v38  ;;  %11222 = vmatmul.mubr.msk.bf16.vlgmr.msra.gmra.mxu0 %vm439_vm3, %v5487_v39  ;;  %v5229_v38 = vld [vmem:[#allocation3 + $0x179] ss:$2 sm:$0xff] }
 0x50a   : > { %11246 = vmatpush3.bf16.msra.mxu1 %v5791_v60  ;;  %11199 = vmatprep.mubr.msk.bf16.mxu1 %vm439_vm3, %v5234_v26  ;;  %v5485_v31 = vld [vmem:[#allocation3 + $0x19f] ss:$2 sm:$0xff]  ;;  %v5483_v39 = vld [vmem:[#allocation3 + $0x18f] ss:$2 sm:$0xff]  ;;  %v5243_v41 = vpack.c.bf16 %v5231_v11, %v5229_v38 }
 0x50b   : > { %11225 = vmatprep.mubr.msk.bf16.mxu0 %vm439_vm3, %v5488_v19  ;;  %11272 = vmatpush3.bf16.msra.mxu0 %v6045_v35  ;;  %v5497_v60 = vpack.c.bf16 %v5485_v31, %v5483_v39  ;;  %v5947_v26 = vld [vmem:[#allocation3 + $0x31] ss:$2 sm:$0xff]  ;;  %v5699_v35 = vld [vmem:[#allocation3 + $0x60] ss:$2 sm:$0xff]  ;;  %v5953_v19 = vld [vmem:[#allocation3 + $0x61] ss:$2 sm:$0xff] }
 0x50c   : > { %11617 = vmatprep.subr.msk.bf16.mxu1 %vm4883_vm7, %v14502_v37  ;;  %11618 = vmatprep.subr.msk.bf16.mxu0 %vm4883_vm7, %v14507_v36  ;;  %v5994_v20 = vpack.c.bf16 %v5949_v33, %v5947_v26  ;;  %v5741_v5 = vpack.c.bf16 %v5699_v35, %v5697_v63  ;;  %v5995_v21 = vpack.c.bf16 %v5953_v19, %v5951_v50  ;;  %v5965_v14 = vld [vmem:[#allocation3 + $0xc1] ss:$2 sm:$0xff]  ;;  %v5963_v57 = vld [vmem:[#allocation3 + $0xb1] ss:$2 sm:$0xff]  ;;  %v5735_v31 = vld [vmem:[#allocation3 + $0x180] ss:$2 sm:$0xff] }
 0x50d   : > { %v5969_v16 = vld [vmem:[#allocation3 + $0xe1] ss:$2 sm:$0xff]  ;;  %v5967_v45 = vld [vmem:[#allocation3 + $0xd1] ss:$2 sm:$0xff]  ;;  %v5729_v33 = vld [vmem:[#allocation3 + $0x150] ss:$2 sm:$0xff] }
 0x50e   : > { %v5973_v28 = vld [vmem:[#allocation3 + $0x101] ss:$2 sm:$0xff]  ;;  %v5971_v62 = vld [vmem:[#allocation3 + $0xf1] ss:$2 sm:$0xff]  ;;  %v5737_v63 = vld [vmem:[#allocation3 + $0x190] ss:$2 sm:$0xff] }
 0x50f   : > { %v5977_v12 = vld [vmem:[#allocation3 + $0x121] ss:$2 sm:$0xff]  ;;  %v5975_v0 = vld [vmem:[#allocation3 + $0x111] ss:$2 sm:$0xff] }
 0x510   : > { %v5981_v54 = vld [vmem:[#allocation3 + $0x141] ss:$2 sm:$0xff]  ;;  %v5979_v9 = vld [vmem:[#allocation3 + $0x131] ss:$2 sm:$0xff] }
 0x511   : > { %11200 = vmatmul.mubr.msk.bf16.gmra.mxu1 %vm439_vm3, %v5235_v52  ;;  %11226 = vmatmul.mubr.msk.bf16.gmra.mxu0 %vm439_vm3, %v5489_v8  ;;  %v6278_v52 = vsel %vm4883_vm7, %v14502_v37, 0  ;;  %v5701_v8 = vld [vmem:[#allocation3 + $0x70] ss:$2 sm:$0xff]  ;;  %v5707_v37 = vld [vmem:[#allocation3 + $0xa0] ss:$2 sm:$0xff] }
 0x512   : > { %11203 = vmatprep.mubr.msk.bf16.mxu1 %vm439_vm3, %v5236_v43  ;;  %11229 = vmatprep.mubr.msk.bf16.mxu0 %vm439_vm3, %v5490_v55  ;;  %v5742_v56 = vpack.c.bf16 %v5703_v34, %v5701_v8  ;;  %v6511_v43 = vsel %vm4883_vm7, %v14507_v36, 0  ;;  %v5996_v55 = vpack.c.bf16 %v5957_v47, %v5955_v4  ;;  %v5711_v36 = vld [vmem:[#allocation3 + $0xc0] ss:$2 sm:$0xff]  ;;  %v5743_v3 = vpack.c.bf16 %v5707_v37, %v5705_v22  ;;  %v5985_v11 = vld [vmem:[#allocation3 + $0x161] ss:$2 sm:$0xff]  ;;  %v14570_v4 = vpop.f32.mrf.mxu0 }
 0x513   : > { %v5989_v59 = vld [vmem:[#allocation3 + $0x181] ss:$2 sm:$0xff]  ;;  %v5983_v38 = vld [vmem:[#allocation3 + $0x151] ss:$2 sm:$0xff]  ;;  %v6434_v34 = vld [vmem:[#allocation3 + $0x58] ss:$2 sm:$0xff] }
 0x514   : > { %v5987_v17 = vld [vmem:[#allocation3 + $0x171] ss:$2 sm:$0xff]  ;;  %v5993_v35 = vld [vmem:[#allocation3 + $0x1a1] ss:$2 sm:$0xff]  ;;  %v6436_v37 = vld [vmem:[#allocation3 + $0x78] ss:$2 sm:$0xff] }
 0x515   : > { %v6201_v19 = vld [vmem:[#allocation3 + $0x57] ss:$2 sm:$0xff]  ;;  %v6438_v22 = vld [vmem:[#allocation3 + $0x98] ss:$2 sm:$0xff] }
 0x516   : > { %v5991_v50 = vld [vmem:[#allocation3 + $0x191] ss:$2 sm:$0xff] }
 0x519   : > { %11204 = vmatmul.mubr.msk.bf16.gmra.mxu1 %vm439_vm3, %v5237_v51  ;;  %11230 = vmatmul.mubr.msk.bf16.gmra.mxu0 %vm439_vm3, %v5491_v42  ;;  %v5997_v51 = vpack.c.bf16 %v5961_v58, %v5959_v25  ;;  %v5709_v42 = vld [vmem:[#allocation3 + $0xb0] ss:$2 sm:$0xff]  ;;  %v6205_v58 = vld [vmem:[#allocation3 + $0x97] ss:$2 sm:$0xff]  ;;  %v14574_v25 = vpop.f32.mrf.mxu0 }
 0x51a   : > { %11207 = vmatprep.mubr.msk.bf16.mxu1 %vm439_vm3, %v5238_v49  ;;  %11233 = vmatprep.mubr.msk.bf16.mxu0 %vm439_vm3, %v5492_v1  ;;  %v5744_v48 = vpack.c.bf16 %v5711_v36, %v5709_v42  ;;  %v5998_v49 = vpack.c.bf16 %v5965_v14, %v5963_v57  ;;  %v5715_v1 = vld [vmem:[#allocation3 + $0xe0] ss:$2 sm:$0xff]  ;;  %v6202_v36 = vld [vmem:[#allocation3 + $0x67] ss:$2 sm:$0xff]  ;;  %v6744_v57 = vsel %vm4883_vm7, %v14544_v30, 0 }
 0x51b   : > { %v5745_v23 = vpack.c.bf16 %v5715_v1, %v5713_v6  ;;  %v6435_v14 = vld [vmem:[#allocation3 + $0x68] ss:$2 sm:$0xff]  ;;  %v6207_v6 = vld [vmem:[#allocation3 + $0xb7] ss:$2 sm:$0xff] }
 0x51c   : > { %v6461_v42 = vpack.c.bf16 %v6436_v37, %v6435_v14  ;;  %v6437_v1 = vld [vmem:[#allocation3 + $0x88] ss:$2 sm:$0xff]  ;;  %v6452_v14 = vld [vmem:[#allocation3 + $0x178] ss:$2 sm:$0xff] }
 0x521   : > { %11208 = vmatmul.mubr.msk.bf16.gmra.mxu1 %vm439_vm3, %v5239_v2  ;;  %11234 = vmatmul.mubr.msk.bf16.gmra.mxu0 %vm439_vm3, %v5493_v7  ;;  %v5999_v2 = vpack.c.bf16 %v5969_v16, %v5967_v45  ;;  %v5717_v7 = vld [vmem:[#allocation3 + $0xf0] ss:$2 sm:$0xff]  ;;  %v6462_v16 = vpack.c.bf16 %v6438_v22, %v6437_v1  ;;  %v6222_v22 = vld [vmem:[#allocation3 + $0x197] ss:$2 sm:$0xff] }
 0x522   : > { %11211 = vmatprep.mubr.msk.bf16.mxu1 %vm439_vm3, %v5240_v61  ;;  %11237 = vmatprep.mubr.msk.bf16.mxu0 %vm439_vm3, %v5494_v10  ;;  %v5746_v32 = vpack.c.bf16 %v5719_v53, %v5717_v7  ;;  %v6000_v61 = vpack.c.bf16 %v5973_v28, %v5971_v62  ;;  %v5723_v10 = vld [vmem:[#allocation3 + $0x120] ss:$2 sm:$0xff]  ;;  %v14583_v53 = vpop.f32.mrf.mxu0 }
 0x523   : > { %v5747_v18 = vpack.c.bf16 %v5723_v10, %v5721_v13  ;;  %v6440_v45 = vld [vmem:[#allocation3 + $0xb8] ss:$2 sm:$0xff]  ;;  %v6439_v7 = vld [vmem:[#allocation3 + $0xa8] ss:$2 sm:$0xff] }
 0x524   : > { %v14588_v62 = vpop.f32.mrf.mxu0  ;;  %v6463_v10 = vpack.c.bf16 %v6440_v45, %v6439_v7  ;;  %v6453_v45 = vld [vmem:[#allocation3 + $0x188] ss:$2 sm:$0xff] }
 0x529   : > { %11212 = vmatmul.mubr.msk.bf16.gmra.mxu1 %vm439_vm3, %v5241_v27  ;;  %11238 = vmatmul.mubr.msk.bf16.gmra.mxu0 %vm439_vm3, %v5495_v24  ;;  %v6001_v27 = vpack.c.bf16 %v5977_v12, %v5975_v0  ;;  %v5725_v24 = vld [vmem:[#allocation3 + $0x130] ss:$2 sm:$0xff]  ;;  %v6208_v12 = vld [vmem:[#allocation3 + $0xc7] ss:$2 sm:$0xff]  ;;  %v14596_v0 = vpop.f32.mrf.mxu0 }
 0x52a   : > { %11215 = vmatprep.mubr.msk.bf16.mxu1 %vm439_vm3, %v5242_v46  ;;  %11241 = vmatprep.mubr.msk.bf16.mxu0 %vm439_vm3, %v5496_v44  ;;  %v5748_v29 = vpack.c.bf16 %v5727_v40, %v5725_v24  ;;  %v6002_v46 = vpack.c.bf16 %v5981_v54, %v5979_v9  ;;  %v5731_v44 = vld [vmem:[#allocation3 + $0x160] ss:$2 sm:$0xff]  ;;  %v6213_v9 = vld [vmem:[#allocation3 + $0x117] ss:$2 sm:$0xff] }
 0x52b   : > { %v5749_v39 = vpack.c.bf16 %v5731_v44, %v5729_v33  ;;  %v6441_v40 = vld [vmem:[#allocation3 + $0xc8] ss:$2 sm:$0xff]  ;;  %v6444_v24 = vld [vmem:[#allocation3 + $0xf8] ss:$2 sm:$0xff] }
 0x52c   : > { %v6443_v44 = vld [vmem:[#allocation3 + $0xe8] ss:$2 sm:$0xff] }
 0x52d   : > { %v6465_v33 = vpack.c.bf16 %v6444_v24, %v6443_v44 }
 0x531   : > { %11216 = vmatmul.mubr.msk.bf16.gmra.mxu1 %vm439_vm3, %v5243_v41  ;;  %11242 = vmatmul.mubr.msk.bf16.gmra.mxu0 %vm439_vm3, %v5497_v60  ;;  %v6003_v41 = vpack.c.bf16 %v5985_v11, %v5983_v38  ;;  %v5733_v60 = vld [vmem:[#allocation3 + $0x170] ss:$2 sm:$0xff]  ;;  %v14600_v11 = vpop.f32.mrf.mxu0  ;;  %v6212_v38 = vld [vmem:[#allocation3 + $0x107] ss:$2 sm:$0xff] }
 0x532   : > { %11247 = vmatprep.mubr.msk.bf16.mxu1 %vm439_vm3, %v5740_v15  ;;  %11273 = vmatprep.mubr.msk.bf16.mxu0 %vm439_vm3, %v5994_v20  ;;  %v5750_v26 = vpack.c.bf16 %v5735_v31, %v5733_v60  ;;  %v6004_v15 = vpack.c.bf16 %v5989_v59, %v5987_v17  ;;  %v5739_v20 = vld [vmem:[#allocation3 + $0x1a0] ss:$2 sm:$0xff] }
 0x533   : > { %v5751_v47 = vpack.c.bf16 %v5739_v20, %v5737_v63  ;;  %v14608_v17 = vpop.f32.mrf.mxu0  ;;  %v6448_v20 = vld [vmem:[#allocation3 + $0x138] ss:$2 sm:$0xff]  ;;  %v6447_v63 = vld [vmem:[#allocation3 + $0x128] ss:$2 sm:$0xff] }
 0x539   : > { %11248 = vmatmul.mubr.msk.bf16.vlgmr.msra.gmra.mxu1 %vm439_vm3, %v5741_v5  ;;  %11274 = vmatmul.mubr.msk.bf16.vlgmr.msra.gmra.mxu0 %vm439_vm3, %v5995_v21  ;;  %v6005_v5 = vpack.c.bf16 %v5993_v35, %v5991_v50  ;;  %v6200_v21 = vld [vmem:[#allocation3 + $0x47] ss:$2 sm:$0xff]  ;;  %v6217_v35 = vld [vmem:[#allocation3 + $0x157] ss:$2 sm:$0xff]  ;;  %v14612_v50 = vpop.f32.mrf.mxu0 }
 0x53a   : > { %11298 = vmatpush3.bf16.msra.mxu1 %v6278_v52  ;;  %11251 = vmatprep.mubr.msk.bf16.mxu1 %vm439_vm3, %v5742_v56  ;;  %v6433_v52 = vld [vmem:[#allocation3 + $0x48] ss:$2 sm:$0xff]  ;;  %v6227_v8 = vpack.c.bf16 %v6201_v19, %v6200_v21  ;;  %v6450_v19 = vld [vmem:[#allocation3 + $0x158] ss:$2 sm:$0xff]  ;;  %v6467_v21 = vpack.c.bf16 %v6448_v20, %v6447_v63  ;;  %v6670_v20 = vld [vmem:[#allocation3 + $0x89] ss:$2 sm:$0xff] }
 0x53b   : > { %11277 = vmatprep.mubr.msk.bf16.mxu0 %vm439_vm3, %v5996_v55  ;;  %11324 = vmatpush3.bf16.msra.mxu0 %v6511_v43  ;;  %v6460_v56 = vpack.c.bf16 %v6434_v34, %v6433_v52  ;;  %v14572_v43 = vpop.f32.mrf.mxu1  ;;  %v6203_v55 = vld [vmem:[#allocation3 + $0x77] ss:$2 sm:$0xff]  ;;  %v6214_v34 = vld [vmem:[#allocation3 + $0x127] ss:$2 sm:$0xff]  ;;  %v14620_v37 = vpop.f32.mrf.mxu0 }
 0x53c   : > { %11619 = vmatprep.subr.msk.bf16.mxu1 %vm4883_vm7, %v14544_v30  ;;  %v6209_v30 = vld [vmem:[#allocation3 + $0xd7] ss:$2 sm:$0xff]  ;;  %v6216_v52 = vld [vmem:[#allocation3 + $0x147] ss:$2 sm:$0xff] }
 0x53d   : > { %v6231_v54 = vpack.c.bf16 %v6209_v30, %v6208_v12  ;;  %v6457_v12 = vld [vmem:[#allocation3 + $0x1a8] ss:$2 sm:$0xff]  ;;  %v6673_v63 = vld [vmem:[#allocation3 + $0xb9] ss:$2 sm:$0xff] }
 0x541   : > { %11252 = vmatmul.mubr.msk.bf16.gmra.mxu1 %vm439_vm3, %v5743_v3  ;;  %11278 = vmatmul.mubr.msk.bf16.gmra.mxu0 %vm439_vm3, %v5997_v51  ;;  %v14576_v3 = vpop.f32.mrf.mxu1  ;;  %v6228_v51 = vpack.c.bf16 %v6203_v55, %v6202_v36  ;;  %v6219_v36 = vld [vmem:[#allocation3 + $0x177] ss:$2 sm:$0xff] }
 0x542   : > { %11255 = vmatprep.mubr.msk.bf16.mxu1 %vm439_vm3, %v5744_v48  ;;  %11281 = vmatprep.mubr.msk.bf16.mxu0 %vm439_vm3, %v5998_v49  ;;  %v6204_v48 = vld [vmem:[#allocation3 + $0x87] ss:$2 sm:$0xff] }
 0x543   : > { %v6229_v49 = vpack.c.bf16 %v6205_v58, %v6204_v48  ;;  %v14585_v28 = vpop.f32.mrf.mxu1  ;;  %v14624_v48 = vpop.f32.mrf.mxu0 }
 0x549   : > { %11256 = vmatmul.mubr.msk.bf16.gmra.mxu1 %vm439_vm3, %v5745_v23  ;;  %11282 = vmatmul.mubr.msk.bf16.gmra.mxu0 %vm439_vm3, %v5999_v2  ;;  %v6442_v23 = vld [vmem:[#allocation3 + $0xd8] ss:$2 sm:$0xff]  ;;  %v6206_v2 = vld [vmem:[#allocation3 + $0xa7] ss:$2 sm:$0xff] }
 0x54a   : > { %11259 = vmatprep.mubr.msk.bf16.mxu1 %vm439_vm3, %v5746_v32  ;;  %11285 = vmatprep.mubr.msk.bf16.mxu0 %vm439_vm3, %v6000_v61  ;;  %v14590_v32 = vpop.f32.mrf.mxu1  ;;  %v6230_v61 = vpack.c.bf16 %v6207_v6, %v6206_v2  ;;  %v6464_v13 = vpack.c.bf16 %v6442_v23, %v6441_v40  ;;  %v6220_v6 = vld [vmem:[#allocation3 + $0x187] ss:$2 sm:$0xff]  ;;  %v14632_v2 = vpop.f32.mrf.mxu0  ;;  %v6459_v40 = vld [vmem:[#allocation3 + $0x1b8] ss:$2 sm:$0xff] }
 0x54b   : > { %v6237_v30 = vpack.c.bf16 %v6222_v22, %v6220_v6 }
 0x551   : > { %11260 = vmatmul.mubr.msk.bf16.gmra.mxu1 %vm439_vm3, %v5747_v18  ;;  %11286 = vmatmul.mubr.msk.bf16.gmra.mxu0 %vm439_vm3, %v6001_v27  ;;  %v14598_v18 = vpop.f32.mrf.mxu1  ;;  %v6211_v27 = vld [vmem:[#allocation3 + $0xf7] ss:$2 sm:$0xff] }
 0x552   : > { %11263 = vmatprep.mubr.msk.bf16.mxu1 %vm439_vm3, %v5748_v29  ;;  %11289 = vmatprep.mubr.msk.bf16.mxu0 %vm439_vm3, %v6002_v46  ;;  %v6446_v29 = vld [vmem:[#allocation3 + $0x118] ss:$2 sm:$0xff]  ;;  %v6210_v46 = vld [vmem:[#allocation3 + $0xe7] ss:$2 sm:$0xff] }
 0x553   : > { %v14602_v31 = vpop.f32.mrf.mxu1  ;;  %v6232_v59 = vpack.c.bf16 %v6211_v27, %v6210_v46 }
 0x559   : > { %11264 = vmatmul.mubr.msk.bf16.gmra.mxu1 %vm439_vm3, %v5749_v39  ;;  %11290 = vmatmul.mubr.msk.bf16.gmra.mxu0 %vm439_vm3, %v6003_v41  ;;  %v6445_v39 = vld [vmem:[#allocation3 + $0x108] ss:$2 sm:$0xff]  ;;  %v6233_v41 = vpack.c.bf16 %v6213_v9, %v6212_v38  ;;  %v6471_v9 = vpack.c.bf16 %v6459_v40, %v6457_v12  ;;  %v6671_v38 = vld [vmem:[#allocation3 + $0x99] ss:$2 sm:$0xff]  ;;  %v6678_v12 = vld [vmem:[#allocation3 + $0x109] ss:$2 sm:$0xff] }
 0x55a   : > { %11267 = vmatprep.mubr.msk.bf16.mxu1 %vm439_vm3, %v5750_v26  ;;  %11293 = vmatprep.mubr.msk.bf16.mxu0 %vm439_vm3, %v6004_v15  ;;  %v6466_v60 = vpack.c.bf16 %v6446_v29, %v6445_v39  ;;  %v14610_v26 = vpop.f32.mrf.mxu1  ;;  %v6215_v15 = vld [vmem:[#allocation3 + $0x137] ss:$2 sm:$0xff] }
 0x55b   : > { %v6666_v29 = vld [vmem:[#allocation3 + $0x49] ss:$2 sm:$0xff] }
 0x55c   : > { %v6668_v39 = vld [vmem:[#allocation3 + $0x69] ss:$2 sm:$0xff] }
 0x561   : > { %11268 = vmatmul.mubr.msk.bf16.gmra.mxu1 %vm439_vm3, %v5751_v47  ;;  %11294 = vmatmul.mubr.msk.bf16.gmra.mxu0 %vm439_vm3, %v6005_v5  ;;  %v14614_v47 = vpop.f32.mrf.mxu1  ;;  %v6234_v5 = vpack.c.bf16 %v6215_v15, %v6214_v34 }
 0x562   : > { %11299 = vmatprep.mubr.msk.bf16.mxu1 %vm439_vm3, %v6227_v8  ;;  %11325 = vmatprep.mubr.msk.bf16.mxu0 %vm439_vm3, %v6460_v56  ;;  %v6449_v8 = vld [vmem:[#allocation3 + $0x148] ss:$2 sm:$0xff]  ;;  %v6235_v56 = vpack.c.bf16 %v6217_v35, %v6216_v52  ;;  %v6695_v35 = vpack.c.bf16 %v6671_v38, %v6670_v20  ;;  %v6685_v38 = vld [vmem:[#allocation3 + $0x179] ss:$2 sm:$0xff] }
 0x563   : > { %v6468_v55 = vpack.c.bf16 %v6450_v19, %v6449_v8  ;;  %v14622_v58 = vpop.f32.mrf.mxu1 }
 0x569   : > { %11300 = vmatmul.mubr.msk.bf16.vlgmr.msra.gmra.mxu1 %vm439_vm3, %v6228_v51  ;;  %11326 = vmatmul.mubr.msk.bf16.vlgmr.msra.gmra.mxu0 %vm439_vm3, %v6461_v42  ;;  %v6455_v51 = vld [vmem:[#allocation3 + $0x198] ss:$2 sm:$0xff]  ;;  %v6218_v42 = vld [vmem:[#allocation3 + $0x167] ss:$2 sm:$0xff] }
 0x56a   : > { %11350 = vmatpush3.bf16.msra.mxu1 %v6744_v57  ;;  %11303 = vmatprep.mubr.msk.bf16.mxu1 %vm439_vm3, %v6229_v49  ;;  %v6451_v57 = vld [vmem:[#allocation3 + $0x168] ss:$2 sm:$0xff]  ;;  %v14626_v49 = vpop.f32.mrf.mxu1  ;;  %v6236_v1 = vpack.c.bf16 %v6219_v36, %v6218_v42  ;;  %v6470_v23 = vpack.c.bf16 %v6455_v51, %v6453_v45 }
 0x56b   : > { %11329 = vmatprep.mubr.msk.bf16.mxu0 %vm439_vm3, %v6462_v16  ;;  %v6469_v16 = vpack.c.bf16 %v6452_v14, %v6451_v57 }
 0x56c   : > { %v14634_v7 = vpop.f32.mrf.mxu1 }
 0x56e   : > { %v14638_v27 = vpop.f32.mrf.mxu1 }
 0x571   : > { %11304 = vmatmul.mubr.msk.bf16.gmra.mxu1 %vm439_vm3, %v6230_v61  ;;  %11330 = vmatmul.mubr.msk.bf16.gmra.mxu0 %vm439_vm3, %v6463_v10  ;;  %v6226_v61 = vld [vmem:[#allocation3 + $0x1b7] ss:$2 sm:$0xff]  ;;  %v6224_v10 = vld [vmem:[#allocation3 + $0x1a7] ss:$2 sm:$0xff] }
 0x572   : > { %11307 = vmatprep.mubr.msk.bf16.mxu1 %vm439_vm3, %v6231_v54  ;;  %11333 = vmatprep.mubr.msk.bf16.mxu0 %vm439_vm3, %v6464_v13  ;;  %v6667_v54 = vld [vmem:[#allocation3 + $0x59] ss:$2 sm:$0xff]  ;;  %v14636_v13 = vpop.f32.mrf.mxu0  ;;  %v6238_v24 = vpack.c.bf16 %v6226_v61, %v6224_v10  ;;  %v6676_v61 = vld [vmem:[#allocation3 + $0xe9] ss:$2 sm:$0xff] }
 0x573   : > { %v6693_v46 = vpack.c.bf16 %v6667_v54, %v6666_v29  ;;  %v6681_v54 = vld [vmem:[#allocation3 + $0x139] ss:$2 sm:$0xff] }
 0x574   : > { %v14643_v44 = vpop.f32.mrf.mxu0 }
 0x579   : > { %11308 = vmatmul.mubr.msk.bf16.gmra.mxu1 %vm439_vm3, %v6232_v59  ;;  %11334 = vmatmul.mubr.msk.bf16.gmra.mxu0 %vm439_vm3, %v6465_v33  ;;  %v14645_v59 = vpop.f32.mrf.mxu1  ;;  %v6669_v33 = vld [vmem:[#allocation3 + $0x79] ss:$2 sm:$0xff] }
 0x57a   : > { %11311 = vmatprep.mubr.msk.bf16.mxu1 %vm439_vm3, %v6233_v41  ;;  %11337 = vmatprep.mubr.msk.bf16.mxu0 %vm439_vm3, %v6466_v60  ;;  %v14647_v41 = vpop.f32.mrf.mxu0  ;;  %v6694_v15 = vpack.c.bf16 %v6669_v33, %v6668_v39  ;;  %v6688_v39 = vld [vmem:[#allocation3 + $0x199] ss:$2 sm:$0xff] }
 0x57b   : > { %v14649_v60 = vpop.f32.mrf.mxu1 }
 0x57c   : > { %v14653_v19 = vpop.f32.mrf.mxu0 }
 0x57d   : > { %v14655_v34 = vpop.f32.mrf.mxu1 }
 0x57e   : > { %v14657_v52 = vpop.f32.mrf.mxu0 }
 0x57f   : > { %v14659_v8 = vpop.f32.mrf.mxu1 }
 0x581   : > { %11312 = vmatmul.mubr.msk.bf16.gmra.mxu1 %vm439_vm3, %v6234_v5  ;;  %11338 = vmatmul.mubr.msk.bf16.gmra.mxu0 %vm439_vm3, %v6467_v21  ;;  %v6675_v5 = vld [vmem:[#allocation3 + $0xd9] ss:$2 sm:$0xff]  ;;  %v6672_v21 = vld [vmem:[#allocation3 + $0xa9] ss:$2 sm:$0xff] }
 0x582   : > { %11315 = vmatprep.mubr.msk.bf16.mxu1 %vm439_vm3, %v6235_v56  ;;  %11341 = vmatprep.mubr.msk.bf16.mxu0 %vm439_vm3, %v6468_v55  ;;  %v6696_v56 = vpack.c.bf16 %v6673_v63, %v6672_v21  ;;  %v6674_v55 = vld [vmem:[#allocation3 + $0xc9] ss:$2 sm:$0xff]  ;;  %v6692_v21 = vld [vmem:[#allocation3 + $0x1b9] ss:$2 sm:$0xff] }
 0x583   : > { %v6697_v36 = vpack.c.bf16 %v6675_v5, %v6674_v55  ;;  %v6690_v5 = vld [vmem:[#allocation3 + $0x1a9] ss:$2 sm:$0xff] }
 0x589   : > { %11316 = vmatmul.mubr.msk.bf16.gmra.mxu1 %vm439_vm3, %v6236_v1  ;;  %11342 = vmatmul.mubr.msk.bf16.gmra.mxu0 %vm439_vm3, %v6469_v16  ;;  %v6677_v16 = vld [vmem:[#allocation3 + $0xf9] ss:$2 sm:$0xff] }
 0x58a   : > { %11319 = vmatprep.mubr.msk.bf16.mxu1 %vm439_vm3, %v6237_v30  ;;  %11345 = vmatprep.mubr.msk.bf16.mxu0 %vm439_vm3, %v6470_v23  ;;  %v6679_v30 = vld [vmem:[#allocation3 + $0x119] ss:$2 sm:$0xff]  ;;  %v6698_v10 = vpack.c.bf16 %v6677_v16, %v6676_v61 }
 0x58b   : > { %v6699_v40 = vpack.c.bf16 %v6679_v30, %v6678_v12 }
 0x591   : > { %11320 = vmatmul.mubr.msk.bf16.gmra.mxu1 %vm439_vm3, %v6238_v24  ;;  %11346 = vmatmul.mubr.msk.bf16.gmra.mxu0 %vm439_vm3, %v6471_v9  ;;  %v6683_v24 = vld [vmem:[#allocation3 + $0x159] ss:$2 sm:$0xff]  ;;  %v6680_v9 = vld [vmem:[#allocation3 + $0x129] ss:$2 sm:$0xff] }
 0x592   : > { %11351 = vmatprep.mubr.msk.bf16.mxu1 %vm439_vm3, %v6693_v46  ;;  %v6700_v29 = vpack.c.bf16 %v6681_v54, %v6680_v9  ;;  %v6682_v46 = vld [vmem:[#allocation3 + $0x149] ss:$2 sm:$0xff] }
 0x593   : > { %v6701_v33 = vpack.c.bf16 %v6683_v24, %v6682_v46  ;;  %v5098_v24 = vadd.f32 %v14570_v4, %v14572_v43  ;;  %v5090_v46 = vadd.f32 %v14574_v25, %v14576_v3  ;;  %v5114_v25 = vadd.f32 %v14596_v0, %v14598_v18 }
 0x599   : > { %11352 = vmatmul.mubr.msk.bf16.vlgmr.msra.gmra.mxu1 %vm439_vm3, %v6694_v15  ;;  %v6684_v15 = vld [vmem:[#allocation3 + $0x169] ss:$2 sm:$0xff] }
 0x59a   : > { %11355 = vmatprep.mubr.msk.bf16.mxu1 %vm439_vm3, %v6695_v35  ;;  %v6702_v20 = vpack.c.bf16 %v6685_v38, %v6684_v15  ;;  %v6686_v35 = vld [vmem:[#allocation3 + $0x189] ss:$2 sm:$0xff]  ;;  %v5101_v15 = vadd.f32 %v14583_v53, %v14585_v28  ;;  %v5106_v53 = vadd.f32 %v14600_v11, %v14602_v31  ;;  %v5130_v11 = vadd.f32 %v14620_v37, %v14622_v58 }
 0x59b   : > { %v6703_v63 = vpack.c.bf16 %v6688_v39, %v6686_v35 }
 0x5a1   : > { %v11161_v14 = vpop.f32.mrf.mxu1  ;;  %v11187_v22 = vpop.f32.mrf.mxu0  ;;  %11356 = vmatmul.mubr.msk.bf16.gmra.mxu1 %vm439_vm3, %v6696_v56  ;;  %v9651_v56 = vld [vmem:[%s16303_s5 + $0x4] sm:$0xf] }
 0x5a2   : > { %v14662_v51 = vadd.f32 %v11187_v22, %v11161_v14  ;;  %11359 = vmatprep.mubr.msk.bf16.mxu1 %vm439_vm3, %v6697_v36  ;;  %v6704_v14 = vpack.c.bf16 %v6692_v21, %v6690_v5  ;;  %11620 = vmatprep.subr.msk.bf16.mxu0 %vm4883_vm7, %v9651_v56  ;;  %v7132_v22 = vsel %vm4883_vm7, %v9651_v56, 0 }
 0x5a3   : > { %v4985_v42 = vpop.f32.mrf.mxu1  ;;  %v5153_v57 = vpop.f32.mrf.mxu0  ;;  %11376 = vmatpush3.bf16.msra.mxu0 %v7132_v22 }
 0x5a4   : > { %v14665_v1 = vadd.f32 %v5153_v57, %v4985_v42 }
 0x5a5   : > { %v11162_v6 = vpop.f32.mrf.mxu1  ;;  %v11188_v45 = vpop.f32.mrf.mxu0 }
 0x5a6   : > { %v14667_v23 = vadd.f32 %v11188_v45, %v11162_v6 }
 0x5a7   : > { %v14678_v55 = vpop.f32.mrf.mxu1  ;;  %v14680_v36 = vpop.f32.mrf.mxu0 }
 0x5a9   : > { %11360 = vmatmul.mubr.msk.bf16.gmra.mxu1 %vm439_vm3, %v6698_v10 }
 0x5aa   : > { %11363 = vmatprep.mubr.msk.bf16.mxu1 %vm439_vm3, %v6699_v40 }
 0x5b1   : > { %11364 = vmatmul.mubr.msk.bf16.gmra.mxu1 %vm439_vm3, %v6700_v29 }
 0x5b2   : > { %11367 = vmatprep.mubr.msk.bf16.mxu1 %vm439_vm3, %v6701_v33 }
 0x5b9   : > { %11368 = vmatmul.mubr.msk.bf16.gmra.mxu1 %vm439_vm3, %v6702_v20 }
 0x5ba   : > { %11371 = vmatprep.mubr.msk.bf16.mxu1 %vm439_vm3, %v6703_v63 }
 0x5c1   : > { %v11165_v42 = vpop.f32.mrf.mxu1  ;;  %v11191_v57 = vpop.f32.mrf.mxu0  ;;  %11372 = vmatmul.mubr.msk.bf16.gmra.mxu1 %vm439_vm3, %v6704_v14 }
 0x5c2   : > { %v14685_v16 = vadd.f32 %v11191_v57, %v11165_v42 }
 0x5c3   : > { %v5001_v6 = vpop.f32.mrf.mxu1  ;;  %v5169_v45 = vpop.f32.mrf.mxu0 }
 0x5c4   : > { %v14687_v30 = vadd.f32 %v5169_v45, %v5001_v6  ;;  %v5117_v6 = vadd.f32 %v14608_v17, %v14610_v26  ;;  %v5122_v17 = vadd.f32 %v14624_v48, %v14626_v49  ;;  %v5146_v48 = vadd.f32 %v14643_v44, %v14645_v59 }
 0x5c5   : > { %v11166_v61 = vpop.f32.mrf.mxu1  ;;  %v11192_v10 = vpop.f32.mrf.mxu0 }
 0x5c6   : > { %v14689_v12 = vadd.f32 %v11192_v10, %v11166_v61 }
 0x5c7   : > { %v14691_v40 = vpop.f32.mrf.mxu1  ;;  %v14693_v54 = vpop.f32.mrf.mxu0 }
 0x5c9   : > { %v11197_v9 = vpop.f32.mrf.mxu1  ;;  %v11223_v29 = vpop.f32.mrf.mxu0 }
 0x5ca   : > { %v5416_v33 = vadd.f32 %v11197_v9, %v5098_v24 }
 0x5cb   : > { %v5319_v38 = vpop.f32.mrf.mxu1  ;;  %v5573_v39 = vpop.f32.mrf.mxu0 }
 0x5cc   : > { %v14701_v20 = vadd.f32 %v11223_v29, %v5416_v33  ;;  %v5414_v35 = vadd.f32 %v5319_v38, %v5090_v46 }
 0x5cd   : > { %v11198_v63 = vpop.f32.mrf.mxu1  ;;  %v11224_v5 = vpop.f32.mrf.mxu0 }
 0x5ce   : > { %v14703_v21 = vadd.f32 %v5573_v39, %v5414_v35  ;;  %v5417_v56 = vadd.f32 %v11198_v63, %v5101_v15  ;;  %v5133_v15 = vadd.f32 %v14632_v2, %v14634_v7  ;;  %v5138_v2 = vadd.f32 %v14647_v41, %v14649_v60 }
 0x5cf   : > { %v14705_v4 = vpop.f32.mrf.mxu1  ;;  %v14707_v43 = vpop.f32.mrf.mxu0 }
 0x5d0   : > { %v14711_v3 = vadd.f32 %v11224_v5, %v5417_v56 }
 0x5d1   : > { %v11201_v14 = vpop.f32.mrf.mxu1  ;;  %v11227_v22 = vpop.f32.mrf.mxu0 }
 0x5d2   : > { %v5420_v28 = vadd.f32 %v11201_v14, %v5114_v25 }
 0x5d3   : > { %v5335_v42 = vpop.f32.mrf.mxu1  ;;  %v5589_v57 = vpop.f32.mrf.mxu0 }
 0x5d4   : > { %v14717_v45 = vadd.f32 %v11227_v22, %v5420_v28  ;;  %v5418_v61 = vadd.f32 %v5335_v42, %v5106_v53 }
 0x5d5   : > { %v11202_v10 = vpop.f32.mrf.mxu1  ;;  %v11228_v24 = vpop.f32.mrf.mxu0 }
 0x5d6   : > { %v14719_v9 = vadd.f32 %v5589_v57, %v5418_v61  ;;  %v5421_v0 = vadd.f32 %v11202_v10, %v5117_v6  ;;  %v5149_v57 = vadd.f32 %v14653_v19, %v14655_v34  ;;  %v7056_v34 = vld [vmem:[%s16303_s5] sm:$0xf] }
 0x5d7   : > { %v14721_v18 = vpop.f32.mrf.mxu1  ;;  %v14723_v29 = vpop.f32.mrf.mxu0  ;;  %11621 = vmatprep.subr.msk.bf16.mxu1 %vm4883_vm7, %v7056_v34 }
 0x5d8   : > { %v14727_v31 = vadd.f32 %v11228_v24, %v5421_v0 }
 0x5d9   : > { %v11205_v46 = vpop.f32.mrf.mxu1  ;;  %v11231_v33 = vpop.f32.mrf.mxu0 }
 0x5da   : > { %v5424_v26 = vadd.f32 %v11205_v46, %v5130_v11 }
 0x5db   : > { %v5351_v38 = vpop.f32.mrf.mxu1  ;;  %v5605_v39 = vpop.f32.mrf.mxu0 }
 0x5dc   : > { %v14733_v35 = vadd.f32 %v11231_v33, %v5424_v26  ;;  %v5422_v63 = vadd.f32 %v5351_v38, %v5122_v17 }
 0x5dd   : > { %v11206_v5 = vpop.f32.mrf.mxu1  ;;  %v11232_v56 = vpop.f32.mrf.mxu0 }
 0x5de   : > { %v14735_v25 = vadd.f32 %v5605_v39, %v5422_v63  ;;  %v5425_v37 = vadd.f32 %v11206_v5, %v5133_v15  ;;  %v7300_v39 = vsel %vm4883_vm7, %v7056_v34, 0  ;;  %v7057_v15 = vld [vmem:[#allocation4 + $0x18] sm:$0xff]  ;;  %v7058_v63 = vld [vmem:[#allocation4 + $0x20] sm:$0xff] }
 0x5df   : > { %v14737_v58 = vpop.f32.mrf.mxu1  ;;  %v14739_v14 = vpop.f32.mrf.mxu0  ;;  %v7020_v5 = vld [vmem:[#allocation4 + $0x17] sm:$0xff]  ;;  %11402 = vmatpush3.bf16.msra.mxu1 %v7300_v39 }
 0x5e0   : > { %v14743_v49 = vadd.f32 %v11232_v56, %v5425_v37 }
 0x5e1   : > { %v11209_v22 = vpop.f32.mrf.mxu1  ;;  %v11235_v53 = vpop.f32.mrf.mxu0 }
 0x5e2   : > { %v5428_v7 = vadd.f32 %v11209_v22, %v5146_v48  ;;  %v7021_v48 = vld [vmem:[#allocation4 + $0x1f] sm:$0xff] }
 0x5e3   : > { %v5367_v28 = vpop.f32.mrf.mxu1  ;;  %v5621_v42 = vpop.f32.mrf.mxu0 }
 0x5e4   : > { %v14749_v6 = vadd.f32 %v11235_v53, %v5428_v7  ;;  %v5426_v61 = vadd.f32 %v5367_v28, %v5138_v2  ;;  %v7044_v2 = vpack.c.bf16 %v7021_v48, %v7020_v5 }
 0x5e5   : > { %v11210_v10 = vpop.f32.mrf.mxu1  ;;  %v11236_v24 = vpop.f32.mrf.mxu0 }
 0x5e6   : > { %v14751_v0 = vadd.f32 %v5621_v42, %v5426_v61  ;;  %v5429_v44 = vadd.f32 %v11210_v10, %v5149_v57  ;;  %11403 = vmatprep.mubr.msk.bf16.mxu1 %vm439_vm3, %v7044_v2 }
 0x5e7   : > { %v14753_v59 = vpop.f32.mrf.mxu1  ;;  %v14755_v11 = vpop.f32.mrf.mxu0 }
 0x5e8   : > { %v14757_v46 = vadd.f32 %v11236_v24, %v5429_v44 }
 0x5e9   : > { %v11213_v41 = vpop.f32.mrf.mxu1  ;;  %v11239_v60 = vpop.f32.mrf.mxu0 }
 0x5ea   : > { %v5432_v33 = vadd.f32 %v11213_v41, %v14662_v51  ;;  %v7081_v51 = vpack.c.bf16 %v7058_v63, %v7057_v15 }
 0x5eb   : > { %v5383_v17 = vpop.f32.mrf.mxu1  ;;  %v5637_v19 = vpop.f32.mrf.mxu0 }
 0x5ec   : > { %v14763_v26 = vadd.f32 %v11239_v60, %v5432_v33  ;;  %v5430_v38 = vadd.f32 %v5383_v17, %v14665_v1  ;;  %11377 = vmatprep.mubr.msk.bf16.mxu0 %vm439_vm3, %v7081_v51 }
 0x5ed   : > { %v11214_v56 = vpop.f32.mrf.mxu1  ;;  %v11240_v37 = vpop.f32.mrf.mxu0 }
 0x5ee   : > { %v14768_v22 = vadd.f32 %v5637_v19, %v5430_v38  ;;  %v5433_v53 = vadd.f32 %v11214_v56, %v14667_v23  ;;  %v14783_v23 = vld [vmem:[%s16303_s5 + $0x8] sm:$0xf] }
 0x5ef   : > { %v14771_v7 = vpop.f32.mrf.mxu1  ;;  %v14773_v1 = vpop.f32.mrf.mxu0  ;;  %11622 = vmatprep.subr.msk.bf16.mxu0 %vm4883_vm7, %v14783_v23 }
 0x5f0   : > { %v14776_v28 = vadd.f32 %v11240_v37, %v5433_v53 }
 0x5f1   : > { %v11217_v42 = vpop.f32.mrf.mxu1  ;;  %v11243_v57 = vpop.f32.mrf.mxu0 }
 0x5f2   : > { %v5436_v61 = vadd.f32 %v11217_v42, %v14685_v16 }
 0x5f3   : > { %v5399_v10 = vpop.f32.mrf.mxu1  ;;  %v5653_v24 = vpop.f32.mrf.mxu0 }
 0x5f4   : > { %v14785_v44 = vadd.f32 %v11243_v57, %v5436_v61  ;;  %v5434_v41 = vadd.f32 %v5399_v10, %v14687_v30 }
 0x5f5   : > { %v11218_v60 = vpop.f32.mrf.mxu1  ;;  %v11244_v33 = vpop.f32.mrf.mxu0 }
 0x5f6   : > { %v14790_v17 = vadd.f32 %v5653_v24, %v5434_v41  ;;  %v5437_v16 = vadd.f32 %v11218_v60, %v14689_v12 }
 0x5f7   : > { %v14793_v19 = vpop.f32.mrf.mxu1  ;;  %v14795_v34 = vpop.f32.mrf.mxu0 }
 0x5f8   : > { %v14797_v38 = vadd.f32 %v11244_v33, %v5437_v16 }
 0x5f9   : > { %v11249_v39 = vpop.f32.mrf.mxu1  ;;  %v14799_v15 = vpop.f32.mrf.mxu0 }
 0x5fa   : > { %v14802_v30 = vadd.f32 %v11249_v39, %v14701_v20 }
 0x5fb   : > { %v5827_v63 = vpop.f32.mrf.mxu1  ;;  %v14804_v5 = vpop.f32.mrf.mxu0 }
 0x5fc   : > { %v14807_v56 = vadd.f32 %v5827_v63, %v14703_v21 }
 0x5fd   : > { %v11250_v37 = vpop.f32.mrf.mxu1  ;;  %v14809_v12 = vpop.f32.mrf.mxu0 }
 0x5fe   : > { %v14812_v51 = vadd.f32 %v11250_v37, %v14711_v3 }
 0x5ff   : > { %v14814_v48 = vpop.f32.mrf.mxu1  ;;  %v14816_v53 = vpop.f32.mrf.mxu0 }
 0x601   : > { %v11253_v2 = vpop.f32.mrf.mxu1  ;;  %v14818_v42 = vpop.f32.mrf.mxu0 }
 0x602   : > { %v14821_v20 = vadd.f32 %v11253_v2, %v14717_v45 }
 0x603   : > { %v5843_v57 = vpop.f32.mrf.mxu1  ;;  %v14823_v61 = vpop.f32.mrf.mxu0 }
 0x604   : > { %v14826_v21 = vadd.f32 %v5843_v57, %v14719_v9 }
 0x605   : > { %v11254_v10 = vpop.f32.mrf.mxu1  ;;  %v14828_v24 = vpop.f32.mrf.mxu0 }
 0x606   : > { %v14831_v3 = vadd.f32 %v11254_v10, %v14727_v31 }
 0x607   : > { %v14833_v41 = vpop.f32.mrf.mxu1  ;;  %v14835_v60 = vpop.f32.mrf.mxu0 }
 0x608   : > { %16538 = vst [vmem:[#allocation22_spill] sm:$0xff] %v14835_v60 }
 0x609   : > { %v11257_v33 = vpop.f32.mrf.mxu1  ;;  %v14837_v16 = vpop.f32.mrf.mxu0 }
 0x60a   : > { %16539 = vst [vmem:[#allocation26_spill] sm:$0xff] %v14837_v16  ;;  %v14840_v45 = vadd.f32 %v11257_v33, %v14733_v35 }
 0x60b   : > { %v5859_v39 = vpop.f32.mrf.mxu1  ;;  %v14842_v63 = vpop.f32.mrf.mxu0 }
 0x60c   : > { %16540 = vst [vmem:[#allocation25_spill] sm:$0xff] %v14842_v63  ;;  %v14845_v9 = vadd.f32 %v5859_v39, %v14735_v25 }
 0x60d   : > { %v11258_v37 = vpop.f32.mrf.mxu1  ;;  %v14847_v2 = vpop.f32.mrf.mxu0 }
 0x60e   : > { %16541 = vst [vmem:[#allocation30_spill] sm:$0xff] %v14847_v2  ;;  %v14850_v31 = vadd.f32 %v11258_v37, %v14743_v49  ;;  %v14874_v37 = vld [vmem:[%s16303_s5 + $0xc] sm:$0xf] }
 0x60f   : > { %v14852_v57 = vpop.f32.mrf.mxu1  ;;  %v14854_v10 = vpop.f32.mrf.mxu0  ;;  %16548 = vst [vmem:[#allocation16_spill] sm:$0xff] %v14874_v37  ;;  %11623 = vmatprep.subr.msk.bf16.mxu1 %vm4883_vm7, %v14874_v37 }
 0x611   : > { %v11261_v16 = vpop.f32.mrf.mxu1  ;;  %v14856_v60 = vpop.f32.mrf.mxu0 }
 0x612   : > { %16542 = vst [vmem:[#allocation29_spill] sm:$0xff] %v14856_v60  ;;  %v14859_v35 = vadd.f32 %v11261_v16, %v14749_v6 }
 0x613   : > { %v5875_v33 = vpop.f32.mrf.mxu1  ;;  %v14861_v63 = vpop.f32.mrf.mxu0 }
 0x614   : > { %16543 = vst [vmem:[#allocation36_spill] sm:$0xff] %v14859_v35  ;;  %16544 = vst [vmem:[#allocation35_spill] sm:$0xff] %v14861_v63  ;;  %v14864_v25 = vadd.f32 %v5875_v33, %v14751_v0 }
 0x615   : > { %v11262_v39 = vpop.f32.mrf.mxu1  ;;  %v14866_v2 = vpop.f32.mrf.mxu0 }
 0x616   : > { %16545 = vst [vmem:[#allocation39_spill] sm:$0xff] %v14864_v25  ;;  %16546 = vst [vmem:[#allocation12_spill] sm:$0xff] %v14866_v2  ;;  %v14869_v49 = vadd.f32 %v11262_v39, %v14757_v46 }
 0x617   : > { %v14876_v60 = vpop.f32.mrf.mxu1  ;;  %v14878_v6 = vpop.f32.mrf.mxu0 }
 0x618   : > { %16547 = vst [vmem:[#allocation17_spill] sm:$0xff] %v14869_v49  ;;  %16549 = vst [vmem:[#allocation20_spill] sm:$0xff] %v14878_v6 }
 0x619   : > { %v11265_v0 = vpop.f32.mrf.mxu1  ;;  %v14882_v16 = vpop.f32.mrf.mxu0 }
 0x61a   : > { %16550 = vst [vmem:[#allocation21_spill] sm:$0xff] %v14882_v16  ;;  %v14885_v33 = vadd.f32 %v11265_v0, %v14763_v26 }
 0x61b   : > { %v5891_v46 = vpop.f32.mrf.mxu1  ;;  %v14887_v39 = vpop.f32.mrf.mxu0 }
 0x61c   : > { %16551 = vst [vmem:[#allocation32_spill] sm:$0xff] %v14885_v33  ;;  %16552 = vst [vmem:[#allocation34_spill] sm:$0xff] %v14887_v39  ;;  %v14890_v2 = vadd.f32 %v5891_v46, %v14768_v22 }
 0x61d   : > { %v11266_v49 = vpop.f32.mrf.mxu1  ;;  %v14892_v63 = vpop.f32.mrf.mxu0 }
 0x61e   : > { %16553 = vst [vmem:[#allocation24_spill] sm:$0xff] %v14890_v2  ;;  %16554 = vst [vmem:[#allocation27_spill] sm:$0xff] %v14892_v63  ;;  %v14895_v6 = vadd.f32 %v11266_v49, %v14776_v28 }
 0x61f   : > { %v14897_v25 = vpop.f32.mrf.mxu1  ;;  %v14899_v37 = vpop.f32.mrf.mxu0 }
 0x620   : > { %16555 = vst [vmem:[#allocation28_spill] sm:$0xff] %v14895_v6  ;;  %16556 = vst [vmem:[#allocation33_spill] sm:$0xff] %v14897_v25 }
 0x621   : > { %16557 = vst [vmem:[#allocation31_spill] sm:$0xff] %v14899_v37  ;;  %v11269_v16 = vpop.f32.mrf.mxu1  ;;  %v14901_v35 = vpop.f32.mrf.mxu0 }
 0x622   : > { %16558 = vst [vmem:[#allocation37_spill] sm:$0xff] %v14901_v35  ;;  %v14904_v26 = vadd.f32 %v11269_v16, %v14785_v44 }
 0x623   : > { %v5907_v0 = vpop.f32.mrf.mxu1  ;;  %v14906_v39 = vpop.f32.mrf.mxu0 }
 0x624   : > { %16559 = vst [vmem:[#allocation13_spill] sm:$0xff] %v14904_v26  ;;  %16560 = vst [vmem:[#allocation11_spill] sm:$0xff] %v14906_v39  ;;  %v14909_v22 = vadd.f32 %v5907_v0, %v14790_v17 }
 0x625   : > { %v11270_v46 = vpop.f32.mrf.mxu1  ;;  %v14911_v63 = vpop.f32.mrf.mxu0 }
 0x626   : > { %16561 = vst [vmem:[#allocation38_spill] sm:$0xff] %v14909_v22  ;;  %16562 = vst [vmem:[#allocation15_spill] sm:$0xff] %v14911_v63  ;;  %v14914_v28 = vadd.f32 %v11270_v46, %v14797_v38 }
 0x627   : > { %v14916_v49 = vpop.f32.mrf.mxu1  ;;  %v14918_v37 = vpop.f32.mrf.mxu0 }
 0x628   : > { %16563 = vst [vmem:[#allocation14_spill] sm:$0xff] %v14914_v28  ;;  %16564 = vst [vmem:[#allocation40_spill] sm:$0xff] %v14916_v49 }
 0x629   : > { %16565 = vst [vmem:[#allocation19_spill] sm:$0xff] %v14918_v37  ;;  %v11301_v35 = vpop.f32.mrf.mxu1  ;;  %v14920_v6 = vpop.f32.mrf.mxu0 }
 0x62b   : > { %v6314_v44 = vpop.f32.mrf.mxu1  ;;  %v14922_v16 = vpop.f32.mrf.mxu0 }
 0x62d   : > { %v14924_v39 = vpop.f32.mrf.mxu1  ;;  %v14928_v0 = vpop.f32.mrf.mxu0 }
 0x62e   : > { %16566 = vst [vmem:[#allocation9_spill] sm:$0xff] %v14928_v0 }
 0x62f   : > { %v14926_v17 = vpop.f32.mrf.mxu1  ;;  %v14934_v46 = vpop.f32.mrf.mxu0 }
 0x630   : > { %16568 = vst [vmem:[#allocation10_spill] sm:$0xff] %v14934_v46 }
 0x631   : > { %v14930_v63 = vpop.f32.mrf.mxu1  ;;  %v14940_v22 = vpop.f32.mrf.mxu0 }
 0x632   : > { %16571 = vst [vmem:[#allocation42_spill] sm:$0xff] %v14940_v22 }
 0x633   : > { %v14932_v38 = vpop.f32.mrf.mxu1  ;;  %v14946_v2 = vpop.f32.mrf.mxu0 }
 0x634   : > { %16567 = vst [vmem:[#allocation8_spill] sm:$0xff] %v14932_v38  ;;  %16574 = vst [vmem:[#allocation44_spill] sm:$0xff] %v14946_v2 }
 0x635   : > { %v14936_v28 = vpop.f32.mrf.mxu1  ;;  %v14952_v0 = vpop.f32.mrf.mxu0 }
 0x636   : > { %16569 = vst [vmem:[#allocation18_spill] sm:$0xff] %v14936_v28  ;;  %16577 = vst [vmem:[#allocation47_spill] sm:$0xff] %v14952_v0 }
 0x637   : > { %v14938_v37 = vpop.f32.mrf.mxu1  ;;  %v14958_v28 = vpop.f32.mrf.mxu0 }
 0x638   : > { %16570 = vst [vmem:[#allocation41_spill] sm:$0xff] %v14938_v37  ;;  %16580 = vst [vmem:[#allocation50_spill] sm:$0xff] %v14958_v28 }
 0x639   : > { %v14942_v26 = vpop.f32.mrf.mxu1 }
 0x63a   : > { %16572 = vst [vmem:[#allocation23_spill] sm:$0xff] %v14942_v26  ;;  %v14964_v26 = vpop.f32.mrf.mxu0 }
 0x63b   : > { %v14944_v49 = vpop.f32.mrf.mxu1  ;;  %16583 = vst [vmem:[#allocation53_spill] sm:$0xff] %v14964_v26 }
 0x63c   : > { %16573 = vst [vmem:[#allocation43_spill] sm:$0xff] %v14944_v49  ;;  %v14966_v49 = vpop.permute.xlu1 %6960 }
 0x63d   : > { %v14948_v25 = vpop.f32.mrf.mxu1  ;;  %16584 = vst [vmem:[#allocation54_spill] sm:$0xff] %v14966_v49  ;;  %vm6968_vm9 = vcmp.eq.s32.totalorder %v14966_v49, 1 }
 0x63e   : > { %16575 = vst [vmem:[#allocation45_spill] sm:$0xff] %v14948_v25 }
 0x63f   : > { %v14950_v33 = vpop.f32.mrf.mxu1 }
 0x640   : > { %16576 = vst [vmem:[#allocation46_spill] sm:$0xff] %v14950_v33  ;;  %v5093_v33 = vadd.f32 %v14588_v62, %v14590_v32  ;;  %v5141_v62 = vadd.f32 %v14657_v52, %v14659_v8  ;;  %v5157_v32 = vadd.f32 %v14680_v36, %v14678_v55 }
 0x641   : > { %v14954_v38 = vpop.f32.mrf.mxu1 }
 0x642   : > { %16578 = vst [vmem:[#allocation48_spill] sm:$0xff] %v14954_v38  ;;  %v14974_v38 = vpop.f32.mrf.mxu0  ;;  %v5427_v52 = vadd.f32 %v14753_v59, %v5141_v62  ;;  %v5431_v8 = vadd.f32 %v14771_v7, %v5157_v32  ;;  %v6179_v7 = vadd.f32 %v14809_v12, %v14812_v51 }
 0x643   : > { %v14956_v46 = vpop.f32.mrf.mxu1 }
 0x644   : > { %16579 = vst [vmem:[#allocation49_spill] sm:$0xff] %v14956_v46  ;;  %v5109_v46 = vadd.f32 %v14612_v50, %v14614_v47  ;;  %v5173_v50 = vadd.f32 %v14693_v54, %v14691_v40  ;;  %v6176_v40 = vadd.f32 %v14804_v5, %v14807_v56  ;;  %v5681_v5 = vadd.f32 %v14755_v11, %v5427_v52 }
 0x645   : > { %v14960_v37 = vpop.f32.mrf.mxu1  ;;  %v5685_v56 = vadd.f32 %v14773_v1, %v5431_v8  ;;  %v6182_v1 = vadd.f32 %v14818_v42, %v14821_v20 }
 0x646   : > { %16581 = vst [vmem:[#allocation51_spill] sm:$0xff] %v14960_v37  ;;  %v11682_v37 = vpop.permute.xlu1 %11681  ;;  %v5419_v26 = vadd.f32 %v14721_v18, %v5109_v46  ;;  %v5435_v55 = vadd.f32 %v14793_v19, %v5173_v50  ;;  %v6409_v19 = vadd.f32 %v6314_v44, %v6176_v40  ;;  %v5935_v46 = vadd.f32 %v14876_v60, %v5681_v5 }
 0x647   : > { %v14962_v22 = vpop.f32.mrf.mxu1  ;;  %v6415_v62 = vadd.f32 %v14930_v63, %v6182_v1  ;;  %v16600_v63 = vld [vmem:[#allocation39_spill] sm:$0xff]  ;;  %v16609_v1 = vld [vmem:[#allocation18_spill] sm:$0xff] }
 0x648   : > { %16582 = vst [vmem:[#allocation52_spill] sm:$0xff] %v14962_v22  ;;  %v5415_v22 = vadd.f32 %v14705_v4, %v5093_v33  ;;  %v11684_v4 = vunpack.i.h.bf16 %v11682_v37  ;;  %v6642_v44 = vadd.f32 %v14922_v16, %v6409_v19  ;;  %v16606_v19 = vld [vmem:[#allocation12_spill] sm:$0xff] }
 0x649   : > { %v14968_v2 = vpop.f32.mrf.mxu1 }
 0x64a   : > { %16585 = vst [vmem:[#allocation55_spill] sm:$0xff] %v14968_v2  ;;  %v14986_v2 = vpop.f32.mrf.mxu0  ;;  %v5669_v18 = vadd.f32 %v14707_v43, %v5415_v22  ;;  %vm15017_vm8 = vcmp.eq.s32.totalorder %v11684_v4, 1 }
 0x64b   : > { %v14970_v25 = vpop.f32.mrf.mxu1 }
 0x64c   : > { %16586 = vst [vmem:[#allocation56_spill] sm:$0xff] %v14970_v25  ;;  %v5125_v25 = vadd.f32 %v14636_v13, %v14638_v27  ;;  %v6178_v13 = vadd.f32 %v14799_v15, %v14802_v30  ;;  %v5673_v27 = vadd.f32 %v14723_v29, %v5419_v26  ;;  %v5923_v54 = vadd.f32 %v14814_v48, %v5669_v18 }
 0x64d   : > { %v14978_v28 = vpop.f32.mrf.mxu1  ;;  %v11683_v29 = vunpack.i.l.bf16 %v11682_v37  ;;  %v15024_v48 = vadd.f32 %v14795_v34, %v5435_v55  ;;  %v6412_v37 = vadd.f32 %v14924_v39, %v6179_v7  ;;  %v6180_v34 = vadd.f32 %v14823_v61, %v14826_v21  ;;  %v16591_v39 = vld [vmem:[#allocation26_spill] sm:$0xff]  ;;  %v16592_v61 = vld [vmem:[#allocation25_spill] sm:$0xff]  ;;  %v16603_v55 = vld [vmem:[#allocation16_spill] sm:$0xff] }
 0x64e   : > { %v5423_v33 = vadd.f32 %v14737_v58, %v5125_v25  ;;  %v6411_v43 = vadd.f32 %v11301_v35, %v6178_v13  ;;  %v15009_v58 = vpop.f32.mrf.mxu0  ;;  %v5927_v15 = vadd.f32 %v14833_v41, %v5673_v27  ;;  %v16587_v25 = vmov 0  ;;  %v16601_v13 = vld [vmem:[#allocation35_spill] sm:$0xff]  ;;  %v16605_v7 = vld [vmem:[#allocation17_spill] sm:$0xff] }
 0x64f   : > { %v14982_v0 = vpop.f32.mrf.mxu1  ;;  %v16588_v25 = vsel %vm15017_vm8, 4294967295, %v16587_v25  ;;  %v6177_v12 = vadd.f32 %v14816_v53, %v5923_v54  ;;  %v16590_v53 = vld [vmem:[#allocation22_spill] sm:$0xff]  ;;  %v6186_v22 = vadd.f32 %v16591_v39, %v14840_v45  ;;  %v6184_v21 = vadd.f32 %v16592_v61, %v14845_v9  ;;  %v16594_v45 = vld [vmem:[#allocation9_spill] sm:$0xff]  ;;  %v16610_v61 = vld [vmem:[#allocation32_spill] sm:$0xff] }
 0x650   : > { %v5677_v59 = vadd.f32 %v14739_v14, %v5423_v33  ;;  %16589 = vst [vmem:[#allocation57_spill] sm:$0xff] %v16588_v25  ;;  %v15030_v14 = vsel %vm4883_vm7, %v14783_v23, 0  ;;  %v6644_v35 = vadd.f32 %v14920_v6, %v6411_v43  ;;  %v15036_v11 = vpop.f32.mrf.mxu0  ;;  %v6183_v23 = vadd.f32 %v14828_v24, %v14831_v3  ;;  %v16593_v24 = vld [vmem:[#allocation30_spill] sm:$0xff]  ;;  %v16599_v33 = vld [vmem:[#allocation29_spill] sm:$0xff] }
 0x651   : > { %v14994_v47 = vpop.f32.mrf.mxu1  ;;  %v6181_v26 = vadd.f32 %v16590_v53, %v5927_v15  ;;  %v6410_v42 = vadd.f32 %v14926_v17, %v6177_v12  ;;  %v15059_v3 = vadd.f32 %v16593_v24, %v14850_v31  ;;  %v6645_v16 = vadd.f32 %v16594_v45, %v6412_v37  ;;  %v16598_v31 = vld [vmem:[#allocation36_spill] sm:$0xff]  ;;  %v16604_v54 = vld [vmem:[#allocation10_spill] sm:$0xff]  ;;  %v16611_v24 = vld [vmem:[#allocation21_spill] sm:$0xff] }
 0x652   : > { %v5931_v51 = vadd.f32 %v14852_v57, %v5677_v59  ;;  %v15049_v57 = vld [vmem:[%s16302_s4] ss:$0 sm:$0xff]  ;;  %v15067_v4 = vpop.f32.mrf.mxu0  ;;  %vm15070_vm10 = vcmp.eq.s32.totalorder %v11683_v29, 1  ;;  %v16595_v9 = vmov 0  ;;  %v15076_v60 = vadd.f32 %v16599_v33, %v16598_v31  ;;  %v16607_v12 = vld [vmem:[#allocation20_spill] sm:$0xff] }
 0x653   : > { %v15004_v36 = vpop.f32.mrf.mxu1  ;;  %v16596_v9 = vsel %vm15070_vm10, 4294967295, %v16595_v9  ;;  %v15080_v27 = vadd.f32 %v16601_v13, %v16600_v63  ;;  %v15085_v40 = vsel %vm4883_vm7, %v16603_v55, 0  ;;  %v6643_v43 = vadd.f32 %v16604_v54, %v6410_v42  ;;  %v16617_v54 = vld [vmem:[#allocation28_spill] sm:$0xff] }
 0x654   : > { %v15064_v50 = vadd.f32 %v14854_v10, %v5931_v51  ;;  %16597 = vst [vmem:[#allocation22_spill] sm:$0xff] %v16596_v9  ;;  %v16602_v10 = vld [vmem:[#allocation8_spill] sm:$0xff]  ;;  %v15091_v5 = vadd.f32 %v16606_v19, %v16605_v7  ;;  %v15094_v51 = vadd.f32 %v16607_v12, %v5935_v46  ;;  %v16612_v46 = vld [vmem:[#allocation33_spill] sm:$0xff] }
 0x655   : > { %v15012_v30 = vpop.f32.mrf.mxu1  ;;  %v6413_v52 = vadd.f32 %v16602_v10, %v6180_v34  ;;  %v6416_v34 = vadd.f32 %v16609_v1, %v6183_v23  ;;  %v5939_v45 = vadd.f32 %v16612_v46, %v5685_v56  ;;  %v16615_v10 = vld [vmem:[#allocation24_spill] sm:$0xff]  ;;  %v16618_v56 = vld [vmem:[#allocation27_spill] sm:$0xff] }
 0x656   : > { %v16621_v1 = vld [vmem:[#allocation31_spill] sm:$0xff] }
 0x657   : > { %v15026_v41 = vpop.f32.mrf.mxu1 }
 0x659   : > { %v11353_v6 = vpop.f32.mrf.mxu1 }
 0x65a   : > { %v6877_v20 = vadd.f32 %v11353_v6, %v6644_v35  ;;  %v16608_v35 = vld [vmem:[#allocation42_spill] sm:$0xff]  ;;  %v15098_v6 = vpop.f32.mrf.mxu0 }
 0x65b   : > { %v6780_v32 = vpop.f32.mrf.mxu1  ;;  %v6648_v37 = vadd.f32 %v16608_v35, %v6415_v62 }
 0x65c   : > { %v6907_v17 = vadd.f32 %v15049_v57, %v6877_v20  ;;  %v6875_v18 = vadd.f32 %v6780_v32, %v6642_v44  ;;  %v15105_v32 = vadd.f32 %v16611_v24, %v16610_v61  ;;  %v15125_v7 = vpop.f32.mrf.mxu0 }
 0x65d   : > { %v11354_v8 = vpop.f32.mrf.mxu1 }
 0x65e   : > { %v6931_v15 = vmax.f32 %v6907_v17, 0.0  ;;  %v6905_v29 = vadd.f32 %v15049_v57, %v6875_v18  ;;  %v6878_v59 = vadd.f32 %v11354_v8, %v6645_v16  ;;  %v16613_v16 = vld [vmem:[#allocation44_spill] sm:$0xff]  ;;  %v16614_v17 = vld [vmem:[#allocation41_spill] sm:$0xff]  ;;  %v16616_v8 = vld [vmem:[#allocation34_spill] sm:$0xff] }
 0x65f   : > { %v6783_v53 = vpop.f32.mrf.mxu1  ;;  %v6646_v62 = vadd.f32 %v16613_v16, %v6413_v52  ;;  %v6414_v23 = vadd.f32 %v16614_v17, %v6181_v26  ;;  %v15116_v55 = vadd.f32 %v16616_v8, %v16615_v10  ;;  %v16619_v52 = vld [vmem:[#allocation47_spill] sm:$0xff]  ;;  %v16625_v17 = vld [vmem:[#allocation13_spill] sm:$0xff]  ;;  %v15153_v8 = vpop.f32.mrf.mxu0 }
 0x660   : > { %v6973_v39 = vsel %vm15017_vm8, %v6931_v15, 0.0  ;;  %v6929_v44 = vmax.f32 %v6905_v29, 0.0  ;;  %v6908_v42 = vadd.f32 %v15049_v57, %v6878_v59  ;;  %v6876_v20 = vadd.f32 %v6783_v53, %v6643_v43  ;;  %v16620_v15 = vld [vmem:[#allocation23_spill] sm:$0xff] }
 0x661   : > { %6997 = vst.msk [vmem:[#allocation4 + $0x40] sm:$0xff] %vm439_vm3, %v6973_v39  ;;  %v11357_v18 = vpop.f32.mrf.mxu1  ;;  %v15120_v43 = vadd.f32 %v16618_v56, %v16617_v54  ;;  %v6649_v26 = vadd.f32 %v16619_v52, %v6416_v34  ;;  %v6419_v29 = vadd.f32 %v16620_v15, %v6186_v22  ;;  %v15131_v53 = vadd.f32 %v16621_v1, %v5939_v45  ;;  %v16622_v39 = vld [vmem:[#allocation40_spill] sm:$0xff]  ;;  %v16626_v45 = vld [vmem:[#allocation37_spill] sm:$0xff]  ;;  %v7059_v15 = vld [vmem:[#allocation4 + $0x28] sm:$0xff] }
 0x662   : > { %v6971_v31 = vsel %vm6968_vm9, %v6929_v44, 0.0  ;;  %v6932_v33 = vmax.f32 %v6908_v42, 0.0  ;;  %v6906_v63 = vadd.f32 %v15049_v57, %v6876_v20  ;;  %v6881_v13 = vadd.f32 %v11357_v18, %v6648_v37  ;;  %v16623_v44 = vld [vmem:[#allocation50_spill] sm:$0xff]  ;;  %v16624_v42 = vld [vmem:[#allocation43_spill] sm:$0xff] }
 0x663   : > { %6995 = vst.msk [vmem:[#allocation4 + $0x30] sm:$0xff] %vm439_vm3, %v6971_v31  ;;  %v6796_v59 = vpop.f32.mrf.mxu1  ;;  %v5943_v34 = vadd.f32 %v16622_v39, %v15024_v48  ;;  %v6647_v22 = vadd.f32 %v16623_v44, %v6414_v23  ;;  %v6417_v20 = vadd.f32 %v16624_v42, %v6184_v21  ;;  %v15143_v18 = vadd.f32 %v16626_v45, %v16625_v17  ;;  %v16627_v31 = vld [vmem:[#allocation38_spill] sm:$0xff]  ;;  %v16628_v48 = vld [vmem:[#allocation11_spill] sm:$0xff]  ;;  %v16629_v23 = vld [vmem:[#allocation53_spill] sm:$0xff]  ;;  %v15182_v45 = vpop.f32.mrf.mxu0 }
 0x664   : > { %v6974_v19 = vsel %vm6968_vm9, %v6932_v33, 0.0  ;;  %v6930_v12 = vmax.f32 %v6906_v63, 0.0  ;;  %v6911_v35 = vadd.f32 %v15049_v57, %v6881_v13  ;;  %v6879_v37 = vadd.f32 %v6796_v59, %v6646_v62  ;;  %v16630_v63 = vld [vmem:[#allocation45_spill] sm:$0xff]  ;;  %v7022_v59 = vld [vmem:[#allocation4 + $0x27] sm:$0xff] }
 0x665   : > { %6998 = vst.msk [vmem:[#allocation4 + $0x48] sm:$0xff] %vm439_vm3, %v6974_v19  ;;  %v11358_v61 = vpop.f32.mrf.mxu1  ;;  %v15147_v33 = vadd.f32 %v16628_v48, %v16627_v31  ;;  %v6652_v21 = vadd.f32 %v16629_v23, %v6419_v29  ;;  %v6420_v13 = vadd.f32 %v16630_v63, %v15059_v3  ;;  %v16631_v19 = vld [vmem:[#allocation14_spill] sm:$0xff] }
 0x666   : > { %v6972_v24 = vsel %vm15070_vm10, %v6930_v12, 0.0  ;;  %v6935_v46 = vmax.f32 %v6911_v35, 0.0  ;;  %v6909_v16 = vadd.f32 %v15049_v57, %v6879_v37  ;;  %v6882_v62 = vadd.f32 %v11358_v61, %v6649_v26  ;;  %v16632_v12 = vld [vmem:[#allocation15_spill] sm:$0xff]  ;;  %v16634_v1 = vld [vmem:[#allocation46_spill] sm:$0xff] }
 0x667   : > { %6996 = vst.msk [vmem:[#allocation4 + $0x38] sm:$0xff] %vm439_vm3, %v6972_v24  ;;  %v6799_v10 = vpop.f32.mrf.mxu1  ;;  %v15160_v29 = vadd.f32 %v16632_v12, %v16631_v19  ;;  %v16633_v35 = vld [vmem:[#allocation19_spill] sm:$0xff]  ;;  %v6650_v37 = vadd.f32 %v14974_v38, %v6417_v20  ;;  %v6418_v39 = vadd.f32 %v16634_v1, %v15064_v50  ;;  %v16635_v38 = vld [vmem:[#allocation48_spill] sm:$0xff] }
 0x668   : > { %v6977_v54 = vsel %vm6968_vm9, %v6935_v46, 0.0  ;;  %v6933_v56 = vmax.f32 %v6909_v16, 0.0  ;;  %v6912_v52 = vadd.f32 %v15049_v57, %v6882_v62  ;;  %v6880_v26 = vadd.f32 %v6799_v10, %v6647_v22  ;;  %v16636_v10 = vld [vmem:[#allocation49_spill] sm:$0xff]  ;;  %v16637_v1 = vld [vmem:[#allocation51_spill] sm:$0xff] }
 0x669   : > { %v15163_v3 = vadd.f32 %v16633_v35, %v5943_v34  ;;  %7001 = vst.msk [vmem:[#allocation4 + $0x60] sm:$0xff] %vm439_vm3, %v6977_v54  ;;  %v11361_v44 = vpop.f32.mrf.mxu1  ;;  %v6653_v34 = vadd.f32 %v14986_v2, %v6420_v13  ;;  %v6423_v20 = vadd.f32 %v16635_v38, %v15076_v60  ;;  %v15187_v2 = vld [vmem:[#allocation4 + $0x40] sm:$0xff]  ;;  %v15194_v60 = vld [vmem:[%s16303_s5 + $0x10] sm:$0xf]  ;;  %v6651_v13 = vadd.f32 %v15009_v58, %v6418_v39 }
 0x66a   : > { %v6975_v22 = vsel %vm15070_vm10, %v6933_v56, 0.0  ;;  %v6936_v42 = vmax.f32 %v6912_v52, 0.0  ;;  %v6910_v61 = vadd.f32 %v15049_v57, %v6880_v26  ;;  %v6885_v24 = vadd.f32 %v11361_v44, %v6652_v21  ;;  %v15172_v46 = vld [vmem:[#allocation4 + $0x30] sm:$0xff]  ;;  %v15205_v52 = vld [vmem:[%s16303_s5 + $0x14] sm:$0xf] }
 0x66b   : > { %v15174_v16 = vld [vmem:[#allocation4 + $0x2f] sm:$0xff]  ;;  %6999 = vst.msk [vmem:[#allocation4 + $0x50] sm:$0xff] %vm439_vm3, %v6975_v22  ;;  %v6812_v50 = vpop.f32.mrf.mxu1  ;;  %v7082_v62 = vpack.c.bf16 %v15172_v46, %v7059_v15  ;;  %v6421_v54 = vadd.f32 %v16636_v10, %v15080_v27  ;;  %v6424_v39 = vadd.f32 %v16637_v1, %v15091_v5 }
 0x66c   : > { %v7045_v17 = vpack.c.bf16 %v15174_v16, %v7022_v59  ;;  %v6978_v31 = vsel %vm15070_vm10, %v6936_v42, 0.0  ;;  %v6934_v48 = vmax.f32 %v6910_v61, 0.0  ;;  %v6915_v23 = vadd.f32 %v15049_v57, %v6885_v24  ;;  %v15189_v63 = vld [vmem:[#allocation4 + $0x48] sm:$0xff]  ;;  %v15230_v42 = vpop.f32.mrf.mxu0 }
 0x66d   : > { %v6883_v21 = vadd.f32 %v6812_v50, %v6650_v37  ;;  %7002 = vst.msk [vmem:[#allocation4 + $0x68] sm:$0xff] %vm439_vm3, %v6978_v31  ;;  %v11362_v56 = vpop.f32.mrf.mxu1  ;;  %11378 = vmatmul.mubr.msk.bf16.vlgmr.msra.gmra.mxu0 %vm439_vm3, %v7082_v62  ;;  %v6656_v37 = vadd.f32 %v15036_v11, %v6423_v20  ;;  %v6654_v24 = vadd.f32 %v15067_v4, %v6421_v54  ;;  %v7432_v50 = vld [vmem:[#allocation4 + $0x21] sm:$0xff] }
 0x66e   : > { %11404 = vmatmul.mubr.msk.bf16.vlgmr.msra.gmra.mxu1 %vm439_vm3, %v7045_v17  ;;  %v6976_v58 = vsel %vm15017_vm8, %v6934_v48, 0.0  ;;  %v6939_v15 = vmax.f32 %v6915_v23, 0.0  ;;  %v6886_v59 = vadd.f32 %v11362_v56, %v6653_v34  ;;  %11428 = vmatpush3.bf16.msra.mxu0 %v15030_v14  ;;  %v15213_v19 = vld [vmem:[#allocation4 + $0x38] sm:$0xff]  ;;  %v16638_v34 = vld [vmem:[#allocation52_spill] sm:$0xff] }
 0x66f   : > { %v6913_v27 = vadd.f32 %v15049_v57, %v6883_v21  ;;  %v15215_v12 = vld [vmem:[#allocation4 + $0x37] sm:$0xff]  ;;  %v15217_v35 = vld [vmem:[#allocation4 + $0x3f] sm:$0xff]  ;;  %11454 = vmatpush3.bf16.msra.mxu1 %v15085_v40  ;;  %7000 = vst.msk [vmem:[#allocation4 + $0x58] sm:$0xff] %vm439_vm3, %v6976_v58  ;;  %v6815_v44 = vpop.f32.mrf.mxu1  ;;  %v7083_v22 = vpack.c.bf16 %v15187_v2, %v15213_v19  ;;  %11624 = vmatprep.subr.msk.bf16.mxu0 %vm4883_vm7, %v15194_v60 }
 0x670   : > { %v7046_v14 = vpack.c.bf16 %v15217_v35, %v15215_v12  ;;  %v6981_v11 = vsel %vm15070_vm10, %v6939_v15, 0.0  ;;  %v6916_v5 = vadd.f32 %v15049_v57, %v6886_v59  ;;  %v6884_v61 = vadd.f32 %v6815_v44, %v6651_v13  ;;  %11625 = vmatprep.subr.msk.bf16.mxu1 %vm4883_vm7, %v15205_v52  ;;  %v16639_v13 = vld [vmem:[#allocation55_spill] sm:$0xff]  ;;  %v6614_v15 = vpop.f32.mrf.mxu0  ;;  %v16640_v44 = vld [vmem:[#allocation56_spill] sm:$0xff] }
 0x671   : > { %v6937_v40 = vmax.f32 %v6913_v27, 0.0  ;;  %v6422_v38 = vadd.f32 %v16638_v34, %v15094_v51  ;;  %7005 = vst.msk [vmem:[#allocation4 + $0x80] sm:$0xff] %vm439_vm3, %v6981_v11  ;;  %v11365_v20 = vpop.f32.mrf.mxu1  ;;  %11381 = vmatprep.mubr.msk.bf16.mxu0 %vm439_vm3, %v7083_v22  ;;  %v15250_v51 = vld [vmem:[#allocation4 + $0x47] sm:$0xff]  ;;  %v6657_v21 = vadd.f32 %v15098_v6, %v6424_v39  ;;  %v6427_v10 = vadd.f32 %v16639_v13, %v15105_v32 }
 0x672   : > { %11407 = vmatprep.mubr.msk.bf16.mxu1 %vm439_vm3, %v7046_v14  ;;  %v6940_v17 = vmax.f32 %v6916_v5, 0.0  ;;  %v6914_v31 = vadd.f32 %v15049_v57, %v6884_v61  ;;  %v6889_v4 = vadd.f32 %v11365_v20, %v6656_v37  ;;  %v15248_v48 = vld [vmem:[#allocation4 + $0x50] sm:$0xff]  ;;  %v15269_v32 = vld [vmem:[#allocation4 + $0x60] sm:$0xff]  ;;  %v6425_v22 = vadd.f32 %v16640_v44, %v15116_v55 }
 0x673   : > { %v6979_v62 = vsel %vm15017_vm8, %v6937_v40, 0.0  ;;  %v15252_v23 = vld [vmem:[#allocation4 + $0x4f] sm:$0xff]  ;;  %v6828_v54 = vpop.f32.mrf.mxu1  ;;  %v15260_v56 = vpack.c.bf16 %v15248_v48, %v15189_v63  ;;  %v6655_v39 = vadd.f32 %v15125_v7, %v6422_v38  ;;  %v6660_v38 = vadd.f32 %v15153_v8, %v6427_v10 }
 0x674   : > { %7003 = vst.msk [vmem:[#allocation4 + $0x70] sm:$0xff] %vm439_vm3, %v6979_v62  ;;  %v15264_v58 = vpack.c.bf16 %v15252_v23, %v15250_v51  ;;  %v6982_v27 = vsel %vm15017_vm8, %v6940_v17, 0.0  ;;  %v6938_v59 = vmax.f32 %v6914_v31, 0.0  ;;  %v6919_v6 = vadd.f32 %v15049_v57, %v6889_v4  ;;  %v15271_v1 = vld [vmem:[#allocation4 + $0x68] sm:$0xff]  ;;  %v11347_v4 = vpop.f32.mrf.mxu0 }
 0x675   : > { %v6887_v37 = vadd.f32 %v6828_v54, %v6654_v24  ;;  %7006 = vst.msk [vmem:[#allocation4 + $0x88] sm:$0xff] %vm439_vm3, %v6982_v27  ;;  %v11366_v14 = vpop.f32.mrf.mxu1  ;;  %11382 = vmatmul.mubr.msk.bf16.gmra.mxu0 %vm439_vm3, %v15260_v56  ;;  %v6428_v20 = vadd.f32 %v14978_v28, %v15120_v43  ;;  %v6658_v28 = vadd.f32 %v15182_v45, %v6425_v22 }
 0x676   : > { %11408 = vmatmul.mubr.msk.bf16.gmra.mxu1 %vm439_vm3, %v15264_v58  ;;  %v6980_v40 = vsel %vm6968_vm9, %v6938_v59, 0.0  ;;  %v6943_v5 = vmax.f32 %v6919_v6, 0.0  ;;  %v6890_v61 = vadd.f32 %v11366_v14, %v6657_v21  ;;  %v15286_v55 = vld [vmem:[#allocation4 + $0x58] sm:$0xff]  ;;  %v6426_v43 = vadd.f32 %v14982_v0, %v15131_v53  ;;  %v15322_v53 = vld [vmem:[#allocation4 + $0x67] sm:$0xff] }
 0x677   : > { %v6917_v7 = vadd.f32 %v15049_v57, %v6887_v37  ;;  %v15288_v24 = vld [vmem:[#allocation4 + $0x57] sm:$0xff]  ;;  %v15290_v34 = vld [vmem:[#allocation4 + $0x5f] sm:$0xff]  ;;  %7004 = vst.msk [vmem:[#allocation4 + $0x78] sm:$0xff] %vm439_vm3, %v6980_v40  ;;  %v6831_v62 = vpop.f32.mrf.mxu1  ;;  %v15298_v17 = vpack.c.bf16 %v15269_v32, %v15286_v55  ;;  %v6661_v44 = vadd.f32 %v15230_v42, %v6428_v20  ;;  %v6431_v22 = vadd.f32 %v14994_v47, %v15143_v18 }
 0x678   : > { %v15302_v31 = vpack.c.bf16 %v15290_v34, %v15288_v24  ;;  %v6985_v21 = vsel %vm15017_vm8, %v6943_v5, 0.0  ;;  %v6920_v8 = vadd.f32 %v15049_v57, %v6890_v61  ;;  %v6888_v10 = vadd.f32 %v6831_v62, %v6655_v39  ;;  %v15341_v47 = vld [vmem:[#allocation4 + $0x80] sm:$0xff] }
 0x679   : > { %v6941_v13 = vmax.f32 %v6917_v7, 0.0  ;;  %7009 = vst.msk [vmem:[#allocation4 + $0xa0] sm:$0xff] %vm439_vm3, %v6985_v21  ;;  %v11369_v54 = vpop.f32.mrf.mxu1  ;;  %11385 = vmatprep.mubr.msk.bf16.mxu0 %vm439_vm3, %v15298_v17  ;;  %v6627_v7 = vpop.f32.mrf.mxu0  ;;  %v6659_v62 = vadd.f32 %v6614_v15, %v6426_v43  ;;  %v6429_v21 = vadd.f32 %v15004_v36, %v15147_v33 }
 0x67a   : > { %11411 = vmatprep.mubr.msk.bf16.mxu1 %vm439_vm3, %v15302_v31  ;;  %v6944_v6 = vmax.f32 %v6920_v8, 0.0  ;;  %v6918_v45 = vadd.f32 %v15049_v57, %v6888_v10  ;;  %v6893_v37 = vadd.f32 %v11369_v54, %v6660_v38 }
 0x67b   : > { %v6983_v59 = vsel %vm6968_vm9, %v6941_v13, 0.0  ;;  %v15320_v0 = vld [vmem:[#allocation4 + $0x70] sm:$0xff]  ;;  %v6844_v14 = vpop.f32.mrf.mxu1 }
 0x67c   : > { %v15324_v39 = vld [vmem:[#allocation4 + $0x6f] sm:$0xff]  ;;  %7007 = vst.msk [vmem:[#allocation4 + $0x90] sm:$0xff] %vm439_vm3, %v6983_v59  ;;  %v15332_v40 = vpack.c.bf16 %v15320_v0, %v15271_v1  ;;  %v6986_v61 = vsel %vm6968_vm9, %v6944_v6, 0.0  ;;  %v6942_v38 = vmax.f32 %v6918_v45, 0.0  ;;  %v6923_v42 = vadd.f32 %v15049_v57, %v6893_v37 }
 0x67d   : > { %v15336_v5 = vpack.c.bf16 %v15324_v39, %v15322_v53  ;;  %v6891_v20 = vadd.f32 %v6844_v14, %v6658_v28  ;;  %v15343_v18 = vld [vmem:[#allocation4 + $0x88] sm:$0xff]  ;;  %7010 = vst.msk [vmem:[#allocation4 + $0xa8] sm:$0xff] %vm439_vm3, %v6986_v61  ;;  %v11370_v13 = vpop.f32.mrf.mxu1  ;;  %v6664_v59 = vadd.f32 %v11347_v4, %v6431_v22  ;;  %v6432_v6 = vadd.f32 %v15012_v30, %v15160_v29  ;;  %v11348_v14 = vpop.f32.mrf.mxu0 }
 0x67e   : > { %11386 = vmatmul.mubr.msk.bf16.gmra.mxu0 %vm439_vm3, %v15332_v40  ;;  %v6984_v10 = vsel %vm15070_vm10, %v6942_v38, 0.0  ;;  %v6947_v28 = vmax.f32 %v6923_v42, 0.0  ;;  %v6894_v43 = vadd.f32 %v11370_v13, %v6661_v44  ;;  %v15357_v36 = vld [vmem:[#allocation4 + $0x78] sm:$0xff]  ;;  %v6662_v30 = vadd.f32 %v6627_v7, %v6429_v21 }
 0x67f   : > { %11412 = vmatmul.mubr.msk.bf16.gmra.mxu1 %vm439_vm3, %v15336_v5  ;;  %v6921_v15 = vadd.f32 %v15049_v57, %v6891_v20  ;;  %v15359_v33 = vld [vmem:[#allocation4 + $0x77] sm:$0xff]  ;;  %v15361_v54 = vld [vmem:[#allocation4 + $0x7f] sm:$0xff]  ;;  %7008 = vst.msk [vmem:[#allocation4 + $0x98] sm:$0xff] %vm439_vm3, %v6984_v10  ;;  %v6847_v45 = vpop.f32.mrf.mxu1  ;;  %v15368_v37 = vpack.c.bf16 %v15341_v47, %v15357_v36  ;;  %v6430_v29 = vadd.f32 %v15026_v41, %v15163_v3  ;;  %v15391_v3 = vld [vmem:[#allocation4 + $0x87] sm:$0xff] }
 0x680   : > { %v15372_v44 = vpack.c.bf16 %v15361_v54, %v15359_v33  ;;  %v6989_v61 = vsel %vm6968_vm9, %v6947_v28, 0.0  ;;  %v6924_v4 = vadd.f32 %v15049_v57, %v6894_v43  ;;  %v6892_v22 = vadd.f32 %v6847_v45, %v6659_v62 }
 0x681   : > { %16641 = vst [vmem:[#allocation26_spill] sm:$0xff] %v15368_v37  ;;  %v6945_v38 = vmax.f32 %v6921_v15, 0.0  ;;  %7013 = vst.msk [vmem:[#allocation4 + $0xc0] sm:$0xff] %vm439_vm3, %v6989_v61  ;;  %v11373_v42 = vpop.f32.mrf.mxu1  ;;  %11389 = vmatprep.mubr.msk.bf16.mxu0 %vm439_vm3, %v15368_v37  ;;  %v6665_v28 = vadd.f32 %v11348_v14, %v6432_v6  ;;  %v6630_v61 = vpop.f32.mrf.mxu0  ;;  %v15407_v6 = vld [vmem:[#allocation4 + $0xa0] sm:$0xff] }
 0x682   : > { %11415 = vmatprep.mubr.msk.bf16.mxu1 %vm439_vm3, %v15372_v44  ;;  %v6948_v62 = vmax.f32 %v6924_v4, 0.0  ;;  %v6922_v7 = vadd.f32 %v15049_v57, %v6892_v22  ;;  %v6897_v21 = vadd.f32 %v11373_v42, %v6664_v59  ;;  %v6663_v42 = vadd.f32 %v6630_v61, %v6430_v29 }
 0x683   : > { %v6987_v13 = vsel %vm15070_vm10, %v6945_v38, 0.0  ;;  %v15389_v41 = vld [vmem:[#allocation4 + $0x90] sm:$0xff]  ;;  %v6860_v15 = vpop.f32.mrf.mxu1 }
 0x684   : > { %v15393_v10 = vld [vmem:[#allocation4 + $0x8f] sm:$0xff]  ;;  %7011 = vst.msk [vmem:[#allocation4 + $0xb0] sm:$0xff] %vm439_vm3, %v6987_v13  ;;  %v15398_v43 = vpack.c.bf16 %v15389_v41, %v15343_v18  ;;  %v6990_v59 = vsel %vm15070_vm10, %v6948_v62, 0.0  ;;  %v6946_v38 = vmax.f32 %v6922_v7, 0.0  ;;  %v6927_v4 = vadd.f32 %v15049_v57, %v6897_v21  ;;  %v7448_v37 = vld [vmem:[#allocation4 + $0xa1] sm:$0xff] }
 0x685   : > { %v15402_v45 = vpack.c.bf16 %v15393_v10, %v15391_v3  ;;  %v6895_v22 = vadd.f32 %v6860_v15, %v6662_v30  ;;  %v15409_v14 = vld [vmem:[#allocation4 + $0xa8] sm:$0xff]  ;;  %7014 = vst.msk [vmem:[#allocation4 + $0xc8] sm:$0xff] %vm439_vm3, %v6990_v59  ;;  %v11374_v13 = vpop.f32.mrf.mxu1 }
 0x686   : > { %16642 = vst [vmem:[#allocation25_spill] sm:$0xff] %v15398_v43  ;;  %11390 = vmatmul.mubr.msk.bf16.gmra.mxu0 %vm439_vm3, %v15398_v43  ;;  %v6988_v30 = vsel %vm15017_vm8, %v6946_v38, 0.0  ;;  %v6951_v7 = vmax.f32 %v6927_v4, 0.0  ;;  %v6898_v15 = vadd.f32 %v11374_v13, %v6665_v28  ;;  %v15421_v29 = vld [vmem:[#allocation4 + $0x98] sm:$0xff]  ;;  %v15543_v43 = vld [vmem:[#allocation4 + $0x41] sm:$0xff] }
 0x687   : > { %16643 = vst [vmem:[#allocation30_spill] sm:$0xff] %v15402_v45  ;;  %11416 = vmatmul.mubr.msk.bf16.gmra.mxu1 %vm439_vm3, %v15402_v45  ;;  %v6925_v21 = vadd.f32 %v15049_v57, %v6895_v22  ;;  %v15423_v61 = vld [vmem:[#allocation4 + $0x97] sm:$0xff]  ;;  %v15425_v59 = vld [vmem:[#allocation4 + $0x9f] sm:$0xff]  ;;  %7012 = vst.msk [vmem:[#allocation4 + $0xb8] sm:$0xff] %vm439_vm3, %v6988_v30  ;;  %v6863_v8 = vpop.f32.mrf.mxu1  ;;  %v15430_v20 = vpack.c.bf16 %v15407_v6, %v15421_v29  ;;  %v8196_v45 = vsel %vm4883_vm7, %v15205_v52, 0 }
 0x688   : > { %v15434_v38 = vpack.c.bf16 %v15425_v59, %v15423_v61  ;;  %v6993_v28 = vsel %vm15070_vm10, %v6951_v7, 0.0  ;;  %v6928_v22 = vadd.f32 %v15049_v57, %v6898_v15  ;;  %v6896_v13 = vadd.f32 %v6863_v8, %v6663_v42  ;;  %v15451_v8 = vld [vmem:[#allocation4 + $0xa7] sm:$0xff]  ;;  %v15565_v52 = vld [vmem:[#allocation4 + $0x51] sm:$0xff] }
 0x689   : > { %16644 = vst [vmem:[#allocation9_spill] sm:$0xff] %v15430_v20  ;;  %v6949_v4 = vmax.f32 %v6925_v21, 0.0  ;;  %7017 = vst.msk [vmem:[#allocation4 + $0xe0] sm:$0xff] %vm439_vm3, %v6993_v28  ;;  %11393 = vmatprep.mubr.msk.bf16.mxu0 %vm439_vm3, %v15430_v20  ;;  %v7686_v20 = vpack.c.bf16 %v15250_v51, %v15217_v35  ;;  %v15556_v35 = vld [vmem:[%s16303_s5 + $0x18] sm:$0xf] }
 0x68a   : > { %16645 = vst [vmem:[#allocation36_spill] sm:$0xff] %v15434_v38  ;;  %11419 = vmatprep.mubr.msk.bf16.mxu1 %vm439_vm3, %v15434_v38  ;;  %v6952_v11 = vmax.f32 %v6928_v22, 0.0  ;;  %v6926_v7 = vadd.f32 %v15049_v57, %v6896_v13  ;;  %v15466_v22 = vld [vmem:[#allocation4 + $0xc0] sm:$0xff]  ;;  %v7966_v38 = vsel %vm4883_vm7, %v15194_v60, 0 }
 0x68b   : > { %v6991_v62 = vsel %vm15017_vm8, %v6949_v4, 0.0  ;;  %v15449_v21 = vld [vmem:[#allocation4 + $0xb0] sm:$0xff]  ;;  %v15561_v60 = vld [vmem:[%s16303_s5 + $0x1c] sm:$0xf]  ;;  %v15571_v51 = vld [vmem:[#allocation4 + $0x59] sm:$0xff] }
 0x68c   : > { %v15453_v42 = vld [vmem:[#allocation4 + $0xaf] sm:$0xff]  ;;  %7015 = vst.msk [vmem:[#allocation4 + $0xd0] sm:$0xff] %vm439_vm3, %v6991_v62  ;;  %v15458_v15 = vpack.c.bf16 %v15449_v21, %v15409_v14  ;;  %v6994_v4 = vsel %vm15017_vm8, %v6952_v11, 0.0  ;;  %v6950_v57 = vmax.f32 %v6926_v7, 0.0  ;;  %v7431_v62 = vld [vmem:[#allocation4 + $0x19] sm:$0xff]  ;;  %v15502_v25 = vld [vmem:[#allocation4 + $0xc7] sm:$0xff] }
 0x68d   : > { %v15462_v28 = vpack.c.bf16 %v15453_v42, %v15451_v8  ;;  %v15468_v13 = vld [vmem:[#allocation4 + $0xc8] sm:$0xff]  ;;  %7018 = vst.msk [vmem:[#allocation4 + $0xe8] sm:$0xff] %vm439_vm3, %v6994_v4  ;;  %v7455_v49 = vpack.c.bf16 %v7432_v50, %v7431_v62 }
 0x68e   : > { %16646 = vst [vmem:[#allocation29_spill] sm:$0xff] %v15458_v15  ;;  %11394 = vmatmul.mubr.msk.bf16.gmra.mxu0 %vm439_vm3, %v15458_v15  ;;  %v6992_v30 = vsel %vm6968_vm9, %v6950_v57, 0.0  ;;  %v15479_v11 = vld [vmem:[#allocation4 + $0xb8] sm:$0xff] }
 0x68f   : > { %16647 = vst [vmem:[#allocation39_spill] sm:$0xff] %v15462_v28  ;;  %11420 = vmatmul.mubr.msk.bf16.gmra.mxu1 %vm439_vm3, %v15462_v28  ;;  %v15481_v7 = vld [vmem:[#allocation4 + $0xb7] sm:$0xff]  ;;  %v15483_v27 = vld [vmem:[#allocation4 + $0xbf] sm:$0xff]  ;;  %7016 = vst.msk [vmem:[#allocation4 + $0xd8] sm:$0xff] %vm439_vm3, %v6992_v30  ;;  %v15488_v4 = vpack.c.bf16 %v15466_v22, %v15479_v11 }
 0x690   : > { %v15492_v26 = vpack.c.bf16 %v15483_v27, %v15481_v7 }
 0x691   : > { %16648 = vst [vmem:[#allocation35_spill] sm:$0xff] %v15488_v4  ;;  %11397 = vmatprep.mubr.msk.bf16.mxu0 %vm439_vm3, %v15488_v4  ;;  %v7685_v4 = vpack.c.bf16 %v15215_v12, %v15174_v16  ;;  %v15532_v12 = vld [vmem:[#allocation4 + $0x31] sm:$0xff] }
 0x692   : > { %16649 = vst [vmem:[#allocation8_spill] sm:$0xff] %v15492_v26  ;;  %11423 = vmatprep.mubr.msk.bf16.mxu1 %vm439_vm3, %v15492_v26 }
 0x693   : > { %v15500_v30 = vld [vmem:[#allocation4 + $0xd0] sm:$0xff] }
 0x694   : > { %v15504_v9 = vld [vmem:[#allocation4 + $0xcf] sm:$0xff]  ;;  %v15508_v15 = vpack.c.bf16 %v15500_v30, %v15468_v13  ;;  %v15528_v28 = vld [vmem:[#allocation4 + $0xe1] sm:$0xff] }
 0x695   : > { %v15512_v57 = vpack.c.bf16 %v15504_v9, %v15502_v25 }
 0x696   : > { %16650 = vst [vmem:[#allocation16_spill] sm:$0xff] %v15508_v15  ;;  %11398 = vmatmul.mubr.msk.bf16.gmra.mxu0 %vm439_vm3, %v15508_v15  ;;  %v15522_v50 = vld [vmem:[#allocation4 + $0xd7] sm:$0xff]  ;;  %v15524_v62 = vld [vmem:[#allocation4 + $0xdf] sm:$0xff]  ;;  %v7445_v15 = vld [vmem:[#allocation4 + $0x89] sm:$0xff] }
 0x697   : > { %16651 = vst [vmem:[#allocation10_spill] sm:$0xff] %v15512_v57  ;;  %11424 = vmatmul.mubr.msk.bf16.gmra.mxu1 %vm439_vm3, %v15512_v57  ;;  %11429 = vmatprep.mubr.msk.bf16.mxu0 %vm439_vm3, %v7455_v49  ;;  %v15526_v26 = vld [vmem:[#allocation4 + $0xd9] sm:$0xff] }
 0x698   : > { %11455 = vmatprep.mubr.msk.bf16.mxu1 %vm439_vm3, %v7685_v4  ;;  %v15536_v57 = vld [vmem:[#allocation4 + $0x39] sm:$0xff]  ;;  %v7433_v4 = vld [vmem:[#allocation4 + $0x29] sm:$0xff] }
 0x699   : > { %v7456_v49 = vpack.c.bf16 %v15532_v12, %v7433_v4  ;;  %v7457_v16 = vpack.c.bf16 %v15543_v43, %v15536_v57  ;;  %v7687_v4 = vpack.c.bf16 %v15288_v24, %v15252_v23  ;;  %v7437_v23 = vld [vmem:[#allocation4 + $0x49] sm:$0xff] }
 0x69a   : > { %v15574_v24 = vpack.c.bf16 %v15565_v52, %v7437_v23 }
 0x69c   : > { %16652 = vst [vmem:[#allocation17_spill] sm:$0xff] %v15574_v24 }
 0x69e   : > { %11430 = vmatmul.mubr.msk.bf16.vlgmr.msra.gmra.mxu0 %vm439_vm3, %v7456_v49  ;;  %v7441_v49 = vld [vmem:[#allocation4 + $0x69] sm:$0xff] }
 0x69f   : > { %11456 = vmatmul.mubr.msk.bf16.vlgmr.msra.gmra.mxu1 %vm439_vm3, %v7686_v20  ;;  %11480 = vmatpush3.bf16.msra.mxu0 %v7966_v38  ;;  %v7688_v20 = vpack.c.bf16 %v15322_v53, %v15290_v34  ;;  %v15578_v38 = vld [vmem:[#allocation4 + $0x61] sm:$0xff]  ;;  %v15592_v34 = vld [vmem:[#allocation4 + $0x71] sm:$0xff]  ;;  %v15594_v53 = vld [vmem:[#allocation4 + $0x79] sm:$0xff] }
 0x6a0   : > { %11433 = vmatprep.mubr.msk.bf16.mxu0 %vm439_vm3, %v7457_v16  ;;  %11459 = vmatprep.mubr.msk.bf16.mxu1 %vm439_vm3, %v7687_v4  ;;  %v7689_v16 = vpack.c.bf16 %v15359_v33, %v15324_v39  ;;  %v15597_v4 = vpack.c.bf16 %v15592_v34, %v7441_v49  ;;  %v7690_v39 = vpack.c.bf16 %v15391_v3, %v15361_v54  ;;  %v15601_v33 = vld [vmem:[#allocation4 + $0x81] sm:$0xff]  ;;  %v7446_v54 = vld [vmem:[#allocation4 + $0x91] sm:$0xff]  ;;  %v7447_v3 = vld [vmem:[#allocation4 + $0x99] sm:$0xff] }
 0x6a1   : > { %11506 = vmatpush3.bf16.msra.mxu1 %v8196_v45  ;;  %11626 = vmatprep.subr.msk.bf16.mxu0 %vm4883_vm7, %v15556_v35  ;;  %v15582_v45 = vpack.c.bf16 %v15578_v38, %v15571_v51 }
 0x6a2   : > { %11627 = vmatprep.subr.msk.bf16.mxu1 %vm4883_vm7, %v15561_v60  ;;  %16654 = vst [vmem:[#allocation20_spill] sm:$0xff] %v15597_v4 }
 0x6a3   : > { %16653 = vst [vmem:[#allocation12_spill] sm:$0xff] %v15582_v45 }
 0x6a6   : > { %11434 = vmatmul.mubr.msk.bf16.gmra.mxu0 %vm439_vm3, %v15574_v24  ;;  %v7692_v24 = vpack.c.bf16 %v15451_v8, %v15425_v59  ;;  %v7694_v8 = vpack.c.bf16 %v15502_v25, %v15483_v27 }
 0x6a7   : > { %11460 = vmatmul.mubr.msk.bf16.gmra.mxu1 %vm439_vm3, %v7688_v20  ;;  %11437 = vmatprep.mubr.msk.bf16.mxu0 %vm439_vm3, %v15582_v45  ;;  %v15605_v20 = vpack.c.bf16 %v15601_v33, %v15594_v53  ;;  %v15615_v45 = vpack.c.bf16 %v7446_v54, %v7445_v15 }
 0x6a8   : > { %11463 = vmatprep.mubr.msk.bf16.mxu1 %vm439_vm3, %v7689_v16  ;;  %v7691_v16 = vpack.c.bf16 %v15423_v61, %v15393_v10  ;;  %v15619_v10 = vpack.c.bf16 %v7448_v37, %v7447_v3  ;;  %v7693_v61 = vpack.c.bf16 %v15481_v7, %v15453_v42  ;;  %v7695_v7 = vpack.c.bf16 %v15522_v50, %v15504_v9 }
 0x6a9   : > { %16655 = vst [vmem:[#allocation42_spill] sm:$0xff] %v15605_v20  ;;  %v8145_v9 = vpack.c.bf16 %v15536_v57, %v15532_v12  ;;  %v8656_v57 = vsel %vm4883_vm7, %v15561_v60, 0  ;;  %v16659_v12 = vpack.c.bf16 %v15189_v63, %v15187_v2  ;;  %v8148_v2 = vpack.c.bf16 %v7441_v49, %v15578_v38  ;;  %v16678_v38 = vld [vmem:[#allocation16_spill] sm:$0xff] }
 0x6aa   : > { %16656 = vst [vmem:[#allocation18_spill] sm:$0xff] %v15619_v10  ;;  %v8149_v63 = vpack.c.bf16 %v15594_v53, %v15592_v34  ;;  %v8151_v60 = vpack.c.bf16 %v7447_v3, %v7446_v54  ;;  %v8372_v34 = vld [vmem:[#allocation4 + $0xef] sm:$0xff]  ;;  %v8373_v54 = vld [vmem:[#allocation4 + $0xf7] sm:$0xff]  ;;  %v8374_v3 = vld [vmem:[#allocation4 + $0xff] sm:$0xff] }
 0x6ab   : > { %v8602_v53 = vld [vmem:[#allocation4 + $0xf0] sm:$0xff] }
 0x6ae   : > { %11438 = vmatmul.mubr.msk.bf16.gmra.mxu0 %vm439_vm3, %v15597_v4  ;;  %v7452_v4 = vld [vmem:[#allocation4 + $0xc1] sm:$0xff] }
 0x6af   : > { %11464 = vmatmul.mubr.msk.bf16.gmra.mxu1 %vm439_vm3, %v7690_v39  ;;  %11441 = vmatprep.mubr.msk.bf16.mxu0 %vm439_vm3, %v15605_v20  ;;  %v7450_v39 = vld [vmem:[#allocation4 + $0xb1] sm:$0xff]  ;;  %v7449_v20 = vld [vmem:[#allocation4 + $0xa9] sm:$0xff] }
 0x6b0   : > { %11467 = vmatprep.mubr.msk.bf16.mxu1 %vm439_vm3, %v7691_v16  ;;  %v7451_v16 = vld [vmem:[#allocation4 + $0xb9] sm:$0xff]  ;;  %v15629_v59 = vpack.c.bf16 %v7450_v39, %v7449_v20 }
 0x6b1   : > { %v15633_v42 = vpack.c.bf16 %v7452_v4, %v7451_v16 }
 0x6b3   : > { %16657 = vst [vmem:[#allocation32_spill] sm:$0xff] %v15633_v42 }
 0x6b6   : > { %11442 = vmatmul.mubr.msk.bf16.gmra.mxu0 %vm439_vm3, %v15615_v45 }
 0x6b7   : > { %11468 = vmatmul.mubr.msk.bf16.gmra.mxu1 %vm439_vm3, %v7692_v24  ;;  %11445 = vmatprep.mubr.msk.bf16.mxu0 %vm439_vm3, %v15619_v10  ;;  %v7454_v24 = vld [vmem:[#allocation4 + $0xd1] sm:$0xff]  ;;  %v15643_v10 = vld [vmem:[#allocation4 + $0xe7] sm:$0xff] }
 0x6b8   : > { %11471 = vmatprep.mubr.msk.bf16.mxu1 %vm439_vm3, %v7693_v61  ;;  %v7453_v61 = vld [vmem:[#allocation4 + $0xc9] sm:$0xff]  ;;  %v7696_v27 = vpack.c.bf16 %v15643_v10, %v15524_v62 }
 0x6b9   : > { %v15645_v25 = vpack.c.bf16 %v7454_v24, %v7453_v61 }
 0x6be   : > { %11446 = vmatmul.mubr.msk.bf16.gmra.mxu0 %vm439_vm3, %v15629_v59 }
 0x6bf   : > { %11472 = vmatmul.mubr.msk.bf16.gmra.mxu1 %vm439_vm3, %v7694_v8  ;;  %11449 = vmatprep.mubr.msk.bf16.mxu0 %vm439_vm3, %v15633_v42  ;;  %v16658_v8 = vpack.c.bf16 %v15213_v19, %v15172_v46  ;;  %v8426_v42 = vsel %vm4883_vm7, %v15556_v35, 0  ;;  %v8147_v46 = vpack.c.bf16 %v15571_v51, %v15565_v52  ;;  %v9754_v19 = vld [vmem:[%s16303_s5 + $0x20] sm:$0xf]  ;;  %v16661_v35 = vpack.c.bf16 %v15271_v1, %v15269_v32 }
 0x6c0   : > { %11475 = vmatprep.mubr.msk.bf16.mxu1 %vm439_vm3, %v7695_v7  ;;  %v8146_v7 = vpack.c.bf16 %v7437_v23, %v15543_v43  ;;  %v16660_v43 = vpack.c.bf16 %v15286_v55, %v15248_v48  ;;  %v16662_v48 = vpack.c.bf16 %v15357_v36, %v15320_v0  ;;  %v8150_v55 = vpack.c.bf16 %v7445_v15, %v15601_v33  ;;  %v7913_v15 = vld [vmem:[#allocation4 + $0xe0] sm:$0xff]  ;;  %v16676_v51 = vld [vmem:[#allocation35_spill] sm:$0xff] }
 0x6c1   : > { %v16663_v52 = vpack.c.bf16 %v15343_v18, %v15341_v47  ;;  %v16664_v32 = vpack.c.bf16 %v15421_v29, %v15389_v41  ;;  %v8152_v1 = vpack.c.bf16 %v7449_v20, %v7448_v37  ;;  %v8153_v0 = vpack.c.bf16 %v7451_v16, %v7450_v39  ;;  %v7912_v18 = vld [vmem:[#allocation4 + $0xd8] sm:$0xff]  ;;  %v16677_v23 = vld [vmem:[#allocation10_spill] sm:$0xff] }
 0x6c2   : > { %v16665_v36 = vpack.c.bf16 %v15409_v14, %v15407_v6  ;;  %v16666_v47 = vpack.c.bf16 %v15479_v11, %v15449_v21  ;;  %v8154_v41 = vpack.c.bf16 %v7453_v61, %v7452_v4  ;;  %v7925_v29 = vpack.c.bf16 %v7912_v18, %v15500_v30  ;;  %v7914_v14 = vld [vmem:[#allocation4 + $0xe8] sm:$0xff]  ;;  %v8603_v39 = vld [vmem:[#allocation4 + $0xf8] sm:$0xff]  ;;  %v8604_v16 = vld [vmem:[#allocation4 + $0x100] sm:$0xff] }
 0x6c3   : > { %v8155_v37 = vpack.c.bf16 %v15526_v26, %v7454_v24  ;;  %v16667_v6 = vpack.c.bf16 %v15468_v13, %v15466_v22  ;;  %v15723_v21 = vld [vmem:[#allocation4 + $0xe9] sm:$0xff]  ;;  %v7926_v11 = vpack.c.bf16 %v7914_v14, %v7913_v15  ;;  %v8886_v22 = vsel %vm4883_vm7, %v9754_v19, 0  ;;  %v16672_v13 = vld [vmem:[#allocation9_spill] sm:$0xff] }
 0x6c4   : > { %v8156_v30 = vpack.c.bf16 %v15723_v21, %v15528_v28  ;;  %v8614_v49 = vpack.c.bf16 %v7913_v15, %v7912_v18  ;;  %v8385_v4 = vpack.c.bf16 %v8372_v34, %v15643_v10  ;;  %v8615_v33 = vpack.c.bf16 %v8602_v53, %v7914_v14  ;;  %v16680_v10 = vld [vmem:[#allocation17_spill] sm:$0xff]  ;;  %v16681_v61 = vld [vmem:[#allocation12_spill] sm:$0xff]  ;;  %v16684_v14 = vld [vmem:[#allocation18_spill] sm:$0xff] }
 0x6c5   : > { %v16679_v20 = vpack.c.bf16 %v15524_v62, %v15522_v50  ;;  %v8616_v24 = vpack.c.bf16 %v8604_v16, %v8603_v39 }
 0x6c6   : > { %11450 = vmatmul.mubr.msk.bf16.gmra.mxu0 %vm439_vm3, %v15645_v25 }
 0x6c7   : > { %11476 = vmatmul.mubr.msk.bf16.gmra.mxu1 %vm439_vm3, %v7696_v27  ;;  %11481 = vmatprep.mubr.msk.bf16.mxu0 %vm439_vm3, %v16658_v8 }
 0x6c8   : > { %11507 = vmatprep.mubr.msk.bf16.mxu1 %vm439_vm3, %v8145_v9  ;;  %v16682_v9 = vld [vmem:[#allocation20_spill] sm:$0xff] }
 0x6ce   : > { %11482 = vmatmul.mubr.msk.bf16.vlgmr.msra.gmra.mxu0 %vm439_vm3, %v16659_v12 }
 0x6cf   : > { %11508 = vmatmul.mubr.msk.bf16.vlgmr.msra.gmra.mxu1 %vm439_vm3, %v8146_v7  ;;  %11532 = vmatpush3.bf16.msra.mxu0 %v8426_v42  ;;  %v8386_v42 = vpack.c.bf16 %v8374_v3, %v8373_v54 }
 0x6d0   : > { %11485 = vmatprep.mubr.msk.bf16.mxu0 %vm439_vm3, %v16660_v43  ;;  %11511 = vmatprep.mubr.msk.bf16.mxu1 %vm439_vm3, %v8147_v46 }
 0x6d1   : > { %11558 = vmatpush3.bf16.msra.mxu1 %v8656_v57  ;;  %11628 = vmatprep.subr.msk.bf16.mxu0 %vm4883_vm7, %v9754_v19 }
 0x6d6   : > { %11486 = vmatmul.mubr.msk.bf16.gmra.mxu0 %vm439_vm3, %v16661_v35 }
 0x6d7   : > { %11512 = vmatmul.mubr.msk.bf16.gmra.mxu1 %vm439_vm3, %v8148_v2  ;;  %11489 = vmatprep.mubr.msk.bf16.mxu0 %vm439_vm3, %v16662_v48 }
 0x6d8   : > { %11515 = vmatprep.mubr.msk.bf16.mxu1 %vm439_vm3, %v8149_v63 }
 0x6de   : > { %11490 = vmatmul.mubr.msk.bf16.gmra.mxu0 %vm439_vm3, %v16663_v52 }
 0x6df   : > { %11516 = vmatmul.mubr.msk.bf16.gmra.mxu1 %vm439_vm3, %v8150_v55  ;;  %11493 = vmatprep.mubr.msk.bf16.mxu0 %vm439_vm3, %v16664_v32  ;;  %v16683_v55 = vld [vmem:[#allocation42_spill] sm:$0xff] }
 0x6e0   : > { %11519 = vmatprep.mubr.msk.bf16.mxu1 %vm439_vm3, %v8151_v60 }
 0x6e6   : > { %11494 = vmatmul.mubr.msk.bf16.gmra.mxu0 %vm439_vm3, %v16665_v36 }
 0x6e7   : > { %11520 = vmatmul.mubr.msk.bf16.gmra.mxu1 %vm439_vm3, %v8152_v1  ;;  %11497 = vmatprep.mubr.msk.bf16.mxu0 %vm439_vm3, %v16666_v47 }
 0x6e8   : > { %11523 = vmatprep.mubr.msk.bf16.mxu1 %vm439_vm3, %v8153_v0 }
 0x6ee   : > { %11498 = vmatmul.mubr.msk.bf16.gmra.mxu0 %vm439_vm3, %v16667_v6 }
 0x6ef   : > { %11524 = vmatmul.mubr.msk.bf16.gmra.mxu1 %vm439_vm3, %v8154_v41  ;;  %11501 = vmatprep.mubr.msk.bf16.mxu0 %vm439_vm3, %v7925_v29 }
 0x6f0   : > { %11527 = vmatprep.mubr.msk.bf16.mxu1 %vm439_vm3, %v8155_v37 }
 0x6f6   : > { %11502 = vmatmul.mubr.msk.bf16.gmra.mxu0 %vm439_vm3, %v7926_v11 }
 0x6f7   : > { %11528 = vmatmul.mubr.msk.bf16.gmra.mxu1 %vm439_vm3, %v8156_v30  ;;  %11533 = vmatprep.mubr.msk.bf16.mxu0 %vm439_vm3, %v15264_v58  ;;  %v16668_v58 = vld [vmem:[#allocation26_spill] sm:$0xff] }
 0x6f8   : > { %11559 = vmatprep.mubr.msk.bf16.mxu1 %vm439_vm3, %v15260_v56  ;;  %v16669_v56 = vld [vmem:[#allocation30_spill] sm:$0xff] }
 0x6fe   : > { %11534 = vmatmul.mubr.msk.bf16.vlgmr.msra.gmra.mxu0 %vm439_vm3, %v15302_v31  ;;  %v16670_v31 = vld [vmem:[#allocation25_spill] sm:$0xff] }
 0x6ff   : > { %11560 = vmatmul.mubr.msk.bf16.vlgmr.msra.gmra.mxu1 %vm439_vm3, %v15298_v17  ;;  %11584 = vmatpush3.bf16.msra.mxu0 %v8886_v22  ;;  %v16671_v17 = vld [vmem:[#allocation36_spill] sm:$0xff] }
 0x700   : > { %11537 = vmatprep.mubr.msk.bf16.mxu0 %vm439_vm3, %v15336_v5  ;;  %11563 = vmatprep.mubr.msk.bf16.mxu1 %vm439_vm3, %v15332_v40  ;;  %v16673_v5 = vld [vmem:[#allocation39_spill] sm:$0xff]  ;;  %v16674_v40 = vld [vmem:[#allocation29_spill] sm:$0xff] }
 0x706   : > { %11538 = vmatmul.mubr.msk.bf16.gmra.mxu0 %vm439_vm3, %v15372_v44  ;;  %v16675_v44 = vld [vmem:[#allocation8_spill] sm:$0xff] }
 0x707   : > { %11564 = vmatmul.mubr.msk.bf16.gmra.mxu1 %vm439_vm3, %v16668_v58  ;;  %11541 = vmatprep.mubr.msk.bf16.mxu0 %vm439_vm3, %v16669_v56 }
 0x708   : > { %11567 = vmatprep.mubr.msk.bf16.mxu1 %vm439_vm3, %v16670_v31 }
 0x70e   : > { %11542 = vmatmul.mubr.msk.bf16.gmra.mxu0 %vm439_vm3, %v16671_v17 }
 0x70f   : > { %11568 = vmatmul.mubr.msk.bf16.gmra.mxu1 %vm439_vm3, %v16672_v13  ;;  %11545 = vmatprep.mubr.msk.bf16.mxu0 %vm439_vm3, %v16673_v5 }
 0x710   : > { %11571 = vmatprep.mubr.msk.bf16.mxu1 %vm439_vm3, %v16674_v40 }
 0x716   : > { %11546 = vmatmul.mubr.msk.bf16.gmra.mxu0 %vm439_vm3, %v16675_v44  ;;  %v16685_v44 = vld [vmem:[#allocation32_spill] sm:$0xff] }
 0x717   : > { %11572 = vmatmul.mubr.msk.bf16.gmra.mxu1 %vm439_vm3, %v16676_v51  ;;  %11549 = vmatprep.mubr.msk.bf16.mxu0 %vm439_vm3, %v16677_v23 }
 0x718   : > { %11575 = vmatprep.mubr.msk.bf16.mxu1 %vm439_vm3, %v16678_v38 }
 0x71e   : > { %11550 = vmatmul.mubr.msk.bf16.gmra.mxu0 %vm439_vm3, %v16679_v20 }
 0x71f   : > { %11576 = vmatmul.mubr.msk.bf16.gmra.mxu1 %vm439_vm3, %v8614_v49  ;;  %11553 = vmatprep.mubr.msk.bf16.mxu0 %vm439_vm3, %v8385_v4  ;;  %v8832_v49 = vld [vmem:[#allocation4 + $0xf1] sm:$0xff] }
 0x720   : > { %11579 = vmatprep.mubr.msk.bf16.mxu1 %vm439_vm3, %v8615_v33  ;;  %v8845_v3 = vpack.c.bf16 %v8832_v49, %v15723_v21 }
 0x726   : > { %11554 = vmatmul.mubr.msk.bf16.gmra.mxu0 %vm439_vm3, %v8386_v42 }
 0x727   : > { %11580 = vmatmul.mubr.msk.bf16.gmra.mxu1 %vm439_vm3, %v8616_v24  ;;  %11585 = vmatprep.mubr.msk.bf16.mxu0 %vm439_vm3, %v16680_v10  ;;  %v8833_v24 = vld [vmem:[#allocation4 + $0xf9] sm:$0xff]  ;;  %v8834_v10 = vld [vmem:[#allocation4 + $0x101] sm:$0xff] }
 0x728   : > { %v8846_v21 = vpack.c.bf16 %v8834_v10, %v8833_v24 }
 0x72d   : > { %v11379_v50 = vpop.f32.mrf.mxu0 }
 0x72e   : > { %v11405_v62 = vpop.f32.mrf.mxu1  ;;  %11586 = vmatmul.mubr.msk.bf16.vlgmr.msra.gmra.mxu0 %vm439_vm3, %v16681_v61 }
 0x72f   : > { %v15780_v27 = vadd.f32 %v11405_v62, %v11379_v50  ;;  %11589 = vmatprep.mubr.msk.bf16.mxu0 %vm439_vm3, %v16682_v9  ;;  %v7168_v8 = vpop.f32.mrf.mxu0 }
 0x730   : > { %v7336_v7 = vpop.f32.mrf.mxu1 }
 0x731   : > { %v15784_v57 = vadd.f32 %v7336_v7, %v7168_v8  ;;  %v11380_v12 = vpop.f32.mrf.mxu0 }
 0x732   : > { %v11406_v46 = vpop.f32.mrf.mxu1 }
 0x733   : > { %v15786_v19 = vadd.f32 %v11406_v46, %v11380_v12  ;;  %v7171_v43 = vpop.f32.mrf.mxu0 }
 0x734   : > { %v7339_v2 = vpop.f32.mrf.mxu1 }
 0x735   : > { %v15788_v63 = vadd.f32 %v7339_v2, %v7171_v43  ;;  %v11383_v35 = vpop.f32.mrf.mxu0 }
 0x736   : > { %v11409_v48 = vpop.f32.mrf.mxu1  ;;  %11590 = vmatmul.mubr.msk.bf16.gmra.mxu0 %vm439_vm3, %v16683_v55 }
 0x737   : > { %v15792_v60 = vadd.f32 %v11409_v48, %v11383_v35  ;;  %11593 = vmatprep.mubr.msk.bf16.mxu0 %vm439_vm3, %v15615_v45  ;;  %v7184_v52 = vpop.f32.mrf.mxu0 }
 0x738   : > { %v7352_v32 = vpop.f32.mrf.mxu1 }
 0x739   : > { %v15796_v1 = vadd.f32 %v7352_v32, %v7184_v52  ;;  %v11384_v0 = vpop.f32.mrf.mxu0 }
 0x73a   : > { %v11410_v36 = vpop.f32.mrf.mxu1 }
 0x73b   : > { %v15798_v47 = vadd.f32 %v11410_v36, %v11384_v0  ;;  %v7187_v18 = vpop.f32.mrf.mxu0 }
 0x73c   : > { %v7355_v41 = vpop.f32.mrf.mxu1 }
 0x73d   : > { %v15800_v29 = vadd.f32 %v7355_v41, %v7187_v18 }
 0x73e   : > { %v11387_v37 = vpop.f32.mrf.mxu0  ;;  %11594 = vmatmul.mubr.msk.bf16.gmra.mxu0 %vm439_vm3, %v16684_v14 }
 0x73f   : > { %v11413_v6 = vpop.f32.mrf.mxu1  ;;  %11597 = vmatprep.mubr.msk.bf16.mxu0 %vm439_vm3, %v15629_v59 }
 0x740   : > { %v15804_v15 = vadd.f32 %v11413_v6, %v11387_v37  ;;  %v7200_v45 = vpop.f32.mrf.mxu0 }
 0x741   : > { %v7368_v11 = vpop.f32.mrf.mxu1 }
 0x742   : > { %v15808_v30 = vadd.f32 %v7368_v11, %v7200_v45  ;;  %v11388_v22 = vpop.f32.mrf.mxu0 }
 0x743   : > { %v11414_v58 = vpop.f32.mrf.mxu1 }
 0x744   : > { %v15810_v56 = vadd.f32 %v11414_v58, %v11388_v22  ;;  %v7203_v31 = vpop.f32.mrf.mxu0 }
 0x745   : > { %v7371_v17 = vpop.f32.mrf.mxu1 }
 0x746   : > { %v15812_v13 = vadd.f32 %v7371_v17, %v7203_v31  ;;  %v11391_v5 = vpop.f32.mrf.mxu0  ;;  %11598 = vmatmul.mubr.msk.bf16.gmra.mxu0 %vm439_vm3, %v16685_v44 }
 0x747   : > { %v11417_v40 = vpop.f32.mrf.mxu1  ;;  %11601 = vmatprep.mubr.msk.bf16.mxu0 %vm439_vm3, %v15645_v25  ;;  %v16686_v25 = vpack.c.bf16 %v15528_v28, %v15526_v26 }
 0x748   : > { %v15816_v51 = vadd.f32 %v11417_v40, %v11391_v5  ;;  %v7216_v59 = vpop.f32.mrf.mxu0 }
 0x749   : > { %v7384_v23 = vpop.f32.mrf.mxu1 }
 0x74a   : > { %v15820_v38 = vadd.f32 %v7384_v23, %v7216_v59  ;;  %v11392_v34 = vpop.f32.mrf.mxu0 }
 0x74b   : > { %v11418_v53 = vpop.f32.mrf.mxu1 }
 0x74c   : > { %v15822_v4 = vadd.f32 %v11418_v53, %v11392_v34  ;;  %v7219_v33 = vpop.f32.mrf.mxu0 }
 0x74d   : > { %v7387_v20 = vpop.f32.mrf.mxu1 }
 0x74e   : > { %v15824_v54 = vadd.f32 %v7387_v20, %v7219_v33  ;;  %v11395_v39 = vpop.f32.mrf.mxu0  ;;  %11602 = vmatmul.mubr.msk.bf16.gmra.mxu0 %vm439_vm3, %v16686_v25 }
 0x74f   : > { %v11421_v16 = vpop.f32.mrf.mxu1  ;;  %11605 = vmatprep.mubr.msk.bf16.mxu0 %vm439_vm3, %v8845_v3 }
 0x750   : > { %v15831_v42 = vadd.f32 %v11421_v16, %v11395_v39  ;;  %v7232_v50 = vpop.f32.mrf.mxu0 }
 0x751   : > { %v7400_v62 = vpop.f32.mrf.mxu1 }
 0x752   : > { %v15834_v61 = vadd.f32 %v7400_v62, %v7232_v50  ;;  %v11396_v9 = vpop.f32.mrf.mxu0 }
 0x753   : > { %v11422_v8 = vpop.f32.mrf.mxu1 }
 0x754   : > { %v15836_v7 = vadd.f32 %v11422_v8, %v11396_v9  ;;  %v7235_v12 = vpop.f32.mrf.mxu0 }
 0x755   : > { %v7403_v46 = vpop.f32.mrf.mxu1 }
 0x756   : > { %v15838_v26 = vadd.f32 %v7403_v46, %v7235_v12  ;;  %v11399_v28 = vpop.f32.mrf.mxu0  ;;  %11606 = vmatmul.mubr.msk.bf16.gmra.mxu0 %vm439_vm3, %v8846_v21 }
 0x757   : > { %v11425_v43 = vpop.f32.mrf.mxu1 }
 0x758   : > { %v15841_v2 = vadd.f32 %v11425_v43, %v11399_v28  ;;  %v7248_v35 = vpop.f32.mrf.mxu0 }
 0x759   : > { %v7416_v48 = vpop.f32.mrf.mxu1 }
 0x75a   : > { %v15843_v55 = vadd.f32 %v7416_v48, %v7248_v35  ;;  %v11400_v52 = vpop.f32.mrf.mxu0 }
 0x75b   : > { %v11426_v32 = vpop.f32.mrf.mxu1 }
 0x75c   : > { %v15845_v0 = vadd.f32 %v11426_v32, %v11400_v52  ;;  %v7251_v36 = vpop.f32.mrf.mxu0 }
 0x75d   : > { %v7419_v18 = vpop.f32.mrf.mxu1 }
 0x75e   : > { %v15847_v41 = vadd.f32 %v7419_v18, %v7251_v36  ;;  %v11431_v37 = vpop.f32.mrf.mxu0 }
 0x75f   : > { %v11457_v6 = vpop.f32.mrf.mxu1  ;;  %v7639_v14 = vadd.f32 %v11431_v37, %v15780_v27 }
 0x760   : > { %v7542_v45 = vpop.f32.mrf.mxu0 }
 0x761   : > { %v7772_v11 = vpop.f32.mrf.mxu1  ;;  %v15850_v22 = vadd.f32 %v11457_v6, %v7639_v14  ;;  %v7637_v58 = vadd.f32 %v7542_v45, %v15784_v57 }
 0x762   : > { %v11432_v31 = vpop.f32.mrf.mxu0 }
 0x763   : > { %v11458_v17 = vpop.f32.mrf.mxu1  ;;  %v15853_v5 = vadd.f32 %v7772_v11, %v7637_v58  ;;  %v7640_v40 = vadd.f32 %v11432_v31, %v15786_v19 }
 0x764   : > { %v7545_v44 = vpop.f32.mrf.mxu0 }
 0x765   : > { %v7775_v59 = vpop.f32.mrf.mxu1  ;;  %v15856_v23 = vadd.f32 %v11458_v17, %v7640_v40  ;;  %v7638_v34 = vadd.f32 %v7545_v44, %v15788_v63 }
 0x766   : > { %v11435_v53 = vpop.f32.mrf.mxu0 }
 0x767   : > { %v11461_v27 = vpop.f32.mrf.mxu1  ;;  %v15859_v49 = vadd.f32 %v7775_v59, %v7638_v34  ;;  %v7643_v33 = vadd.f32 %v11435_v53, %v15792_v60 }
 0x768   : > { %v7558_v20 = vpop.f32.mrf.mxu0 }
 0x769   : > { %v7788_v57 = vpop.f32.mrf.mxu1  ;;  %v15862_v3 = vadd.f32 %v11461_v27, %v7643_v33  ;;  %v7641_v39 = vadd.f32 %v7558_v20, %v15796_v1 }
 0x76a   : > { %v11436_v16 = vpop.f32.mrf.mxu0 }
 0x76b   : > { %v11462_v19 = vpop.f32.mrf.mxu1  ;;  %v15865_v25 = vadd.f32 %v7788_v57, %v7641_v39  ;;  %v7644_v24 = vadd.f32 %v11436_v16, %v15798_v47 }
 0x76c   : > { %v7561_v10 = vpop.f32.mrf.mxu0 }
 0x76d   : > { %v7791_v63 = vpop.f32.mrf.mxu1  ;;  %v15868_v50 = vadd.f32 %v11462_v19, %v7644_v24  ;;  %v7642_v62 = vadd.f32 %v7561_v10, %v15800_v29 }
 0x76e   : > { %v11439_v9 = vpop.f32.mrf.mxu0 }
 0x76f   : > { %v11465_v60 = vpop.f32.mrf.mxu1  ;;  %v15871_v8 = vadd.f32 %v7791_v63, %v7642_v62  ;;  %v7647_v21 = vadd.f32 %v11439_v9, %v15804_v15 }
 0x770   : > { %v7574_v12 = vpop.f32.mrf.mxu0 }
 0x771   : > { %v7804_v1 = vpop.f32.mrf.mxu1  ;;  %v15874_v46 = vadd.f32 %v11465_v60, %v7647_v21  ;;  %v7645_v28 = vadd.f32 %v7574_v12, %v15808_v30 }
 0x772   : > { %v11440_v43 = vpop.f32.mrf.mxu0 }
 0x773   : > { %v11466_v47 = vpop.f32.mrf.mxu1  ;;  %v15877_v35 = vadd.f32 %v7804_v1, %v7645_v28  ;;  %v7648_v48 = vadd.f32 %v11440_v43, %v15810_v56 }
 0x774   : > { %v7577_v52 = vpop.f32.mrf.mxu0 }
 0x775   : > { %v7807_v29 = vpop.f32.mrf.mxu1  ;;  %v15880_v32 = vadd.f32 %v11466_v47, %v7648_v48  ;;  %v7646_v36 = vadd.f32 %v7577_v52, %v15812_v13 }
 0x776   : > { %v11443_v18 = vpop.f32.mrf.mxu0 }
 0x777   : > { %v11469_v15 = vpop.f32.mrf.mxu1  ;;  %v15883_v37 = vadd.f32 %v7807_v29, %v7646_v36  ;;  %v7651_v6 = vadd.f32 %v11443_v18, %v15816_v51 }
 0x778   : > { %v7590_v14 = vpop.f32.mrf.mxu0 }
 0x779   : > { %v7820_v30 = vpop.f32.mrf.mxu1  ;;  %v15886_v45 = vadd.f32 %v11469_v15, %v7651_v6  ;;  %v7649_v11 = vadd.f32 %v7590_v14, %v15820_v38 }
 0x77a   : > { %v11444_v58 = vpop.f32.mrf.mxu0 }
 0x77b   : > { %v11470_v56 = vpop.f32.mrf.mxu1  ;;  %v15889_v31 = vadd.f32 %v7820_v30, %v7649_v11  ;;  %v7652_v17 = vadd.f32 %v11444_v58, %v15822_v4 }
 0x77c   : > { %v7593_v40 = vpop.f32.mrf.mxu0 }
 0x77d   : > { %v7823_v13 = vpop.f32.mrf.mxu1  ;;  %v15892_v44 = vadd.f32 %v11470_v56, %v7652_v17  ;;  %v7650_v59 = vadd.f32 %v7593_v40, %v15824_v54 }
 0x77e   : > { %v11447_v34 = vpop.f32.mrf.mxu0 }
 0x77f   : > { %v11473_v51 = vpop.f32.mrf.mxu1  ;;  %v15895_v53 = vadd.f32 %v7823_v13, %v7650_v59  ;;  %v7655_v27 = vadd.f32 %v11447_v34, %v15831_v42 }
 0x780   : > { %v7606_v33 = vpop.f32.mrf.mxu0 }
 0x781   : > { %v7836_v38 = vpop.f32.mrf.mxu1  ;;  %v15898_v20 = vadd.f32 %v11473_v51, %v7655_v27  ;;  %v7653_v57 = vadd.f32 %v7606_v33, %v15834_v61 }
 0x782   : > { %v11448_v39 = vpop.f32.mrf.mxu0 }
 0x783   : > { %v11474_v4 = vpop.f32.mrf.mxu1  ;;  %v15901_v16 = vadd.f32 %v7836_v38, %v7653_v57  ;;  %v7656_v19 = vadd.f32 %v11448_v39, %v15836_v7 }
 0x784   : > { %v7609_v24 = vpop.f32.mrf.mxu0 }
 0x785   : > { %v7839_v54 = vpop.f32.mrf.mxu1  ;;  %v15904_v10 = vadd.f32 %v11474_v4, %v7656_v19  ;;  %v7654_v63 = vadd.f32 %v7609_v24, %v15838_v26 }
 0x786   : > { %v11451_v62 = vpop.f32.mrf.mxu0 }
 0x787   : > { %v11477_v42 = vpop.f32.mrf.mxu1  ;;  %v15907_v9 = vadd.f32 %v7839_v54, %v7654_v63  ;;  %v7659_v60 = vadd.f32 %v11451_v62, %v15841_v2 }
 0x788   : > { %v7622_v21 = vpop.f32.mrf.mxu0 }
 0x789   : > { %v7852_v61 = vpop.f32.mrf.mxu1  ;;  %v15910_v12 = vadd.f32 %v11477_v42, %v7659_v60  ;;  %v7657_v1 = vadd.f32 %v7622_v21, %v15843_v55 }
 0x78a   : > { %v11452_v28 = vpop.f32.mrf.mxu0 }
 0x78b   : > { %v11478_v7 = vpop.f32.mrf.mxu1  ;;  %v15913_v43 = vadd.f32 %v7852_v61, %v7657_v1  ;;  %v7660_v47 = vadd.f32 %v11452_v28, %v15845_v0 }
 0x78c   : > { %v7625_v48 = vpop.f32.mrf.mxu0 }
 0x78d   : > { %v7855_v26 = vpop.f32.mrf.mxu1  ;;  %v15916_v52 = vadd.f32 %v11478_v7, %v7660_v47  ;;  %v7658_v29 = vadd.f32 %v7625_v48, %v15847_v41 }
 0x78e   : > { %v11483_v36 = vpop.f32.mrf.mxu0 }
 0x78f   : > { %v15919_v2 = vpop.f32.mrf.mxu1  ;;  %v15921_v18 = vadd.f32 %v7855_v26, %v7658_v29  ;;  %v15924_v15 = vadd.f32 %v11483_v36, %v15850_v22 }
 0x790   : > { %v8002_v55 = vpop.f32.mrf.mxu0 }
 0x791   : > { %v15926_v6 = vpop.f32.mrf.mxu1  ;;  %v15929_v14 = vadd.f32 %v8002_v55, %v15853_v5 }
 0x792   : > { %v11484_v0 = vpop.f32.mrf.mxu0 }
 0x793   : > { %v15931_v30 = vpop.f32.mrf.mxu1  ;;  %v15934_v11 = vadd.f32 %v11484_v0, %v15856_v23 }
 0x794   : > { %v8005_v41 = vpop.f32.mrf.mxu0 }
 0x795   : > { %v15936_v58 = vpop.f32.mrf.mxu1  ;;  %v15939_v56 = vadd.f32 %v8005_v41, %v15859_v49 }
 0x796   : > { %v11487_v22 = vpop.f32.mrf.mxu0 }
 0x797   : > { %v15941_v17 = vpop.f32.mrf.mxu1  ;;  %v15944_v40 = vadd.f32 %v11487_v22, %v15862_v3 }
 0x798   : > { %v8018_v5 = vpop.f32.mrf.mxu0 }
 0x799   : > { %v15946_v13 = vpop.f32.mrf.mxu1  ;;  %v15949_v59 = vadd.f32 %v8018_v5, %v15865_v25 }
 0x79a   : > { %v11488_v23 = vpop.f32.mrf.mxu0 }
 0x79b   : > { %v15951_v34 = vpop.f32.mrf.mxu1  ;;  %v15954_v51 = vadd.f32 %v11488_v23, %v15868_v50 }
 0x79c   : > { %v8021_v49 = vpop.f32.mrf.mxu0 }
 0x79d   : > { %v15956_v27 = vpop.f32.mrf.mxu1  ;;  %v15959_v33 = vadd.f32 %v8021_v49, %v15871_v8 }
 0x79e   : > { %v11491_v3 = vpop.f32.mrf.mxu0 }
 0x79f   : > { %v11517_v38 = vpop.f32.mrf.mxu1  ;;  %v8107_v57 = vadd.f32 %v11491_v3, %v15874_v46 }
 0x7a0   : > { %v8034_v39 = vpop.f32.mrf.mxu0 }
 0x7a1   : > { %v15962_v4 = vpop.f32.mrf.mxu1  ;;  %v8337_v25 = vadd.f32 %v11517_v38, %v8107_v57  ;;  %v15965_v19 = vadd.f32 %v8034_v39, %v15877_v35 }
 0x7a2   : > { %v11492_v24 = vpop.f32.mrf.mxu0 }
 0x7a3   : > { %v11518_v50 = vpop.f32.mrf.mxu1  ;;  %v8108_v54 = vadd.f32 %v11492_v24, %v15880_v32 }
 0x7a4   : > { %v8037_v63 = vpop.f32.mrf.mxu0 }
 0x7a5   : > { %v15968_v62 = vpop.f32.mrf.mxu1  ;;  %v8338_v8 = vadd.f32 %v11518_v50, %v8108_v54  ;;  %v15971_v42 = vadd.f32 %v8037_v63, %v15883_v37 }
 0x7a6   : > { %v11495_v60 = vpop.f32.mrf.mxu0 }
 0x7a7   : > { %v11521_v46 = vpop.f32.mrf.mxu1  ;;  %v8111_v21 = vadd.f32 %v11495_v60, %v15886_v45 }
 0x7a8   : > { %v8050_v61 = vpop.f32.mrf.mxu0 }
 0x7a9   : > { %v8280_v1 = vpop.f32.mrf.mxu1  ;;  %v8341_v28 = vadd.f32 %v11521_v46, %v8111_v21  ;;  %v8109_v35 = vadd.f32 %v8050_v61, %v15889_v31 }
 0x7aa   : > { %v11496_v7 = vpop.f32.mrf.mxu0 }
 0x7ab   : > { %v11522_v47 = vpop.f32.mrf.mxu1  ;;  %v8339_v48 = vadd.f32 %v8280_v1, %v8109_v35  ;;  %v8112_v32 = vadd.f32 %v11496_v7, %v15892_v44 }
 0x7ac   : > { %v8053_v26 = vpop.f32.mrf.mxu0 }
 0x7ad   : > { %v8283_v29 = vpop.f32.mrf.mxu1  ;;  %v8342_v36 = vadd.f32 %v11522_v47, %v8112_v32  ;;  %v8110_v37 = vadd.f32 %v8053_v26, %v15895_v53 }
 0x7ae   : > { %v11499_v55 = vpop.f32.mrf.mxu0 }
 0x7af   : > { %v15977_v0 = vpop.f32.mrf.mxu1  ;;  %v8340_v41 = vadd.f32 %v8283_v29, %v8110_v37  ;;  %v15980_v45 = vadd.f32 %v11499_v55, %v15898_v20 }
 0x7b0   : > { %v8066_v22 = vpop.f32.mrf.mxu0 }
 0x7b1   : > { %v15982_v5 = vpop.f32.mrf.mxu1  ;;  %v15985_v31 = vadd.f32 %v8066_v22, %v15901_v16 }
 0x7b2   : > { %v11500_v23 = vpop.f32.mrf.mxu0 }
 0x7b3   : > { %v15987_v44 = vpop.f32.mrf.mxu1  ;;  %v15990_v49 = vadd.f32 %v11500_v23, %v15904_v10 }
 0x7b4   : > { %v8069_v53 = vpop.f32.mrf.mxu0 }
 0x7b5   : > { %v15992_v3 = vpop.f32.mrf.mxu1  ;;  %v15995_v38 = vadd.f32 %v8069_v53, %v15907_v9 }
 0x7b6   : > { %v11503_v20 = vpop.f32.mrf.mxu0 }
 0x7b7   : > { %v15997_v57 = vpop.f32.mrf.mxu1  ;;  %v16000_v39 = vadd.f32 %v11503_v20, %v15910_v12 }
 0x7b8   : > { %16687 = vst [vmem:[#allocation21_spill] sm:$0xff] %v15997_v57  ;;  %v8082_v16 = vpop.f32.mrf.mxu0 }
 0x7b9   : > { %16688 = vst [vmem:[#allocation33_spill] sm:$0xff] %v16000_v39  ;;  %v16002_v24 = vpop.f32.mrf.mxu1  ;;  %v16005_v50 = vadd.f32 %v8082_v16, %v15913_v43 }
 0x7ba   : > { %16689 = vst [vmem:[#allocation44_spill] sm:$0xff] %v16002_v24  ;;  %v11504_v10 = vpop.f32.mrf.mxu0 }
 0x7bb   : > { %16690 = vst [vmem:[#allocation41_spill] sm:$0xff] %v16005_v50  ;;  %v16007_v54 = vpop.f32.mrf.mxu1  ;;  %v16010_v63 = vadd.f32 %v11504_v10, %v15916_v52 }
 0x7bc   : > { %16691 = vst [vmem:[#allocation24_spill] sm:$0xff] %v16007_v54  ;;  %v8085_v9 = vpop.f32.mrf.mxu0 }
 0x7bd   : > { %16692 = vst [vmem:[#allocation34_spill] sm:$0xff] %v16010_v63  ;;  %v16012_v60 = vpop.f32.mrf.mxu1  ;;  %v16015_v46 = vadd.f32 %v8085_v9, %v15921_v18 }
 0x7be   : > { %16693 = vst [vmem:[#allocation28_spill] sm:$0xff] %v16012_v60  ;;  %v11535_v12 = vpop.f32.mrf.mxu0 }
 0x7bf   : > { %16694 = vst [vmem:[#allocation27_spill] sm:$0xff] %v16015_v46  ;;  %v11561_v21 = vpop.f32.mrf.mxu1 }
 0x7c0   : > { %v8462_v61 = vpop.f32.mrf.mxu0 }
 0x7c1   : > { %v8692_v35 = vpop.f32.mrf.mxu1 }
 0x7c2   : > { %v11536_v1 = vpop.f32.mrf.mxu0 }
 0x7c3   : > { %v11562_v47 = vpop.f32.mrf.mxu1 }
 0x7c4   : > { %v8465_v7 = vpop.f32.mrf.mxu0 }
 0x7c5   : > { %v8695_v52 = vpop.f32.mrf.mxu1 }
 0x7c6   : > { %v16017_v43 = vpop.f32.mrf.mxu0 }
 0x7c7   : > { %v16025_v18 = vpop.f32.mrf.mxu1 }
 0x7c8   : > { %v8478_v32 = vpop.f32.mrf.mxu0 }
 0x7c9   : > { %v8708_v20 = vpop.f32.mrf.mxu1 }
 0x7ca   : > { %v16019_v26 = vpop.f32.mrf.mxu0 }
 0x7cb   : > { %v16035_v54 = vpop.f32.mrf.mxu1 }
 0x7cc   : > { %v16021_v29 = vpop.f32.mrf.mxu0 }
 0x7cd   : > { %v16041_v39 = vpop.f32.mrf.mxu1 }
 0x7ce   : > { %v11543_v37 = vpop.f32.mrf.mxu0 }
 0x7cf   : > { %v16023_v55 = vadd.f32 %v11543_v37, %v8337_v25 }
 0x7d0   : > { %v16027_v22 = vpop.f32.mrf.mxu0 }
 0x7d2   : > { %v11544_v23 = vpop.f32.mrf.mxu0 }
 0x7d3   : > { %v16029_v53 = vadd.f32 %v11544_v23, %v8338_v8  ;;  %v16047_v23 = vpop.f32.mrf.mxu1 }
 0x7d4   : > { %v16031_v16 = vpop.f32.mrf.mxu0 }
 0x7d5   : > { %16695 = vst [vmem:[#allocation47_spill] sm:$0xff] %v16029_v53 }
 0x7d6   : > { %v11547_v10 = vpop.f32.mrf.mxu0 }
 0x7d7   : > { %v16033_v9 = vadd.f32 %v11547_v10, %v8341_v28  ;;  %v16053_v10 = vpop.f32.mrf.mxu1 }
 0x7d8   : > { %v8510_v63 = vpop.f32.mrf.mxu0 }
 0x7d9   : > { %16696 = vst [vmem:[#allocation23_spill] sm:$0xff] %v16033_v9  ;;  %v16037_v57 = vadd.f32 %v8510_v63, %v8339_v48 }
 0x7da   : > { %v11548_v25 = vpop.f32.mrf.mxu0 }
 0x7db   : > { %16697 = vst [vmem:[#allocation31_spill] sm:$0xff] %v16037_v57  ;;  %v16039_v37 = vadd.f32 %v11548_v25, %v8342_v36  ;;  %v16059_v36 = vpop.f32.mrf.mxu1 }
 0x7dc   : > { %v8513_v60 = vpop.f32.mrf.mxu0  ;;  %16702 = vst [vmem:[#allocation37_spill] sm:$0xff] %v16059_v36 }
 0x7dd   : > { %16698 = vst [vmem:[#allocation40_spill] sm:$0xff] %v16039_v37  ;;  %v16043_v46 = vadd.f32 %v8513_v60, %v8340_v41  ;;  %v8327_v41 = vadd.f32 %v15926_v6, %v15929_v14  ;;  %v8329_v37 = vadd.f32 %v15919_v2, %v15924_v15 }
 0x7de   : > { %v16045_v8 = vpop.f32.mrf.mxu0 }
 0x7df   : > { %16699 = vst [vmem:[#allocation50_spill] sm:$0xff] %v16043_v46  ;;  %v8557_v9 = vadd.f32 %v8462_v61, %v8327_v41  ;;  %v16069_v46 = vpop.f32.mrf.mxu1  ;;  %v8559_v24 = vadd.f32 %v11535_v12, %v8329_v37  ;;  %v16082_v61 = vld [vmem:[%s16304_s6] ss:$0 sm:$0xff] }
 0x7e0   : > { %v16049_v53 = vpop.f32.mrf.mxu0 }
 0x7e1   : > { %v8787_v50 = vadd.f32 %v8692_v35, %v8557_v9  ;;  %v16077_v14 = vpop.f32.mrf.mxu1 }
 0x7e2   : > { %v16051_v28 = vpop.f32.mrf.mxu0 }
 0x7e3   : > { %16700 = vst [vmem:[#allocation43_spill] sm:$0xff] %v16051_v28  ;;  %v8789_v28 = vadd.f32 %v11561_v21, %v8559_v24 }
 0x7e4   : > { %v16055_v48 = vpop.f32.mrf.mxu0 }
 0x7e6   : > { %v16057_v63 = vpop.f32.mrf.mxu0 }
 0x7e7   : > { %16701 = vst [vmem:[#allocation13_spill] sm:$0xff] %v16057_v63  ;;  %v8328_v63 = vadd.f32 %v15936_v58, %v15939_v56  ;;  %v8331_v58 = vadd.f32 %v15946_v13, %v15949_v59 }
 0x7e8   : > { %v16061_v25 = vpop.f32.mrf.mxu0 }
 0x7e9   : > { %16703 = vst [vmem:[#allocation38_spill] sm:$0xff] %v16061_v25  ;;  %v8330_v25 = vadd.f32 %v15931_v30, %v15934_v11  ;;  %v8558_v6 = vadd.f32 %v8465_v7, %v8328_v63  ;;  %v16087_v11 = vpop.f32.mrf.mxu1  ;;  %v8561_v24 = vadd.f32 %v8478_v32, %v8331_v58 }
 0x7ea   : > { %v16065_v60 = vpop.f32.mrf.mxu0 }
 0x7eb   : > { %16704 = vst [vmem:[#allocation11_spill] sm:$0xff] %v16065_v60  ;;  %v8560_v2 = vadd.f32 %v11536_v1, %v8330_v25  ;;  %v8788_v56 = vadd.f32 %v8695_v52, %v8558_v6  ;;  %v8332_v1 = vadd.f32 %v15956_v27, %v15959_v33  ;;  %v8333_v27 = vadd.f32 %v15941_v17, %v15944_v40 }
 0x7ec   : > { %v16071_v57 = vpop.f32.mrf.mxu0 }
 0x7ed   : > { %v8790_v7 = vadd.f32 %v11562_v47, %v8560_v2  ;;  %v8791_v47 = vadd.f32 %v8708_v20, %v8561_v24  ;;  %v8562_v32 = vadd.f32 %v16021_v29, %v8332_v1  ;;  %v8563_v20 = vadd.f32 %v16017_v43, %v8333_v27 }
 0x7ee   : > { %v11587_v36 = vpop.f32.mrf.mxu0 }
 0x7ef   : > { %v9019_v12 = vadd.f32 %v11587_v36, %v8789_v28  ;;  %v16095_v28 = vpop.f32.mrf.mxu1  ;;  %v8792_v29 = vadd.f32 %v16041_v39, %v8562_v32  ;;  %v8793_v1 = vadd.f32 %v16025_v18, %v8563_v20  ;;  %v8335_v39 = vadd.f32 %v15962_v4, %v15965_v19 }
 0x7f0   : > { %v8922_v60 = vpop.f32.mrf.mxu0 }
 0x7f1   : > { %v9017_v15 = vadd.f32 %v8922_v60, %v8787_v50  ;;  %v9049_v37 = vadd.f32 %v16082_v61, %v9019_v12  ;;  %v16103_v58 = vpop.f32.mrf.mxu1  ;;  %v8334_v12 = vadd.f32 %v15951_v34, %v15954_v51 }
 0x7f2   : > { %v11588_v41 = vpop.f32.mrf.mxu0 }
 0x7f3   : > { %v9047_v30 = vadd.f32 %v16082_v61, %v9017_v15  ;;  %v9020_v63 = vadd.f32 %v11588_v41, %v8790_v7  ;;  %v9073_v60 = vmax.f32 %v9049_v37, 0.0  ;;  %v8564_v43 = vadd.f32 %v16019_v26, %v8334_v12 }
 0x7f4   : > { %v8925_v35 = vpop.f32.mrf.mxu0  ;;  %v8336_v26 = vadd.f32 %v15968_v62, %v15971_v42  ;;  %v8343_v62 = vadd.f32 %v15982_v5, %v15985_v31  ;;  %v8345_v42 = vadd.f32 %v15977_v0, %v15980_v45  ;;  %v8344_v0 = vadd.f32 %v15992_v3, %v15995_v38 }
 0x7f5   : > { %v9071_v21 = vmax.f32 %v9047_v30, 0.0  ;;  %v9018_v50 = vadd.f32 %v8925_v35, %v8788_v56  ;;  %v9050_v6 = vadd.f32 %v16082_v61, %v9020_v63  ;;  %v9097_v24 = vsel %vm15017_vm8, %v9073_v60, 0.0 }
 0x7f6   : > { %v11591_v9 = vpop.f32.mrf.mxu0  ;;  %v8794_v18 = vadd.f32 %v16035_v54, %v8564_v43  ;;  %v8575_v45 = vadd.f32 %v16045_v8, %v8345_v42  ;;  %v8346_v5 = vadd.f32 %v15987_v44, %v15990_v49  ;;  %v8797_v3 = vadd.f32 %v16047_v23, %v16023_v55  ;;  %v16708_v44 = vld [vmem:[#allocation43_spill] sm:$0xff]  ;;  %v16710_v43 = vld [vmem:[#allocation44_spill] sm:$0xff] }
 0x7f7   : > { %v9048_v13 = vadd.f32 %v16082_v61, %v9018_v50  ;;  %v9095_v52 = vsel %vm6968_vm9, %v9071_v21, 0.0  ;;  %v9074_v40 = vmax.f32 %v9050_v6, 0.0  ;;  %v11577_v21 = vpop.f32.mrf.mxu1  ;;  %v9023_v51 = vadd.f32 %v11591_v9, %v8793_v1  ;;  %v16709_v1 = vld [vmem:[#allocation41_spill] sm:$0xff] }
 0x7f8   : > { %9119 = vxpose.xlu1.b32.start [1/16] (narrow) %v9095_v52, 8  ;;  %v8938_v36 = vpop.f32.mrf.mxu0  ;;  %v8565_v52 = vadd.f32 %v16027_v22, %v8335_v39  ;;  %v8566_v22 = vadd.f32 %v16031_v16, %v8336_v26  ;;  %v8805_v8 = vadd.f32 %v11577_v21, %v8575_v45  ;;  %v8576_v49 = vadd.f32 %v16708_v44, %v8346_v5  ;;  %v16711_v21 = vld [vmem:[#allocation27_spill] sm:$0xff] }
 0x7f9   : > { %v9072_v25 = vmax.f32 %v9048_v13, 0.0  ;;  %v9021_v2 = vadd.f32 %v8938_v36, %v8791_v47  ;;  %v9098_v13 = vsel %vm6968_vm9, %v9074_v40, 0.0  ;;  %v8756_v36 = vpop.f32.mrf.mxu1  ;;  %v9053_v19 = vadd.f32 %v16082_v61, %v9023_v51  ;;  %v16713_v26 = vld [vmem:[#allocation47_spill] sm:$0xff] }
 0x7fa   : > { %v11592_v33 = vpop.f32.mrf.mxu0  ;;  %v8795_v27 = vadd.f32 %v16053_v10, %v8565_v52  ;;  %v8347_v39 = vadd.f32 %v16710_v43, %v16709_v1  ;;  %v16716_v45 = vld [vmem:[#allocation31_spill] sm:$0xff] }
 0x7fb   : > { %v9096_v41 = vsel %vm15070_vm10, %v9072_v25, 0.0  ;;  %v9051_v30 = vadd.f32 %v16082_v61, %v9021_v2  ;;  %v9024_v9 = vadd.f32 %v11592_v33, %v8794_v18  ;;  %v11578_v60 = vpop.f32.mrf.mxu1  ;;  %v8573_v2 = vadd.f32 %v16049_v53, %v8343_v62 }
 0x7fc   : > { %9120 = vxpose.xlu1.b32.cont [2/16] (narrow) %v9096_v41, 8  ;;  %v8941_v56 = vpop.f32.mrf.mxu0  ;;  %v9077_v41 = vmax.f32 %v9053_v19, 0.0  ;;  %v16714_v19 = vld [vmem:[#allocation37_spill] sm:$0xff]  ;;  %v8799_v5 = vadd.f32 %v16087_v11, %v16716_v45 }
 0x7fd   : > { %v9022_v35 = vadd.f32 %v8941_v56, %v8792_v29  ;;  %v9075_v37 = vmax.f32 %v9051_v30, 0.0  ;;  %v9054_v10 = vadd.f32 %v16082_v61, %v9024_v9  ;;  %v8796_v56 = vadd.f32 %v16069_v46, %v8566_v22  ;;  %v8759_v20 = vpop.f32.mrf.mxu1 }
 0x7fe   : > { %v16109_v17 = vpop.f32.mrf.mxu0  ;;  %v8803_v30 = vadd.f32 %v8756_v36, %v8573_v2  ;;  %v8574_v46 = vadd.f32 %v16055_v48, %v8344_v0  ;;  %v8798_v9 = vadd.f32 %v16714_v19, %v16713_v26  ;;  %v16723_v19 = vld [vmem:[#allocation23_spill] sm:$0xff] }
 0x7ff   : > { %v9052_v63 = vadd.f32 %v16082_v61, %v9022_v35  ;;  %v9099_v25 = vsel %vm15070_vm10, %v9075_v37, 0.0  ;;  %v16154_v31 = vpop.f32.mrf.mxu1  ;;  %v9078_v35 = vmax.f32 %v9054_v10, 0.0  ;;  %v9027_v37 = vadd.f32 %v16109_v17, %v8797_v3 }
 0x800   : > { %9121 = vxpose.xlu1.b32.cont [3/16] (narrow) %v9097_v24, 8  ;;  %v8954_v50 = vpop.f32.mrf.mxu0  ;;  %v9101_v24 = vsel %vm6968_vm9, %v9077_v41, 0.0  ;;  %v8804_v52 = vadd.f32 %v8759_v20, %v8574_v46  ;;  %v8806_v17 = vadd.f32 %v11578_v60, %v8576_v49 }
 0x801   : > { %v9076_v32 = vmax.f32 %v9052_v63, 0.0  ;;  %v9025_v54 = vadd.f32 %v8954_v50, %v8795_v27  ;;  %v8772_v51 = vpop.f32.mrf.mxu1  ;;  %v9102_v23 = vsel %vm15070_vm10, %v9078_v35, 0.0 }
 0x802   : > { %v16118_v34 = vpop.f32.mrf.mxu0 }
 0x803   : > { %v9100_v16 = vsel %vm15017_vm8, %v9076_v32, 0.0  ;;  %v9055_v53 = vadd.f32 %v16082_v61, %v9025_v54  ;;  %v11582_v42 = vpop.f32.mrf.mxu1  ;;  %v9057_v54 = vadd.f32 %v16082_v61, %v9027_v37  ;;  %v9028_v2 = vadd.f32 %v16118_v34, %v8798_v9  ;;  %v16717_v34 = vld [vmem:[#allocation33_spill] sm:$0xff]  ;;  %v16720_v37 = vld [vmem:[#allocation34_spill] sm:$0xff] }
 0x804   : > { %9122 = vxpose.xlu1.b32.cont [4/16] (narrow) %v9098_v13, 8  ;;  %v8957_v47 = vpop.f32.mrf.mxu0  ;;  %v8801_v9 = vadd.f32 %v16077_v14, %v16723_v19 }
 0x805   : > { %v9026_v12 = vadd.f32 %v8957_v47, %v8796_v56  ;;  %v9079_v48 = vmax.f32 %v9055_v53, 0.0  ;;  %v16712_v47 = vld [vmem:[#allocation28_spill] sm:$0xff]  ;;  %v9081_v3 = vmax.f32 %v9057_v54, 0.0 }
 0x806   : > { %v16127_v4 = vpop.f32.mrf.mxu0  ;;  %v8348_v18 = vadd.f32 %v16712_v47, %v16711_v21 }
 0x807   : > { %v9056_v63 = vadd.f32 %v16082_v61, %v9026_v12  ;;  %v16718_v12 = vld [vmem:[#allocation21_spill] sm:$0xff]  ;;  %v9105_v21 = vsel %vm15070_vm10, %v9081_v3, 0.0 }
 0x808   : > { %9123 = vxpose.xlu1.b32.cont [5/16] (narrow) %v9099_v25, 8  ;;  %v16134_v6 = vpop.f32.mrf.mxu0  ;;  %v16715_v25 = vld [vmem:[#allocation38_spill] sm:$0xff]  ;;  %v8578_v46 = vadd.f32 %v16071_v57, %v8348_v18 }
 0x809   : > { %v8577_v27 = vadd.f32 %v16715_v25, %v8347_v39  ;;  %v9080_v41 = vmax.f32 %v9056_v63, 0.0  ;;  %v16719_v39 = vld [vmem:[#allocation50_spill] sm:$0xff]  ;;  %v16722_v63 = vld [vmem:[#allocation13_spill] sm:$0xff] }
 0x80a   : > { %v16140_v33 = vpop.f32.mrf.mxu0  ;;  %v8800_v57 = vadd.f32 %v16103_v58, %v16719_v39 }
 0x80b   : > { %v9104_v11 = vsel %vm6968_vm9, %v9080_v41, 0.0 }
 0x80c   : > { %9124 = vxpose.xlu1.b32.cont [6/16] (narrow) %v9100_v16, 8  ;;  %v16147_v29 = vpop.f32.mrf.mxu0  ;;  %v9103_v16 = vsel %vm15017_vm8, %v9079_v48, 0.0  ;;  %v16721_v48 = vld [vmem:[#allocation24_spill] sm:$0xff] }
 0x80e   : > { %v11603_v40 = vpop.f32.mrf.mxu0 }
 0x80f   : > { %v9035_v36 = vadd.f32 %v11603_v40, %v8805_v8  ;;  %v8349_v40 = vadd.f32 %v16718_v12, %v16717_v34  ;;  %v9029_v8 = vadd.f32 %v16134_v6, %v8799_v5  ;;  %v8350_v6 = vadd.f32 %v16721_v48, %v16720_v37 }
 0x810   : > { %9125 = vxpose.xlu1.b32.cont [7/16] (narrow) %v9101_v24, 8  ;;  %v8986_v38 = vpop.f32.mrf.mxu0  ;;  %v8775_v24 = vpop.f32.mrf.mxu1 }
 0x811   : > { %v9033_v50 = vadd.f32 %v8986_v38, %v8803_v30  ;;  %v9065_v56 = vadd.f32 %v16082_v61, %v9035_v36  ;;  %v8807_v30 = vadd.f32 %v8772_v51, %v8577_v27  ;;  %v9058_v38 = vadd.f32 %v16082_v61, %v9028_v2 }
 0x812   : > { %v11604_v13 = vpop.f32.mrf.mxu0 }
 0x813   : > { %v9063_v55 = vadd.f32 %v16082_v61, %v9033_v50  ;;  %v9036_v20 = vadd.f32 %v11604_v13, %v8806_v17  ;;  %v9089_v49 = vmax.f32 %v9065_v56, 0.0  ;;  %v8579_v13 = vadd.f32 %v16722_v63, %v8349_v40  ;;  %v16724_v17 = vld [vmem:[#allocation11_spill] sm:$0xff] }
 0x814   : > { %9126 = vxpose.xlu1.b32.cont [8/16] (narrow) %v9102_v23, 8  ;;  %v8989_v32 = vpop.f32.mrf.mxu0  ;;  %v9082_v36 = vmax.f32 %v9058_v38, 0.0  ;;  %v9030_v23 = vadd.f32 %v16147_v29, %v8800_v57  ;;  %v8580_v25 = vadd.f32 %v16724_v17, %v8350_v6  ;;  %v9031_v29 = vadd.f32 %v16127_v4, %v8801_v9 }
 0x815   : > { %v9034_v22 = vadd.f32 %v8989_v32, %v8804_v52  ;;  %v9087_v62 = vmax.f32 %v9063_v55, 0.0  ;;  %v9066_v50 = vadd.f32 %v16082_v61, %v9036_v20  ;;  %v8808_v52 = vadd.f32 %v8775_v24, %v8578_v46 }
 0x816   : > { %v11607_v10 = vpop.f32.mrf.mxu0  ;;  %v9059_v55 = vadd.f32 %v16082_v61, %v9029_v8  ;;  %v9113_v26 = vsel %vm6968_vm9, %v9089_v49, 0.0  ;;  %v8809_v32 = vadd.f32 %v16154_v31, %v8579_v13  ;;  %v8810_v56 = vadd.f32 %v11582_v42, %v8580_v25 }
 0x817   : > { %v9064_v0 = vadd.f32 %v16082_v61, %v9034_v22  ;;  %v9111_v60 = vsel %vm15070_vm10, %v9087_v62, 0.0  ;;  %v9090_v47 = vmax.f32 %v9066_v50, 0.0  ;;  %v9060_v22 = vadd.f32 %v16082_v61, %v9030_v23 }
 0x818   : > { %9127 = vxpose.xlu1.b32.cont [9/16] (narrow) %v9103_v16, 8  ;;  %9151 = vxpose.xlu0.b32.start [1/8] (short) (narrow) %v9111_v60, 8  ;;  %v9002_v53 = vpop.f32.mrf.mxu0  ;;  %v9083_v27 = vmax.f32 %v9059_v55, 0.0  ;;  %v9106_v62 = vsel %vm15017_vm8, %v9082_v36, 0.0  ;;  %v9039_v54 = vadd.f32 %v11607_v10, %v8809_v32  ;;  %v16725_v16 = vld [vmem:[#allocation40_spill] sm:$0xff]  ;;  %v9061_v4 = vadd.f32 %v16082_v61, %v9031_v29 }
 0x819   : > { %v9088_v35 = vmax.f32 %v9064_v0, 0.0  ;;  %v9037_v1 = vadd.f32 %v9002_v53, %v8807_v30  ;;  %v9114_v14 = vsel %vm15070_vm10, %v9090_v47, 0.0  ;;  %v8802_v31 = vadd.f32 %v16095_v28, %v16725_v16 }
 0x81a   : > { %v11608_v44 = vpop.f32.mrf.mxu0  ;;  %v9084_v0 = vmax.f32 %v9060_v22, 0.0  ;;  %v9107_v10 = vsel %vm6968_vm9, %v9083_v27, 0.0  ;;  %v9069_v60 = vadd.f32 %v16082_v61, %v9039_v54  ;;  %v9085_v28 = vmax.f32 %v9061_v4, 0.0 }
 0x81b   : > { %v9112_v43 = vsel %vm15017_vm8, %v9088_v35, 0.0  ;;  %v9067_v58 = vadd.f32 %v16082_v61, %v9037_v1  ;;  %v9032_v20 = vadd.f32 %v16140_v33, %v8802_v31  ;;  %v9040_v45 = vadd.f32 %v11608_v44, %v8810_v56 }
 0x81c   : > { %9128 = vxpose.xlu1.b32.cont [10/16] (narrow) %v9104_v11, 8  ;;  %9152 = vxpose.xlu0.b32.cont [2/8] (short) (narrow) %v9112_v43, 8  ;;  %v9005_v51 = vpop.f32.mrf.mxu0  ;;  %v9093_v34 = vmax.f32 %v9069_v60, 0.0  ;;  %v9108_v33 = vsel %vm15070_vm10, %v9084_v0, 0.0  ;;  %v9109_v35 = vsel %vm15017_vm8, %v9085_v28, 0.0  ;;  %v16726_v38 = vmov 0  }
 0x81d   : > { %v9038_v18 = vadd.f32 %v9005_v51, %v8808_v52  ;;  %v9091_v2 = vmax.f32 %v9067_v58, 0.0  ;;  %v9062_v42 = vadd.f32 %v16082_v61, %v9032_v20  ;;  %v9070_v12 = vadd.f32 %v16082_v61, %v9040_v45 }
 0x81e   : > { %v9117_v24 = vsel %vm15070_vm10, %v9093_v34, 0.0 }
 0x81f   : > { %v9068_v41 = vadd.f32 %v16082_v61, %v9038_v18  ;;  %v9115_v53 = vsel %vm15017_vm8, %v9091_v2, 0.0  ;;  %v9086_v30 = vmax.f32 %v9062_v42, 0.0  ;;  %v9094_v46 = vmax.f32 %v9070_v12, 0.0 }
 0x820   : > { %9129 = vxpose.xlu1.b32.cont [11/16] (narrow) %v9105_v21, 8  ;;  %9153 = vxpose.xlu0.b32.cont [3/8] (short) (narrow) %v9113_v26, 8 }
 0x821   : > { %v9092_v5 = vmax.f32 %v9068_v41, 0.0  ;;  %v9110_v61 = vsel %vm6968_vm9, %v9086_v30, 0.0  ;;  %v9118_v3 = vsel %vm15017_vm8, %v9094_v46, 0.0 }
 0x823   : > { %v9116_v40 = vsel %vm6968_vm9, %v9092_v5, 0.0 }
 0x824   : > { %9130 = vxpose.xlu1.b32.cont [12/16] (narrow) %v9106_v62, 8  ;;  %9154 = vxpose.xlu0.b32.cont [4/8] (short) (narrow) %v9114_v14, 8 }
 0x828   : > { %9131 = vxpose.xlu1.b32.cont [13/16] (narrow) %v9107_v10, 8  ;;  %9155 = vxpose.xlu0.b32.cont [5/8] (short) (narrow) %v9115_v53, 8 }
 0x82c   : > { %9132 = vxpose.xlu1.b32.cont [14/16] (narrow) %v9108_v33, 8  ;;  %9156 = vxpose.xlu0.b32.cont [6/8] (short) (narrow) %v9116_v40, 8 }
 0x830   : > { %9133 = vxpose.xlu1.b32.cont [15/16] (narrow) %v9109_v35, 8  ;;  %9157 = vxpose.xlu0.b32.cont [7/8] (short) (narrow) %v9117_v24, 8 }
 0x834   : > { %9134 = vxpose.xlu1.b32.end [16/16] (narrow) %v9110_v61, 8  ;;  %9158 = vxpose.xlu0.b32.end [8/8] (short) (narrow) %v9118_v3, 8 }
 0x85d   : > { %11685 = vset.pattern.permute.xlu0 %v16726_v38 }
 0x874   : > { %v9135_v8 = vpop.trf.xlu1 }
 0x875   : > { %9185 = vrot.lane.b32.xlu1 %v9135_v8, %s11764_s16  ;;  %9195 = vrot.lane.b32.xlu0 %v9135_v8, %s11765_s17  ;;  %9183 = vst.msk [vmem:[%s16245_s18] sm:$0xff] %vm439_vm3, %v9135_v8  ;;  %s9222_s16 = scalar_lea.sflag [#allocation6], %s269_s14  ;;  %s11698_s17 = scalar_lea.vmem %s9236_s8, 128 }
 0x876   : > { %p11699_p11 = scmp.ne.s32.totalorder %s9236_s8, %s11698_s17 }
 0x878   : > { %p11700_p12 = pnand %p11699_p11, %p11850_p5 }
 0x879   : > { %9190 = vrot.lane.b32.xlu1 %v9135_v8, %s11766_s19  ;;  %s11771_s19 = smov [#allocation5]  }
 0x87a   : > { %p11701_p13 = pneg %p11700_p12  ;;  %s11702_s28 = sshll.u32 %s11771_s19, 4  ;;  %s11703_s28 = int_to_ptr.vmem [resolvable:$false] %s11702_s28 }
 0x87b   : > { %p11705_p0 = scmp.lt.s32.totalorder %s9236_s8, %s11703_s28 }
 0x87d   : > { %9200 = vrot.lane.b32.xlu1 %v9135_v8, %s11767_s20  ;;  %s11704_s20 = scalar_lea.vmem %s11703_s28, 256 }
 0x87e   : > { %p11706_p1 = scmp.lt.s32.totalorder %s11704_s20, %s11698_s17 }
 0x880   : > { %p11707_p2 = por %p11706_p1, %p11705_p0 }
 0x881   : > { %9205 = vrot.lane.b32.xlu1 %v9135_v8, %s11768_s21 }
 0x882   : > { %p11708_p3 = pnand %p11707_p2, %p11701_p13 }
 0x894   : > { %v9167_v59 = vpop.trf.xlu0 }
 0x895   : > { %9211 = vrot.lane.b32.xlu1 %v9167_v59, %s11769_s22 }
 0x899   : > { %9216 = vrot.lane.b32.xlu1 %v9167_v59, %s11770_s23 }
 0x8e7   : > { %v9186_v15 = vpop.permute.xlu1 %9185  ;;  %v9196_v7 = vpop.permute.xlu0 %9195 }
 0x8e8   : > { %9189 = vst.msk [vmem:[%s16245_s18] sm:$0xff] %vm9188_vm11, %v9186_v15 }
 0x8eb   : > { %v9191_v44 = vpop.permute.xlu1 %9190 }
 0x8ec   : > { %9194 = vst.msk [vmem:[%s16245_s18] sm:$0xff] %vm9193_vm12, %v9191_v44 }
 0x8ed   : > { %9199 = vst.msk [vmem:[%s16245_s18] sm:$0xff] %vm9198_vm13, %v9196_v7 }
 0x8ef   : > { %v9201_v11 = vpop.permute.xlu1 %9200 }
 0x8f0   : > { %9204 = vst.msk [vmem:[%s16245_s18] sm:$0xff] %vm9203_vm14, %v9201_v11 }
 0x8f3   : > { %v9206_v49 = vpop.permute.xlu1 %9205 }
 0x8f4   : > { %9209 = vst.msk [vmem:[%s16245_s18] sm:$0xff] %vm9208_vm15, %v9206_v49 }
 0x907   : > { %v9212_v50 = vpop.permute.xlu1 %9211 }
 0x908   : > { %9215 = vst.msk [vmem:[%s16245_s18] sm:$0xff] %vm9214_vm0, %v9212_v50 }
 0x90b   : > { %v9217_v1 = vpop.permute.xlu1 %9216 }
 0x90c   : > { %9220 = vst.msk [vmem:[%s16245_s18] sm:$0xff] %vm9219_vm1, %v9217_v1 }
 0x90d   : > { %11711 = shalt.err (!%p11708_p3)
}
 0x90e   : > { %s11712_s18 = scalar_lea.hbm %s16260_s15, 128  ;;  %s11716_s22 = scalar_lea.hbm %s16305_s7, 256 }
 0x90f   : > { %p11713_p4 = scmp.ne.s32.totalorder %s16260_s15, %s11712_s18  ;;  %p11717_p9 = scmp.lt.s32.totalorder %s16260_s15, %s16305_s7 }
 0x910   : > { %p11718_p10 = scmp.lt.s32.totalorder %s11716_s22, %s11712_s18 }
 0x911   : > { %p11714_p7 = pnand %p11713_p4, %p11850_p5 }
 0x912   : > { %p11719_p11 = por %p11718_p10, %p11717_p9 }
 0x913   : > { %p11715_p8 = pneg %p11714_p7 }
 0x915   : > { %p11720_p12 = pnand %p11719_p11, %p11715_p8 }
 0x917   : > { %11723 = shalt.err (!%p11720_p12)
}
 0x918   : > { %11629 = dma.vmem_to_hbm [thread:$0]  (%p11850_p5), %s9236_s8, 128, %s16260_s15, %s9222_s16  }
 0x919 PF: > { %p11635_p13 = scmp.ge.s32.totalorder %s11758_s27, 2  ;;  %s9247_s9 = sand.u32 1, %s11746_s24  }
 0x91a   : > { %s9248_s13 = scalar_lea.sflag [#allocation6], %s9247_s9 }
 0x91b   : > { %p11632_p0 = pnand %p11635_p13, %p11854_p6 }
 0x91d   : > { %p11633_p1 = pneg %p11632_p0 }
 0x91f   : > { %11741 = dma.done.wait (%p11633_p1), %s9248_s13, 128  }
 0x920   : > { %11743 = vsyncadd (%p11633_p1), %s9248_s13, 4294967168  ;;  %p17_p2 = scmp.ge.s32.totalorder %s11837_s30, 4   ;;  %s16727_s24 = smov %s11750_s25 }
 0x921   : > { %s16728_s25 = smov %s11754_s26  ;;  %s16729_s26 = smov %s11848_s10 }
 0x922   : > { %s16730_s27 = smov %s11837_s30  ;;  %19 = sbr.rel (!%p17_p2) target bundleno = 3 (0x3), region = 260 }
 0x927   :  { %9253 = vsyncpa [#allocation6], 1 }
 0x928   :  { %9255 = vsyncpa [#allocation6 + $0x1], 1 }

</bundles_post_ra>
